<compile_context>
chip_gen: v6e
topology: v6e:2x2x1
jax: 0.10.0
libtpu: 0.0.40
codegen_flags: <defaults>
</compile_context>

<pallas_src>
import functools

import numpy as np
import jax
import jax.numpy as jnp
from jax import lax
from jax.experimental import pallas as pl
from jax.experimental.pallas import tpu as pltpu

FEATURE_DIM = 128
NUM_HEADS = 4
BN_EPS = 1e-5
TILE_N = 128

# TODO(synk): BatchNorm1d is applied in eval mode (running stats folded into a
# per-channel scale/shift); training-mode batch statistics would need a
# cross-batch reduction pass and are not implemented.
# TODO(synk): for very large source lengths (M >~ 4096) the [tN, M] score
# temporaries should be M-tiled with an online (flash-style) softmax; not
# needed at SuperGlue keypoint counts.


def attn_prop_kernel(x_ref, kv_ref,
                     wq_ref, bq_ref,
                     w1_ref, b1_ref, bn_scale_ref, bn_shift_ref,
                     w2_ref, b2_ref,
                     out_ref, slab, *, num_heads, head_dim):
    """One AttentionalPropagation step on a [tN, D] tile of x.

    kv_ref holds the pre-projected key/value slab [M, 2D] (computed once per
    batch outside the kernel).  wq already carries the 1/sqrt(head_dim)
    attention scale.  The merge Conv1d is folded into the MLP's first layer,
    so the MLP input is the [x | head-outputs] slab and its first matmul is a
    single K=2D(=256) MXU pass.
    """
    f32 = jnp.float32
    x = x_ref[0].astype(f32)        # [tN, D]
    kv = kv_ref[0].astype(f32)      # [M, 2D]
    D = num_heads * head_dim
    k = kv[:, :D]
    v = kv[:, D:]

    # q projection (Conv1d k=1 == matmul on the channel axis); scale folded.
    q = jnp.dot(x, wq_ref[...], preferred_element_type=f32) + bq_ref[...]

    # First D lanes of the MLP-input slab are x itself (the torch concat).
    slab[:, :D] = x

    contract_last = (((1,), (1,)), ((), ()))   # q @ k.T without transposing k
    for h in range(num_heads):
        lo = h * head_dim
        qh = q[:, lo:lo + head_dim]
        kh = k[:, lo:lo + head_dim]
        vh = v[:, lo:lo + head_dim]
        s = lax.dot_general(qh, kh, contract_last,
                            preferred_element_type=f32)        # [tN, M]
        s = s - jnp.max(s, axis=-1, keepdims=True)
        p = jnp.exp(s)
        l = jnp.sum(p, axis=-1, keepdims=True)                 # [tN, 1]
        oh = jnp.dot(p, vh, preferred_element_type=f32)        # [tN, hd]
        # softmax normalization folded after p@v; approx recip -> EUP slot.
        slab[:, D + lo:D + lo + head_dim] = oh * pl.reciprocal(l, approx=True)

    # MLP([2D, 2D, D]) with the merge Conv1d algebraically folded in:
    #   h1 = [x | o] @ [[w1x_t], [wm_t @ w1m_t]] + (b1 + bm @ w1m_t)
    h1 = jnp.dot(slab[...], w1_ref[...],
                 preferred_element_type=f32) + b1_ref[...]
    h1 = h1 * bn_scale_ref[...] + bn_shift_ref[...]            # BatchNorm1d (eval)
    h1 = jnp.maximum(h1, 0.0)                                  # ReLU
    delta = jnp.dot(h1, w2_ref[...], preferred_element_type=f32) + b2_ref[...]

    out_ref[0] = (x + delta).astype(out_ref.dtype)             # residual


def attn_prop_pallas(x, src, kp):
    """x: [B, N, D], src: [B, M, D] -> [B, N, D] (x + delta)."""
    B, N, D = x.shape
    M = src.shape[1]

    # k/v projection is identical for every N-tile -> compute it once per
    # batch as a plain XLA matmul and stream the [M, 2D] slab into the kernel.
    # (Keeps both grid axes "parallel": both v7x TensorCores get work.)
    kv = jnp.einsum('bmd,de->bme', src, kp['wkv_t'],
                    precision=lax.Precision.HIGHEST) + kp['bkv']

    # Pad N up to a multiple of TILE_N so the N grid axis always pipelines and
    # the live [tN, M] score temporaries stay bounded (v7x VMEM budget).
    tN = TILE_N
    N_pad = ((N + tN - 1) // tN) * tN
    x_in = x if N_pad == N else jnp.pad(x, ((0, 0), (0, N_pad - N), (0, 0)))
    nt = N_pad // tN

    kernel = functools.partial(attn_prop_kernel,
                               num_heads=NUM_HEADS, head_dim=D // NUM_HEADS)

    weights = [kp['wq_t'], kp['bq'],
               kp['w1_full'], kp['b1'], kp['bn_scale'], kp['bn_shift'],
               kp['w2_t'], kp['b2']]

    def wspec(shape):
        # TODO(synk): weights never change block index; pipeline_mode=
        # pl.Buffered(1) would reclaim the dead second buffer on v7x.
        return pl.BlockSpec(shape, lambda b, n: (0, 0))

    in_specs = [pl.BlockSpec((1, tN, D), lambda b, n: (b, n, 0)),
                pl.BlockSpec((1, M, 2 * D), lambda b, n: (b, 0, 0))]
    in_specs += [wspec(w.shape) for w in weights]

    # Scoped-VMEM request sized from the live set (+2x headroom), clamped to
    # v7x's 64 MiB physical ceiling.
    w_bytes = sum(int(np.prod(w.shape)) for w in weights) * 4
    blk_bytes = 2 * (tN * D + M * 2 * D + tN * D) * 4   # x, kv, out dbl-buf
    scratch_bytes = tN * 2 * D * 4
    temp_bytes = 8 * tN * max(M, 2 * D) * 4              # unrolled head loop
    vmem_bytes = int(min(max(2 * (blk_bytes + 2 * w_bytes + scratch_bytes
                                  + temp_bytes), 32 << 20), 64 << 20))

    out = pl.pallas_call(
        kernel,
        out_shape=jax.ShapeDtypeStruct((B, N_pad, D), x.dtype),
        grid=(B, nt),
        in_specs=in_specs,
        out_specs=pl.BlockSpec((1, tN, D), lambda b, n: (b, n, 0)),
        scratch_shapes=[pltpu.VMEM((tN, 2 * D), jnp.float32)],
        compiler_params=pltpu.CompilerParams(
            dimension_semantics=("parallel", "parallel"),
            vmem_limit_bytes=vmem_bytes),
    )(x_in, kv, *weights)
    return out if N_pad == N else out[:, :N, :]


# ----------------------- parameter setup (glue) -----------------------------

def init_layer_params(key, D):
    ks = jax.random.split(key, 16)

    def w(k, o, i):
        return (0.5 / np.sqrt(i) * jax.random.normal(k, (o, i))).astype(jnp.float32)

    def b(k, o):
        return (0.05 * jax.random.normal(k, (o,))).astype(jnp.float32)

    return dict(
        wq=w(ks[0], D, D), bq=b(ks[1], D),
        wk=w(ks[2], D, D), bk=b(ks[3], D),
        wv=w(ks[4], D, D), bv=b(ks[5], D),
        wm=w(ks[6], D, D), bm=b(ks[7], D),
        w1=w(ks[8], 2 * D, 2 * D), b1=b(ks[9], 2 * D),
        bn_gamma=(1.0 + 0.1 * jax.random.normal(ks[10], (2 * D,))).astype(jnp.float32),
        bn_beta=(0.1 * jax.random.normal(ks[11], (2 * D,))).astype(jnp.float32),
        bn_mean=(0.05 * jax.random.normal(ks[12], (2 * D,))).astype(jnp.float32),
        bn_var=(1.0 + 0.5 * jax.random.uniform(ks[13], (2 * D,))).astype(jnp.float32),
        w2=w(ks[14], D, 2 * D),
        b2=jnp.zeros((D,), jnp.float32),  # nn.init.constant_(mlp[-1].bias, 0.0)
    )


def to_kernel_params(raw, heads):
    """Host-side prep: permute q/k/v output channels to be head-contiguous,
    pre-transpose every weight to [in, out], fold the 1/sqrt(head_dim) scale
    into the q projection, fuse k/v, fold the merge Conv1d into the MLP's
    first layer, and fold BatchNorm running stats into a scale/shift."""
    D = raw['wq'].shape[0]
    dim = D // heads
    # torch view: output channel c maps to (d = c // heads, h = c % heads);
    # head-contiguous index h*dim + d <- old channel d*heads + h.
    perm = np.array([d * heads + h for h in range(heads) for d in range(dim)])
    hi = lax.Precision.HIGHEST
    r2 = lambda v: v.reshape(1, -1)

    scale = 1.0 / float(np.sqrt(dim))
    wq_t = raw['wq'][perm, :].T * scale          # attention scale folded here
    bq = raw['bq'][perm] * scale
    wk_t = raw['wk'][perm, :].T
    wv_t = raw['wv'][perm, :].T

    # merge Conv1d folded into the MLP's first layer:
    #   h1 = w1 @ cat([x, wm @ o + bm]) + b1
    #      = [x | o] @ [[w1x_t], [wm_t @ w1m_t]] + (b1 + bm @ w1m_t)
    wm_t = raw['wm'][:, perm].T                  # [D(head-contig), D]
    w1_t = raw['w1'].T                           # [2D_in, 2D_out]
    w1x_t, w1m_t = w1_t[:D, :], w1_t[D:, :]
    w1o_t = jnp.matmul(wm_t, w1m_t, precision=hi)
    b1 = raw['b1'] + jnp.matmul(raw['bm'], w1m_t, precision=hi)
    w1_full = jnp.concatenate([w1x_t, w1o_t], axis=0)           # [2D, 2D]

    bn_scale = raw['bn_gamma'] / jnp.sqrt(raw['bn_var'] + BN_EPS)
    bn_shift = raw['bn_beta'] - raw['bn_mean'] * bn_scale

    return dict(
        wq_t=wq_t, bq=r2(bq),
        wkv_t=jnp.concatenate([wk_t, wv_t], axis=1),            # [D, 2D]
        bkv=r2(jnp.concatenate([raw['bk'][perm], raw['bv'][perm]])),
        w1_full=w1_full, b1=r2(b1),
        bn_scale=r2(bn_scale), bn_shift=r2(bn_shift),
        w2_t=raw['w2'].T,                                       # [2D, D]
        b2=r2(raw['b2']),
    )


def attentional_gnn_pallas(desc0, desc1, layer_params, layer_names):
    """desc0: [B, D, N0], desc1: [B, D, N1] (PyTorch NCL layout)."""
    x0 = jnp.transpose(desc0, (0, 2, 1))
    x1 = jnp.transpose(desc1, (0, 2, 1))
    for raw, name in zip(layer_params, layer_names):
        kp = to_kernel_params(raw, NUM_HEADS)
        if name == 'cross':
            s0, s1 = x1, x0
        else:
            s0, s1 = x0, x1
        x0, x1 = attn_prop_pallas(x0, s0, kp), attn_prop_pallas(x1, s1, kp)
    return jnp.transpose(x0, (0, 2, 1)), jnp.transpose(x1, (0, 2, 1))


# ----------------------- pure-JAX reference (torch semantics) ---------------

def _conv1d(w, bias, t):
    return jnp.einsum('oi,bil->bol', w, t,
                      precision=lax.Precision.HIGHEST) + bias[None, :, None]


def _ref_attn_prop(raw, x, src):  # x: [B, D, N], src: [B, D, M]
    heads = NUM_HEADS
    B, D, N = x.shape
    dim = D // heads

    q = _conv1d(raw['wq'], raw['bq'], x).reshape(B, dim, heads, N)
    k = _conv1d(raw['wk'], raw['bk'], src).reshape(B, dim, heads, src.shape[-1])
    v = _conv1d(raw['wv'], raw['bv'], src).reshape(B, dim, heads, src.shape[-1])
    scores = jnp.einsum('bdhn,bdhm->bhnm', q, k,
                        precision=lax.Precision.HIGHEST) / (dim ** 0.5)
    prob = jax.nn.softmax(scores, axis=-1)
    o = jnp.einsum('bhnm,bdhm->bdhn', prob, v,
                   precision=lax.Precision.HIGHEST).reshape(B, D, N)
    message = _conv1d(raw['wm'], raw['bm'], o)
    cat = jnp.concatenate([x, message], axis=1)
    h1 = _conv1d(raw['w1'], raw['b1'], cat)
    h1 = (h1 - raw['bn_mean'][None, :, None]) * lax.rsqrt(
        raw['bn_var'][None, :, None] + BN_EPS)
    h1 = h1 * raw['bn_gamma'][None, :, None] + raw['bn_beta'][None, :, None]
    h1 = jnp.maximum(h1, 0.0)
    return _conv1d(raw['w2'], raw['b2'], h1)


def _ref_gnn(desc0, desc1, layer_params, layer_names):
    for raw, name in zip(layer_params, layer_names):
        if name == 'cross':
            s0, s1 = desc1, desc0
        else:
            s0, s1 = desc0, desc1
        d0 = _ref_attn_prop(raw, desc0, s0)
        d1 = _ref_attn_prop(raw, desc1, s1)
        desc0, desc1 = desc0 + d0, desc1 + d1
    return desc0, desc1


if __name__ == "__main__":
    key = jax.random.PRNGKey(0)
    k_d0, k_d1, k_p = jax.random.split(key, 3)

    B, D = 2, FEATURE_DIM
    N0, N1 = 256, 128
    desc0 = jax.random.normal(k_d0, (B, D, N0), dtype=jnp.float32)
    desc1 = jax.random.normal(k_d1, (B, D, N1), dtype=jnp.float32)

    layer_names = ['self', 'cross']
    layer_params = [init_layer_params(k, D)
                    for k in jax.random.split(k_p, len(layer_names))]

    out0, out1 = attentional_gnn_pallas(desc0, desc1, layer_params, layer_names)
    jax.block_until_ready((out0, out1))

    ref0, ref1 = _ref_gnn(desc0, desc1, layer_params, layer_names)
    # Tolerance loosened vs. the exact-reciprocal version: the EUP approximate
    # reciprocal in the softmax normalization contributes ~1e-4..1e-3 relative
    # error per layer; real bugs (permutation / weight-fold errors) are O(1).
    assert np.allclose(np.asarray(out0), np.asarray(ref0), atol=5e-3, rtol=5e-3), \
        float(np.max(np.abs(np.asarray(out0) - np.asarray(ref0))))
    assert np.allclose(np.asarray(out1), np.asarray(ref1), atol=5e-3, rtol=5e-3), \
        float(np.max(np.abs(np.asarray(out1) - np.asarray(ref1))))

    print("KERNEL_OK")
</pallas_src>

<mosaic_0001>
module attributes {stable_mosaic.version = 11 : i64} {
  func.func @attn_prop_kernel(%arg0: i32, %arg1: i32, %arg2: memref<1x128x128xf32, #tpu.memory_space<vmem>>, %arg3: memref<1x256x256xf32, #tpu.memory_space<vmem>>, %arg4: memref<128x128xf32, #tpu.memory_space<vmem>>, %arg5: memref<1x128xf32, #tpu.memory_space<vmem>>, %arg6: memref<256x256xf32, #tpu.memory_space<vmem>>, %arg7: memref<1x256xf32, #tpu.memory_space<vmem>>, %arg8: memref<1x256xf32, #tpu.memory_space<vmem>>, %arg9: memref<1x256xf32, #tpu.memory_space<vmem>>, %arg10: memref<256x128xf32, #tpu.memory_space<vmem>>, %arg11: memref<1x128xf32, #tpu.memory_space<vmem>>, %arg12: memref<1x128x128xf32, #tpu.memory_space<vmem>>, %arg13: memref<128x256xf32, #tpu.memory_space<vmem>>) attributes {dimension_semantics = [#tpu.dimension_semantics<parallel>, #tpu.dimension_semantics<parallel>], iteration_bounds = array<i64: 2, 2>, scalar_prefetch = 0 : i64, scratch_operands = 1 : i64, tpu.core_type = #tpu.core_type<tc>, window_params = [{transform_indices = @transform_0, window_bounds = array<i64: 1, 128, 128>}, {transform_indices = @transform_1, window_bounds = array<i64: 1, 256, 256>}, {pipeline_mode = #tpu.pipeline_mode<synchronous>, transform_indices = @transform_2, window_bounds = array<i64: 128, 128>}, {pipeline_mode = #tpu.pipeline_mode<synchronous>, transform_indices = @transform_3, window_bounds = array<i64: 1, 128>}, {pipeline_mode = #tpu.pipeline_mode<synchronous>, transform_indices = @transform_4, window_bounds = array<i64: 256, 256>}, {pipeline_mode = #tpu.pipeline_mode<synchronous>, transform_indices = @transform_5, window_bounds = array<i64: 1, 256>}, {pipeline_mode = #tpu.pipeline_mode<synchronous>, transform_indices = @transform_6, window_bounds = array<i64: 1, 256>}, {pipeline_mode = #tpu.pipeline_mode<synchronous>, transform_indices = @transform_7, window_bounds = array<i64: 1, 256>}, {pipeline_mode = #tpu.pipeline_mode<synchronous>, transform_indices = @transform_8, window_bounds = array<i64: 256, 128>}, {pipeline_mode = #tpu.pipeline_mode<synchronous>, transform_indices = @transform_9, window_bounds = array<i64: 1, 128>}, {transform_indices = @transform_10, window_bounds = array<i64: 1, 128, 128>}]} {
    %c0 = arith.constant 0 : index
    %c0_0 = arith.constant 0 : index
    %c0_1 = arith.constant 0 : index
    %0 = vector.load %arg2[%c0, %c0_0, %c0_1] : memref<1x128x128xf32, #tpu.memory_space<vmem>>, vector<1x128x128xf32>
    %1 = vector.shape_cast %0 : vector<1x128x128xf32> to vector<128x128xf32>
    %c0_2 = arith.constant 0 : index
    %c0_3 = arith.constant 0 : index
    %c0_4 = arith.constant 0 : index
    %2 = vector.load %arg3[%c0_2, %c0_3, %c0_4] : memref<1x256x256xf32, #tpu.memory_space<vmem>>, vector<1x256x256xf32>
    %3 = vector.shape_cast %2 : vector<1x256x256xf32> to vector<256x256xf32>
    %4 = vector.extract_strided_slice %3 {offsets = [0, 0], sizes = [256, 128], strides = [1, 1]} : vector<256x256xf32> to vector<256x128xf32>
    %5 = vector.extract_strided_slice %3 {offsets = [0, 128], sizes = [256, 128], strides = [1, 1]} : vector<256x256xf32> to vector<256x128xf32>
    %c0_5 = arith.constant 0 : index
    %c0_6 = arith.constant 0 : index
    %6 = vector.load %arg4[%c0_5, %c0_6] : memref<128x128xf32, #tpu.memory_space<vmem>>, vector<128x128xf32>
    %cst = arith.constant dense<0.000000e+00> : vector<128x128xf32>
    %7 = tpu.matmul %1, %6, %cst {dimension_numbers = #tpu.dot_dimension_numbers<[1], [0], [0], [1], [0, 0, 1, 1], [], []>} : vector<128x128xf32>, vector<128x128xf32>, vector<128x128xf32> -> vector<128x128xf32>
    %c0_7 = arith.constant 0 : index
    %c0_8 = arith.constant 0 : index
    %8 = vector.load %arg5[%c0_7, %c0_8] : memref<1x128xf32, #tpu.memory_space<vmem>>, vector<1x128xf32>
    %9 = vector.broadcast %8 : vector<1x128xf32> to vector<128x128xf32>
    %10 = arith.addf %7, %9 : vector<128x128xf32>
    %c0_9 = arith.constant 0 : index
    %c0_10 = arith.constant 0 : index
    %11 = vector.load %arg13[%c0_9, %c0_10] : memref<128x256xf32, #tpu.memory_space<vmem>>, vector<128x128xf32>
    tpu.vector_store %arg13[%c0_9, %c0_10], %1 {strides = array<i32>} : memref<128x256xf32, #tpu.memory_space<vmem>>, vector<128x128xf32>,
    %12 = vector.extract_strided_slice %10 {offsets = [0, 0], sizes = [128, 32], strides = [1, 1]} : vector<128x128xf32> to vector<128x32xf32>
    %13 = vector.extract_strided_slice %4 {offsets = [0, 0], sizes = [256, 32], strides = [1, 1]} : vector<256x128xf32> to vector<256x32xf32>
    %14 = vector.extract_strided_slice %5 {offsets = [0, 0], sizes = [256, 32], strides = [1, 1]} : vector<256x128xf32> to vector<256x32xf32>
    %cst_11 = arith.constant dense<0.000000e+00> : vector<128x256xf32>
    %15 = tpu.matmul %12, %13, %cst_11 {dimension_numbers = #tpu.dot_dimension_numbers<[1], [1], [0], [0], [0, 0, 1, 0], [], []>} : vector<128x32xf32>, vector<256x32xf32>, vector<128x256xf32> -> vector<128x256xf32>
    %cst_12 = arith.constant dense<0xFF800000> : vector<128xf32>
    %16 = vector.multi_reduction <maximumf>, %15, %cst_12 [1] : vector<128x256xf32> to vector<128xf32>
    %17 = vector.shape_cast %16 : vector<128xf32> to vector<128x1xf32>
    %18 = vector.broadcast %17 : vector<128x1xf32> to vector<128x256xf32>
    %19 = arith.subf %15, %18 : vector<128x256xf32>
    %20 = math.exp %19 : vector<128x256xf32>
    %cst_13 = arith.constant dense<0.000000e+00> : vector<128xf32>
    %21 = vector.multi_reduction <add>, %20, %cst_13 [1] : vector<128x256xf32> to vector<128xf32>
    %22 = vector.shape_cast %21 : vector<128xf32> to vector<128x1xf32>
    %cst_14 = arith.constant dense<0.000000e+00> : vector<128x32xf32>
    %23 = tpu.matmul %20, %14, %cst_14 {dimension_numbers = #tpu.dot_dimension_numbers<[1], [0], [0], [1], [0, 0, 1, 1], [], []>} : vector<128x256xf32>, vector<256x32xf32>, vector<128x32xf32> -> vector<128x32xf32>
    %24 = tpu.reciprocal %22 {approx = true} : vector<128x1xf32> -> vector<128x1xf32>
    %25 = vector.broadcast %24 : vector<128x1xf32> to vector<128x32xf32>
    %26 = arith.mulf %23, %25 : vector<128x32xf32>
    %c0_15 = arith.constant 0 : index
    %c128 = arith.constant 128 : index
    %27 = vector.load %arg13[%c0_15, %c128] : memref<128x256xf32, #tpu.memory_space<vmem>>, vector<128x32xf32>
    tpu.vector_store %arg13[%c0_15, %c128], %26 {strides = array<i32>} : memref<128x256xf32, #tpu.memory_space<vmem>>, vector<128x32xf32>,
    %28 = vector.extract_strided_slice %10 {offsets = [0, 32], sizes = [128, 32], strides = [1, 1]} : vector<128x128xf32> to vector<128x32xf32>
    %29 = vector.extract_strided_slice %4 {offsets = [0, 32], sizes = [256, 32], strides = [1, 1]} : vector<256x128xf32> to vector<256x32xf32>
    %30 = vector.extract_strided_slice %5 {offsets = [0, 32], sizes = [256, 32], strides = [1, 1]} : vector<256x128xf32> to vector<256x32xf32>
    %cst_16 = arith.constant dense<0.000000e+00> : vector<128x256xf32>
    %31 = tpu.matmul %28, %29, %cst_16 {dimension_numbers = #tpu.dot_dimension_numbers<[1], [1], [0], [0], [0, 0, 1, 0], [], []>} : vector<128x32xf32>, vector<256x32xf32>, vector<128x256xf32> -> vector<128x256xf32>
    %cst_17 = arith.constant dense<0xFF800000> : vector<128xf32>
    %32 = vector.multi_reduction <maximumf>, %31, %cst_17 [1] : vector<128x256xf32> to vector<128xf32>
    %33 = vector.shape_cast %32 : vector<128xf32> to vector<128x1xf32>
    %34 = vector.broadcast %33 : vector<128x1xf32> to vector<128x256xf32>
    %35 = arith.subf %31, %34 : vector<128x256xf32>
    %36 = math.exp %35 : vector<128x256xf32>
    %cst_18 = arith.constant dense<0.000000e+00> : vector<128xf32>
    %37 = vector.multi_reduction <add>, %36, %cst_18 [1] : vector<128x256xf32> to vector<128xf32>
    %38 = vector.shape_cast %37 : vector<128xf32> to vector<128x1xf32>
    %cst_19 = arith.constant dense<0.000000e+00> : vector<128x32xf32>
    %39 = tpu.matmul %36, %30, %cst_19 {dimension_numbers = #tpu.dot_dimension_numbers<[1], [0], [0], [1], [0, 0, 1, 1], [], []>} : vector<128x256xf32>, vector<256x32xf32>, vector<128x32xf32> -> vector<128x32xf32>
    %40 = tpu.reciprocal %38 {approx = true} : vector<128x1xf32> -> vector<128x1xf32>
    %41 = vector.broadcast %40 : vector<128x1xf32> to vector<128x32xf32>
    %42 = arith.mulf %39, %41 : vector<128x32xf32>
    %c0_20 = arith.constant 0 : index
    %c160 = arith.constant 160 : index
    %43 = vector.load %arg13[%c0_20, %c160] : memref<128x256xf32, #tpu.memory_space<vmem>>, vector<128x32xf32>
    tpu.vector_store %arg13[%c0_20, %c160], %42 {strides = array<i32>} : memref<128x256xf32, #tpu.memory_space<vmem>>, vector<128x32xf32>,
    %44 = vector.extract_strided_slice %10 {offsets = [0, 64], sizes = [128, 32], strides = [1, 1]} : vector<128x128xf32> to vector<128x32xf32>
    %45 = vector.extract_strided_slice %4 {offsets = [0, 64], sizes = [256, 32], strides = [1, 1]} : vector<256x128xf32> to vector<256x32xf32>
    %46 = vector.extract_strided_slice %5 {offsets = [0, 64], sizes = [256, 32], strides = [1, 1]} : vector<256x128xf32> to vector<256x32xf32>
    %cst_21 = arith.constant dense<0.000000e+00> : vector<128x256xf32>
    %47 = tpu.matmul %44, %45, %cst_21 {dimension_numbers = #tpu.dot_dimension_numbers<[1], [1], [0], [0], [0, 0, 1, 0], [], []>} : vector<128x32xf32>, vector<256x32xf32>, vector<128x256xf32> -> vector<128x256xf32>
    %cst_22 = arith.constant dense<0xFF800000> : vector<128xf32>
    %48 = vector.multi_reduction <maximumf>, %47, %cst_22 [1] : vector<128x256xf32> to vector<128xf32>
    %49 = vector.shape_cast %48 : vector<128xf32> to vector<128x1xf32>
    %50 = vector.broadcast %49 : vector<128x1xf32> to vector<128x256xf32>
    %51 = arith.subf %47, %50 : vector<128x256xf32>
    %52 = math.exp %51 : vector<128x256xf32>
    %cst_23 = arith.constant dense<0.000000e+00> : vector<128xf32>
    %53 = vector.multi_reduction <add>, %52, %cst_23 [1] : vector<128x256xf32> to vector<128xf32>
    %54 = vector.shape_cast %53 : vector<128xf32> to vector<128x1xf32>
    %cst_24 = arith.constant dense<0.000000e+00> : vector<128x32xf32>
    %55 = tpu.matmul %52, %46, %cst_24 {dimension_numbers = #tpu.dot_dimension_numbers<[1], [0], [0], [1], [0, 0, 1, 1], [], []>} : vector<128x256xf32>, vector<256x32xf32>, vector<128x32xf32> -> vector<128x32xf32>
    %56 = tpu.reciprocal %54 {approx = true} : vector<128x1xf32> -> vector<128x1xf32>
    %57 = vector.broadcast %56 : vector<128x1xf32> to vector<128x32xf32>
    %58 = arith.mulf %55, %57 : vector<128x32xf32>
    %c0_25 = arith.constant 0 : index
    %c192 = arith.constant 192 : index
    %59 = vector.load %arg13[%c0_25, %c192] : memref<128x256xf32, #tpu.memory_space<vmem>>, vector<128x32xf32>
    tpu.vector_store %arg13[%c0_25, %c192], %58 {strides = array<i32>} : memref<128x256xf32, #tpu.memory_space<vmem>>, vector<128x32xf32>,
    %60 = vector.extract_strided_slice %10 {offsets = [0, 96], sizes = [128, 32], strides = [1, 1]} : vector<128x128xf32> to vector<128x32xf32>
    %61 = vector.extract_strided_slice %4 {offsets = [0, 96], sizes = [256, 32], strides = [1, 1]} : vector<256x128xf32> to vector<256x32xf32>
    %62 = vector.extract_strided_slice %5 {offsets = [0, 96], sizes = [256, 32], strides = [1, 1]} : vector<256x128xf32> to vector<256x32xf32>
    %cst_26 = arith.constant dense<0.000000e+00> : vector<128x256xf32>
    %63 = tpu.matmul %60, %61, %cst_26 {dimension_numbers = #tpu.dot_dimension_numbers<[1], [1], [0], [0], [0, 0, 1, 0], [], []>} : vector<128x32xf32>, vector<256x32xf32>, vector<128x256xf32> -> vector<128x256xf32>
    %cst_27 = arith.constant dense<0xFF800000> : vector<128xf32>
    %64 = vector.multi_reduction <maximumf>, %63, %cst_27 [1] : vector<128x256xf32> to vector<128xf32>
    %65 = vector.shape_cast %64 : vector<128xf32> to vector<128x1xf32>
    %66 = vector.broadcast %65 : vector<128x1xf32> to vector<128x256xf32>
    %67 = arith.subf %63, %66 : vector<128x256xf32>
    %68 = math.exp %67 : vector<128x256xf32>
    %cst_28 = arith.constant dense<0.000000e+00> : vector<128xf32>
    %69 = vector.multi_reduction <add>, %68, %cst_28 [1] : vector<128x256xf32> to vector<128xf32>
    %70 = vector.shape_cast %69 : vector<128xf32> to vector<128x1xf32>
    %cst_29 = arith.constant dense<0.000000e+00> : vector<128x32xf32>
    %71 = tpu.matmul %68, %62, %cst_29 {dimension_numbers = #tpu.dot_dimension_numbers<[1], [0], [0], [1], [0, 0, 1, 1], [], []>} : vector<128x256xf32>, vector<256x32xf32>, vector<128x32xf32> -> vector<128x32xf32>
    %72 = tpu.reciprocal %70 {approx = true} : vector<128x1xf32> -> vector<128x1xf32>
    %73 = vector.broadcast %72 : vector<128x1xf32> to vector<128x32xf32>
    %74 = arith.mulf %71, %73 : vector<128x32xf32>
    %c0_30 = arith.constant 0 : index
    %c224 = arith.constant 224 : index
    %75 = vector.load %arg13[%c0_30, %c224] : memref<128x256xf32, #tpu.memory_space<vmem>>, vector<128x32xf32>
    tpu.vector_store %arg13[%c0_30, %c224], %74 {strides = array<i32>} : memref<128x256xf32, #tpu.memory_space<vmem>>, vector<128x32xf32>,
    %c0_31 = arith.constant 0 : index
    %c0_32 = arith.constant 0 : index
    %76 = vector.load %arg13[%c0_31, %c0_32] : memref<128x256xf32, #tpu.memory_space<vmem>>, vector<128x256xf32>
    %c0_33 = arith.constant 0 : index
    %c0_34 = arith.constant 0 : index
    %77 = vector.load %arg6[%c0_33, %c0_34] : memref<256x256xf32, #tpu.memory_space<vmem>>, vector<256x256xf32>
    %cst_35 = arith.constant dense<0.000000e+00> : vector<128x256xf32>
    %78 = tpu.matmul %76, %77, %cst_35 {dimension_numbers = #tpu.dot_dimension_numbers<[1], [0], [0], [1], [0, 0, 1, 1], [], []>} : vector<128x256xf32>, vector<256x256xf32>, vector<128x256xf32> -> vector<128x256xf32>
    %c0_36 = arith.constant 0 : index
    %c0_37 = arith.constant 0 : index
    %79 = vector.load %arg7[%c0_36, %c0_37] : memref<1x256xf32, #tpu.memory_space<vmem>>, vector<1x256xf32>
    %80 = vector.broadcast %79 : vector<1x256xf32> to vector<128x256xf32>
    %81 = arith.addf %78, %80 : vector<128x256xf32>
    %c0_38 = arith.constant 0 : index
    %c0_39 = arith.constant 0 : index
    %82 = vector.load %arg8[%c0_38, %c0_39] : memref<1x256xf32, #tpu.memory_space<vmem>>, vector<1x256xf32>
    %83 = vector.broadcast %82 : vector<1x256xf32> to vector<128x256xf32>
    %84 = arith.mulf %81, %83 : vector<128x256xf32>
    %c0_40 = arith.constant 0 : index
    %c0_41 = arith.constant 0 : index
    %85 = vector.load %arg9[%c0_40, %c0_41] : memref<1x256xf32, #tpu.memory_space<vmem>>, vector<1x256xf32>
    %86 = vector.broadcast %85 : vector<1x256xf32> to vector<128x256xf32>
    %87 = arith.addf %84, %86 : vector<128x256xf32>
    %cst_42 = arith.constant 0.000000e+00 : f32
    %88 = vector.broadcast %cst_42 : f32 to vector<128x256xf32>
    %89 = arith.maximumf %87, %88 : vector<128x256xf32>
    %c0_43 = arith.constant 0 : index
    %c0_44 = arith.constant 0 : index
    %90 = vector.load %arg10[%c0_43, %c0_44] : memref<256x128xf32, #tpu.memory_space<vmem>>, vector<256x128xf32>
    %cst_45 = arith.constant dense<0.000000e+00> : vector<128x128xf32>
    %91 = tpu.matmul %89, %90, %cst_45 {dimension_numbers = #tpu.dot_dimension_numbers<[1], [0], [0], [1], [0, 0, 1, 1], [], []>} : vector<128x256xf32>, vector<256x128xf32>, vector<128x128xf32> -> vector<128x128xf32>
    %c0_46 = arith.constant 0 : index
    %c0_47 = arith.constant 0 : index
    %92 = vector.load %arg11[%c0_46, %c0_47] : memref<1x128xf32, #tpu.memory_space<vmem>>, vector<1x128xf32>
    %93 = vector.broadcast %92 : vector<1x128xf32> to vector<128x128xf32>
    %94 = arith.addf %91, %93 : vector<128x128xf32>
    %95 = arith.addf %1, %94 : vector<128x128xf32>
    %c0_48 = arith.constant 0 : index
    %c0_49 = arith.constant 0 : index
    %c0_50 = arith.constant 0 : index
    %96 = vector.load %arg12[%c0_48, %c0_49, %c0_50] : memref<1x128x128xf32, #tpu.memory_space<vmem>>, vector<1x128x128xf32>
    %97 = vector.shape_cast %96 : vector<1x128x128xf32> to vector<128x128xf32>
    %98 = vector.shape_cast %95 : vector<128x128xf32> to vector<1x128x128xf32>
    tpu.vector_store %arg12[%c0_48, %c0_49, %c0_50], %98 {strides = array<i32>} : memref<1x128x128xf32, #tpu.memory_space<vmem>>, vector<1x128x128xf32>,
    return
  }
  func.func @transform_0(%arg0: i32, %arg1: i32) -> (i32, i32, i32) {
    %c0_i32 = arith.constant 0 : i32
    %c0_i32_0 = arith.constant 0 : i32
    return %arg0, %arg1, %c0_i32 : i32, i32, i32
  }
  func.func @transform_1(%arg0: i32, %arg1: i32) -> (i32, i32, i32) {
    %c0_i32 = arith.constant 0 : i32
    %c0_i32_0 = arith.constant 0 : i32
    %c0_i32_1 = arith.constant 0 : i32
    return %arg0, %c0_i32, %c0_i32_0 : i32, i32, i32
  }
  func.func @transform_2(%arg0: i32, %arg1: i32) -> (i32, i32) {
    %c0_i32 = arith.constant 0 : i32
    %c0_i32_0 = arith.constant 0 : i32
    %c0_i32_1 = arith.constant 0 : i32
    return %c0_i32, %c0_i32_0 : i32, i32
  }
  func.func @transform_3(%arg0: i32, %arg1: i32) -> (i32, i32) {
    %c0_i32 = arith.constant 0 : i32
    %c0_i32_0 = arith.constant 0 : i32
    %c0_i32_1 = arith.constant 0 : i32
    return %c0_i32, %c0_i32_0 : i32, i32
  }
  func.func @transform_4(%arg0: i32, %arg1: i32) -> (i32, i32) {
    %c0_i32 = arith.constant 0 : i32
    %c0_i32_0 = arith.constant 0 : i32
    %c0_i32_1 = arith.constant 0 : i32
    return %c0_i32, %c0_i32_0 : i32, i32
  }
  func.func @transform_5(%arg0: i32, %arg1: i32) -> (i32, i32) {
    %c0_i32 = arith.constant 0 : i32
    %c0_i32_0 = arith.constant 0 : i32
    %c0_i32_1 = arith.constant 0 : i32
    return %c0_i32, %c0_i32_0 : i32, i32
  }
  func.func @transform_6(%arg0: i32, %arg1: i32) -> (i32, i32) {
    %c0_i32 = arith.constant 0 : i32
    %c0_i32_0 = arith.constant 0 : i32
    %c0_i32_1 = arith.constant 0 : i32
    return %c0_i32, %c0_i32_0 : i32, i32
  }
  func.func @transform_7(%arg0: i32, %arg1: i32) -> (i32, i32) {
    %c0_i32 = arith.constant 0 : i32
    %c0_i32_0 = arith.constant 0 : i32
    %c0_i32_1 = arith.constant 0 : i32
    return %c0_i32, %c0_i32_0 : i32, i32
  }
  func.func @transform_8(%arg0: i32, %arg1: i32) -> (i32, i32) {
    %c0_i32 = arith.constant 0 : i32
    %c0_i32_0 = arith.constant 0 : i32
    %c0_i32_1 = arith.constant 0 : i32
    return %c0_i32, %c0_i32_0 : i32, i32
  }
  func.func @transform_9(%arg0: i32, %arg1: i32) -> (i32, i32) {
    %c0_i32 = arith.constant 0 : i32
    %c0_i32_0 = arith.constant 0 : i32
    %c0_i32_1 = arith.constant 0 : i32
    return %c0_i32, %c0_i32_0 : i32, i32
  }
  func.func @transform_10(%arg0: i32, %arg1: i32) -> (i32, i32, i32) {
    %c0_i32 = arith.constant 0 : i32
    %c0_i32_0 = arith.constant 0 : i32
    return %arg0, %arg1, %c0_i32 : i32, i32, i32
  }
}

</mosaic_0001>

<bundles_post_ra>
// kernel: tpu_custom_call.1
= control target key start
LH: loop header
LB: loop body
LE: loop exit
PB: predicated region body
PF: predicated region fallthrough
CT: control target
= control target key end

     0   :  { %s10292_s0 = inlined_call_operand.hbm [shape: f32[2,256,128], index: 0, kind: input, shape index: {}]   ;;  %s10293_s1 = inlined_call_operand.hbm [shape: f32[2,256,256], index: 1, kind: input, shape index: {}]   ;;  %s10294_s2 = inlined_call_operand.hbm [shape: f32[128,128], index: 2, kind: input, shape index: {}]   ;;  %s10295_s3 = inlined_call_operand.vmem [shape: f32[1,128], index: 3, kind: input, shape index: {}]   ;;  %s10296_s4 = inlined_call_operand.hbm [shape: f32[256,256], index: 4, kind: input, shape index: {}]   ;;  %s10297_s5 = inlined_call_operand.vmem [shape: f32[1,256], index: 5, kind: input, shape index: {}]   ;;  %s10298_s6 = inlined_call_operand.vmem [shape: f32[1,256], index: 6, kind: input, shape index: {}]   ;;  %s10299_s7 = inlined_call_operand.vmem [shape: f32[1,256], index: 7, kind: input, shape index: {}]   ;;  %s10300_s8 = inlined_call_operand.hbm [shape: f32[256,128], index: 8, kind: input, shape index: {}]   ;;  %s10301_s9 = inlined_call_operand.vmem [shape: f32[1,128], index: 9, kind: input, shape index: {}]   ;;  %s10302_s10 = inlined_call_operand.hbm [shape: f32[2,256,128], index: 10, kind: output, shape index: {}]  }
   0x1   :  { %10410 = sst [smem:[#allocation171_spill]] %s10294_s2 }
   0x2   :  { %10411 = sst [smem:[#allocation172_spill]] %s10295_s3 }
   0x3   :  { %10412 = sst [smem:[#allocation173_spill]] %s10296_s4 }
   0x4   :  { %10413 = sst [smem:[#allocation174_spill]] %s10297_s5 }
   0x5   :  { %10414 = sst [smem:[#allocation175_spill]] %s10298_s6 }
   0x6   :  { %10415 = sst [smem:[#allocation176_spill]] %s10299_s7 }
   0x7   :  { %10416 = sst [smem:[#allocation177_spill]] %s10300_s8 }
   0x8   :  { %10417 = sst [smem:[#allocation178_spill]] %s10301_s9 }
   0x9   :  { %10418 = sst [smem:[#allocation179_spill]] %s10302_s10 }
   0xa   :  { %15 = vsyncpa [#allocation4], 0 }
   0xb   :  { %17 = vsyncpa [#allocation4 + $0x1], 0 }
   0xc   :  { %18 = vsyncpa [#allocation7], 0 }
   0xd   :  { %20 = vsyncpa [#allocation7 + $0x1], 0 }
   0xe   :  { %21 = vsyncpa [#allocation10], 0 }
   0xf   :  { %22 = vsyncpa [#allocation5], 0 }
  0x10   :  { %24 = vsyncpa [#allocation5 + $0x1], 0  ;;  %s6834_s13 = smov 0   ;;  %s6836_s14 = smov 0  }
  0x11   :  { %s6838_s15 = smov 0   ;;  %s6840_s16 = smov 0  }
  0x12   :  { %s6842_s17 = smov 0   ;;  %s6844_s18 = smov 0  }
  0x13   :  { %s6846_s19 = smov 0   ;;  %s6848_s20 = smov 0  }
  0x14   :  { %s6850_s21 = smov 0   ;;  %s6852_s22 = smov 0  }
  0x15   :  { %s6854_s23 = smov 0  }
  0x16 LB: > { %10419 = sst [smem:[#allocation18_spill]] %s6734_s16  ;;  %s6888_s24 = sadd.s32 4294967295, %s6762_s23   ;;  %s6762_s23 = sphi %s6854_s23, %s30_s23   ;;  %s6758_s22 = sphi %s6852_s22, %s11008_s22   ;;  %s6754_s21 = sphi %s6850_s21, %s10999_s21   ;;  %s6750_s20 = sphi %s6848_s20, %s11007_s20   ;;  %s6746_s19 = sphi %s6846_s19, %s10998_s19   ;;  %s6742_s18 = sphi %s6844_s18, %s11006_s18   ;;  %s6738_s17 = sphi %s6842_s17, %s11005_s17   ;;  %s6734_s16 = sphi %s6840_s16, %s11004_s16   ;;  %s6730_s15 = sphi %s6838_s15, %s11003_s15   ;;  %s6726_s14 = sphi %s6836_s14, %s11002_s14   ;;  %s6722_s13 = sphi %s6834_s13, %s11001_s13  }
  0x17   : > { %10420 = sst [smem:[#allocation19_spill]] %s6746_s19  ;;  %s4928_s25 = sadd.s32 4294967294, %s6762_s23  }
  0x18   : > { %10421 = sst [smem:[#allocation20_spill]] %s6750_s20  ;;  %p64_p0 = scmp.ne.s32.totalorder %s6738_s17, %s6734_s16 }
  0x19   : > { %10422 = sst [smem:[#allocation21_spill]] %s6754_s21  ;;  %p10319_p1 = scmp.eq.s32.totalorder %s6888_s24, 0 }
  0x1a   : > { %p90_p2 = scmp.ne.s32.totalorder %s6726_s14, %s6722_s13  ;;  %p290_p5 = scmp.eq.s32.totalorder %s4928_s25, 3 }
  0x1b   : > { %p6898_p4 = por %p10319_p1, %p64_p0  ;;  %p4929_p7 = scmp.ge.s32.totalorder %s6762_s23, 1 }
  0x1c   : > { %p6904_p6 = por %p90_p2, %p10319_p1  ;;  %p6909_p8 = por %p290_p5, %p64_p0 }
  0x1d   : > { %p297_p9 = scmp.lt.s32.totalorder %s6762_s23, 5  ;;  %s6764_s30 = smov [#allocation8]  }
  0x1e   : > { %s10424_s27 = scalar_select %p6904_p6, 1, 0 }
  0x1f   : > { %s10426_s28 = scalar_select %p6909_p8, 1, 0 }
  0x20   : > { %10425 = sst [smem:[#allocation22_spill]] %s10424_s27  ;;  %p6914_p10 = pnand %p4929_p7, %p297_p9 }
  0x21   : > { %10427 = sst [smem:[#allocation23_spill]] %s10426_s28  ;;  %s309_s11 = sshll.u32 %s6764_s30, 4  ;;  %s310_s11 = int_to_ptr.vmem [resolvable:$true] %s309_s11 }
  0x22   : > { %p5911_p11 = pneg %p6914_p10  ;;  %s6765_s13 = smov [#allocation9]  }
  0x23   : > { %s325_s25 = sshll.u32 %s6765_s13, 4  ;;  %s6507_s28 = scalar_lea.vmem %s310_s11, 2048  ;;  %s326_s25 = int_to_ptr.vmem [resolvable:$true] %s325_s25 }
  0x24   : > { %p6922_p12 = pnand %p5911_p11, %p10319_p1  ;;  %p6508_p0 = scmp.ne.s32.totalorder %s310_s11, %s6507_s28 }
  0x25   : > { %p6515_p7 = scmp.lt.s32.totalorder %s310_s11, %s310_s11  ;;  %p6516_p9 = scmp.lt.s32.totalorder %s6507_s28, %s6507_s28 }
  0x26   : > { %p6498_p13 = pneg %p6922_p12 }
  0x27   : > { %p6517_p3 = por %p6516_p9, %p6515_p7 }
  0x28   : > { %p6510_p2 = pnand %p6508_p0, %p6498_p13 }
  0x2a   : > { %p6511_p5 = pneg %p6510_p2 }
  0x2c   : > { %p6518_p11 = pnand %p6517_p3, %p6511_p5 }
  0x2e   : > { %6521 = shalt.err (!%p6518_p11)
}
  0x2f   : > { %s10306_s30 = smov 128   ;;  %s10308_s16 = smov 8  }
  0x30   : > { %s10430_s2 = sld [smem:[#allocation171_spill]]  ;;  %s6533_s20 = scalar_lea.vmem %s326_s25, 8192 }
  0x31   : > { %p6534_p0 = scmp.ne.s32.totalorder %s326_s25, %s6533_s20  ;;  %p6541_p3 = scmp.lt.s32.totalorder %s326_s25, %s326_s25 }
  0x32   : > { %p6542_p5 = scmp.lt.s32.totalorder %s6533_s20, %s6533_s20 }
  0x33   : > { %p6536_p2 = pnand %p6534_p0, %p6498_p13 }
  0x34   : > { %p6543_p9 = por %p6542_p5, %p6541_p3 }
  0x35   : > { %p6537_p7 = pneg %p6536_p2 }
  0x36   : > { %5914 = dma.hbm_to_vmem [thread:$0]  (!%p6922_p12), %s10430_s2, 2048, %s310_s11, [#allocation7], %s10306_s30, %s10306_s30, %s10308_s16  }
  0x37   : > { %p6544_p11 = pnand %p6543_p9, %p6537_p7 }
  0x39   : > { %6547 = shalt.err (!%p6544_p11)
}
  0x3a   : > { %s10310_s28 = smov 256   ;;  %s10311_s19 = smov 16  }
  0x3b   : > { %s10431_s4 = sld [smem:[#allocation173_spill]]  ;;  %s6770_s13 = smov [#allocation11]  }
  0x3c   : > { %s347_s30 = sshll.u32 %s6770_s13, 4  ;;  %s348_s30 = int_to_ptr.vmem [resolvable:$true] %s347_s30 }
  0x3d   : > { %s6559_s16 = scalar_lea.vmem %s348_s30, 4096  ;;  %p6567_p3 = scmp.lt.s32.totalorder %s348_s30, %s348_s30 }
  0x3e   : > { %p6560_p0 = scmp.ne.s32.totalorder %s348_s30, %s6559_s16  ;;  %p6568_p5 = scmp.lt.s32.totalorder %s6559_s16, %s6559_s16 }
  0x40   : > { %p6562_p2 = pnand %p6560_p0, %p6498_p13  ;;  %p6569_p9 = por %p6568_p5, %p6567_p3 }
  0x41   : > { %5917 = dma.hbm_to_vmem [thread:$0]  (!%p6922_p12), %s10431_s4, 8192, %s326_s25, [#allocation10], %s10310_s28, %s10310_s28, %s10311_s19  }
  0x42   : > { %p6563_p7 = pneg %p6562_p2 }
  0x44   : > { %p6570_p11 = pnand %p6569_p9, %p6563_p7 }
  0x46   : > { %6573 = shalt.err (!%p6570_p11)
}
  0x47   : > { %s10432_s20 = smov 8   ;;  %s10433_s2 = smov 128  }
  0x48   : > { %s10434_s8 = sld [smem:[#allocation177_spill]]  ;;  %s39_s16 = sadd.s32 1, %s6754_s21 }
  0x49   : > { %p40_p13 = scmp.ge.s32.totalorder %s39_s16, 2  ;;  %s42_s12 = sadd.s32 1, %s6758_s22 }
  0x4a   : > { %s51_s11 = sadd.s32 1, %s6742_s18  ;;  %p58_p0 = scmp.ne.s32.totalorder %s6742_s18, %s6738_s17 }
  0x4b   : > { %s11010_s16 = smov (%p40_p13, %s39_s16), 0  ;;  %s11012_s12 = smov (!%p40_p13, %s42_s12), %s6758_s22 }
  0x4c   : > { %10435 = sst [smem:[#allocation24_spill]] %s11010_s16  ;;  %s47_s13 = ssub.s32 %s6754_s21, %s11010_s16 }
  0x4d   : > { %p10320_p2 = scmp.eq.s32.totalorder %s6762_s23, 0  ;;  %p44_p7 = scmp.ge.s32.totalorder %s11012_s12, 2 }
  0x4e   : > { %5920 = dma.hbm_to_vmem [thread:$0]  (!%p6922_p12), %s10434_s8, 4096, %s348_s30, [#allocation10], %s10433_s2, %s10433_s2, %s10432_s20  }
  0x4f   : > { %p10436_p3 = scmp.eq.s32.totalorder %s6888_s24, 3  ;;  %p6980_p12 = por %p10320_p2, %p58_p0 }
  0x50   : > { %p5935_p9 = scmp.lt.s32.totalorder %s6762_s23, 4  ;;  %s11014_s12 = smov (%p44_p7, %s11012_s12), 0 }
  0x51   : > { %p6974_p5 = por %p10436_p3, %p58_p0  ;;  %10440 = sst [smem:[#allocation26_spill]] %s11014_s12 }
  0x52   : > { %s364_s10 = sand.u32 1, %s6742_s18   ;;  %s4935_s28 = sshll.u32 %s6754_s21, 4 }
  0x53   : > { %s10437_s25 = scalar_select %p6974_p5, 1, 0 }
  0x54   : > { %s6991_s19 = ssub.s32 %s6758_s22, %s11014_s12  ;;  %s4934_s8 = sshll.u32 %s364_s10, 7 }
  0x55   : > { %10438 = sst [smem:[#allocation25_spill]] %s10437_s25  ;;  %s48_s4 = sor.u32 %s47_s13, %s6991_s19 }
  0x56   : > { %p49_p13 = scmp.eq.s32.totalorder %s48_s4, 0  ;;  %s4936_s16 = sshll.u32 %s6758_s22, 5 }
  0x57   : > { %s374_s9 = sadd.s32 %s4936_s16, %s4935_s28  ;;  %s368_s7 = scalar_lea.vmem [#allocation3], %s4934_s8 }
  0x58   : > { %s6997_s25 = scalar_select %p49_p13, %s6742_s18, %s51_s11  }
  0x59   : > { %s377_s6 = sshll.u32 %s368_s7, 4  ;;  %s4937_s5 = sshll.u32 %s374_s9, 7  ;;  %s378_s6 = int_to_ptr.vmem [resolvable:$true] %s377_s6 }
  0x5a   : > { %s376_s21 = scalar_lea.hbm %s10292_s0, %s4937_s5  ;;  %p7006_p0 = pnand %p5935_p9, %p6980_p12 }
  0x5b   : > { %s387_s4 = sand.u32 1, %s6762_s23   ;;  %s365_s13 = scalar_lea.sflag [#allocation4], %s364_s10 }
  0x5c   : > { %p6576_p7 = pneg %p7006_p0  ;;  %s6587_s28 = scalar_lea.vmem %s378_s6, 2048 }
  0x5d   : > { %p6588_p3 = scmp.ne.s32.totalorder %s378_s6, %s6587_s28  ;;  %s6771_s7 = smov [#allocation3]  }
  0x5e   : > { %s6592_s8 = sshll.u32 %s6771_s7, 4  ;;  %s6593_s8 = int_to_ptr.vmem [resolvable:$false] %s6592_s8 }
  0x5f   : > { %p6590_p13 = pnand %p6588_p3, %p6576_p7  ;;  %s6594_s3 = scalar_lea.vmem %s6593_s8, 4096 }
  0x60   : > { %p6595_p2 = scmp.lt.s32.totalorder %s378_s6, %s6593_s8  ;;  %p6596_p11 = scmp.lt.s32.totalorder %s6594_s3, %s6587_s28 }
  0x61   : > { %p6591_p1 = pneg %p6590_p13 }
  0x62   : > { %p6597_p8 = por %p6596_p11, %p6595_p2 }
  0x64   : > { %p6598_p12 = pnand %p6597_p8, %p6591_p1 }
  0x66   : > { %6601 = shalt.err (!%p6598_p12)
}
  0x67   : > { %5924 = dma.hbm_to_vmem [thread:$0]  (!%p7006_p0), %s376_s21, 2048, %s378_s6, %s365_s13, %s10433_s2, %s10433_s2, %s10432_s20  }
  0x68   : > { %s77_s5 = sadd.s32 1, %s6730_s15  ;;  %p84_p7 = scmp.ne.s32.totalorder %s6730_s15, %s6726_s14 }
  0x69   : > { %p10442_p2 = scmp.eq.s32.totalorder %s6991_s19, 0  ;;  %p10443_p1 = scmp.eq.s32.totalorder %s6762_s23, 0 }
  0x6a   : > { %s389_s27 = sand.u32 1, %s6730_s15   ;;  %s5148_s16 = sshll.u32 %s6758_s22, 13 }
  0x6b   : > { %s7024_s9 = scalar_select %p10442_p2, %s6730_s15, %s77_s5  }
  0x6c   : > { %p86_p8 = por %p84_p7, %p10443_p1  ;;  %s4938_s12 = sshll.u32 %s389_s27, 9 }
  0x6d   : > { %s397_s10 = scalar_lea.hbm %s10293_s1, %s5148_s16  ;;  %s391_s2 = scalar_lea.vmem [#allocation6], %s4938_s12 }
  0x6e   : > { %p7035_p11 = pnand %p5935_p9, %p86_p8  ;;  %s398_s6 = sshll.u32 %s391_s2, 4  ;;  %s399_s6 = int_to_ptr.vmem [resolvable:$true] %s398_s6 }
  0x6f   : > { %s388_s19 = scalar_lea.sflag [#allocation7], %s387_s4  ;;  %s6615_s21 = scalar_lea.vmem %s399_s6, 8192 }
  0x70   : > { %p6604_p0 = pneg %p7035_p11  ;;  %p6616_p3 = scmp.ne.s32.totalorder %s399_s6, %s6615_s21 }
  0x71   : > { %s6772_s20 = smov [#allocation6]  }
  0x72   : > { %p6618_p13 = pnand %p6616_p3, %p6604_p0  ;;  %s6620_s13 = sshll.u32 %s6772_s20, 4  ;;  %s6621_s13 = int_to_ptr.vmem [resolvable:$false] %s6620_s13 }
  0x73   : > { %s6622_s7 = scalar_lea.vmem %s6621_s13, 16384  ;;  %p6623_p7 = scmp.lt.s32.totalorder %s399_s6, %s6621_s13 }
  0x74   : > { %p6619_p12 = pneg %p6618_p13  ;;  %p6624_p9 = scmp.lt.s32.totalorder %s6622_s7, %s6615_s21 }
  0x76   : > { %p6625_p2 = por %p6624_p9, %p6623_p7 }
  0x78   : > { %p6626_p1 = pnand %p6625_p2, %p6619_p12 }
  0x7a   : > { %6629 = shalt.err (!%p6626_p1)
}
  0x7b   : > { %s10445_s8 = smov 16   ;;  %s10446_s3 = smov 256  }
  0x7c   : > { %5927 = dma.hbm_to_vmem [thread:$0]  (!%p7035_p11), %s397_s10, 8192, %s399_s6, %s388_s19, %s10446_s3, %s10446_s3, %s10445_s8  }
  0x7d   : > { %410 = sbr.rel (%p6914_p10) target bundleno = 2541 (0x9ed), region = 60 }
  0x82   : > { %s7049_s4 = sand.u32 1, %s6738_s17  }
  0x83   : > { %s4942_s5 = sshll.u32 %s7049_s4, 7  ;;  %s413_s27 = scalar_lea.sflag [#allocation4], %s7049_s4 }
  0x84   : > { %s7055_s16 = scalar_lea.vmem [#allocation3], %s4942_s5 }
  0x85   : > { %6701 = dma.done.wait (%p6898_p4), %s413_s27, 2048  }
  0x86   : > { %6703 = vsyncadd (%p6898_p4), %s413_s27, 4294965248  ;;  %s421_s12 = sand.u32 1, %s6888_s24   ;;  %s423_s11 = sand.u32 1, %s6726_s14  }
  0x87   : > { %s4943_s30 = sshll.u32 %s423_s11, 9  ;;  %s422_s10 = scalar_lea.sflag [#allocation7], %s421_s12 }
  0x88   : > { %s7063_s28 = scalar_lea.vmem [#allocation6], %s4943_s30 }
  0x89   : > { %6705 = dma.done.wait (%p6904_p6), %s422_s10, 8192  }
  0x8a   : > { %6707 = vsyncadd (%p6904_p6), %s422_s10, 4294959104  ;;  %p10448_p10 = scmp.eq.s32.totalorder %s6888_s24, 0 }
  0x8c   : > { %6709 = dma.done.wait (%p10448_p10), [#allocation7], 2048   ;;  %p10449_p8 = pmov %p10448_p10 }
  0x8e   : > { %6711 = vsyncadd (%p10449_p8), [#allocation7], 4294965248  ;;  %p10450_p4 = pmov %p10449_p8 }
  0x90   : > { %6713 = dma.done.wait (%p10450_p4), [#allocation10], 12288   ;;  %p10451_p11 = pmov %p10450_p4 }
  0x91   : > { %v576_v0 = vld [vmem:[#allocation8 + $0x78] sm:$0xff]  ;;  %v575_v1 = vld [vmem:[#allocation8 + $0x70] sm:$0xff]  ;;  %v574_v2 = vld [vmem:[#allocation8 + $0x68] sm:$0xff]  ;;  %vm745_vm0 = vcmask 261120   ;;  %s6773_s24 = smov 96   ;;  %s6774_s26 = smov 64  }
  0x92   : > { %6715 = vsyncadd (%p10451_p11), [#allocation10], 4294955008  ;;  %5837 = vmatprep.subr.mxu0 %v576_v0  ;;  %v573_v3 = vld [vmem:[#allocation8 + $0x60] sm:$0xff]  ;;  %v572_v4 = vld [vmem:[#allocation8 + $0x58] sm:$0xff]  ;;  %s6775_s2 = smov 32   ;;  %s10497_s21 = sld [smem:[#allocation172_spill]] }
  0x93   : > { %5838 = vmatpush3.msra.mxu0 %v576_v0  ;;  %v481_v5 = vld [vmem:[%s7055_s16] sm:$0xff]  ;;  %v7079_v6 = vld [vmem:[%s7055_s16 + $0x8] sm:$0xff]  ;;  %v571_v7 = vld [vmem:[#allocation8 + $0x50] sm:$0xff]  ;;  %vm2350_vm1 = vcmask 523520   ;;  %vm3249_vm2 = vcmask 785920   ;;  %vm4148_vm3 = vcmask 1048320  }
  0x94   : > { %5839 = vmatprep.subr.mxu0 %v575_v1  ;;  %5869 = vmatprep.mubr.f32.mxu0 %v481_v5  ;;  %729 = vst [vmem:[#allocation2] sm:$0xff] %v481_v5  ;;  %730 = vst [vmem:[#allocation2 + $0x10] sm:$0xff] %v7079_v6  ;;  %v7083_v8 = vld [vmem:[%s7055_s16 + $0x10] sm:$0xff]  ;;  %v7086_v9 = vld [vmem:[%s7055_s16 + $0x18] sm:$0xff]  ;;  %s10983_s7 = sld [smem:[#allocation174_spill]]  ;;  %s6776_s29 = smov [#allocation12]  }
  0x95   : > { %5840 = vmatpush3.msra.mxu0 %v575_v1  ;;  %v7089_v10 = vld [vmem:[%s7055_s16 + $0x20] sm:$0xff]  ;;  %731 = vst [vmem:[#allocation2 + $0x20] sm:$0xff] %v7083_v8  ;;  %732 = vst [vmem:[#allocation2 + $0x30] sm:$0xff] %v7086_v9  ;;  %v7095_v11 = vld [vmem:[%s7055_s16 + $0x28] sm:$0xff]  ;;  %s10984_s27 = sld [smem:[#allocation175_spill]] }
  0x96   : > { %5841 = vmatprep.subr.mxu0 %v574_v2  ;;  %733 = vst [vmem:[#allocation2 + $0x40] sm:$0xff] %v7089_v10  ;;  %v7098_v12 = vld [vmem:[%s7055_s16 + $0x30] sm:$0xff]  ;;  %v7101_v13 = vld [vmem:[%s7055_s16 + $0x38] sm:$0xff]  ;;  %v570_v14 = vld [vmem:[#allocation8 + $0x48] sm:$0xff]  ;;  %s10985_s12 = sld [smem:[#allocation176_spill]] }
  0x97   : > { %5842 = vmatpush3.msra.mxu0 %v574_v2  ;;  %734 = vst [vmem:[#allocation2 + $0x50] sm:$0xff] %v7095_v11  ;;  %735 = vst [vmem:[#allocation2 + $0x60] sm:$0xff] %v7098_v12  ;;  %v7107_v15 = vld [vmem:[%s7055_s16 + $0x40] sm:$0xff]  ;;  %v7110_v16 = vld [vmem:[%s7055_s16 + $0x48] sm:$0xff]  ;;  %s10990_s10 = sld [smem:[#allocation178_spill]] }
  0x98   : > { %5843 = vmatprep.subr.mxu0 %v573_v3  ;;  %736 = vst [vmem:[#allocation2 + $0x70] sm:$0xff] %v7101_v13  ;;  %v7113_v17 = vld [vmem:[%s7055_s16 + $0x50] sm:$0xff]  ;;  %737 = vst [vmem:[#allocation2 + $0x80] sm:$0xff] %v7107_v15  ;;  %v7119_v18 = vld [vmem:[%s7055_s16 + $0x58] sm:$0xff]  ;;  %s10994_s8 = sld [smem:[#allocation179_spill]] }
  0x99   : > { %5844 = vmatpush3.msra.mxu0 %v573_v3  ;;  %738 = vst [vmem:[#allocation2 + $0x90] sm:$0xff] %v7110_v16  ;;  %739 = vst [vmem:[#allocation2 + $0xa0] sm:$0xff] %v7113_v17  ;;  %v7122_v19 = vld [vmem:[%s7055_s16 + $0x60] sm:$0xff]  ;;  %v7125_v20 = vld [vmem:[%s7055_s16 + $0x68] sm:$0xff] }
  0x9a   : > { %5845 = vmatprep.subr.mxu0 %v572_v4  ;;  %740 = vst [vmem:[#allocation2 + $0xb0] sm:$0xff] %v7119_v18  ;;  %741 = vst [vmem:[#allocation2 + $0xc0] sm:$0xff] %v7122_v19  ;;  %v7131_v21 = vld [vmem:[%s7055_s16 + $0x70] sm:$0xff]  ;;  %v7134_v22 = vld [vmem:[%s7055_s16 + $0x78] sm:$0xff] }
  0x9b   : > { %5846 = vmatpush3.msra.mxu0 %v572_v4  ;;  %742 = vst [vmem:[#allocation2 + $0xd0] sm:$0xff] %v7125_v20  ;;  %v7137_v23 = vld [vmem:[%s7063_s28 + $0xf0] sm:$0xff]  ;;  %743 = vst [vmem:[#allocation2 + $0xe0] sm:$0xff] %v7131_v21  ;;  %v569_v25 = vld [vmem:[#allocation8 + $0x40] sm:$0xff] }
  0x9c   : > { %5847 = vmatprep.subr.mxu0 %v571_v7  ;;  %744 = vst [vmem:[#allocation2 + $0xf0] sm:$0xff] %v7134_v22  ;;  %1498 = vrot.lane.b32.xlu1 %v7137_v23, %s6773_s24  ;;  %v7144_v24 = vld [vmem:[%s7063_s28 + $0x1f0] sm:$0xff]  ;;  %v7149_v26 = vld [vmem:[%s7063_s28 + $0x1e0] sm:$0xff]  ;;  %v568_v28 = vld [vmem:[#allocation8 + $0x38] sm:$0xff] }
  0x9d   : > { %5848 = vmatpush3.msra.mxu0 %v571_v7  ;;  %1530 = vrot.lane.b32.xlu0 %v7144_v24, %s6773_s24  ;;  %v7152_v27 = vld [vmem:[%s7063_s28 + $0xd0] sm:$0xff]  ;;  %v7163_v30 = vld [vmem:[%s7063_s28 + $0xe0] sm:$0xff]  ;;  %v566_v32 = vld [vmem:[#allocation8 + $0x28] sm:$0xff] }
  0x9e   : > { %5849 = vmatprep.subr.mxu0 %v570_v14  ;;  %5181 = vmatprep.subr.msk.mxu1 %vm745_vm0, %v7144_v24  ;;  %v567_v29 = vld [vmem:[#allocation8 + $0x30] sm:$0xff]  ;;  %v565_v33 = vld [vmem:[#allocation8 + $0x20] sm:$0xff]  ;;  %v564_v36 = vld [vmem:[#allocation8 + $0x18] sm:$0xff] }
  0x9f   : > { %5850 = vmatpush3.msra.mxu0 %v570_v14  ;;  %5182 = vmatpush3.xpose.msk.msra.mxu1 %vm745_vm0, %v7137_v23  ;;  %v7166_v31 = vld [vmem:[%s7063_s28 + $0xb0] sm:$0xff]  ;;  %v7180_v35 = vld [vmem:[%s7063_s28 + $0x1a0] sm:$0xff]  ;;  %v562_v41 = vld [vmem:[#allocation8 + $0x8] sm:$0xff] }
  0xa0   : > { %5851 = vmatprep.subr.mxu0 %v569_v25  ;;  %1528 = vrot.lane.b32.xlu1 %v7149_v26, %s6773_s24  ;;  %v7177_v34 = vld [vmem:[%s7063_s28 + $0x1d0] sm:$0xff]  ;;  %v7191_v38 = vld [vmem:[%s7063_s28 + $0x1c0] sm:$0xff]  ;;  %v7402_v0 = vld [vmem:[%s7063_s28 + $0x1f8] sm:$0xff] }
  0xa1   : > { %5852 = vmatpush3.msra.mxu0 %v569_v25  ;;  %1494 = vrot.lane.b32.xlu0 %v7152_v27, %s6773_s24  ;;  %v563_v37 = vld [vmem:[#allocation8 + $0x10] sm:$0xff]  ;;  %v7194_v39 = vld [vmem:[%s7063_s28 + $0xa0] sm:$0xff]  ;;  %v7406_v1 = vld [vmem:[%s7063_s28 + $0xf8] sm:$0xff] }
  0xa2   : > { %5853 = vmatprep.subr.mxu0 %v568_v28  ;;  %5183 = vmatprep.subr.msk.mxu1 %vm745_vm0, %v7149_v26  ;;  %v7197_v40 = vld [vmem:[%s7063_s28 + $0xc0] sm:$0xff]  ;;  %v7208_v43 = vld [vmem:[%s7063_s28 + $0x1b0] sm:$0xff]  ;;  %v7410_v2 = vld [vmem:[%s7063_s28 + $0x1e8] sm:$0xff] }
  0xa3   : > { %5854 = vmatpush3.msra.mxu0 %v568_v28  ;;  %5184 = vmatpush3.xpose.msk.msra.mxu1 %vm745_vm0, %v7163_v30  ;;  %v561_v42 = vld [vmem:[#allocation8] sm:$0xff]  ;;  %v7223_v45 = vld [vmem:[%s7063_s28 + $0x170] sm:$0xff]  ;;  %v7416_v3 = vld [vmem:[%s7063_s28 + $0xe8] sm:$0xff] }
  0xa4   : > { %5855 = vmatprep.subr.mxu0 %v567_v29  ;;  %1496 = vrot.lane.b32.xlu1 %v7163_v30, %s6773_s24  ;;  %v7211_v44 = vld [vmem:[%s7063_s28 + $0x80] sm:$0xff]  ;;  %v7229_v46 = vld [vmem:[%s7063_s28 + $0x190] sm:$0xff]  ;;  %v7422_v4 = vld [vmem:[%s7063_s28 + $0x1d8] sm:$0xff] }
  0xa5   : > { %5856 = vmatpush3.msra.mxu0 %v567_v29  ;;  %1490 = vrot.lane.b32.xlu0 %v7166_v31, %s6773_s24  ;;  %v7241_v47 = vld [vmem:[%s7063_s28 + $0x70] sm:$0xff]  ;;  %v7248_v49 = vld [vmem:[%s7063_s28 + $0x180] sm:$0xff]  ;;  %v7425_v5 = vld [vmem:[%s7063_s28 + $0xd8] sm:$0xff] }
  0xa6   : > { %5857 = vmatprep.subr.mxu0 %v566_v32  ;;  %5185 = vmatprep.subr.msk.mxu1 %vm745_vm0, %v7177_v34  ;;  %v7244_v48 = vld [vmem:[%s7063_s28 + $0x90] sm:$0xff]  ;;  %v7260_v50 = vld [vmem:[%s7063_s28 + $0x60] sm:$0xff]  ;;  %v7436_v7 = vld [vmem:[%s7063_s28 + $0xc8] sm:$0xff] }
  0xa7   : > { %5858 = vmatpush3.msra.mxu0 %v566_v32  ;;  %5186 = vmatpush3.xpose.msk.msra.mxu1 %vm745_vm0, %v7152_v27  ;;  %v7273_v51 = vld [vmem:[%s7063_s28 + $0x150] sm:$0xff]  ;;  %v7277_v52 = vld [vmem:[%s7063_s28 + $0x160] sm:$0xff]  ;;  %v7470_v14 = vld [vmem:[%s7063_s28 + $0x188] sm:$0xff] }
  0xa8   : > { %5859 = vmatprep.subr.mxu0 %v565_v33  ;;  %1526 = vrot.lane.b32.xlu1 %v7177_v34, %s6773_s24  ;;  %v7289_v53 = vld [vmem:[%s7063_s28 + $0x50] sm:$0xff]  ;;  %v7301_v54 = vld [vmem:[%s7063_s28 + $0x40] sm:$0xff]  ;;  %10452 = vst [vmem:[#allocation27_spill] sm:$0xff] %v7470_v14  ;;  %v7516_v25 = vld [vmem:[%s7063_s28 + $0x48] sm:$0xff] }
  0xa9   : > { %5860 = vmatpush3.msra.mxu0 %v565_v33  ;;  %1520 = vrot.lane.b32.xlu0 %v7180_v35, %s6773_s24  ;;  %v7305_v55 = vld [vmem:[%s7063_s28 + $0x140] sm:$0xff]  ;;  %v7317_v56 = vld [vmem:[%s7063_s28 + $0x30] sm:$0xff]  ;;  %10456 = vst [vmem:[#allocation31_spill] sm:$0xff] %v7516_v25  ;;  %v7522_v28 = vld [vmem:[%s7063_s28 + $0x138] sm:$0xff] }
  0xaa   : > { %5861 = vmatprep.subr.mxu0 %v564_v36  ;;  %5187 = vmatprep.subr.msk.mxu1 %vm745_vm0, %v7191_v38  ;;  %v7321_v57 = vld [vmem:[%s7063_s28 + $0x130] sm:$0xff]  ;;  %v7333_v58 = vld [vmem:[%s7063_s28 + $0x20] sm:$0xff]  ;;  %10457 = vst [vmem:[#allocation32_spill] sm:$0xff] %v7522_v28  ;;  %v7525_v29 = vld [vmem:[%s7063_s28 + $0x38] sm:$0xff] }
  0xab   : > { %5862 = vmatpush3.msra.mxu0 %v564_v36  ;;  %5188 = vmatpush3.xpose.msk.msra.mxu1 %vm745_vm0, %v7197_v40  ;;  %v7337_v59 = vld [vmem:[%s7063_s28 + $0x120] sm:$0xff]  ;;  %v7348_v60 = vld [vmem:[%s7063_s28 + $0x10] sm:$0xff]  ;;  %10458 = vst [vmem:[#allocation33_spill] sm:$0xff] %v7525_v29  ;;  %v7530_v32 = vld [vmem:[%s7063_s28 + $0x128] sm:$0xff] }
  0xac   : > { %5863 = vmatprep.subr.mxu0 %v563_v37  ;;  %1524 = vrot.lane.b32.xlu1 %v7191_v38, %s6773_s24  ;;  %v7351_v61 = vld [vmem:[%s7063_s28 + $0x110] sm:$0xff]  ;;  %v7362_v62 = vld [vmem:[%s7063_s28] sm:$0xff]  ;;  %v7536_v33 = vld [vmem:[%s7063_s28 + $0x28] sm:$0xff] }
  0xad   : > { %5864 = vmatpush3.msra.mxu0 %v563_v37  ;;  %1488 = vrot.lane.b32.xlu0 %v7194_v39, %s6773_s24  ;;  %v7365_v63 = vld [vmem:[%s7063_s28 + $0x100] sm:$0xff]  ;;  %10459 = vst [vmem:[#allocation34_spill] sm:$0xff] %v7536_v33  ;;  %v7542_v36 = vld [vmem:[%s7063_s28 + $0x118] sm:$0xff] }
  0xae   : > { %5865 = vmatprep.subr.mxu0 %v562_v41  ;;  %5189 = vmatprep.subr.msk.mxu1 %vm745_vm0, %v7208_v43  ;;  %10460 = vst [vmem:[#allocation35_spill] sm:$0xff] %v7542_v36  ;;  %v7545_v37 = vld [vmem:[%s7063_s28 + $0x18] sm:$0xff] }
  0xaf   : > { %5866 = vmatpush3.msra.mxu0 %v562_v41  ;;  %5190 = vmatpush3.xpose.msk.msra.mxu1 %vm745_vm0, %v7166_v31 }
  0xb0   : > { %5867 = vmatprep.subr.mxu0 %v561_v42  ;;  %1492 = vrot.lane.b32.xlu1 %v7197_v40, %s6773_s24 }
  0xb1   : > { %5868 = vmatpush3.msra.mxu0 %v561_v42  ;;  %1484 = vrot.lane.b32.xlu0 %v7211_v44, %s6773_s24 }
  0xb2   : > { %5870 = vmatmul.mubr.f32.vlgmr.msra.gmra.mxu0 %v7079_v6  ;;  %5191 = vmatprep.subr.msk.mxu1 %vm745_vm0, %v7180_v35  ;;  %v7430_v6 = vld [vmem:[%s7063_s28 + $0x1c8] sm:$0xff] }
  0xb3   : > { %5872 = vmatprep.mubr.f32.mxu0 %v7083_v8  ;;  %5192 = vmatpush3.xpose.msk.msra.mxu1 %vm745_vm0, %v7194_v39  ;;  %v7442_v8 = vld [vmem:[%s7063_s28 + $0x1b8] sm:$0xff] }
  0xb4   : > { %1522 = vrot.lane.b32.xlu1 %v7208_v43, %s6773_s24  ;;  %5193 = vmatprep.subr.msk.mxu1 %vm745_vm0, %v7229_v46 }
  0xb5   : > { %1514 = vrot.lane.b32.xlu0 %v7223_v45, %s6773_s24  ;;  %5245 = vmatprep.subr.mxu0 %v7402_v0 }
  0xb6   : > { %5873 = vmatmul.mubr.f32.gmra.mxu0 %v7086_v9  ;;  %v7445_v9 = vld [vmem:[%s7063_s28 + $0xb8] sm:$0xff] }
  0xb7   : > { %5875 = vmatprep.mubr.f32.mxu0 %v7089_v10  ;;  %5194 = vmatpush3.xpose.msk.msra.mxu1 %vm745_vm0, %v7244_v48  ;;  %v7450_v10 = vld [vmem:[%s7063_s28 + $0x1a8] sm:$0xff] }
  0xb8   : > { %1518 = vrot.lane.b32.xlu1 %v7229_v46, %s6773_s24  ;;  %5195 = vmatprep.subr.msk.mxu1 %vm745_vm0, %v7248_v49 }
  0xb9   : > { %1482 = vrot.lane.b32.xlu0 %v7241_v47, %s6773_s24  ;;  %5246 = vmatpush3.msra.mxu0 %v7406_v1 }
  0xba   : > { %5876 = vmatmul.mubr.f32.gmra.mxu0 %v7095_v11  ;;  %5247 = vmatprep.subr.mxu0 %v7410_v2  ;;  %v7456_v11 = vld [vmem:[%s7063_s28 + $0xa8] sm:$0xff] }
  0xbb   : > { %5878 = vmatprep.mubr.f32.mxu0 %v7098_v12  ;;  %5196 = vmatpush3.xpose.msk.msra.mxu1 %vm745_vm0, %v7211_v44  ;;  %v7462_v12 = vld [vmem:[%s7063_s28 + $0x198] sm:$0xff] }
  0xbc   : > { %1486 = vrot.lane.b32.xlu1 %v7244_v48, %s6773_s24  ;;  %5197 = vmatprep.subr.msk.mxu1 %vm745_vm0, %v7223_v45 }
  0xbd   : > { %1480 = vrot.lane.b32.xlu0 %v7260_v50, %s6773_s24  ;;  %5248 = vmatpush3.msra.mxu0 %v7416_v3 }
  0xbe   : > { %5879 = vmatmul.mubr.f32.gmra.mxu0 %v7101_v13  ;;  %5249 = vmatprep.subr.mxu0 %v7422_v4  ;;  %v7465_v13 = vld [vmem:[%s7063_s28 + $0x98] sm:$0xff] }
  0xbf   : > { %5881 = vmatprep.mubr.f32.mxu0 %v7107_v15  ;;  %5198 = vmatpush3.xpose.msk.msra.mxu1 %vm745_vm0, %v7241_v47  ;;  %v7476_v15 = vld [vmem:[%s7063_s28 + $0x88] sm:$0xff] }
  0xc0   : > { %1516 = vrot.lane.b32.xlu1 %v7248_v49, %s6773_s24  ;;  %5199 = vmatprep.subr.msk.mxu1 %vm745_vm0, %v7277_v52 }
  0xc1   : > { %1510 = vrot.lane.b32.xlu0 %v7273_v51, %s6773_s24  ;;  %5250 = vmatpush3.msra.mxu0 %v7425_v5 }
  0xc2   : > { %5882 = vmatmul.mubr.f32.gmra.mxu0 %v7110_v16  ;;  %5251 = vmatprep.subr.mxu0 %v7430_v6  ;;  %v7482_v16 = vld [vmem:[%s7063_s28 + $0x178] sm:$0xff] }
  0xc3   : > { %5884 = vmatprep.mubr.f32.mxu0 %v7113_v17  ;;  %5200 = vmatpush3.xpose.msk.msra.mxu1 %vm745_vm0, %v7260_v50  ;;  %10453 = vst [vmem:[#allocation28_spill] sm:$0xff] %v7482_v16  ;;  %v7485_v17 = vld [vmem:[%s7063_s28 + $0x78] sm:$0xff] }
  0xc4   : > { %1512 = vrot.lane.b32.xlu1 %v7277_v52, %s6773_s24  ;;  %5201 = vmatprep.subr.msk.mxu1 %vm745_vm0, %v7273_v51 }
  0xc5   : > { %1478 = vrot.lane.b32.xlu0 %v7289_v53, %s6773_s24  ;;  %5252 = vmatpush3.msra.mxu0 %v7436_v7 }
  0xc6   : > { %5885 = vmatmul.mubr.f32.gmra.mxu0 %v7119_v18  ;;  %5253 = vmatprep.subr.mxu0 %v7442_v8  ;;  %v7490_v18 = vld [vmem:[%s7063_s28 + $0x168] sm:$0xff] }
  0xc7   : > { %5887 = vmatprep.mubr.f32.mxu0 %v7122_v19  ;;  %5202 = vmatpush3.xpose.msk.msra.mxu1 %vm745_vm0, %v7289_v53  ;;  %v7496_v19 = vld [vmem:[%s7063_s28 + $0x68] sm:$0xff] }
  0xc8   : > { %1476 = vrot.lane.b32.xlu1 %v7301_v54, %s6773_s24  ;;  %5203 = vmatprep.subr.msk.mxu1 %vm745_vm0, %v7305_v55 }
  0xc9   : > { %1508 = vrot.lane.b32.xlu0 %v7305_v55, %s6773_s24  ;;  %5254 = vmatpush3.msra.mxu0 %v7445_v9 }
  0xca   : > { %5888 = vmatmul.mubr.f32.gmra.mxu0 %v7125_v20  ;;  %5255 = vmatprep.subr.mxu0 %v7450_v10  ;;  %v7502_v20 = vld [vmem:[%s7063_s28 + $0x158] sm:$0xff] }
  0xcb   : > { %5890 = vmatprep.mubr.f32.mxu0 %v7131_v21  ;;  %5204 = vmatpush3.xpose.msk.msra.mxu1 %vm745_vm0, %v7301_v54  ;;  %v7505_v21 = vld [vmem:[%s7063_s28 + $0x58] sm:$0xff] }
  0xcc   : > { %1474 = vrot.lane.b32.xlu1 %v7317_v56, %s6773_s24  ;;  %5205 = vmatprep.subr.msk.mxu1 %vm745_vm0, %v7321_v57  ;;  %10454 = vst [vmem:[#allocation29_spill] sm:$0xff] %v7505_v21 }
  0xcd   : > { %1506 = vrot.lane.b32.xlu0 %v7321_v57, %s6773_s24  ;;  %5256 = vmatpush3.msra.mxu0 %v7456_v11 }
  0xce   : > { %5891 = vmatmul.mubr.f32.gmra.mxu0 %v7134_v22  ;;  %5257 = vmatprep.subr.mxu0 %v7462_v12  ;;  %v7510_v22 = vld [vmem:[%s7063_s28 + $0x148] sm:$0xff] }
  0xcf   : > { %5206 = vmatpush3.xpose.msk.msra.mxu1 %vm745_vm0, %v7317_v56  ;;  %5258 = vmatpush3.msra.mxu0 %v7465_v13  ;;  %10455 = vst [vmem:[#allocation30_spill] sm:$0xff] %v7510_v22 }
  0xd0   : > { %1472 = vrot.lane.b32.xlu1 %v7333_v58, %s6773_s24  ;;  %5207 = vmatprep.subr.msk.mxu1 %vm745_vm0, %v7337_v59 }
  0xd1   : > { %1504 = vrot.lane.b32.xlu0 %v7337_v59, %s6773_s24  ;;  %5259 = vmatprep.subr.mxu0 %v7470_v14 }
  0xd2   : > { %5260 = vmatpush3.msra.mxu0 %v7476_v15 }
  0xd3   : > { %5208 = vmatpush3.xpose.msk.msra.mxu1 %vm745_vm0, %v7333_v58  ;;  %5261 = vmatprep.subr.mxu0 %v7482_v16 }
  0xd4   : > { %1470 = vrot.lane.b32.xlu1 %v7348_v60, %s6773_s24  ;;  %5209 = vmatprep.subr.msk.mxu1 %vm745_vm0, %v7351_v61 }
  0xd5   : > { %1502 = vrot.lane.b32.xlu0 %v7351_v61, %s6773_s24  ;;  %5262 = vmatpush3.msra.mxu0 %v7485_v17 }
  0xd6   : > { %5263 = vmatprep.subr.mxu0 %v7490_v18 }
  0xd7   : > { %5210 = vmatpush3.xpose.msk.msra.mxu1 %vm745_vm0, %v7348_v60  ;;  %5264 = vmatpush3.msra.mxu0 %v7496_v19 }
  0xd8   : > { %1468 = vrot.lane.b32.xlu1 %v7362_v62, %s6773_s24  ;;  %5211 = vmatprep.subr.msk.mxu1 %vm745_vm0, %v7365_v63 }
  0xd9   : > { %1500 = vrot.lane.b32.xlu0 %v7365_v63, %s6773_s24  ;;  %5265 = vmatprep.subr.mxu0 %v7502_v20 }
  0xda   : > { %5266 = vmatpush3.msra.mxu0 %v7505_v21 }
  0xdb   : > { %5212 = vmatpush3.xpose.msk.msra.mxu1 %vm745_vm0, %v7362_v62  ;;  %5267 = vmatprep.subr.mxu0 %v7510_v22 }
  0xdc   : > { %2461 = vrot.lane.b32.xlu1 %v7144_v24, %s6774_s26  ;;  %5268 = vmatpush3.msra.mxu0 %v7516_v25 }
  0xdd   : > { %2429 = vrot.lane.b32.xlu0 %v7137_v23, %s6774_s26  ;;  %5269 = vmatprep.subr.mxu0 %v7522_v28  ;;  %v7558_v28 = vld [vmem:[%s7063_s28 + $0x8] sm:$0xff] }
  0xde   : > { %5270 = vmatpush3.msra.mxu0 %v7525_v29  ;;  %v7552_v29 = vld [vmem:[%s7063_s28 + $0x108] sm:$0xff]  ;;  %10463 = vst [vmem:[#allocation38_spill] sm:$0xff] %v7558_v28 }
  0xdf   : > { %5271 = vmatprep.subr.mxu0 %v7530_v32  ;;  %10462 = vst [vmem:[#allocation37_spill] sm:$0xff] %v7552_v29 }
  0xe0   : > { %2427 = vrot.lane.b32.xlu1 %v7163_v30, %s6774_s26  ;;  %5272 = vmatpush3.msra.mxu0 %v7536_v33 }
  0xe1   : > { %2459 = vrot.lane.b32.xlu0 %v7149_v26, %s6774_s26  ;;  %5273 = vmatprep.subr.mxu0 %v7542_v36 }
  0xe2   : > { %5274 = vmatpush3.msra.mxu0 %v7545_v37 }
  0xe3   : > { %5275 = vmatprep.subr.mxu0 %v7552_v29 }
  0xe4   : > { %2457 = vrot.lane.b32.xlu1 %v7177_v34, %s6774_s26  ;;  %5276 = vmatpush3.msra.mxu0 %v7558_v28 }
  0xe5   : > { %2425 = vrot.lane.b32.xlu0 %v7152_v27, %s6774_s26 }
  0xe8   : > { %2423 = vrot.lane.b32.xlu1 %v7197_v40, %s6774_s26 }
  0xe9   : > { %2455 = vrot.lane.b32.xlu0 %v7191_v38, %s6774_s26 }
  0xec   : > { %2453 = vrot.lane.b32.xlu1 %v7208_v43, %s6774_s26 }
  0xed   : > { %2421 = vrot.lane.b32.xlu0 %v7166_v31, %s6774_s26 }
  0xf0   : > { %2419 = vrot.lane.b32.xlu1 %v7194_v39, %s6774_s26 }
  0xf1   : > { %2451 = vrot.lane.b32.xlu0 %v7180_v35, %s6774_s26 }
  0xf4   : > { %2449 = vrot.lane.b32.xlu1 %v7229_v46, %s6774_s26 }
  0xf5   : > { %2417 = vrot.lane.b32.xlu0 %v7244_v48, %s6774_s26 }
  0xf8   : > { %2415 = vrot.lane.b32.xlu1 %v7211_v44, %s6774_s26 }
  0xf9   : > { %2447 = vrot.lane.b32.xlu0 %v7248_v49, %s6774_s26 }
  0xfc   : > { %2445 = vrot.lane.b32.xlu1 %v7223_v45, %s6774_s26 }
  0xfd   : > { %2413 = vrot.lane.b32.xlu0 %v7241_v47, %s6774_s26 }
 0x100   : > { %2411 = vrot.lane.b32.xlu1 %v7260_v50, %s6774_s26 }
 0x101   : > { %2443 = vrot.lane.b32.xlu0 %v7277_v52, %s6774_s26 }
 0x104   : > { %2441 = vrot.lane.b32.xlu1 %v7273_v51, %s6774_s26 }
 0x105   : > { %2409 = vrot.lane.b32.xlu0 %v7289_v53, %s6774_s26 }
 0x108   : > { %2407 = vrot.lane.b32.xlu1 %v7301_v54, %s6774_s26 }
 0x109   : > { %2439 = vrot.lane.b32.xlu0 %v7305_v55, %s6774_s26 }
 0x10c   : > { %2437 = vrot.lane.b32.xlu1 %v7321_v57, %s6774_s26 }
 0x10d   : > { %2405 = vrot.lane.b32.xlu0 %v7317_v56, %s6774_s26 }
 0x10e   : > { %v7547_v41 = vpop.permute.xlu1 %1498 }
 0x10f   : > { %10461 = vst [vmem:[#allocation36_spill] sm:$0xff] %v7547_v41  ;;  %v1531_v42 = vpop.permute.xlu0 %1530 }
 0x110   : > { %2403 = vrot.lane.b32.xlu1 %v7333_v58, %s6774_s26  ;;  %5325 = vmatprep.subr.msk.mxu0 %vm745_vm0, %v1531_v42 }
 0x111   : > { %2435 = vrot.lane.b32.xlu0 %v7337_v59, %s6774_s26 }
 0x112   : > { %v7563_v41 = vpop.permute.xlu1 %1528 }
 0x113   : > { %10464 = vst [vmem:[#allocation39_spill] sm:$0xff] %v7563_v41  ;;  %v7566_v36 = vpop.permute.xlu0 %1494 }
 0x114   : > { %10465 = vst [vmem:[#allocation40_spill] sm:$0xff] %v7566_v36  ;;  %2433 = vrot.lane.b32.xlu1 %v7351_v61, %s6774_s26 }
 0x115   : > { %2401 = vrot.lane.b32.xlu0 %v7348_v60, %s6774_s26 }
 0x116   : > { %v7572_v33 = vpop.permute.xlu1 %1496 }
 0x117   : > { %10466 = vst [vmem:[#allocation41_spill] sm:$0xff] %v7572_v33  ;;  %v7574_v25 = vpop.permute.xlu0 %1490 }
 0x118   : > { %10467 = vst [vmem:[#allocation42_spill] sm:$0xff] %v7574_v25  ;;  %2399 = vrot.lane.b32.xlu1 %v7362_v62, %s6774_s26 }
 0x119   : > { %2431 = vrot.lane.b32.xlu0 %v7365_v63, %s6774_s26 }
 0x11a   : > { %v7580_v41 = vpop.permute.xlu1 %1526 }
 0x11b   : > { %10468 = vst [vmem:[#allocation43_spill] sm:$0xff] %v7580_v41  ;;  %v7584_v42 = vpop.permute.xlu0 %1520 }
 0x11c   : > { %3360 = vrot.lane.b32.xlu1 %v7144_v24, %s6775_s2  ;;  %10469 = vst [vmem:[#allocation44_spill] sm:$0xff] %v7584_v42 }
 0x11d   : > { %3328 = vrot.lane.b32.xlu0 %v7137_v23, %s6775_s2 }
 0x11e   : > { %v7590_v25 = vpop.permute.xlu1 %1524 }
 0x11f   : > { %10470 = vst [vmem:[#allocation45_spill] sm:$0xff] %v7590_v25  ;;  %v7594_v36 = vpop.permute.xlu0 %1488 }
 0x120   : > { %3326 = vrot.lane.b32.xlu1 %v7163_v30, %s6775_s2  ;;  %10471 = vst [vmem:[#allocation46_spill] sm:$0xff] %v7594_v36 }
 0x121   : > { %3358 = vrot.lane.b32.xlu0 %v7149_v26, %s6775_s2 }
 0x122   : > { %v7600_v24 = vpop.permute.xlu1 %1492 }
 0x123   : > { %10472 = vst [vmem:[#allocation47_spill] sm:$0xff] %v7600_v24  ;;  %v7604_v23 = vpop.permute.xlu0 %1484 }
 0x124   : > { %3356 = vrot.lane.b32.xlu1 %v7177_v34, %s6775_s2  ;;  %10473 = vst [vmem:[#allocation48_spill] sm:$0xff] %v7604_v23 }
 0x125   : > { %3324 = vrot.lane.b32.xlu0 %v7152_v27, %s6775_s2 }
 0x126   : > { %v7610_v26 = vpop.permute.xlu1 %1522 }
 0x127   : > { %10474 = vst [vmem:[#allocation49_spill] sm:$0xff] %v7610_v26  ;;  %v7614_v30 = vpop.permute.xlu0 %1514 }
 0x128   : > { %3322 = vrot.lane.b32.xlu1 %v7197_v40, %s6775_s2  ;;  %10475 = vst [vmem:[#allocation50_spill] sm:$0xff] %v7614_v30 }
 0x129   : > { %3354 = vrot.lane.b32.xlu0 %v7191_v38, %s6775_s2 }
 0x12a   : > { %v7616_v27 = vpop.permute.xlu1 %1518 }
 0x12b   : > { %10476 = vst [vmem:[#allocation51_spill] sm:$0xff] %v7616_v27  ;;  %v7618_v34 = vpop.permute.xlu0 %1482 }
 0x12c   : > { %3352 = vrot.lane.b32.xlu1 %v7208_v43, %s6775_s2  ;;  %10477 = vst [vmem:[#allocation52_spill] sm:$0xff] %v7618_v34 }
 0x12d   : > { %3320 = vrot.lane.b32.xlu0 %v7166_v31, %s6775_s2 }
 0x12e   : > { %v7620_v40 = vpop.permute.xlu1 %1486 }
 0x12f   : > { %10478 = vst [vmem:[#allocation53_spill] sm:$0xff] %v7620_v40  ;;  %v7622_v23 = vpop.permute.xlu0 %1480 }
 0x130   : > { %10479 = vst [vmem:[#allocation54_spill] sm:$0xff] %v7622_v23 }
 0x132   : > { %v7624_v36 = vpop.permute.xlu1 %1516 }
 0x133   : > { %10480 = vst [vmem:[#allocation55_spill] sm:$0xff] %v7624_v36  ;;  %v7626_v38 = vpop.permute.xlu0 %1510 }
 0x134   : > { %10481 = vst [vmem:[#allocation56_spill] sm:$0xff] %v7626_v38 }
 0x136   : > { %v7628_v43 = vpop.permute.xlu1 %1512 }
 0x137   : > { %10482 = vst [vmem:[#allocation57_spill] sm:$0xff] %v7628_v43  ;;  %v7630_v42 = vpop.permute.xlu0 %1478 }
 0x138   : > { %10483 = vst [vmem:[#allocation58_spill] sm:$0xff] %v7630_v42 }
 0x13a   : > { %v7632_v26 = vpop.permute.xlu1 %1476 }
 0x13b   : > { %10484 = vst [vmem:[#allocation59_spill] sm:$0xff] %v7632_v26  ;;  %v7634_v31 = vpop.permute.xlu0 %1508 }
 0x13c   : > { %10485 = vst [vmem:[#allocation60_spill] sm:$0xff] %v7634_v31 }
 0x13e   : > { %v7636_v30 = vpop.permute.xlu1 %1474 }
 0x13f   : > { %10486 = vst [vmem:[#allocation61_spill] sm:$0xff] %v7636_v30  ;;  %v7638_v27 = vpop.permute.xlu0 %1506 }
 0x140   : > { %10487 = vst [vmem:[#allocation62_spill] sm:$0xff] %v7638_v27 }
 0x142   : > { %v7640_v34 = vpop.permute.xlu1 %1472 }
 0x143   : > { %10488 = vst [vmem:[#allocation63_spill] sm:$0xff] %v7640_v34  ;;  %v7642_v40 = vpop.permute.xlu0 %1504  ;;  %v7661_v34 = vld [vmem:[%s10497_s21] ss:$0 sm:$0xff] }
 0x144   : > { %10489 = vst [vmem:[#allocation64_spill] sm:$0xff] %v7642_v40 }
 0x146   : > { %v7644_v23 = vpop.permute.xlu1 %1470 }
 0x147   : > { %10490 = vst [vmem:[#allocation65_spill] sm:$0xff] %v7644_v23  ;;  %v7646_v36 = vpop.permute.xlu0 %1502 }
 0x148   : > { %10491 = vst [vmem:[#allocation66_spill] sm:$0xff] %v7646_v36 }
 0x14a   : > { %v7648_v38 = vpop.permute.xlu1 %1468 }
 0x14b   : > { %10492 = vst [vmem:[#allocation67_spill] sm:$0xff] %v7648_v38  ;;  %v7650_v43 = vpop.permute.xlu0 %1500 }
 0x14c   : > { %10493 = vst [vmem:[#allocation68_spill] sm:$0xff] %v7650_v43 }
 0x14e   : > { %v7652_v42 = vpop.permute.xlu1 %2461 }
 0x14f   : > { %10494 = vst [vmem:[#allocation69_spill] sm:$0xff] %v7652_v42  ;;  %v7654_v26 = vpop.permute.xlu0 %2429 }
 0x150   : > { %10495 = vst [vmem:[#allocation70_spill] sm:$0xff] %v7654_v26 }
 0x152   : > { %v7656_v31 = vpop.permute.xlu1 %2427 }
 0x153   : > { %10496 = vst [vmem:[#allocation71_spill] sm:$0xff] %v7656_v31  ;;  %v7663_v40 = vpop.permute.xlu0 %2459 }
 0x154   : > { %10498 = vst [vmem:[#allocation72_spill] sm:$0xff] %v7663_v40 }
 0x156   : > { %v7673_v26 = vpop.permute.xlu1 %2457 }
 0x157   : > { %10499 = vst [vmem:[#allocation73_spill] sm:$0xff] %v7673_v26  ;;  %v7679_v40 = vpop.permute.xlu0 %2425 }
 0x158   : > { %10500 = vst [vmem:[#allocation74_spill] sm:$0xff] %v7679_v40 }
 0x15a   : > { %v7695_v40 = vpop.permute.xlu1 %2423 }
 0x15b   : > { %10501 = vst [vmem:[#allocation75_spill] sm:$0xff] %v7695_v40  ;;  %v7703_v30 = vpop.permute.xlu0 %2455 }
 0x15c   : > { %10502 = vst [vmem:[#allocation76_spill] sm:$0xff] %v7703_v30 }
 0x15e   : > { %v7719_v30 = vpop.permute.xlu1 %2453 }
 0x15f   : > { %10503 = vst [vmem:[#allocation77_spill] sm:$0xff] %v7719_v30  ;;  %v7723_v41 = vpop.permute.xlu0 %2421 }
 0x160   : > { %10504 = vst [vmem:[#allocation78_spill] sm:$0xff] %v7723_v41 }
 0x162   : > { %v7733_v30 = vpop.permute.xlu1 %2419 }
 0x163   : > { %10505 = vst [vmem:[#allocation79_spill] sm:$0xff] %v7733_v30  ;;  %v7747_v21 = vpop.permute.xlu0 %2451 }
 0x164   : > { %10506 = vst [vmem:[#allocation80_spill] sm:$0xff] %v7747_v21 }
 0x167   : > { %v7767_v16 = vpop.permute.xlu0 %2417 }
 0x168   : > { %10508 = vst [vmem:[#allocation82_spill] sm:$0xff] %v7767_v16 }
 0x16b   : > { %v7794_v14 = vpop.permute.xlu0 %2447 }
 0x16c   : > { %10510 = vst [vmem:[#allocation84_spill] sm:$0xff] %v7794_v14 }
 0x16f   : > { %v7817_v29 = vpop.permute.xlu0 %2413 }
 0x170   : > { %10512 = vst [vmem:[#allocation86_spill] sm:$0xff] %v7817_v29 }
 0x172   : > { %v5871_v23 = vpop.f32.mrf.mxu0 }
 0x173   : > { %v7666_v36 = vadd.f32 %v5871_v23, %v7661_v34 }
 0x174   : > { %v650_v38 = vpop.f32.mrf.mxu0 }
 0x175   : > { %v7669_v43 = vadd.f32 %v7661_v34, %v650_v38  ;;  %1438 = vrot.lane.b32.xlu1 %v7666_v36, %s6773_s24 }
 0x176   : > { %v5874_v31 = vpop.f32.mrf.mxu0 }
 0x177   : > { %1436 = vrot.lane.b32.xlu0 %v7669_v43, %s6773_s24  ;;  %5213 = vmatprep.mubr.msk.f32.mxu1 %vm745_vm0, %v7669_v43  ;;  %v7684_v38 = vadd.f32 %v5874_v31, %v7661_v34 }
 0x178   : > { %5214 = vmatmul.mubr.msk.f32.vlgmr.msra.gmra.mxu1 %vm745_vm0, %v7669_v43  ;;  %v660_v23 = vpop.f32.mrf.mxu0 }
 0x179   : > { %2369 = vrot.lane.b32.xlu1 %v7666_v36, %s6774_s26  ;;  %5215 = vmatprep.mubr.msk.f32.mxu1 %vm745_vm0, %v7666_v36  ;;  %v7691_v26 = vadd.f32 %v7661_v34, %v660_v23 }
 0x17a   : > { %v5877_v42 = vpop.f32.mrf.mxu0 }
 0x17b   : > { %2367 = vrot.lane.b32.xlu0 %v7669_v43, %s6774_s26  ;;  %v7710_v27 = vadd.f32 %v5877_v42, %v7661_v34 }
 0x17c   : > { %5216 = vmatmul.mubr.msk.f32.gmra.mxu1 %vm745_vm0, %v7666_v36  ;;  %v670_v31 = vpop.f32.mrf.mxu0 }
 0x17d   : > { %1442 = vrot.lane.b32.xlu1 %v7684_v38, %s6773_s24  ;;  %5217 = vmatprep.mubr.msk.f32.mxu1 %vm745_vm0, %v7691_v26  ;;  %v7717_v24 = vadd.f32 %v7661_v34, %v670_v31 }
 0x17e   : > { %v5880_v23 = vpop.f32.mrf.mxu0 }
 0x17f   : > { %1440 = vrot.lane.b32.xlu0 %v7691_v26, %s6773_s24  ;;  %v7738_v33 = vadd.f32 %v5880_v23, %v7661_v34 }
 0x180   : > { %5218 = vmatmul.mubr.msk.f32.gmra.mxu1 %vm745_vm0, %v7691_v26  ;;  %v680_v40 = vpop.f32.mrf.mxu0 }
 0x181   : > { %2373 = vrot.lane.b32.xlu1 %v7684_v38, %s6774_s26  ;;  %5219 = vmatprep.mubr.msk.f32.mxu1 %vm745_vm0, %v7684_v38  ;;  %v7745_v22 = vadd.f32 %v7661_v34, %v680_v40  ;;  %v7760_v40 = vpop.permute.xlu1 %2449 }
 0x182   : > { %v5883_v25 = vpop.f32.mrf.mxu0  ;;  %10507 = vst [vmem:[#allocation81_spill] sm:$0xff] %v7760_v40 }
 0x183   : > { %2371 = vrot.lane.b32.xlu0 %v7691_v26, %s6774_s26  ;;  %v7758_v23 = vadd.f32 %v5883_v25, %v7661_v34 }
 0x184   : > { %5220 = vmatmul.mubr.msk.f32.gmra.mxu1 %vm745_vm0, %v7684_v38  ;;  %v690_v42 = vpop.f32.mrf.mxu0 }
 0x185   : > { %1446 = vrot.lane.b32.xlu1 %v7710_v27, %s6773_s24  ;;  %5221 = vmatprep.mubr.msk.f32.mxu1 %vm745_vm0, %v7717_v24  ;;  %v7765_v21 = vadd.f32 %v7661_v34, %v690_v42  ;;  %v7783_v16 = vpop.permute.xlu1 %2415 }
 0x186   : > { %v5886_v31 = vpop.f32.mrf.mxu0  ;;  %10509 = vst [vmem:[#allocation83_spill] sm:$0xff] %v7783_v16 }
 0x187   : > { %1444 = vrot.lane.b32.xlu0 %v7717_v24, %s6773_s24  ;;  %v7776_v25 = vadd.f32 %v5886_v31, %v7661_v34 }
 0x188   : > { %5222 = vmatmul.mubr.msk.f32.gmra.mxu1 %vm745_vm0, %v7717_v24  ;;  %v700_v41 = vpop.f32.mrf.mxu0 }
 0x189   : > { %2377 = vrot.lane.b32.xlu1 %v7710_v27, %s6774_s26  ;;  %5223 = vmatprep.mubr.msk.f32.mxu1 %vm745_vm0, %v7710_v27  ;;  %v7781_v42 = vadd.f32 %v7661_v34, %v700_v41  ;;  %v7810_v14 = vpop.permute.xlu1 %2445 }
 0x18a   : > { %v5889_v30 = vpop.f32.mrf.mxu0  ;;  %10511 = vst [vmem:[#allocation85_spill] sm:$0xff] %v7810_v14 }
 0x18b   : > { %2375 = vrot.lane.b32.xlu0 %v7717_v24, %s6774_s26  ;;  %v7792_v31 = vadd.f32 %v5889_v30, %v7661_v34 }
 0x18c   : > { %5224 = vmatmul.mubr.msk.f32.gmra.mxu1 %vm745_vm0, %v7710_v27  ;;  %v710_v28 = vpop.f32.mrf.mxu0 }
 0x18d   : > { %1450 = vrot.lane.b32.xlu1 %v7738_v33, %s6773_s24  ;;  %5225 = vmatprep.mubr.msk.f32.mxu1 %vm745_vm0, %v7745_v22  ;;  %v7799_v41 = vadd.f32 %v7661_v34, %v710_v28 }
 0x18e   : > { %v5892_v40 = vpop.f32.mrf.mxu0 }
 0x18f   : > { %1448 = vrot.lane.b32.xlu0 %v7745_v22, %s6773_s24  ;;  %v7808_v30 = vadd.f32 %v5892_v40, %v7661_v34  ;;  %v7827_v40 = vpop.permute.xlu1 %2411 }
 0x190   : > { %5226 = vmatmul.mubr.msk.f32.gmra.mxu1 %vm745_vm0, %v7745_v22  ;;  %v720_v16 = vpop.f32.mrf.mxu0  ;;  %10513 = vst [vmem:[#allocation87_spill] sm:$0xff] %v7827_v40 }
 0x191   : > { %1454 = vrot.lane.b32.xlu1 %v7758_v23, %s6773_s24  ;;  %5227 = vmatprep.mubr.msk.f32.mxu1 %vm745_vm0, %v7738_v33  ;;  %v7815_v28 = vadd.f32 %v7661_v34, %v720_v16  ;;  %v7835_v16 = vpop.permute.xlu0 %2443 }
 0x192   : > { %10514 = vst [vmem:[#allocation88_spill] sm:$0xff] %v7835_v16 }
 0x193   : > { %1452 = vrot.lane.b32.xlu0 %v7765_v21, %s6773_s24  ;;  %v7845_v34 = vpop.permute.xlu1 %2441 }
 0x194   : > { %5228 = vmatmul.mubr.msk.f32.gmra.mxu1 %vm745_vm0, %v7738_v33  ;;  %10515 = vst [vmem:[#allocation89_spill] sm:$0xff] %v7845_v34 }
 0x195   : > { %1458 = vrot.lane.b32.xlu1 %v7776_v25, %s6773_s24  ;;  %5229 = vmatprep.mubr.msk.f32.mxu1 %vm745_vm0, %v7765_v21 }
 0x197   : > { %1456 = vrot.lane.b32.xlu0 %v7781_v42, %s6773_s24 }
 0x198   : > { %5230 = vmatmul.mubr.msk.f32.gmra.mxu1 %vm745_vm0, %v7765_v21 }
 0x199   : > { %1462 = vrot.lane.b32.xlu1 %v7792_v31, %s6773_s24  ;;  %5231 = vmatprep.mubr.msk.f32.mxu1 %vm745_vm0, %v7758_v23 }
 0x19b   : > { %1460 = vrot.lane.b32.xlu0 %v7799_v41, %s6773_s24 }
 0x19c   : > { %5232 = vmatmul.mubr.msk.f32.gmra.mxu1 %vm745_vm0, %v7758_v23 }
 0x19d   : > { %1466 = vrot.lane.b32.xlu1 %v7808_v30, %s6773_s24  ;;  %5233 = vmatprep.mubr.msk.f32.mxu1 %vm745_vm0, %v7781_v42 }
 0x19f   : > { %1464 = vrot.lane.b32.xlu0 %v7815_v28, %s6773_s24 }
 0x1a0   : > { %5234 = vmatmul.mubr.msk.f32.gmra.mxu1 %vm745_vm0, %v7781_v42 }
 0x1a1   : > { %3318 = vrot.lane.b32.xlu1 %v7194_v39, %s6775_s2  ;;  %5235 = vmatprep.mubr.msk.f32.mxu1 %vm745_vm0, %v7776_v25  ;;  %v7849_v39 = vpop.permute.xlu0 %2409 }
 0x1a2   : > { %10516 = vst [vmem:[#allocation90_spill] sm:$0xff] %v7849_v39 }
 0x1a3   : > { %3350 = vrot.lane.b32.xlu0 %v7180_v35, %s6775_s2  ;;  %v7859_v35 = vpop.permute.xlu1 %2407 }
 0x1a4   : > { %5236 = vmatmul.mubr.msk.f32.gmra.mxu1 %vm745_vm0, %v7776_v25  ;;  %10517 = vst [vmem:[#allocation91_spill] sm:$0xff] %v7859_v35 }
 0x1a5   : > { %3348 = vrot.lane.b32.xlu1 %v7229_v46, %s6775_s2  ;;  %5237 = vmatprep.mubr.msk.f32.mxu1 %vm745_vm0, %v7799_v41  ;;  %v7867_v46 = vpop.permute.xlu0 %2439 }
 0x1a6   : > { %10518 = vst [vmem:[#allocation92_spill] sm:$0xff] %v7867_v46 }
 0x1a7   : > { %2379 = vrot.lane.b32.xlu0 %v7745_v22, %s6774_s26 }
 0x1a8   : > { %5238 = vmatmul.mubr.msk.f32.gmra.mxu1 %vm745_vm0, %v7799_v41 }
 0x1a9   : > { %2381 = vrot.lane.b32.xlu1 %v7738_v33, %s6774_s26  ;;  %5239 = vmatprep.mubr.msk.f32.mxu1 %vm745_vm0, %v7792_v31 }
 0x1ab   : > { %3316 = vrot.lane.b32.xlu0 %v7244_v48, %s6775_s2  ;;  %v7875_v48 = vpop.permute.xlu1 %2437 }
 0x1ac   : > { %5240 = vmatmul.mubr.msk.f32.gmra.mxu1 %vm745_vm0, %v7792_v31  ;;  %10519 = vst [vmem:[#allocation93_spill] sm:$0xff] %v7875_v48 }
 0x1ad   : > { %3314 = vrot.lane.b32.xlu1 %v7211_v44, %s6775_s2  ;;  %5241 = vmatprep.mubr.msk.f32.mxu1 %vm745_vm0, %v7815_v28  ;;  %v7881_v44 = vpop.permute.xlu0 %2405 }
 0x1ae   : > { %10520 = vst [vmem:[#allocation94_spill] sm:$0xff] %v7881_v44 }
 0x1af   : > { %3346 = vrot.lane.b32.xlu0 %v7248_v49, %s6775_s2 }
 0x1b0   : > { %5242 = vmatmul.mubr.msk.f32.gmra.mxu1 %vm745_vm0, %v7815_v28 }
 0x1b1   : > { %3344 = vrot.lane.b32.xlu1 %v7223_v45, %s6775_s2  ;;  %5243 = vmatprep.mubr.msk.f32.mxu1 %vm745_vm0, %v7808_v30  ;;  %v7889_v45 = vpop.permute.xlu1 %2403  ;;  %v7893_v49 = vpop.permute.xlu0 %2435 }
 0x1b2   : > { %10521 = vst [vmem:[#allocation95_spill] sm:$0xff] %v7889_v45  ;;  %10522 = vst [vmem:[#allocation96_spill] sm:$0xff] %v7893_v49 }
 0x1b3   : > { %2383 = vrot.lane.b32.xlu0 %v7765_v21, %s6774_s26 }
 0x1b4   : > { %5244 = vmatmul.mubr.msk.f32.gmra.mxu1 %vm745_vm0, %v7808_v30 }
 0x1b5   : > { %2385 = vrot.lane.b32.xlu1 %v7758_v23, %s6774_s26  ;;  %v7899_v44 = vpop.permute.xlu1 %2433  ;;  %v7903_v48 = vpop.permute.xlu0 %2401 }
 0x1b6   : > { %10523 = vst [vmem:[#allocation97_spill] sm:$0xff] %v7899_v44  ;;  %10524 = vst [vmem:[#allocation98_spill] sm:$0xff] %v7903_v48 }
 0x1b7   : > { %3312 = vrot.lane.b32.xlu0 %v7241_v47, %s6775_s2 }
 0x1b9   : > { %3310 = vrot.lane.b32.xlu1 %v7260_v50, %s6775_s2  ;;  %v7909_v47 = vpop.permute.xlu1 %2399  ;;  %v7913_v50 = vpop.permute.xlu0 %2431 }
 0x1ba   : > { %10525 = vst [vmem:[#allocation99_spill] sm:$0xff] %v7909_v47  ;;  %10526 = vst [vmem:[#allocation100_spill] sm:$0xff] %v7913_v50 }
 0x1bb   : > { %3342 = vrot.lane.b32.xlu0 %v7277_v52, %s6775_s2 }
 0x1bd   : > { %3340 = vrot.lane.b32.xlu1 %v7273_v51, %s6775_s2  ;;  %v7919_v51 = vpop.permute.xlu1 %3360  ;;  %v7923_v52 = vpop.permute.xlu0 %3328 }
 0x1be   : > { %10527 = vst [vmem:[#allocation101_spill] sm:$0xff] %v7919_v51  ;;  %10528 = vst [vmem:[#allocation102_spill] sm:$0xff] %v7923_v52 }
 0x1bf   : > { %2387 = vrot.lane.b32.xlu0 %v7781_v42, %s6774_s26 }
 0x1c1   : > { %2389 = vrot.lane.b32.xlu1 %v7776_v25, %s6774_s26 }
 0x1c3   : > { %3308 = vrot.lane.b32.xlu0 %v7289_v53, %s6775_s2  ;;  %v7929_v53 = vpop.permute.xlu1 %3326 }
 0x1c4   : > { %10529 = vst [vmem:[#allocation103_spill] sm:$0xff] %v7929_v53 }
 0x1c5   : > { %3306 = vrot.lane.b32.xlu1 %v7301_v54, %s6775_s2  ;;  %v7933_v54 = vpop.permute.xlu0 %3358 }
 0x1c6   : > { %10530 = vst [vmem:[#allocation104_spill] sm:$0xff] %v7933_v54 }
 0x1c7   : > { %3338 = vrot.lane.b32.xlu0 %v7305_v55, %s6775_s2  ;;  %v7939_v55 = vpop.permute.xlu1 %3356 }
 0x1c8   : > { %10531 = vst [vmem:[#allocation105_spill] sm:$0xff] %v7939_v55 }
 0x1c9   : > { %3336 = vrot.lane.b32.xlu1 %v7321_v57, %s6775_s2  ;;  %v7943_v57 = vpop.permute.xlu0 %3324 }
 0x1ca   : > { %10532 = vst [vmem:[#allocation106_spill] sm:$0xff] %v7943_v57 }
 0x1cb   : > { %2391 = vrot.lane.b32.xlu0 %v7799_v41, %s6774_s26 }
 0x1cd   : > { %2393 = vrot.lane.b32.xlu1 %v7792_v31, %s6774_s26 }
 0x1cf   : > { %3304 = vrot.lane.b32.xlu0 %v7317_v56, %s6775_s2  ;;  %v7949_v56 = vpop.permute.xlu1 %3322 }
 0x1d0   : > { %10533 = vst [vmem:[#allocation107_spill] sm:$0xff] %v7949_v56 }
 0x1d1   : > { %3302 = vrot.lane.b32.xlu1 %v7333_v58, %s6775_s2  ;;  %v7953_v58 = vpop.permute.xlu0 %3354 }
 0x1d2   : > { %10534 = vst [vmem:[#allocation108_spill] sm:$0xff] %v7953_v58 }
 0x1d3   : > { %3334 = vrot.lane.b32.xlu0 %v7337_v59, %s6775_s2  ;;  %v7959_v59 = vpop.permute.xlu1 %3352 }
 0x1d4   : > { %10535 = vst [vmem:[#allocation109_spill] sm:$0xff] %v7959_v59 }
 0x1d5   : > { %3332 = vrot.lane.b32.xlu1 %v7351_v61, %s6775_s2  ;;  %v7963_v61 = vpop.permute.xlu0 %3320 }
 0x1d6   : > { %10536 = vst [vmem:[#allocation110_spill] sm:$0xff] %v7963_v61 }
 0x1d7   : > { %2395 = vrot.lane.b32.xlu0 %v7815_v28, %s6774_s26 }
 0x1d9   : > { %2397 = vrot.lane.b32.xlu1 %v7808_v30, %s6774_s26 }
 0x1db   : > { %3300 = vrot.lane.b32.xlu0 %v7348_v60, %s6775_s2 }
 0x1dd   : > { %3298 = vrot.lane.b32.xlu1 %v7362_v62, %s6775_s2 }
 0x1df   : > { %3330 = vrot.lane.b32.xlu0 %v7365_v63, %s6775_s2 }
 0x1e1   : > { %3268 = vrot.lane.b32.xlu1 %v7666_v36, %s6775_s2 }
 0x1e3   : > { %3266 = vrot.lane.b32.xlu0 %v7669_v43, %s6775_s2 }
 0x1e5   : > { %3272 = vrot.lane.b32.xlu1 %v7684_v38, %s6775_s2 }
 0x1e7   : > { %v7967_v60 = vpop.permute.xlu1 %1438  ;;  %3270 = vrot.lane.b32.xlu0 %v7691_v26, %s6775_s2 }
 0x1e9   : > { %3276 = vrot.lane.b32.xlu1 %v7710_v27, %s6775_s2  ;;  %v7973_v62 = vpop.permute.xlu0 %1436 }
 0x1eb   : > { %v7975_v63 = vpop.permute.xlu1 %2369  ;;  %3274 = vrot.lane.b32.xlu0 %v7717_v24, %s6775_s2 }
 0x1ec   : > { %10537 = vst [vmem:[#allocation111_spill] sm:$0xff] %v7975_v63 }
 0x1ed   : > { %3280 = vrot.lane.b32.xlu1 %v7738_v33, %s6775_s2  ;;  %v7981_v36 = vpop.permute.xlu0 %2367 }
 0x1ee   : > { %10538 = vst [vmem:[#allocation112_spill] sm:$0xff] %v7981_v36 }
 0x1ef   : > { %v7983_v43 = vpop.permute.xlu1 %1442  ;;  %3278 = vrot.lane.b32.xlu0 %v7745_v22, %s6775_s2 }
 0x1f1   : > { %3284 = vrot.lane.b32.xlu1 %v7758_v23, %s6775_s2  ;;  %v7989_v26 = vpop.permute.xlu0 %1440 }
 0x1f3   : > { %v7991_v27 = vpop.permute.xlu1 %2373  ;;  %3282 = vrot.lane.b32.xlu0 %v7765_v21, %s6775_s2 }
 0x1f4   : > { %10539 = vst [vmem:[#allocation113_spill] sm:$0xff] %v7991_v27 }
 0x1f5   : > { %3288 = vrot.lane.b32.xlu1 %v7776_v25, %s6775_s2  ;;  %v7997_v33 = vpop.permute.xlu0 %2371 }
 0x1f6   : > { %10540 = vst [vmem:[#allocation114_spill] sm:$0xff] %v7997_v33 }
 0x1f7   : > { %v7999_v24 = vpop.permute.xlu1 %1446  ;;  %3286 = vrot.lane.b32.xlu0 %v7781_v42, %s6775_s2 }
 0x1f9   : > { %3292 = vrot.lane.b32.xlu1 %v7792_v31, %s6775_s2  ;;  %v8005_v22 = vpop.permute.xlu0 %1444 }
 0x1fb   : > { %v8007_v38 = vpop.permute.xlu1 %2377  ;;  %3290 = vrot.lane.b32.xlu0 %v7799_v41, %s6775_s2 }
 0x1fc   : > { %10541 = vst [vmem:[#allocation115_spill] sm:$0xff] %v8007_v38 }
 0x1fd   : > { %3296 = vrot.lane.b32.xlu1 %v7808_v30, %s6775_s2  ;;  %v8013_v21 = vpop.permute.xlu0 %2375 }
 0x1fe   : > { %10542 = vst [vmem:[#allocation116_spill] sm:$0xff] %v8013_v21 }
 0x1ff   : > { %v8015_v23 = vpop.permute.xlu1 %1450  ;;  %3294 = vrot.lane.b32.xlu0 %v7815_v28, %s6775_s2 }
 0x200   : > { %10543 = vst [vmem:[#allocation117_spill] sm:$0xff] %v8015_v23 }
 0x201   : > { %v8019_v25 = vpop.permute.xlu0 %1448  ;;  %2039 = vrot.lane.b32.xlu1 %v7425_v5, %s6773_s24 }
 0x203   : > { %v8023_v42 = vpop.permute.xlu1 %1454  ;;  %2075 = vrot.lane.b32.xlu0 %v7402_v0, %s6773_s24 }
 0x204   : > { %10544 = vst [vmem:[#allocation118_spill] sm:$0xff] %v8023_v42 }
 0x205   : > { %v8027_v31 = vpop.permute.xlu0 %1452 }
 0x206   : > { %10545 = vst [vmem:[#allocation119_spill] sm:$0xff] %v8027_v31 }
 0x207   : > { %v8029_v41 = vpop.permute.xlu1 %1458  ;;  %2043 = vrot.lane.b32.xlu0 %v7406_v1, %s6773_s24 }
 0x208   : > { %10546 = vst [vmem:[#allocation120_spill] sm:$0xff] %v8029_v41 }
 0x209   : > { %v8033_v30 = vpop.permute.xlu0 %1456 }
 0x20a   : > { %10547 = vst [vmem:[#allocation121_spill] sm:$0xff] %v8033_v30 }
 0x20b   : > { %v8035_v28 = vpop.permute.xlu1 %1462  ;;  %2073 = vrot.lane.b32.xlu0 %v7410_v2, %s6773_s24 }
 0x20c   : > { %10548 = vst [vmem:[#allocation122_spill] sm:$0xff] %v8035_v28 }
 0x20d   : > { %v8039_v5 = vpop.permute.xlu0 %1460 }
 0x20e   : > { %10549 = vst [vmem:[#allocation123_spill] sm:$0xff] %v8039_v5 }
 0x20f   : > { %v8041_v38 = vpop.permute.xlu1 %1466  ;;  %2041 = vrot.lane.b32.xlu0 %v7416_v3, %s6773_s24 }
 0x210   : > { %10550 = vst [vmem:[#allocation124_spill] sm:$0xff] %v8041_v38 }
 0x211   : > { %v8045_v61 = vpop.permute.xlu0 %1464 }
 0x212   : > { %10551 = vst [vmem:[#allocation125_spill] sm:$0xff] %v8045_v61 }
 0x213   : > { %v8047_v59 = vpop.permute.xlu1 %3318  ;;  %2071 = vrot.lane.b32.xlu0 %v7422_v4, %s6773_s24 }
 0x214   : > { %10552 = vst [vmem:[#allocation126_spill] sm:$0xff] %v8047_v59 }
 0x215   : > { %v8051_v1 = vpop.permute.xlu0 %3350 }
 0x216   : > { %10553 = vst [vmem:[#allocation127_spill] sm:$0xff] %v8051_v1 }
 0x217   : > { %v8053_v21 = vpop.permute.xlu1 %3348 }
 0x218   : > { %10554 = vst [vmem:[#allocation128_spill] sm:$0xff] %v8053_v21 }
 0x219   : > { %v8055_v56 = vpop.permute.xlu0 %2379 }
 0x21a   : > { %10555 = vst [vmem:[#allocation129_spill] sm:$0xff] %v8055_v56 }
 0x21b   : > { %v8057_v2 = vpop.permute.xlu1 %2381 }
 0x21c   : > { %10556 = vst [vmem:[#allocation130_spill] sm:$0xff] %v8057_v2 }
 0x21d   : > { %v8059_v58 = vpop.permute.xlu0 %3316 }
 0x21e   : > { %10557 = vst [vmem:[#allocation131_spill] sm:$0xff] %v8059_v58 }
 0x21f   : > { %v8061_v27 = vpop.permute.xlu1 %3314 }
 0x220   : > { %10558 = vst [vmem:[#allocation132_spill] sm:$0xff] %v8061_v27 }
 0x221   : > { %v8063_v57 = vpop.permute.xlu0 %3346 }
 0x222   : > { %10559 = vst [vmem:[#allocation133_spill] sm:$0xff] %v8063_v57 }
 0x223   : > { %v8065_v55 = vpop.permute.xlu1 %3344 }
 0x224   : > { %10560 = vst [vmem:[#allocation134_spill] sm:$0xff] %v8065_v55 }
 0x225   : > { %v8067_v59 = vpop.permute.xlu0 %2383 }
 0x226   : > { %10561 = vst [vmem:[#allocation135_spill] sm:$0xff] %v8067_v59 }
 0x227   : > { %v8069_v33 = vpop.permute.xlu1 %2385 }
 0x228   : > { %10562 = vst [vmem:[#allocation136_spill] sm:$0xff] %v8069_v33 }
 0x229   : > { %v8071_v4 = vpop.permute.xlu0 %3312 }
 0x22a   : > { %10563 = vst [vmem:[#allocation137_spill] sm:$0xff] %v8071_v4 }
 0x22b   : > { %v8073_v1 = vpop.permute.xlu1 %3310 }
 0x22c   : > { %10564 = vst [vmem:[#allocation138_spill] sm:$0xff] %v8073_v1 }
 0x22d   : > { %v8075_v21 = vpop.permute.xlu0 %3342 }
 0x22e   : > { %10565 = vst [vmem:[#allocation139_spill] sm:$0xff] %v8075_v21 }
 0x22f   : > { %v8077_v56 = vpop.permute.xlu1 %3340 }
 0x230   : > { %10566 = vst [vmem:[#allocation140_spill] sm:$0xff] %v8077_v56 }
 0x231   : > { %v8079_v2 = vpop.permute.xlu0 %2387 }
 0x232   : > { %10567 = vst [vmem:[#allocation141_spill] sm:$0xff] %v8079_v2 }
 0x233   : > { %v8081_v58 = vpop.permute.xlu1 %2389 }
 0x234   : > { %10568 = vst [vmem:[#allocation142_spill] sm:$0xff] %v8081_v58 }
 0x235   : > { %v8083_v27 = vpop.permute.xlu0 %3308 }
 0x236   : > { %10569 = vst [vmem:[#allocation143_spill] sm:$0xff] %v8083_v27 }
 0x237   : > { %v8085_v57 = vpop.permute.xlu1 %3306 }
 0x238   : > { %10570 = vst [vmem:[#allocation144_spill] sm:$0xff] %v8085_v57  ;;  %v8087_v55 = vpop.f32.mrf.mxu1 }
 0x239   : > { %v8089_v59 = vpop.permute.xlu0 %3338 }
 0x23a   : > { %10571 = vst [vmem:[#allocation145_spill] sm:$0xff] %v8089_v59  ;;  %v8091_v33 = vpop.f32.mrf.mxu1 }
 0x23b   : > { %v1051_v1 = vmax.f32 %v8087_v55, %v8091_v33  ;;  %v8095_v21 = vpop.permute.xlu1 %3336 }
 0x23c   : > { %10572 = vst [vmem:[#allocation146_spill] sm:$0xff] %v8095_v21  ;;  %v8097_v56 = vpop.f32.mrf.mxu1 }
 0x23d   : > { %v8099_v2 = vpop.permute.xlu0 %2391  ;;  %1052 = vmax.xlane.f32.xlu0 %v1051_v1 }
 0x23e   : > { %10573 = vst [vmem:[#allocation147_spill] sm:$0xff] %v8099_v2  ;;  %v8101_v58 = vpop.f32.mrf.mxu1 }
 0x23f   : > { %v1054_v57 = vmax.f32 %v8097_v56, %v8101_v58  ;;  %v8105_v27 = vpop.permute.xlu1 %2393 }
 0x240   : > { %10574 = vst [vmem:[#allocation148_spill] sm:$0xff] %v8105_v27  ;;  %v8107_v59 = vpop.f32.mrf.mxu1 }
 0x241   : > { %v8109_v4 = vpop.permute.xlu0 %3304  ;;  %1055 = vmax.xlane.f32.xlu0 %v1054_v57 }
 0x242   : > { %10575 = vst [vmem:[#allocation149_spill] sm:$0xff] %v8109_v4  ;;  %v8111_v53 = vpop.f32.mrf.mxu1 }
 0x243   : > { %v1057_v21 = vmax.f32 %v8107_v59, %v8111_v53  ;;  %v8115_v54 = vpop.permute.xlu1 %3302 }
 0x244   : > { %10576 = vst [vmem:[#allocation150_spill] sm:$0xff] %v8115_v54  ;;  %v8117_v1 = vpop.f32.mrf.mxu1 }
 0x245   : > { %v8119_v2 = vpop.permute.xlu0 %3334  ;;  %1058 = vmax.xlane.f32.xlu1 %v1057_v21 }
 0x246   : > { %10577 = vst [vmem:[#allocation151_spill] sm:$0xff] %v8119_v2  ;;  %v8121_v63 = vpop.f32.mrf.mxu1 }
 0x247   : > { %v1060_v27 = vmax.f32 %v8117_v1, %v8121_v63  ;;  %v8125_v52 = vpop.permute.xlu1 %3332 }
 0x248   : > { %10578 = vst [vmem:[#allocation152_spill] sm:$0xff] %v8125_v52  ;;  %v8127_v57 = vpop.f32.mrf.mxu1 }
 0x249   : > { %v8129_v4 = vpop.permute.xlu0 %2395  ;;  %1061 = vmax.xlane.f32.xlu1 %v1060_v27 }
 0x24a   : > { %10579 = vst [vmem:[#allocation153_spill] sm:$0xff] %v8129_v4  ;;  %v8131_v51 = vpop.f32.mrf.mxu1 }
 0x24b   : > { %v1063_v54 = vmax.f32 %v8127_v57, %v8131_v51  ;;  %v8135_v36 = vpop.permute.xlu1 %2397 }
 0x24c   : > { %10580 = vst [vmem:[#allocation154_spill] sm:$0xff] %v8135_v36  ;;  %v8137_v21 = vpop.f32.mrf.mxu1 }
 0x24d   : > { %v8139_v2 = vpop.permute.xlu0 %3300  ;;  %1064 = vmax.xlane.f32.xlu0 %v1063_v54 }
 0x24e   : > { %10581 = vst [vmem:[#allocation155_spill] sm:$0xff] %v8139_v2  ;;  %v8141_v47 = vpop.f32.mrf.mxu1 }
 0x24f   : > { %v1066_v52 = vmax.f32 %v8137_v21, %v8141_v47  ;;  %v8145_v50 = vpop.permute.xlu1 %3298 }
 0x250   : > { %10582 = vst [vmem:[#allocation156_spill] sm:$0xff] %v8145_v50  ;;  %v8147_v27 = vpop.f32.mrf.mxu1 }
 0x251   : > { %v8149_v4 = vpop.permute.xlu0 %3330  ;;  %1067 = vmax.xlane.f32.xlu1 %v1066_v52 }
 0x252   : > { %10583 = vst [vmem:[#allocation157_spill] sm:$0xff] %v8149_v4  ;;  %v8151_v38 = vpop.f32.mrf.mxu1 }
 0x253   : > { %v1069_v36 = vmax.f32 %v8147_v27, %v8151_v38  ;;  %v8159_v2 = vpop.permute.xlu1 %3268 }
 0x254   : > { %v8155_v48 = vpop.f32.mrf.mxu1  ;;  %10585 = vst [vmem:[#allocation159_spill] sm:$0xff] %v8159_v2 }
 0x255   : > { %v8157_v54 = vpop.permute.xlu0 %3266  ;;  %1070 = vmax.xlane.f32.xlu0 %v1069_v36 }
 0x256   : > { %10584 = vst [vmem:[#allocation158_spill] sm:$0xff] %v8157_v54  ;;  %v8161_v44 = vpop.f32.mrf.mxu1 }
 0x257   : > { %v1072_v50 = vmax.f32 %v8155_v48, %v8161_v44  ;;  %v8173_v49 = vpop.permute.xlu1 %3272 }
 0x258   : > { %v8165_v61 = vpop.f32.mrf.mxu1  ;;  %10587 = vst [vmem:[#allocation161_spill] sm:$0xff] %v8173_v49 }
 0x259   : > { %v8167_v52 = vpop.permute.xlu0 %3270  ;;  %1073 = vmax.xlane.f32.xlu1 %v1072_v50 }
 0x25a   : > { %10586 = vst [vmem:[#allocation160_spill] sm:$0xff] %v8167_v52  ;;  %v8169_v4 = vpop.f32.mrf.mxu1 }
 0x25b   : > { %v1075_v45 = vmax.f32 %v8165_v61, %v8169_v4  ;;  %v8187_v52 = vpop.permute.xlu1 %3276 }
 0x25c   : > { %v8175_v36 = vpop.f32.mrf.mxu1  ;;  %10590 = vst [vmem:[#allocation164_spill] sm:$0xff] %v8187_v52 }
 0x25d   : > { %v8177_v2 = vpop.permute.xlu0 %3274  ;;  %1076 = vmax.xlane.f32.xlu1 %v1075_v45 }
 0x25e   : > { %10588 = vst [vmem:[#allocation162_spill] sm:$0xff] %v8177_v2  ;;  %v8179_v54 = vpop.f32.mrf.mxu1 }
 0x25f   : > { %v1078_v28 = vmax.f32 %v8175_v36, %v8179_v54  ;;  %v8201_v39 = vpop.permute.xlu1 %3280 }
 0x260   : > { %v8183_v5 = vpop.f32.mrf.mxu1  ;;  %10592 = vst [vmem:[#allocation166_spill] sm:$0xff] %v8201_v39 }
 0x261   : > { %v8185_v50 = vpop.permute.xlu0 %3278  ;;  %1079 = vmax.xlane.f32.xlu0 %v1078_v28 }
 0x262   : > { %10589 = vst [vmem:[#allocation163_spill] sm:$0xff] %v8185_v50  ;;  %v8189_v35 = vpop.f32.mrf.mxu1 }
 0x263   : > { %v1081_v49 = vmax.f32 %v8183_v5, %v8189_v35 }
 0x264   : > { %v8193_v46 = vpop.f32.mrf.mxu1 }
 0x265   : > { %v8195_v45 = vpop.permute.xlu0 %3282  ;;  %1082 = vmax.xlane.f32.xlu1 %v1081_v49 }
 0x266   : > { %10591 = vst [vmem:[#allocation165_spill] sm:$0xff] %v8195_v45  ;;  %v8197_v2 = vpop.f32.mrf.mxu1  ;;  %v8215_v45 = vpop.permute.xlu1 %3284 }
 0x267   : > { %v1084_v41 = vmax.f32 %v8193_v46, %v8197_v2  ;;  %10595 = vst [vmem:[#allocation169_spill] sm:$0xff] %v8215_v45 }
 0x268   : > { %v8203_v28 = vpop.f32.mrf.mxu1 }
 0x269   : > { %v8205_v50 = vpop.permute.xlu0 %3286  ;;  %1085 = vmax.xlane.f32.xlu0 %v1084_v41 }
 0x26a   : > { %10593 = vst [vmem:[#allocation167_spill] sm:$0xff] %v8205_v50  ;;  %v8207_v52 = vpop.f32.mrf.mxu1  ;;  %v8229_v29 = vpop.permute.xlu1 %3288 }
 0x26b   : > { %v1087_v34 = vmax.f32 %v8203_v28, %v8207_v52 }
 0x26c   : > { %v8211_v30 = vpop.f32.mrf.mxu1 }
 0x26d   : > { %v8213_v49 = vpop.permute.xlu0 %3290  ;;  %1088 = vmax.xlane.f32.xlu1 %v1087_v34 }
 0x26e   : > { %10594 = vst [vmem:[#allocation168_spill] sm:$0xff] %v8213_v49  ;;  %v8217_v40 = vpop.f32.mrf.mxu1  ;;  %v8231_v45 = vpop.permute.xlu1 %3292 }
 0x26f   : > { %v1090_v39 = vmax.f32 %v8211_v30, %v8217_v40 }
 0x270   : > { %v8221_v16 = vpop.f32.mrf.mxu1 }
 0x271   : > { %v8223_v41 = vpop.permute.xlu0 %3294  ;;  %1091 = vmax.xlane.f32.xlu1 %v1090_v39 }
 0x272   : > { %10596 = vst [vmem:[#allocation170_spill] sm:$0xff] %v8223_v41  ;;  %v8225_v50 = vpop.f32.mrf.mxu1  ;;  %v8233_v31 = vpop.permute.xlu1 %3296 }
 0x273   : > { %v1093_v42 = vmax.f32 %v8221_v16, %v8225_v50 }
 0x275   : > { %1094 = vmax.xlane.f32.xlu0 %v1093_v42  ;;  %v2076_v34 = vpop.permute.xlu0 %2075 }
 0x276   : > { %5389 = vmatprep.subr.mxu1 %v2076_v34  ;;  %v2040_v39 = vpop.permute.xlu1 %2039 }
 0x279   : > { %v2044_v49 = vpop.permute.xlu0 %2043 }
 0x27a   : > { %5390 = vmatpush3.msra.mxu1 %v2044_v49 }
 0x27d   : > { %v2074_v14 = vpop.permute.xlu0 %2073 }
 0x27e   : > { %5391 = vmatprep.subr.mxu1 %v2074_v14  ;;  %v10598_v14 = vld [vmem:[#allocation27_spill] sm:$0xff] }
 0x281   : > { %v2042_v41 = vpop.permute.xlu0 %2041 }
 0x282   : > { %2037 = vrot.lane.b32.xlu1 %v7436_v7, %s6773_s24  ;;  %5392 = vmatpush3.msra.mxu1 %v2042_v41  ;;  %v8251_v7 = vpop.f32.mrf.mxu1 }
 0x285   : > { %v2072_v23 = vpop.permute.xlu0 %2071 }
 0x286   : > { %2067 = vrot.lane.b32.xlu1 %v7442_v8, %s6773_s24  ;;  %5393 = vmatprep.subr.mxu1 %v2072_v23  ;;  %v10601_v23 = vld [vmem:[#allocation29_spill] sm:$0xff] }
 0x287   : > { %5394 = vmatpush3.msra.mxu1 %v2040_v39 }
 0x28b   : > { %2069 = vrot.lane.b32.xlu0 %v7430_v6, %s6773_s24  ;;  %v8255_v6 = vpop.f32.mrf.mxu1 }
 0x28c   : > { %v1096_v8 = vmax.f32 %v8251_v7, %v8255_v6 }
 0x28f   : > { %2035 = vrot.lane.b32.xlu0 %v7445_v9, %s6773_s24 }
 0x293   : > { %2065 = vrot.lane.b32.xlu0 %v7450_v10, %s6773_s24 }
 0x297   : > { %2033 = vrot.lane.b32.xlu0 %v7456_v11, %s6773_s24  ;;  %v10597_v11 = vld [vmem:[#allocation37_spill] sm:$0xff] }
 0x29b   : > { %2063 = vrot.lane.b32.xlu0 %v7462_v12, %s6773_s24 }
 0x29f   : > { %2029 = vrot.lane.b32.xlu0 %v7476_v15, %s6773_s24  ;;  %v10599_v15 = vld [vmem:[#allocation38_spill] sm:$0xff] }
 0x2a3   : > { %2027 = vrot.lane.b32.xlu0 %v7485_v17, %s6773_s24 }
 0x2a7   : > { %2057 = vrot.lane.b32.xlu0 %v7490_v18, %s6773_s24 }
 0x2aa   : > { %1097 = vmax.xlane.f32.xlu1 %v1096_v8 }
 0x2ab   : > { %2025 = vrot.lane.b32.xlu0 %v7496_v19, %s6773_s24 }
 0x2af   : > { %2055 = vrot.lane.b32.xlu0 %v7502_v20, %s6773_s24  ;;  %v10600_v20 = vld [vmem:[#allocation28_spill] sm:$0xff] }
 0x2b3   : > { %2049 = vrot.lane.b32.xlu0 %v7530_v32, %s6773_s24 }
 0x2b7   : > { %2015 = vrot.lane.b32.xlu0 %v7545_v37, %s6773_s24 }
 0x2bb   : > { %2031 = vrot.lane.b32.xlu1 %v7465_v13, %s6773_s24  ;;  %2045 = vrot.lane.b32.xlu0 %v10597_v11, %s6773_s24 }
 0x2bf   : > { %2061 = vrot.lane.b32.xlu1 %v10598_v14, %s6773_s24  ;;  %2013 = vrot.lane.b32.xlu0 %v10599_v15, %s6773_s24  ;;  %v10603_v14 = vld [vmem:[#allocation31_spill] sm:$0xff] }
 0x2c3   : > { %2059 = vrot.lane.b32.xlu1 %v10600_v20, %s6773_s24  ;;  %2974 = vrot.lane.b32.xlu0 %v7402_v0, %s6774_s26  ;;  %v10602_v0 = vld [vmem:[#allocation30_spill] sm:$0xff] }
 0x2c6   : > { %v1053_v32 = vpop.xlane.xlu0 %1052 }
 0x2c7   : > { %v1099_v37 = vsub.f32 %v8087_v55, %v1053_v32  ;;  %v1100_v13 = vsub.f32 %v8091_v33, %v1053_v32  ;;  %2023 = vrot.lane.b32.xlu1 %v10601_v23, %s6773_s24  ;;  %2940 = vrot.lane.b32.xlu0 %v7416_v3, %s6774_s26  ;;  %v10604_v32 = vld [vmem:[#allocation32_spill] sm:$0xff]  ;;  %v10605_v23 = vld [vmem:[#allocation33_spill] sm:$0xff] }
 0x2c9   : > { %v1131_v42 = vmul.f32 1.442695, %v1099_v37  ;;  %v1133_v49 = vmul.f32 1.442695, %v1100_v13 }
 0x2ca   : > { %v1056_v41 = vpop.xlane.xlu0 %1055 }
 0x2cb   : > { %6040 = vpow2.f32 %v1131_v42  ;;  %v1101_v34 = vsub.f32 %v8097_v56, %v1056_v41  ;;  %v1102_v39 = vsub.f32 %v8101_v58, %v1056_v41  ;;  %2053 = vrot.lane.b32.xlu1 %v10602_v0, %s6773_s24  ;;  %2934 = vrot.lane.b32.xlu0 %v7445_v9, %s6774_s26 }
 0x2cc   : > { %6042 = vpow2.f32 %v1133_v49 }
 0x2cd   : > { %v1135_v55 = vmul.f32 1.442695, %v1101_v34  ;;  %v1137_v33 = vmul.f32 1.442695, %v1102_v39  ;;  %v10607_v34 = vld [vmem:[#allocation34_spill] sm:$0xff] }
 0x2ce   : > { %v1059_v8 = vpop.xlane.xlu1 %1058 }
 0x2cf   : > { %6044 = vpow2.f32 %v1135_v55  ;;  %v1103_v3 = vsub.f32 %v8107_v59, %v1059_v8  ;;  %v1104_v11 = vsub.f32 %v8111_v53, %v1059_v8  ;;  %2021 = vrot.lane.b32.xlu1 %v10603_v14, %s6773_s24  ;;  %2964 = vrot.lane.b32.xlu0 %v7450_v10, %s6774_s26  ;;  %v10609_v8 = vld [vmem:[#allocation39_spill] sm:$0xff] }
 0x2d0   : > { %6046 = vpow2.f32 %v1137_v33  ;;  %v10611_v14 = vld [vmem:[#allocation35_spill] sm:$0xff] }
 0x2d1   : > { %v1139_v56 = vmul.f32 1.442695, %v1103_v3  ;;  %v1141_v58 = vmul.f32 1.442695, %v1104_v11 }
 0x2d2   : > { %v1062_v15 = vpop.xlane.xlu1 %1061 }
 0x2d3   : > { %6048 = vpow2.f32 %v1139_v56  ;;  %v1105_v9 = vsub.f32 %v8117_v1, %v1062_v15  ;;  %v1106_v20 = vsub.f32 %v8121_v63, %v1062_v15  ;;  %2051 = vrot.lane.b32.xlu1 %v10604_v32, %s6773_s24  ;;  %2962 = vrot.lane.b32.xlu0 %v7462_v12, %s6774_s26  ;;  %v10612_v56 = vld [vmem:[#allocation41_spill] sm:$0xff] }
 0x2d4   : > { %6050 = vpow2.f32 %v1141_v58 }
 0x2d5   : > { %v1143_v53 = vmul.f32 1.442695, %v1105_v9  ;;  %v1145_v59 = vmul.f32 1.442695, %v1106_v20  ;;  %v10613_v20 = vld [vmem:[#allocation43_spill] sm:$0xff] }
 0x2d6   : > { %v1065_v37 = vpop.xlane.xlu0 %1064 }
 0x2d7   : > { %6052 = vpow2.f32 %v1143_v53  ;;  %v1107_v10 = vsub.f32 %v8127_v57, %v1065_v37  ;;  %v1108_v13 = vsub.f32 %v8131_v51, %v1065_v37  ;;  %2019 = vrot.lane.b32.xlu1 %v10605_v23, %s6773_s24  ;;  %2926 = vrot.lane.b32.xlu0 %v7485_v17, %s6774_s26  ;;  %v10608_v17 = vld [vmem:[#allocation36_spill] sm:$0xff] }
 0x2d8   : > { %v6041_v63 = vpop.eup %6040  ;;  %6054 = vpow2.f32 %v1145_v59  ;;  %v6424_v59 = vld [vmem:[%s7063_s28 + $0xf8] sm:$0xff]  ;;  %v10615_v37 = vld [vmem:[#allocation40_spill] sm:$0xff] }
 0x2d9   : > { %v6043_v1 = vpop.eup %6042  ;;  %v1147_v42 = vmul.f32 1.442695, %v1107_v10  ;;  %v1149_v12 = vmul.f32 1.442695, %v1108_v13  ;;  %v6425_v10 = vld [vmem:[%s7063_s28 + $0x158] sm:$0xff] }
 0x2da   : > { %1307 = vmatprep.mubr.f32.mxu0 %v6043_v1  ;;  %v1068_v49 = vpop.xlane.xlu1 %1067  ;;  %v8311_v41 = vadd.f32 %v6043_v1, %v6041_v63  ;;  %v10616_v1 = vld [vmem:[#allocation45_spill] sm:$0xff] }
 0x2db   : > { %6056 = vpow2.f32 %v1147_v42  ;;  %1308 = vmatmul.mubr.f32.vlgmr.msra.gmra.mxu0 %v6041_v63  ;;  %v1109_v57 = vsub.f32 %v8137_v21, %v1068_v49  ;;  %v1110_v51 = vsub.f32 %v8141_v47, %v1068_v49  ;;  %2017 = vrot.lane.b32.xlu1 %v10607_v34, %s6773_s24  ;;  %v6426_v49 = vld [vmem:[%s7063_s28 + $0x1e8] sm:$0xff]  ;;  %v6427_v34 = vld [vmem:[%s7063_s28 + $0x58] sm:$0xff] }
 0x2dc   : > { %10606 = vst [vmem:[#allocation37_spill] sm:$0xff] %v8311_v41  ;;  %v6045_v39 = vpop.eup %6044  ;;  %6058 = vpow2.f32 %v1149_v12  ;;  %5326 = vmatpush3.xpose.msk.msra.mxu0 %vm745_vm0, %v10608_v17  ;;  %2956 = vrot.lane.b32.xlu0 %v7490_v18, %s6774_s26 }
 0x2dd   : > { %v6047_v0 = vpop.eup %6046  ;;  %v1151_v55 = vmul.f32 1.442695, %v1109_v57  ;;  %v1153_v33 = vmul.f32 1.442695, %v1110_v51  ;;  %5327 = vmatprep.subr.msk.mxu0 %vm745_vm0, %v10609_v8  ;;  %v10618_v51 = vld [vmem:[#allocation47_spill] sm:$0xff] }
 0x2de   : > { %1312 = vmatprep.mubr.f32.mxu0 %v6047_v0  ;;  %v1071_v21 = vpop.xlane.xlu0 %1070  ;;  %v8323_v47 = vadd.f32 %v6047_v0, %v6045_v39 }
 0x2df   : > { %6060 = vpow2.f32 %v1151_v55  ;;  %1313 = vmatmul.mubr.f32.gmra.mxu0 %v6045_v39  ;;  %v1111_v3 = vsub.f32 %v8147_v27, %v1071_v21  ;;  %v1112_v11 = vsub.f32 %v8151_v38, %v1071_v21  ;;  %2047 = vrot.lane.b32.xlu1 %v10611_v14, %s6773_s24  ;;  %v10619_v55 = vld [vmem:[#allocation49_spill] sm:$0xff]  ;;  %v6428_v21 = vld [vmem:[%s7063_s28 + $0x1d8] sm:$0xff]  ;;  %v6429_v14 = vld [vmem:[%s7063_s28 + $0x48] sm:$0xff] }
 0x2e0   : > { %10610 = vst [vmem:[#allocation27_spill] sm:$0xff] %v8323_v47  ;;  %v6049_v18 = vpop.eup %6048  ;;  %6062 = vpow2.f32 %v1153_v33  ;;  %5328 = vmatpush3.xpose.msk.msra.mxu0 %vm745_vm0, %v10612_v56  ;;  %2924 = vrot.lane.b32.xlu0 %v7496_v19, %s6774_s26 }
 0x2e1   : > { %v6051_v58 = vpop.eup %6050  ;;  %v1155_v15 = vmul.f32 1.442695, %v1111_v3  ;;  %v1157_v9 = vmul.f32 1.442695, %v1112_v11  ;;  %5329 = vmatprep.subr.msk.mxu0 %vm745_vm0, %v10613_v20  ;;  %v10621_v11 = vld [vmem:[#allocation42_spill] sm:$0xff] }
 0x2e2   : > { %1317 = vmatprep.mubr.f32.mxu0 %v6051_v58  ;;  %v1074_v38 = vpop.xlane.xlu1 %1073  ;;  %v8335_v27 = vadd.f32 %v6051_v58, %v6049_v18 }
 0x2e3   : > { %6064 = vpow2.f32 %v1155_v15  ;;  %1318 = vmatmul.mubr.f32.gmra.mxu0 %v6049_v18  ;;  %v1113_v32 = vsub.f32 %v8155_v48, %v1074_v38  ;;  %v1114_v53 = vsub.f32 %v8161_v44, %v1074_v38  ;;  %2942 = vrot.lane.b32.xlu1 %v6424_v59, %s6774_s26  ;;  %v10622_v15 = vld [vmem:[#allocation44_spill] sm:$0xff]  ;;  %v6430_v38 = vld [vmem:[%s7063_s28 + $0xd8] sm:$0xff] }
 0x2e4   : > { %10614 = vst [vmem:[#allocation38_spill] sm:$0xff] %v8335_v27  ;;  %v6053_v19 = vpop.eup %6052  ;;  %6066 = vpow2.f32 %v1157_v9  ;;  %5330 = vmatpush3.xpose.msk.msra.mxu0 %vm745_vm0, %v10615_v37  ;;  %2954 = vrot.lane.b32.xlu0 %v6425_v10, %s6774_s26  ;;  %v6431_v59 = vld [vmem:[%s7063_s28 + $0x138] sm:$0xff] }
 0x2e5   : > { %v6055_v13 = vpop.eup %6054  ;;  %v1159_v23 = vmul.f32 1.442695, %v1113_v32  ;;  %v1161_v63 = vmul.f32 1.442695, %v1114_v53  ;;  %5331 = vmatprep.subr.msk.mxu0 %vm745_vm0, %v10616_v1  ;;  %v10624_v53 = vld [vmem:[#allocation46_spill] sm:$0xff]  ;;  %v6432_v1 = vld [vmem:[%s7063_s28 + $0x1c8] sm:$0xff] }
 0x2e6   : > { %1322 = vmatprep.mubr.f32.mxu0 %v6055_v13  ;;  %v1077_v48 = vpop.xlane.xlu1 %1076  ;;  %v8347_v44 = vadd.f32 %v6055_v13, %v6053_v19  ;;  %v10625_v13 = vld [vmem:[#allocation51_spill] sm:$0xff] }
 0x2e7   : > { %6068 = vpow2.f32 %v1159_v23  ;;  %1323 = vmatmul.mubr.f32.gmra.mxu0 %v6053_v19  ;;  %v1115_v42 = vsub.f32 %v8165_v61, %v1077_v48  ;;  %v1116_v12 = vsub.f32 %v8169_v4, %v1077_v48  ;;  %2972 = vrot.lane.b32.xlu1 %v6426_v49, %s6774_s26 }
 0x2e8   : > { %10617 = vst [vmem:[#allocation28_spill] sm:$0xff] %v8347_v44  ;;  %v6057_v57 = vpop.eup %6056  ;;  %6070 = vpow2.f32 %v1161_v63  ;;  %5332 = vmatpush3.xpose.msk.msra.mxu0 %vm745_vm0, %v10618_v51  ;;  %2922 = vrot.lane.b32.xlu0 %v6427_v34, %s6774_s26  ;;  %v10628_v51 = vld [vmem:[#allocation55_spill] sm:$0xff] }
 0x2e9   : > { %v6059_v39 = vpop.eup %6058  ;;  %v1163_v17 = vmul.f32 1.442695, %v1115_v42  ;;  %v1165_v0 = vmul.f32 1.442695, %v1116_v12  ;;  %5333 = vmatprep.subr.msk.mxu0 %vm745_vm0, %v10619_v55  ;;  %v10627_v42 = vld [vmem:[#allocation53_spill] sm:$0xff]  ;;  %v10630_v55 = vld [vmem:[#allocation48_spill] sm:$0xff] }
 0x2ea   : > { %1327 = vmatprep.mubr.f32.mxu0 %v6059_v39  ;;  %v1080_v61 = vpop.xlane.xlu0 %1079  ;;  %v8359_v4 = vadd.f32 %v6059_v39, %v6057_v57 }
 0x2eb   : > { %6072 = vpow2.f32 %v1163_v17  ;;  %1328 = vmatmul.mubr.f32.gmra.mxu0 %v6057_v57  ;;  %v1117_v33 = vsub.f32 %v8175_v36, %v1080_v61  ;;  %v1118_v8 = vsub.f32 %v8179_v54, %v1080_v61  ;;  %2970 = vrot.lane.b32.xlu1 %v6428_v21, %s6774_s26  ;;  %v6433_v17 = vld [vmem:[%s7063_s28 + $0xc8] sm:$0xff]  ;;  %v10631_v21 = vld [vmem:[#allocation50_spill] sm:$0xff] }
 0x2ec   : > { %10620 = vst [vmem:[#allocation29_spill] sm:$0xff] %v8359_v4  ;;  %v6061_v3 = vpop.eup %6060  ;;  %6074 = vpow2.f32 %v1165_v0  ;;  %5334 = vmatpush3.xpose.msk.msra.mxu0 %vm745_vm0, %v10621_v11  ;;  %2920 = vrot.lane.b32.xlu0 %v6429_v14, %s6774_s26  ;;  %v6434_v14 = vld [vmem:[%s7063_s28 + $0x1b8] sm:$0xff] }
 0x2ed   : > { %v6063_v18 = vpop.eup %6062  ;;  %v1167_v56 = vmul.f32 1.442695, %v1117_v33  ;;  %v1169_v58 = vmul.f32 1.442695, %v1118_v8  ;;  %5335 = vmatprep.subr.msk.mxu0 %vm745_vm0, %v10622_v15 }
 0x2ee   : > { %1332 = vmatprep.mubr.f32.mxu0 %v6063_v18  ;;  %v1083_v54 = vpop.xlane.xlu1 %1082  ;;  %v8371_v36 = vadd.f32 %v6063_v18, %v6061_v3 }
 0x2ef   : > { %6076 = vpow2.f32 %v1167_v56  ;;  %1333 = vmatmul.mubr.f32.gmra.mxu0 %v6061_v3  ;;  %v1119_v9 = vsub.f32 %v8183_v5, %v1083_v54  ;;  %v1120_v20 = vsub.f32 %v8189_v35, %v1083_v54  ;;  %2938 = vrot.lane.b32.xlu1 %v6430_v38, %s6774_s26  ;;  %v10633_v56 = vld [vmem:[#allocation52_spill] sm:$0xff] }
 0x2f0   : > { %10623 = vst [vmem:[#allocation30_spill] sm:$0xff] %v8371_v36  ;;  %v6065_v32 = vpop.eup %6064  ;;  %6078 = vpow2.f32 %v1169_v58  ;;  %5336 = vmatpush3.xpose.msk.msra.mxu0 %vm745_vm0, %v10624_v53  ;;  %2950 = vrot.lane.b32.xlu0 %v6431_v59, %s6774_s26  ;;  %v6435_v53 = vld [vmem:[%s7063_s28 + $0xa8] sm:$0xff] }
 0x2f1   : > { %v6067_v19 = vpop.eup %6066  ;;  %v1171_v37 = vmul.f32 1.442695, %v1119_v9  ;;  %v1173_v10 = vmul.f32 1.442695, %v1120_v20  ;;  %5337 = vmatprep.subr.msk.mxu0 %vm745_vm0, %v10625_v13  ;;  %v10634_v9 = vld [vmem:[#allocation57_spill] sm:$0xff] }
 0x2f2   : > { %1337 = vmatprep.mubr.f32.mxu0 %v6067_v19  ;;  %v1086_v35 = vpop.xlane.xlu0 %1085  ;;  %v8383_v5 = vadd.f32 %v6067_v19, %v6065_v32  ;;  %v10636_v19 = vld [vmem:[#allocation54_spill] sm:$0xff] }
 0x2f3   : > { %6080 = vpow2.f32 %v1171_v37  ;;  %1338 = vmatmul.mubr.f32.gmra.mxu0 %v6065_v32  ;;  %v1121_v23 = vsub.f32 %v8193_v46, %v1086_v35  ;;  %v1122_v63 = vsub.f32 %v8197_v2, %v1086_v35  ;;  %2968 = vrot.lane.b32.xlu1 %v6432_v1, %s6774_s26  ;;  %v10637_v35 = vld [vmem:[#allocation56_spill] sm:$0xff] }
 0x2f4   : > { %10626 = vst [vmem:[#allocation31_spill] sm:$0xff] %v8383_v5  ;;  %v6069_v48 = vpop.eup %6068  ;;  %6082 = vpow2.f32 %v1173_v10  ;;  %5338 = vmatpush3.xpose.msk.msra.mxu0 %vm745_vm0, %v10627_v42  ;;  %v10640_v42 = vld [vmem:[#allocation60_spill] sm:$0xff] }
 0x2f5   : > { %v6071_v12 = vpop.eup %6070  ;;  %v1175_v49 = vmul.f32 1.442695, %v1121_v23  ;;  %v1177_v57 = vmul.f32 1.442695, %v1122_v63  ;;  %5339 = vmatprep.subr.msk.mxu0 %vm745_vm0, %v10628_v51  ;;  %v10639_v63 = vld [vmem:[#allocation58_spill] sm:$0xff]  ;;  %v10642_v51 = vld [vmem:[#allocation59_spill] sm:$0xff] }
 0x2f6   : > { %1342 = vmatprep.mubr.f32.mxu0 %v6071_v12  ;;  %v1089_v34 = vpop.xlane.xlu1 %1088  ;;  %v8393_v46 = vadd.f32 %v6071_v12, %v6069_v48  ;;  %v6436_v12 = vld [vmem:[%s7063_s28 + $0x98] sm:$0xff] }
 0x2f7   : > { %6084 = vpow2.f32 %v1175_v49  ;;  %1343 = vmatmul.mubr.f32.gmra.mxu0 %v6069_v48  ;;  %v1123_v2 = vsub.f32 %v8203_v28, %v1089_v34  ;;  %v1124_v39 = vsub.f32 %v8207_v52, %v1089_v34  ;;  %2936 = vrot.lane.b32.xlu1 %v6433_v17, %s6774_s26 }
 0x2f8   : > { %10629 = vst [vmem:[#allocation32_spill] sm:$0xff] %v8393_v46  ;;  %v6073_v0 = vpop.eup %6072  ;;  %6086 = vpow2.f32 %v1177_v57  ;;  %5340 = vmatpush3.xpose.msk.msra.mxu0 %vm745_vm0, %v10630_v55  ;;  %v10645_v55 = vld [vmem:[#allocation61_spill] sm:$0xff] }
 0x2f9   : > { %v6075_v61 = vpop.eup %6074  ;;  %v1179_v33 = vmul.f32 1.442695, %v1123_v2  ;;  %v1181_v8 = vmul.f32 1.442695, %v1124_v39  ;;  %5341 = vmatprep.subr.msk.mxu0 %vm745_vm0, %v10631_v21  ;;  %v10643_v2 = vld [vmem:[#allocation62_spill] sm:$0xff]  ;;  %v6437_v39 = vld [vmem:[%s7063_s28 + $0x188] sm:$0xff] }
 0x2fa   : > { %1347 = vmatprep.mubr.f32.mxu0 %v6075_v61  ;;  %v1092_v3 = vpop.xlane.xlu1 %1091  ;;  %v8403_v28 = vadd.f32 %v6075_v61, %v6073_v0 }
 0x2fb   : > { %6088 = vpow2.f32 %v1179_v33  ;;  %1348 = vmatmul.mubr.f32.gmra.mxu0 %v6073_v0  ;;  %v1125_v52 = vsub.f32 %v8211_v30, %v1092_v3  ;;  %v1126_v11 = vsub.f32 %v8217_v40, %v1092_v3  ;;  %2966 = vrot.lane.b32.xlu1 %v6434_v14, %s6774_s26  ;;  %v10646_v33 = vld [vmem:[#allocation64_spill] sm:$0xff]  ;;  %v10649_v14 = vld [vmem:[#allocation66_spill] sm:$0xff] }
 0x2fc   : > { %10632 = vst [vmem:[#allocation33_spill] sm:$0xff] %v8403_v28  ;;  %v6077_v18 = vpop.eup %6076  ;;  %6090 = vpow2.f32 %v1181_v8  ;;  %5342 = vmatpush3.xpose.msk.msra.mxu0 %vm745_vm0, %v10633_v56  ;;  %v6438_v8 = vld [vmem:[%s7063_s28 + $0x88] sm:$0xff] }
 0x2fd   : > { %v6079_v58 = vpop.eup %6078  ;;  %v1183_v15 = vmul.f32 1.442695, %v1125_v52  ;;  %v1185_v54 = vmul.f32 1.442695, %v1126_v11  ;;  %5343 = vmatprep.subr.msk.mxu0 %vm745_vm0, %v10634_v9  ;;  %v10648_v52 = vld [vmem:[#allocation63_spill] sm:$0xff] }
 0x2fe   : > { %1352 = vmatprep.mubr.f32.mxu0 %v6079_v58  ;;  %v2038_v20 = vpop.permute.xlu1 %2037  ;;  %v1095_v30 = vpop.xlane.xlu0 %1094  ;;  %v8413_v38 = vadd.f32 %v6079_v58, %v6077_v18  ;;  %v10651_v58 = vld [vmem:[#allocation65_spill] sm:$0xff]  ;;  %v10653_v9 = vld [vmem:[#allocation67_spill] sm:$0xff] }
 0x2ff   : > { %6092 = vpow2.f32 %v1183_v15  ;;  %1353 = vmatmul.mubr.f32.gmra.mxu0 %v6077_v18  ;;  %v1127_v40 = vsub.f32 %v8221_v16, %v1095_v30  ;;  %v1128_v32 = vsub.f32 %v8225_v50, %v1095_v30  ;;  %2932 = vrot.lane.b32.xlu1 %v6435_v53, %s6774_s26  ;;  %v6439_v18 = vld [vmem:[%s7063_s28 + $0x178] sm:$0xff]  ;;  %v10652_v15 = vld [vmem:[#allocation68_spill] sm:$0xff] }
 0x300   : > { %10635 = vst [vmem:[#allocation34_spill] sm:$0xff] %v8413_v38  ;;  %v6081_v59 = vpop.eup %6080  ;;  %6094 = vpow2.f32 %v1185_v54  ;;  %5344 = vmatpush3.xpose.msk.msra.mxu0 %vm745_vm0, %v10636_v19  ;;  %v6440_v54 = vld [vmem:[%s7063_s28 + $0x148] sm:$0xff]  ;;  %v6441_v30 = vld [vmem:[%s7063_s28 + $0x38] sm:$0xff] }
 0x301   : > { %v6083_v37 = vpop.eup %6082  ;;  %v1187_v10 = vmul.f32 1.442695, %v1127_v40  ;;  %v1189_v13 = vmul.f32 1.442695, %v1128_v32  ;;  %5345 = vmatprep.subr.msk.mxu0 %vm745_vm0, %v10637_v35  ;;  %v6442_v40 = vld [vmem:[%s7063_s28 + $0x128] sm:$0xff]  ;;  %v6444_v53 = vld [vmem:[%s7063_s28 + $0x118] sm:$0xff] }
 0x302   : > { %1357 = vmatprep.mubr.f32.mxu0 %v6083_v37  ;;  %v2070_v23 = vpop.permute.xlu0 %2069  ;;  %v8423_v16 = vadd.f32 %v6083_v37, %v6081_v59  ;;  %v2068_v1 = vpop.permute.xlu1 %2067  ;;  %v6443_v32 = vld [vmem:[%s7063_s28 + $0x28] sm:$0xff] }
 0x303   : > { %6096 = vpow2.f32 %v1187_v10  ;;  %1358 = vmatmul.mubr.f32.gmra.mxu0 %v6081_v59  ;;  %5395 = vmatprep.subr.mxu1 %v2070_v23 }
 0x304   : > { %10638 = vst [vmem:[#allocation36_spill] sm:$0xff] %v8423_v16  ;;  %v6085_v50 = vpop.eup %6084  ;;  %6098 = vpow2.f32 %v1189_v13  ;;  %5346 = vmatpush3.xpose.msk.msra.mxu0 %vm745_vm0, %v10639_v63  ;;  %5396 = vmatpush3.msra.mxu1 %v2038_v20  ;;  %v10654_v20 = vld [vmem:[#allocation69_spill] sm:$0xff]  ;;  %v10656_v63 = vld [vmem:[#allocation70_spill] sm:$0xff] }
 0x305   : > { %v6087_v48 = vpop.eup %6086  ;;  %5347 = vmatprep.subr.msk.mxu0 %vm745_vm0, %v10640_v42  ;;  %5397 = vmatprep.subr.mxu1 %v2068_v1  ;;  %v10659_v1 = vld [vmem:[#allocation73_spill] sm:$0xff] }
 0x306   : > { %1362 = vmatprep.mubr.f32.mxu0 %v6087_v48  ;;  %2930 = vrot.lane.b32.xlu1 %v6436_v12, %s6774_s26  ;;  %v8431_v49 = vadd.f32 %v6087_v48, %v6085_v50  ;;  %v10661_v48 = vld [vmem:[#allocation76_spill] sm:$0xff]  ;;  %v10663_v42 = vld [vmem:[#allocation77_spill] sm:$0xff] }
 0x307   : > { %1363 = vmatmul.mubr.f32.gmra.mxu0 %v6085_v50  ;;  %v10665_v12 = vld [vmem:[#allocation80_spill] sm:$0xff] }
 0x308   : > { %10641 = vst [vmem:[#allocation39_spill] sm:$0xff] %v8431_v49  ;;  %v6089_v57 = vpop.eup %6088  ;;  %5348 = vmatpush3.xpose.msk.msra.mxu0 %vm745_vm0, %v10642_v51  ;;  %v10669_v51 = vld [vmem:[#allocation117_spill] sm:$0xff] }
 0x309   : > { %v6091_v34 = vpop.eup %6090  ;;  %5349 = vmatprep.subr.msk.mxu0 %vm745_vm0, %v10643_v2  ;;  %v10672_v2 = vld [vmem:[#allocation119_spill] sm:$0xff] }
 0x30a   : > { %1367 = vmatprep.mubr.f32.mxu0 %v6091_v34  ;;  %2960 = vrot.lane.b32.xlu1 %v6437_v39, %s6774_s26  ;;  %v8439_v17 = vadd.f32 %v6091_v34, %v6089_v57  ;;  %v10670_v34 = vld [vmem:[#allocation84_spill] sm:$0xff]  ;;  %v10673_v39 = vld [vmem:[#allocation85_spill] sm:$0xff] }
 0x30b   : > { %1368 = vmatmul.mubr.f32.gmra.mxu0 %v6089_v57  ;;  %v10667_v57 = vld [vmem:[#allocation81_spill] sm:$0xff] }
 0x30c   : > { %10644 = vst [vmem:[#allocation35_spill] sm:$0xff] %v8439_v17  ;;  %v6093_v0 = vpop.eup %6092  ;;  %5350 = vmatpush3.xpose.msk.msra.mxu0 %vm745_vm0, %v10645_v55  ;;  %v10676_v55 = vld [vmem:[#allocation88_spill] sm:$0xff] }
 0x30d   : > { %v6095_v61 = vpop.eup %6094  ;;  %5351 = vmatprep.subr.msk.mxu0 %vm745_vm0, %v10646_v33  ;;  %v10678_v33 = vld [vmem:[#allocation121_spill] sm:$0xff] }
 0x30e   : > { %1372 = vmatprep.mubr.f32.mxu0 %v6095_v61  ;;  %2928 = vrot.lane.b32.xlu1 %v6438_v8, %s6774_s26  ;;  %v8447_v21 = vadd.f32 %v6095_v61, %v6093_v0  ;;  %v10677_v61 = vld [vmem:[#allocation87_spill] sm:$0xff]  ;;  %v10679_v8 = vld [vmem:[#allocation89_spill] sm:$0xff] }
 0x30f   : > { %1373 = vmatmul.mubr.f32.gmra.mxu0 %v6093_v0  ;;  %v10675_v0 = vld [vmem:[#allocation118_spill] sm:$0xff] }
 0x310   : > { %10647 = vst [vmem:[#allocation41_spill] sm:$0xff] %v8447_v21  ;;  %v6097_v3 = vpop.eup %6096  ;;  %5352 = vmatpush3.xpose.msk.msra.mxu0 %vm745_vm0, %v10648_v52  ;;  %v10681_v52 = vld [vmem:[#allocation120_spill] sm:$0xff] }
 0x311   : > { %v6099_v11 = vpop.eup %6098  ;;  %5353 = vmatprep.subr.msk.mxu0 %vm745_vm0, %v10649_v14  ;;  %v10683_v14 = vld [vmem:[#allocation91_spill] sm:$0xff] }
 0x312   : > { %1377 = vmatprep.mubr.f32.mxu0 %v6099_v11  ;;  %2958 = vrot.lane.b32.xlu1 %v6439_v18, %s6774_s26  ;;  %v8455_v56 = vadd.f32 %v6099_v11, %v6097_v3  ;;  %v10682_v11 = vld [vmem:[#allocation92_spill] sm:$0xff]  ;;  %v10684_v18 = vld [vmem:[#allocation123_spill] sm:$0xff] }
 0x313   : > { %1378 = vmatmul.mubr.f32.gmra.mxu0 %v6097_v3  ;;  %v10680_v3 = vld [vmem:[#allocation90_spill] sm:$0xff] }
 0x314   : > { %10650 = vst [vmem:[#allocation43_spill] sm:$0xff] %v8455_v56  ;;  %5354 = vmatpush3.xpose.msk.msra.mxu0 %vm745_vm0, %v10651_v58  ;;  %v10685_v58 = vld [vmem:[#allocation93_spill] sm:$0xff] }
 0x315   : > { %5355 = vmatprep.subr.msk.mxu0 %vm745_vm0, %v10652_v15  ;;  %v10686_v15 = vld [vmem:[#allocation94_spill] sm:$0xff] }
 0x316   : > { %2952 = vrot.lane.b32.xlu1 %v6440_v54, %s6774_s26  ;;  %v10687_v54 = vld [vmem:[#allocation122_spill] sm:$0xff] }
 0x318   : > { %5356 = vmatpush3.xpose.msk.msra.mxu0 %vm745_vm0, %v10653_v9  ;;  %v10688_v9 = vld [vmem:[#allocation96_spill] sm:$0xff] }
 0x319   : > { %5469 = vmatprep.subr.msk.mxu0 %vm745_vm0, %v10654_v20  ;;  %v10689_v20 = vld [vmem:[#allocation95_spill] sm:$0xff] }
 0x31a   : > { %2918 = vrot.lane.b32.xlu1 %v6441_v30, %s6774_s26  ;;  %v10690_v30 = vld [vmem:[#allocation125_spill] sm:$0xff] }
 0x31e   : > { %2948 = vrot.lane.b32.xlu1 %v6442_v40, %s6774_s26  ;;  %v10691_v40 = vld [vmem:[#allocation97_spill] sm:$0xff] }
 0x322   : > { %2916 = vrot.lane.b32.xlu1 %v6443_v32, %s6774_s26  ;;  %v10692_v32 = vld [vmem:[#allocation98_spill] sm:$0xff] }
 0x326   : > { %2946 = vrot.lane.b32.xlu1 %v6444_v53, %s6774_s26  ;;  %v10693_v53 = vld [vmem:[#allocation124_spill] sm:$0xff] }
 0x333   : > { %v1098_v59 = vpop.xlane.xlu1 %1097 }
 0x334   : > { %v1129_v19 = vsub.f32 %v8251_v7, %v1098_v59  ;;  %v1130_v37 = vsub.f32 %v8255_v6, %v1098_v59  ;;  %v10657_v7 = vld [vmem:[#allocation72_spill] sm:$0xff]  ;;  %v10658_v6 = vld [vmem:[#allocation71_spill] sm:$0xff] }
 0x335   : > { %v10694_v59 = vld [vmem:[#allocation100_spill] sm:$0xff] }
 0x336   : > { %v1191_v10 = vmul.f32 1.442695, %v1129_v19  ;;  %v1193_v13 = vmul.f32 1.442695, %v1130_v37  ;;  %v10695_v19 = vld [vmem:[#allocation99_spill] sm:$0xff]  ;;  %v10696_v37 = vld [vmem:[#allocation112_spill] sm:$0xff] }
 0x338   : > { %6100 = vpow2.f32 %v1191_v10  ;;  %v10697_v10 = vld [vmem:[#allocation101_spill] sm:$0xff] }
 0x339   : > { %6102 = vpow2.f32 %v1193_v13  ;;  %v10698_v13 = vld [vmem:[#allocation102_spill] sm:$0xff] }
 0x345   : > { %v6101_v35 = vpop.eup %6100 }
 0x346   : > { %v6103_v23 = vpop.eup %6102 }
 0x347   : > { %1382 = vmatprep.mubr.f32.mxu0 %v6103_v23  ;;  %v8477_v50 = vadd.f32 %v6103_v23, %v6101_v35  ;;  %v10700_v23 = vld [vmem:[#allocation104_spill] sm:$0xff] }
 0x348   : > { %1383 = vmatmul.mubr.f32.gmra.mxu0 %v6101_v35  ;;  %v10699_v35 = vld [vmem:[#allocation111_spill] sm:$0xff] }
 0x349   : > { %10655 = vst [vmem:[#allocation40_spill] sm:$0xff] %v8477_v50  ;;  %5357 = vmatprep.mubr.msk.f32.mxu0 %vm745_vm0, %v7973_v62 }
 0x34c   : > { %5358 = vmatmul.mubr.msk.f32.vlgmr.msra.gmra.mxu0 %vm745_vm0, %v7973_v62  ;;  %v10660_v62 = vld [vmem:[#allocation74_spill] sm:$0xff] }
 0x34d   : > { %5470 = vmatpush3.xpose.msk.msra.mxu0 %vm745_vm0, %v10656_v63  ;;  %5359 = vmatprep.mubr.msk.f32.mxu0 %vm745_vm0, %v7967_v60  ;;  %v10701_v63 = vld [vmem:[#allocation103_spill] sm:$0xff] }
 0x34e   : > { %5471 = vmatprep.subr.msk.mxu0 %vm745_vm0, %v10657_v7  ;;  %v10702_v7 = vld [vmem:[#allocation114_spill] sm:$0xff] }
 0x350   : > { %5360 = vmatmul.mubr.msk.f32.gmra.mxu0 %vm745_vm0, %v7967_v60  ;;  %v10662_v60 = vld [vmem:[#allocation75_spill] sm:$0xff] }
 0x351   : > { %5472 = vmatpush3.xpose.msk.msra.mxu0 %vm745_vm0, %v10658_v6  ;;  %5361 = vmatprep.mubr.msk.f32.mxu0 %vm745_vm0, %v7989_v26  ;;  %v10703_v6 = vld [vmem:[#allocation105_spill] sm:$0xff] }
 0x352   : > { %5473 = vmatprep.subr.msk.mxu0 %vm745_vm0, %v10659_v1  ;;  %v10704_v1 = vld [vmem:[#allocation106_spill] sm:$0xff] }
 0x354   : > { %5362 = vmatmul.mubr.msk.f32.gmra.mxu0 %vm745_vm0, %v7989_v26  ;;  %v10664_v26 = vld [vmem:[#allocation78_spill] sm:$0xff] }
 0x355   : > { %5474 = vmatpush3.xpose.msk.msra.mxu0 %vm745_vm0, %v10660_v62  ;;  %5363 = vmatprep.mubr.msk.f32.mxu0 %vm745_vm0, %v7983_v43  ;;  %v10705_v62 = vld [vmem:[#allocation113_spill] sm:$0xff] }
 0x356   : > { %5475 = vmatprep.subr.msk.mxu0 %vm745_vm0, %v10661_v48  ;;  %v10706_v48 = vld [vmem:[#allocation108_spill] sm:$0xff] }
 0x358   : > { %5364 = vmatmul.mubr.msk.f32.gmra.mxu0 %vm745_vm0, %v7983_v43  ;;  %v10666_v43 = vld [vmem:[#allocation79_spill] sm:$0xff] }
 0x359   : > { %5476 = vmatpush3.xpose.msk.msra.mxu0 %vm745_vm0, %v10662_v60  ;;  %5365 = vmatprep.mubr.msk.f32.mxu0 %vm745_vm0, %v8005_v22  ;;  %v10707_v60 = vld [vmem:[#allocation107_spill] sm:$0xff] }
 0x35a   : > { %5477 = vmatprep.subr.msk.mxu0 %vm745_vm0, %v10663_v42  ;;  %v10708_v42 = vld [vmem:[#allocation116_spill] sm:$0xff] }
 0x35c   : > { %5366 = vmatmul.mubr.msk.f32.gmra.mxu0 %vm745_vm0, %v8005_v22  ;;  %v10668_v22 = vld [vmem:[#allocation82_spill] sm:$0xff] }
 0x35d   : > { %5478 = vmatpush3.xpose.msk.msra.mxu0 %vm745_vm0, %v10664_v26  ;;  %5367 = vmatprep.mubr.msk.f32.mxu0 %vm745_vm0, %v7999_v24  ;;  %v10709_v26 = vld [vmem:[#allocation109_spill] sm:$0xff] }
 0x35e   : > { %5479 = vmatprep.subr.msk.mxu0 %vm745_vm0, %v10665_v12 }
 0x360   : > { %5368 = vmatmul.mubr.msk.f32.gmra.mxu0 %vm745_vm0, %v7999_v24  ;;  %v10671_v24 = vld [vmem:[#allocation83_spill] sm:$0xff] }
 0x361   : > { %5480 = vmatpush3.xpose.msk.msra.mxu0 %vm745_vm0, %v10666_v43  ;;  %5369 = vmatprep.mubr.msk.f32.mxu0 %vm745_vm0, %v8019_v25  ;;  %v10711_v43 = vld [vmem:[#allocation110_spill] sm:$0xff] }
 0x362   : > { %5481 = vmatprep.subr.msk.mxu0 %vm745_vm0, %v10667_v57 }
 0x364   : > { %5370 = vmatmul.mubr.msk.f32.gmra.mxu0 %vm745_vm0, %v8019_v25  ;;  %v10674_v25 = vld [vmem:[#allocation86_spill] sm:$0xff] }
 0x365   : > { %5482 = vmatpush3.xpose.msk.msra.mxu0 %vm745_vm0, %v10668_v22  ;;  %5371 = vmatprep.mubr.msk.f32.mxu0 %vm745_vm0, %v10669_v51  ;;  %v10713_v22 = vld [vmem:[#allocation115_spill] sm:$0xff] }
 0x366   : > { %5483 = vmatprep.subr.msk.mxu0 %vm745_vm0, %v10670_v34 }
 0x368   : > { %5372 = vmatmul.mubr.msk.f32.gmra.mxu0 %vm745_vm0, %v10669_v51  ;;  %v10714_v51 = vld [vmem:[#allocation127_spill] sm:$0xff] }
 0x369   : > { %5484 = vmatpush3.xpose.msk.msra.mxu0 %vm745_vm0, %v10671_v24  ;;  %5373 = vmatprep.mubr.msk.f32.mxu0 %vm745_vm0, %v10672_v2  ;;  %v10716_v24 = vld [vmem:[#allocation126_spill] sm:$0xff] }
 0x36a   : > { %5485 = vmatprep.subr.msk.mxu0 %vm745_vm0, %v10673_v39  ;;  %v10718_v39 = vld [vmem:[#allocation129_spill] sm:$0xff] }
 0x36c   : > { %5374 = vmatmul.mubr.msk.f32.gmra.mxu0 %vm745_vm0, %v10672_v2 }
 0x36d   : > { %5486 = vmatpush3.xpose.msk.msra.mxu0 %vm745_vm0, %v10674_v25  ;;  %5375 = vmatprep.mubr.msk.f32.mxu0 %vm745_vm0, %v10675_v0  ;;  %v10719_v25 = vld [vmem:[#allocation128_spill] sm:$0xff] }
 0x36e   : > { %5487 = vmatprep.subr.msk.mxu0 %vm745_vm0, %v10676_v55  ;;  %v10721_v55 = vld [vmem:[#allocation131_spill] sm:$0xff] }
 0x370   : > { %5376 = vmatmul.mubr.msk.f32.gmra.mxu0 %vm745_vm0, %v10675_v0 }
 0x371   : > { %5488 = vmatpush3.xpose.msk.msra.mxu0 %vm745_vm0, %v10677_v61  ;;  %5377 = vmatprep.mubr.msk.f32.mxu0 %vm745_vm0, %v10678_v33  ;;  %v10722_v61 = vld [vmem:[#allocation130_spill] sm:$0xff] }
 0x372   : > { %5489 = vmatprep.subr.msk.mxu0 %vm745_vm0, %v10679_v8  ;;  %v10724_v8 = vld [vmem:[#allocation133_spill] sm:$0xff] }
 0x374   : > { %5378 = vmatmul.mubr.msk.f32.gmra.mxu0 %vm745_vm0, %v10678_v33 }
 0x375   : > { %5490 = vmatpush3.xpose.msk.msra.mxu0 %vm745_vm0, %v10680_v3  ;;  %5379 = vmatprep.mubr.msk.f32.mxu0 %vm745_vm0, %v10681_v52  ;;  %v10725_v3 = vld [vmem:[#allocation132_spill] sm:$0xff] }
 0x376   : > { %5491 = vmatprep.subr.msk.mxu0 %vm745_vm0, %v10682_v11 }
 0x378   : > { %5380 = vmatmul.mubr.msk.f32.gmra.mxu0 %vm745_vm0, %v10681_v52  ;;  %v10726_v52 = vld [vmem:[#allocation135_spill] sm:$0xff] }
 0x379   : > { %5492 = vmatpush3.xpose.msk.msra.mxu0 %vm745_vm0, %v10683_v14  ;;  %5381 = vmatprep.mubr.msk.f32.mxu0 %vm745_vm0, %v10684_v18  ;;  %v10728_v14 = vld [vmem:[#allocation134_spill] sm:$0xff] }
 0x37a   : > { %5493 = vmatprep.subr.msk.mxu0 %vm745_vm0, %v10685_v58  ;;  %v10729_v58 = vld [vmem:[#allocation137_spill] sm:$0xff] }
 0x37c   : > { %5382 = vmatmul.mubr.msk.f32.gmra.mxu0 %vm745_vm0, %v10684_v18  ;;  %v2036_v18 = vpop.permute.xlu0 %2035 }
 0x37d   : > { %5494 = vmatpush3.xpose.msk.msra.mxu0 %vm745_vm0, %v10686_v15  ;;  %5383 = vmatprep.mubr.msk.f32.mxu0 %vm745_vm0, %v10687_v54  ;;  %v10730_v15 = vld [vmem:[#allocation136_spill] sm:$0xff] }
 0x37e   : > { %5495 = vmatprep.subr.msk.mxu0 %vm745_vm0, %v10688_v9  ;;  %5398 = vmatpush3.msra.mxu1 %v2036_v18  ;;  %v10732_v9 = vld [vmem:[#allocation139_spill] sm:$0xff] }
 0x380   : > { %5384 = vmatmul.mubr.msk.f32.gmra.mxu0 %vm745_vm0, %v10687_v54 }
 0x381   : > { %5496 = vmatpush3.xpose.msk.msra.mxu0 %vm745_vm0, %v10689_v20  ;;  %5385 = vmatprep.mubr.msk.f32.mxu0 %vm745_vm0, %v10690_v30  ;;  %v2032_v20 = vpop.permute.xlu1 %2031 }
 0x382   : > { %5497 = vmatprep.subr.msk.mxu0 %vm745_vm0, %v10691_v40  ;;  %v10733_v40 = vld [vmem:[#allocation138_spill] sm:$0xff] }
 0x384   : > { %5386 = vmatmul.mubr.msk.f32.gmra.mxu0 %vm745_vm0, %v10690_v30  ;;  %v2066_v30 = vpop.permute.xlu0 %2065 }
 0x385   : > { %5498 = vmatpush3.xpose.msk.msra.mxu0 %vm745_vm0, %v10692_v32  ;;  %5387 = vmatprep.mubr.msk.f32.mxu0 %vm745_vm0, %v10693_v53  ;;  %v10734_v32 = vld [vmem:[#allocation141_spill] sm:$0xff] }
 0x386   : > { %5499 = vmatprep.subr.msk.mxu0 %vm745_vm0, %v10694_v59  ;;  %v10736_v59 = vld [vmem:[#allocation140_spill] sm:$0xff]  ;;  %5399 = vmatprep.subr.mxu1 %v2066_v30  ;;  %v10758_v30 = vld [vmem:[#allocation158_spill] sm:$0xff] }
 0x388   : > { %5388 = vmatmul.mubr.msk.f32.gmra.mxu0 %vm745_vm0, %v10693_v53 }
 0x389   : > { %5500 = vmatpush3.xpose.msk.msra.mxu0 %vm745_vm0, %v10695_v19  ;;  %5501 = vmatprep.mubr.msk.f32.mxu0 %vm745_vm0, %v10696_v37  ;;  %v2062_v19 = vpop.permute.xlu1 %2061 }
 0x38a   : > { %5613 = vmatprep.subr.msk.mxu0 %vm745_vm0, %v10697_v10  ;;  %v10737_v10 = vld [vmem:[#allocation143_spill] sm:$0xff] }
 0x38c   : > { %5502 = vmatmul.mubr.msk.f32.vlgmr.msra.gmra.mxu0 %vm745_vm0, %v10696_v37  ;;  %v2034_v37 = vpop.permute.xlu0 %2033 }
 0x38d   : > { %5614 = vmatpush3.xpose.msk.msra.mxu0 %vm745_vm0, %v10698_v13  ;;  %5503 = vmatprep.mubr.msk.f32.mxu0 %vm745_vm0, %v10699_v35  ;;  %v10738_v13 = vld [vmem:[#allocation142_spill] sm:$0xff] }
 0x38e   : > { %5615 = vmatprep.subr.msk.mxu0 %vm745_vm0, %v10700_v23  ;;  %v10740_v23 = vld [vmem:[#allocation145_spill] sm:$0xff]  ;;  %5400 = vmatpush3.msra.mxu1 %v2034_v37 }
 0x390   : > { %5504 = vmatmul.mubr.msk.f32.gmra.mxu0 %vm745_vm0, %v10699_v35 }
 0x391   : > { %5616 = vmatpush3.xpose.msk.msra.mxu0 %vm745_vm0, %v10701_v63  ;;  %5505 = vmatprep.mubr.msk.f32.mxu0 %vm745_vm0, %v10702_v7  ;;  %v2060_v63 = vpop.permute.xlu1 %2059 }
 0x392   : > { %5617 = vmatprep.subr.msk.mxu0 %vm745_vm0, %v10703_v6  ;;  %v10741_v6 = vld [vmem:[#allocation144_spill] sm:$0xff] }
 0x394   : > { %5506 = vmatmul.mubr.msk.f32.gmra.mxu0 %vm745_vm0, %v10702_v7  ;;  %v2064_v7 = vpop.permute.xlu0 %2063 }
 0x395   : > { %5618 = vmatpush3.xpose.msk.msra.mxu0 %vm745_vm0, %v10704_v1  ;;  %5507 = vmatprep.mubr.msk.f32.mxu0 %vm745_vm0, %v10705_v62  ;;  %v10742_v1 = vld [vmem:[#allocation147_spill] sm:$0xff] }
 0x396   : > { %5619 = vmatprep.subr.msk.mxu0 %vm745_vm0, %v10706_v48  ;;  %v10744_v48 = vld [vmem:[#allocation146_spill] sm:$0xff]  ;;  %5401 = vmatprep.subr.mxu1 %v2064_v7 }
 0x397   : > { %5402 = vmatpush3.msra.mxu1 %v2032_v20  ;;  %v10757_v20 = vld [vmem:[#allocation156_spill] sm:$0xff] }
 0x398   : > { %5508 = vmatmul.mubr.msk.f32.gmra.mxu0 %vm745_vm0, %v10705_v62  ;;  %5403 = vmatprep.subr.mxu1 %v2062_v19  ;;  %v10760_v19 = vld [vmem:[#allocation159_spill] sm:$0xff] }
 0x399   : > { %5620 = vmatpush3.xpose.msk.msra.mxu0 %vm745_vm0, %v10707_v60  ;;  %5509 = vmatprep.mubr.msk.f32.mxu0 %vm745_vm0, %v10708_v42  ;;  %v2024_v60 = vpop.permute.xlu1 %2023 }
 0x39a   : > { %5621 = vmatprep.subr.msk.mxu0 %vm745_vm0, %v10709_v26  ;;  %v10745_v26 = vld [vmem:[#allocation149_spill] sm:$0xff] }
 0x39b   : > { %v8641_v12 = vpop.f32.mrf.mxu0 }
 0x39c   : > { %10710 = vst [vmem:[#allocation45_spill] sm:$0xff] %v8641_v12  ;;  %5510 = vmatmul.mubr.msk.f32.gmra.mxu0 %vm745_vm0, %v10708_v42  ;;  %v2030_v42 = vpop.permute.xlu0 %2029 }
 0x39d   : > { %5622 = vmatpush3.xpose.msk.msra.mxu0 %vm745_vm0, %v10711_v43  ;;  %v8647_v57 = vpop.f32.mrf.mxu0  ;;  %5511 = vmatprep.mubr.msk.f32.mxu0 %vm745_vm0, %v10713_v22  ;;  %v10746_v43 = vld [vmem:[#allocation148_spill] sm:$0xff] }
 0x39e   : > { %10712 = vst [vmem:[#allocation47_spill] sm:$0xff] %v8647_v57  ;;  %5623 = vmatprep.subr.msk.mxu0 %vm745_vm0, %v10714_v51  ;;  %v10748_v51 = vld [vmem:[#allocation151_spill] sm:$0xff]  ;;  %5404 = vmatpush3.msra.mxu1 %v2030_v42 }
 0x39f   : > { %v8653_v34 = vpop.f32.mrf.mxu0  ;;  %5405 = vmatprep.subr.mxu1 %v2060_v63  ;;  %v10764_v63 = vld [vmem:[#allocation161_spill] sm:$0xff] }
 0x3a0   : > { %10715 = vst [vmem:[#allocation49_spill] sm:$0xff] %v8653_v34  ;;  %5512 = vmatmul.mubr.msk.f32.gmra.mxu0 %vm745_vm0, %v10713_v22 }
 0x3a1   : > { %5624 = vmatpush3.xpose.msk.msra.mxu0 %vm745_vm0, %v10716_v24  ;;  %v8659_v2 = vpop.f32.mrf.mxu0  ;;  %5513 = vmatprep.mubr.msk.f32.mxu0 %vm745_vm0, %v10718_v39  ;;  %v2054_v24 = vpop.permute.xlu1 %2053 }
 0x3a2   : > { %10717 = vst [vmem:[#allocation42_spill] sm:$0xff] %v8659_v2  ;;  %5625 = vmatprep.subr.msk.mxu0 %vm745_vm0, %v10719_v25  ;;  %v10749_v25 = vld [vmem:[#allocation150_spill] sm:$0xff] }
 0x3a3   : > { %v8665_v0 = vpop.f32.mrf.mxu0 }
 0x3a4   : > { %10720 = vst [vmem:[#allocation44_spill] sm:$0xff] %v8665_v0  ;;  %5514 = vmatmul.mubr.msk.f32.gmra.mxu0 %vm745_vm0, %v10718_v39  ;;  %v2028_v39 = vpop.permute.xlu0 %2027 }
 0x3a5   : > { %5626 = vmatpush3.xpose.msk.msra.mxu0 %vm745_vm0, %v10721_v55  ;;  %5515 = vmatprep.mubr.msk.f32.mxu0 %vm745_vm0, %v10722_v61  ;;  %v8673_v33 = vpop.f32.mrf.mxu0  ;;  %v10750_v55 = vld [vmem:[#allocation153_spill] sm:$0xff]  ;;  %v2022_v18 = vpop.permute.xlu1 %2021 }
 0x3a6   : > { %10723 = vst [vmem:[#allocation46_spill] sm:$0xff] %v8673_v33  ;;  %5627 = vmatprep.subr.msk.mxu0 %vm745_vm0, %v10724_v8  ;;  %v10752_v8 = vld [vmem:[#allocation152_spill] sm:$0xff]  ;;  %5406 = vmatpush3.msra.mxu1 %v2028_v39 }
 0x3a7   : > { %v8683_v11 = vpop.f32.mrf.mxu0 }
 0x3a8   : > { %5516 = vmatmul.mubr.msk.f32.gmra.mxu0 %vm745_vm0, %v10722_v61  ;;  %10727 = vst [vmem:[#allocation51_spill] sm:$0xff] %v8683_v11 }
 0x3a9   : > { %5628 = vmatpush3.xpose.msk.msra.mxu0 %vm745_vm0, %v10725_v3  ;;  %5517 = vmatprep.mubr.msk.f32.mxu0 %vm745_vm0, %v10726_v52  ;;  %v8693_v54 = vpop.f32.mrf.mxu0  ;;  %v2058_v3 = vpop.permute.xlu0 %2057 }
 0x3aa   : > { %5629 = vmatprep.subr.msk.mxu0 %vm745_vm0, %v10728_v14  ;;  %10731 = vst [vmem:[#allocation53_spill] sm:$0xff] %v8693_v54  ;;  %v10754_v14 = vld [vmem:[#allocation154_spill] sm:$0xff]  ;;  %5407 = vmatprep.subr.mxu1 %v2058_v3  ;;  %v10774_v3 = vld [vmem:[#allocation165_spill] sm:$0xff] }
 0x3ab   : > { %v8703_v53 = vpop.f32.mrf.mxu0 }
 0x3ac   : > { %5518 = vmatmul.mubr.msk.f32.gmra.mxu0 %vm745_vm0, %v10726_v52  ;;  %10735 = vst [vmem:[#allocation55_spill] sm:$0xff] %v8703_v53  ;;  %v10753_v52 = vld [vmem:[#allocation155_spill] sm:$0xff] }
 0x3ad   : > { %5630 = vmatpush3.xpose.msk.msra.mxu0 %vm745_vm0, %v10729_v58  ;;  %5519 = vmatprep.mubr.msk.f32.mxu0 %vm745_vm0, %v10730_v15  ;;  %v8713_v35 = vpop.f32.mrf.mxu0 }
 0x3ae   : > { %5631 = vmatprep.subr.msk.mxu0 %vm745_vm0, %v10732_v9  ;;  %10739 = vst [vmem:[#allocation48_spill] sm:$0xff] %v8713_v35  ;;  %v2026_v9 = vpop.permute.xlu0 %2025 }
 0x3af   : > { %v8723_v62 = vpop.f32.mrf.mxu0  ;;  %5408 = vmatpush3.msra.mxu1 %v2026_v9 }
 0x3b0   : > { %5520 = vmatmul.mubr.msk.f32.gmra.mxu0 %vm745_vm0, %v10730_v15  ;;  %10743 = vst [vmem:[#allocation50_spill] sm:$0xff] %v8723_v62  ;;  %v10756_v15 = vld [vmem:[#allocation157_spill] sm:$0xff] }
 0x3b1   : > { %5632 = vmatpush3.xpose.msk.msra.mxu0 %vm745_vm0, %v10733_v40  ;;  %5521 = vmatprep.mubr.msk.f32.mxu0 %vm745_vm0, %v10734_v32  ;;  %v8733_v22 = vpop.f32.mrf.mxu0 }
 0x3b2   : > { %5633 = vmatprep.subr.msk.mxu0 %vm745_vm0, %v10736_v59  ;;  %10747 = vst [vmem:[#allocation52_spill] sm:$0xff] %v8733_v22  ;;  %v2056_v59 = vpop.permute.xlu0 %2055 }
 0x3b3   : > { %v8743_v61 = vpop.f32.mrf.mxu0  ;;  %5409 = vmatprep.subr.mxu1 %v2056_v59  ;;  %v10781_v59 = vld [vmem:[#allocation168_spill] sm:$0xff] }
 0x3b4   : > { %5522 = vmatmul.mubr.msk.f32.gmra.mxu0 %vm745_vm0, %v10734_v32  ;;  %10751 = vst [vmem:[#allocation57_spill] sm:$0xff] %v8743_v61  ;;  %v2052_v32 = vpop.permute.xlu1 %2051  ;;  %5410 = vmatpush3.msra.mxu1 %v2024_v60  ;;  %v10768_v60 = vld [vmem:[#allocation164_spill] sm:$0xff] }
 0x3b5   : > { %5634 = vmatpush3.xpose.msk.msra.mxu0 %vm745_vm0, %v10737_v10  ;;  %5523 = vmatprep.mubr.msk.f32.mxu0 %vm745_vm0, %v10738_v13  ;;  %v8753_v58 = vpop.f32.mrf.mxu0  ;;  %v10762_v10 = vld [vmem:[#allocation160_spill] sm:$0xff] }
 0x3b6   : > { %5635 = vmatprep.subr.msk.mxu0 %vm745_vm0, %v10740_v23  ;;  %10755 = vst [vmem:[#allocation54_spill] sm:$0xff] %v8753_v58  ;;  %5411 = vmatprep.subr.mxu1 %v2054_v24  ;;  %v2050_v42 = vpop.permute.xlu0 %2049 }
 0x3b7   : > { %v8763_v40 = vpop.f32.mrf.mxu0  ;;  %5412 = vmatpush3.msra.mxu1 %v2022_v18  ;;  %v10776_v18 = vld [vmem:[#allocation169_spill] sm:$0xff] }
 0x3b8   : > { %5524 = vmatmul.mubr.msk.f32.gmra.mxu0 %vm745_vm0, %v10738_v13  ;;  %10759 = vst [vmem:[#allocation56_spill] sm:$0xff] %v8763_v40  ;;  %v2020_v13 = vpop.permute.xlu1 %2019  ;;  %5413 = vmatprep.subr.mxu1 %v2052_v32 }
 0x3b9   : > { %5636 = vmatpush3.xpose.msk.msra.mxu0 %vm745_vm0, %v10741_v6  ;;  %5525 = vmatprep.mubr.msk.f32.mxu0 %vm745_vm0, %v10742_v1  ;;  %v8769_v37 = vpop.f32.mrf.mxu0  ;;  %v10766_v6 = vld [vmem:[#allocation162_spill] sm:$0xff] }
 0x3ba   : > { %5637 = vmatprep.subr.msk.mxu0 %vm745_vm0, %v10744_v48  ;;  %10761 = vst [vmem:[#allocation58_spill] sm:$0xff] %v8769_v37  ;;  %5414 = vmatpush3.msra.mxu1 %v2020_v13  ;;  %v2016_v24 = vpop.permute.xlu0 %2015  ;;  %v10784_v13 = vld [vmem:[#allocation170_spill] sm:$0xff] }
 0x3bb   : > { %v8775_v23 = vpop.f32.mrf.mxu0  ;;  %5415 = vmatprep.subr.mxu1 %v2050_v42 }
 0x3bc   : > { %5526 = vmatmul.mubr.msk.f32.gmra.mxu0 %vm745_vm0, %v10742_v1  ;;  %10763 = vst [vmem:[#allocation60_spill] sm:$0xff] %v8775_v23  ;;  %v2018_v1 = vpop.permute.xlu1 %2017 }
 0x3bd   : > { %5638 = vmatpush3.xpose.msk.msra.mxu0 %vm745_vm0, %v10745_v26  ;;  %5527 = vmatprep.mubr.msk.f32.mxu0 %vm745_vm0, %v10746_v43  ;;  %v8781_v7 = vpop.f32.mrf.mxu0 }
 0x3be   : > { %5639 = vmatprep.subr.msk.mxu0 %vm745_vm0, %v10748_v51  ;;  %10765 = vst [vmem:[#allocation59_spill] sm:$0xff] %v8781_v7  ;;  %5416 = vmatpush3.msra.mxu1 %v2018_v1  ;;  %v10770_v51 = vld [vmem:[#allocation163_spill] sm:$0xff] }
 0x3bf   : > { %v8787_v48 = vpop.f32.mrf.mxu0 }
 0x3c0   : > { %5528 = vmatmul.mubr.msk.f32.gmra.mxu0 %vm745_vm0, %v10746_v43  ;;  %10767 = vst [vmem:[#allocation62_spill] sm:$0xff] %v8787_v48  ;;  %v2048_v43 = vpop.permute.xlu1 %2047 }
 0x3c1   : > { %5640 = vmatpush3.xpose.msk.msra.mxu0 %vm745_vm0, %v10749_v25  ;;  %5529 = vmatprep.mubr.msk.f32.mxu0 %vm745_vm0, %v10750_v55  ;;  %v8793_v26 = vpop.f32.mrf.mxu0  ;;  %v10772_v25 = vld [vmem:[#allocation166_spill] sm:$0xff] }
 0x3c2   : > { %5641 = vmatprep.subr.msk.mxu0 %vm745_vm0, %v10752_v8  ;;  %10769 = vst [vmem:[#allocation61_spill] sm:$0xff] %v8793_v26  ;;  %5417 = vmatprep.subr.mxu1 %v2048_v43 }
 0x3c3   : > { %v8799_v39 = vpop.f32.mrf.mxu0  ;;  %5418 = vmatpush3.msra.mxu1 %v2016_v24 }
 0x3c4   : > { %5530 = vmatmul.mubr.msk.f32.gmra.mxu0 %vm745_vm0, %v10750_v55  ;;  %10771 = vst [vmem:[#allocation64_spill] sm:$0xff] %v8799_v39  ;;  %v2046_v55 = vpop.permute.xlu0 %2045 }
 0x3c5   : > { %5642 = vmatpush3.xpose.msk.msra.mxu0 %vm745_vm0, %v10753_v52  ;;  %5531 = vmatprep.mubr.msk.f32.mxu0 %vm745_vm0, %v10754_v14  ;;  %v8805_v8 = vpop.f32.mrf.mxu0 }
 0x3c6   : > { %5643 = vmatprep.subr.msk.mxu0 %vm745_vm0, %v10756_v15  ;;  %10773 = vst [vmem:[#allocation63_spill] sm:$0xff] %v8805_v8  ;;  %5419 = vmatprep.subr.mxu1 %v2046_v55 }
 0x3c8   : > { %5532 = vmatmul.mubr.msk.f32.gmra.mxu0 %vm745_vm0, %v10754_v14  ;;  %v2014_v52 = vpop.permute.xlu0 %2013  ;;  %v8811_v14 = vpop.f32.mrf.mxu0 }
 0x3c9   : > { %5644 = vmatpush3.xpose.msk.msra.mxu0 %vm745_vm0, %v10757_v20  ;;  %5645 = vmatprep.mubr.msk.f32.mxu0 %vm745_vm0, %v10758_v30  ;;  %10775 = vst [vmem:[#allocation66_spill] sm:$0xff] %v8811_v14  ;;  %v10778_v20 = vld [vmem:[#allocation167_spill] sm:$0xff] }
 0x3ca   : > { %5420 = vmatpush3.msra.mxu1 %v2014_v52  ;;  %v8817_v9 = vpop.f32.mrf.mxu0 }
 0x3cb   : > { %10777 = vst [vmem:[#allocation65_spill] sm:$0xff] %v8817_v9 }
 0x3cc   : > { %5646 = vmatmul.mubr.msk.f32.vlgmr.msra.gmra.mxu0 %vm745_vm0, %v10758_v30  ;;  %v2975_v15 = vpop.permute.xlu0 %2974  ;;  %v8823_v30 = vpop.f32.mrf.mxu0 }
 0x3cd   : > { %5647 = vmatprep.mubr.msk.f32.mxu0 %vm745_vm0, %v10760_v19  ;;  %5533 = vmatprep.subr.mxu1 %v2975_v15  ;;  %10779 = vst [vmem:[#allocation68_spill] sm:$0xff] %v8823_v30 }
 0x3ce   : > { %v8829_v32 = vpop.f32.mrf.mxu0 }
 0x3cf   : > { %10780 = vst [vmem:[#allocation67_spill] sm:$0xff] %v8829_v32 }
 0x3d0   : > { %5648 = vmatmul.mubr.msk.f32.gmra.mxu0 %vm745_vm0, %v10760_v19  ;;  %v8835_v19 = vpop.f32.mrf.mxu0  ;;  %v8997_v35 = vpop.permute.xlu0 %2940 }
 0x3d1   : > { %5649 = vmatprep.mubr.msk.f32.mxu0 %vm745_vm0, %v10762_v10  ;;  %10782 = vst [vmem:[#allocation69_spill] sm:$0xff] %v8835_v19 }
 0x3d4   : > { %5650 = vmatmul.mubr.msk.f32.gmra.mxu0 %vm745_vm0, %v10762_v10  ;;  %v8841_v10 = vpop.f32.mrf.mxu0  ;;  %v9009_v28 = vpop.permute.xlu0 %2934 }
 0x3d5   : > { %5651 = vmatprep.mubr.msk.f32.mxu0 %vm745_vm0, %v10764_v63  ;;  %10783 = vst [vmem:[#allocation70_spill] sm:$0xff] %v8841_v10  ;;  %v8923_v10 = vpop.permute.xlu1 %2942 }
 0x3d8   : > { %5652 = vmatmul.mubr.msk.f32.gmra.mxu0 %vm745_vm0, %v10764_v63 }
 0x3d9   : > { %5653 = vmatprep.mubr.msk.f32.mxu0 %vm745_vm0, %v10766_v6 }
 0x3dc   : > { %5654 = vmatmul.mubr.msk.f32.gmra.mxu0 %vm745_vm0, %v10766_v6 }
 0x3dd   : > { %5655 = vmatprep.mubr.msk.f32.mxu0 %vm745_vm0, %v10768_v60 }
 0x3e0   : > { %5656 = vmatmul.mubr.msk.f32.gmra.mxu0 %vm745_vm0, %v10768_v60 }
 0x3e1   : > { %5657 = vmatprep.mubr.msk.f32.mxu0 %vm745_vm0, %v10770_v51 }
 0x3e4   : > { %5658 = vmatmul.mubr.msk.f32.gmra.mxu0 %vm745_vm0, %v10770_v51 }
 0x3e5   : > { %5659 = vmatprep.mubr.msk.f32.mxu0 %vm745_vm0, %v10772_v25 }
 0x3e8   : > { %5660 = vmatmul.mubr.msk.f32.gmra.mxu0 %vm745_vm0, %v10772_v25 }
 0x3e9   : > { %5661 = vmatprep.mubr.msk.f32.mxu0 %vm745_vm0, %v10774_v3 }
 0x3ec   : > { %5662 = vmatmul.mubr.msk.f32.gmra.mxu0 %vm745_vm0, %v10774_v3 }
 0x3ed   : > { %5663 = vmatprep.mubr.msk.f32.mxu0 %vm745_vm0, %v10776_v18 }
 0x3f0   : > { %5664 = vmatmul.mubr.msk.f32.gmra.mxu0 %vm745_vm0, %v10776_v18 }
 0x3f1   : > { %5665 = vmatprep.mubr.msk.f32.mxu0 %vm745_vm0, %v10778_v20 }
 0x3f4   : > { %5666 = vmatmul.mubr.msk.f32.gmra.mxu0 %vm745_vm0, %v10778_v20 }
 0x3f5   : > { %5667 = vmatprep.mubr.msk.f32.mxu0 %vm745_vm0, %v8229_v29 }
 0x3f8   : > { %5668 = vmatmul.mubr.msk.f32.gmra.mxu0 %vm745_vm0, %v8229_v29  ;;  %v8847_v29 = vpop.f32.mrf.mxu0 }
 0x3f9   : > { %5669 = vmatprep.mubr.msk.f32.mxu0 %vm745_vm0, %v10781_v59  ;;  %10785 = vst [vmem:[#allocation72_spill] sm:$0xff] %v8847_v29 }
 0x3fa   : > { %v8853_v63 = vpop.f32.mrf.mxu0 }
 0x3fb   : > { %10786 = vst [vmem:[#allocation71_spill] sm:$0xff] %v8853_v63 }
 0x3fc   : > { %5670 = vmatmul.mubr.msk.f32.gmra.mxu0 %vm745_vm0, %v10781_v59 }
 0x3fd   : > { %5671 = vmatprep.mubr.msk.f32.mxu0 %vm745_vm0, %v8231_v45 }
 0x400   : > { %5672 = vmatmul.mubr.msk.f32.gmra.mxu0 %vm745_vm0, %v8231_v45 }
 0x401   : > { %5673 = vmatprep.mubr.msk.f32.mxu0 %vm745_vm0, %v10784_v13 }
 0x404   : > { %5674 = vmatmul.mubr.msk.f32.gmra.mxu0 %vm745_vm0, %v10784_v13 }
 0x405   : > { %5675 = vmatprep.mubr.msk.f32.mxu0 %vm745_vm0, %v8233_v31 }
 0x408   : > { %v8855_v6 = vpop.f32.mrf.mxu0  ;;  %5676 = vmatmul.mubr.msk.f32.gmra.mxu0 %vm745_vm0, %v8233_v31 }
 0x409   : > { %10787 = vst [vmem:[#allocation73_spill] sm:$0xff] %v8855_v6 }
 0x40a   : > { %v8859_v1 = vpop.f32.mrf.mxu0 }
 0x40b   : > { %10788 = vst [vmem:[#allocation74_spill] sm:$0xff] %v8859_v1 }
 0x40c   : > { %v8861_v45 = vpop.f32.mrf.mxu0 }
 0x40e   : > { %v8863_v60 = vpop.f32.mrf.mxu0 }
 0x40f   : > { %v1789_v42 = vmax.f32 %v8861_v45, %v8863_v60 }
 0x410   : > { %v8867_v43 = vpop.f32.mrf.mxu0 }
 0x411   : > { %1790 = vmax.xlane.f32.xlu1 %v1789_v42 }
 0x412   : > { %v8869_v51 = vpop.f32.mrf.mxu0 }
 0x413   : > { %v1792_v24 = vmax.f32 %v8867_v43, %v8869_v51 }
 0x414   : > { %v8873_v25 = vpop.f32.mrf.mxu0 }
 0x415   : > { %1793 = vmax.xlane.f32.xlu0 %v1792_v24 }
 0x416   : > { %v8875_v31 = vpop.f32.mrf.mxu0 }
 0x417   : > { %v1795_v55 = vmax.f32 %v8873_v25, %v8875_v31 }
 0x418   : > { %v8879_v3 = vpop.f32.mrf.mxu0 }
 0x419   : > { %1796 = vmax.xlane.f32.xlu1 %v1795_v55 }
 0x41a   : > { %v8881_v52 = vpop.f32.mrf.mxu0 }
 0x41b   : > { %v1798_v18 = vmax.f32 %v8879_v3, %v8881_v52 }
 0x41c   : > { %v8885_v15 = vpop.f32.mrf.mxu0 }
 0x41d   : > { %1799 = vmax.xlane.f32.xlu0 %v1798_v18 }
 0x41e   : > { %v8887_v20 = vpop.f32.mrf.mxu0 }
 0x41f   : > { %v1801_v59 = vmax.f32 %v8885_v15, %v8887_v20 }
 0x420   : > { %v8891_v13 = vpop.f32.mrf.mxu0 }
 0x421   : > { %1802 = vmax.xlane.f32.xlu1 %v1801_v59 }
 0x422   : > { %v8893_v42 = vpop.f32.mrf.mxu0 }
 0x423   : > { %v1804_v24 = vmax.f32 %v8891_v13, %v8893_v42 }
 0x424   : > { %v8897_v55 = vpop.f32.mrf.mxu0 }
 0x425   : > { %1805 = vmax.xlane.f32.xlu0 %v1804_v24 }
 0x426   : > { %v8899_v1 = vpop.f32.mrf.mxu0 }
 0x427   : > { %v1807_v18 = vmax.f32 %v8897_v55, %v8899_v1 }
 0x428   : > { %v8903_v6 = vpop.f32.mrf.mxu0 }
 0x429   : > { %1808 = vmax.xlane.f32.xlu0 %v1807_v18 }
 0x42a   : > { %v8905_v63 = vpop.f32.mrf.mxu0 }
 0x42b   : > { %v1810_v59 = vmax.f32 %v8903_v6, %v8905_v63 }
 0x42c   : > { %v8909_v29 = vpop.f32.mrf.mxu0 }
 0x42d   : > { %1811 = vmax.xlane.f32.xlu1 %v1810_v59 }
 0x42e   : > { %v8911_v32 = vpop.f32.mrf.mxu0 }
 0x42f   : > { %v1813_v24 = vmax.f32 %v8909_v29, %v8911_v32 }
 0x430   : > { %v8915_v30 = vpop.f32.mrf.mxu0 }
 0x431   : > { %1814 = vmax.xlane.f32.xlu0 %v1813_v24  ;;  %v8933_v24 = vpop.permute.xlu1 %2972 }
 0x432   : > { %v8917_v9 = vpop.f32.mrf.mxu0 }
 0x433   : > { %v1816_v18 = vmax.f32 %v8915_v30, %v8917_v9 }
 0x434   : > { %v8921_v14 = vpop.f32.mrf.mxu0 }
 0x435   : > { %1817 = vmax.xlane.f32.xlu1 %v1816_v18  ;;  %v8945_v17 = vpop.permute.xlu1 %2970 }
 0x436   : > { %v8925_v19 = vpop.f32.mrf.mxu0 }
 0x437   : > { %v1819_v59 = vmax.f32 %v8921_v14, %v8925_v19 }
 0x438   : > { %v8929_v26 = vpop.f32.mrf.mxu0 }
 0x439   : > { %1820 = vmax.xlane.f32.xlu1 %v1819_v59 }
 0x43a   : > { %v8931_v48 = vpop.f32.mrf.mxu0 }
 0x43b   : > { %v1822_v8 = vmax.f32 %v8929_v26, %v8931_v48 }
 0x43c   : > { %v8937_v39 = vpop.f32.mrf.mxu0 }
 0x43d   : > { %10789 = vst [vmem:[#allocation76_spill] sm:$0xff] %v8937_v39  ;;  %1823 = vmax.xlane.f32.xlu1 %v1822_v8  ;;  %v8955_v8 = vpop.permute.xlu1 %2938 }
 0x43e   : > { %v8939_v50 = vpop.f32.mrf.mxu0 }
 0x43f   : > { %10790 = vst [vmem:[#allocation75_spill] sm:$0xff] %v8939_v50  ;;  %v1825_v18 = vmax.f32 %v8937_v39, %v8939_v50 }
 0x440   : > { %v8943_v56 = vpop.f32.mrf.mxu0 }
 0x441   : > { %10791 = vst [vmem:[#allocation77_spill] sm:$0xff] %v8943_v56  ;;  %1826 = vmax.xlane.f32.xlu1 %v1825_v18  ;;  %v8967_v62 = vpop.permute.xlu1 %2968 }
 0x442   : > { %v8947_v59 = vpop.f32.mrf.mxu0 }
 0x443   : > { %10792 = vst [vmem:[#allocation78_spill] sm:$0xff] %v8947_v59  ;;  %v1828_v49 = vmax.f32 %v8943_v56, %v8947_v59 }
 0x444   : > { %v8951_v21 = vpop.f32.mrf.mxu0 }
 0x445   : > { %10793 = vst [vmem:[#allocation80_spill] sm:$0xff] %v8951_v21  ;;  %1829 = vmax.xlane.f32.xlu1 %v1828_v49 }
 0x446   : > { %v8953_v7 = vpop.f32.mrf.mxu0 }
 0x447   : > { %10794 = vst [vmem:[#allocation79_spill] sm:$0xff] %v8953_v7  ;;  %v1831_v23 = vmax.f32 %v8951_v21, %v8953_v7 }
 0x448   : > { %v8959_v37 = vpop.f32.mrf.mxu0 }
 0x449   : > { %10795 = vst [vmem:[#allocation81_spill] sm:$0xff] %v8959_v37  ;;  %1832 = vmax.xlane.f32.xlu0 %v1831_v23  ;;  %v8977_v23 = vpop.permute.xlu1 %2936 }
 0x44a   : > { %v8961_v40 = vpop.f32.mrf.mxu0 }
 0x44b   : > { %10796 = vst [vmem:[#allocation82_spill] sm:$0xff] %v8961_v40  ;;  %v1834_v18 = vmax.f32 %v8959_v37, %v8961_v40 }
 0x44c   : > { %v8965_v22 = vpop.f32.mrf.mxu0 }
 0x44d   : > { %10797 = vst [vmem:[#allocation117_spill] sm:$0xff] %v8965_v22  ;;  %1835 = vmax.xlane.f32.xlu1 %v1834_v18  ;;  %v8989_v58 = vpop.permute.xlu1 %2966 }
 0x44e   : > { %v8969_v49 = vpop.f32.mrf.mxu0 }
 0x44f   : > { %10798 = vst [vmem:[#allocation84_spill] sm:$0xff] %v8969_v49  ;;  %v2720_v54 = vmax.f32 %v8965_v22, %v8969_v49  ;;  %v6446_v49 = vld [vmem:[%s7063_s28 + $0x108] sm:$0xff] }
 0x450   : > { %v8973_v11 = vpop.f32.mrf.mxu0  ;;  %v6447_v22 = vld [vmem:[%s7063_s28 + $0x8] sm:$0xff] }
 0x451   : > { %10799 = vst [vmem:[#allocation83_spill] sm:$0xff] %v8973_v11  ;;  %2721 = vmax.xlane.f32.xlu1 %v2720_v54  ;;  %v9001_v53 = vpop.permute.xlu1 %2932 }
 0x452   : > { %v8975_v2 = vpop.f32.mrf.mxu0 }
 0x453   : > { %10800 = vst [vmem:[#allocation119_spill] sm:$0xff] %v8975_v2  ;;  %v2723_v34 = vmax.f32 %v8973_v11, %v8975_v2 }
 0x454   : > { %v8981_v38 = vpop.f32.mrf.mxu0 }
 0x455   : > { %10801 = vst [vmem:[#allocation85_spill] sm:$0xff] %v8981_v38  ;;  %2724 = vmax.xlane.f32.xlu0 %v2723_v34 }
 0x456   : > { %v8983_v57 = vpop.f32.mrf.mxu0 }
 0x457   : > { %10802 = vst [vmem:[#allocation86_spill] sm:$0xff] %v8983_v57  ;;  %v2726_v18 = vmax.f32 %v8981_v38, %v8983_v57 }
 0x458   : > { %v8987_v12 = vpop.f32.mrf.mxu0 }
 0x459   : > { %10803 = vst [vmem:[#allocation118_spill] sm:$0xff] %v8987_v12  ;;  %2727 = vmax.xlane.f32.xlu1 %v2726_v18 }
 0x45a   : > { %v8991_v54 = vpop.f32.mrf.mxu0 }
 0x45b   : > { %10804 = vst [vmem:[#allocation88_spill] sm:$0xff] %v8991_v54  ;;  %v2729_v61 = vmax.f32 %v8987_v12, %v8991_v54 }
 0x45c   : > { %v8995_v16 = vpop.f32.mrf.mxu0 }
 0x45d   : > { %10805 = vst [vmem:[#allocation87_spill] sm:$0xff] %v8995_v16  ;;  %2730 = vmax.xlane.f32.xlu0 %v2729_v61  ;;  %v9015_v61 = vpop.permute.xlu1 %2930 }
 0x45e   : > { %v8999_v34 = vpop.f32.mrf.mxu0 }
 0x45f   : > { %10806 = vst [vmem:[#allocation121_spill] sm:$0xff] %v8999_v34  ;;  %v2732_v33 = vmax.f32 %v8995_v16, %v8999_v34 }
 0x460   : > { %v9005_v0 = vpop.f32.mrf.mxu0 }
 0x461   : > { %10807 = vst [vmem:[#allocation89_spill] sm:$0xff] %v9005_v0  ;;  %2733 = vmax.xlane.f32.xlu1 %v2732_v33  ;;  %v9023_v33 = vpop.permute.xlu0 %2964  ;;  %v9027_v4 = vpop.permute.xlu1 %2960 }
 0x462   : > { %v9007_v18 = vpop.f32.mrf.mxu0 }
 0x463   : > { %10808 = vst [vmem:[#allocation90_spill] sm:$0xff] %v9007_v18  ;;  %v2735_v46 = vmax.f32 %v9005_v0, %v9007_v18 }
 0x464   : > { %v9013_v36 = vpop.f32.mrf.mxu0 }
 0x465   : > { %10809 = vst [vmem:[#allocation120_spill] sm:$0xff] %v9013_v36  ;;  %2736 = vmax.xlane.f32.xlu1 %v2735_v46  ;;  %v9035_v0 = vpop.permute.xlu0 %2962 }
 0x466   : > { %v9017_v44 = vpop.f32.mrf.mxu0 }
 0x467   : > { %10810 = vst [vmem:[#allocation92_spill] sm:$0xff] %v9017_v44  ;;  %v2738_v47 = vmax.f32 %v9013_v36, %v9017_v44 }
 0x468   : > { %v9021_v41 = vpop.f32.mrf.mxu0 }
 0x469   : > { %10811 = vst [vmem:[#allocation91_spill] sm:$0xff] %v9021_v41  ;;  %2739 = vmax.xlane.f32.xlu0 %v2738_v47  ;;  %v9041_v47 = vpop.permute.xlu1 %2928 }
 0x46a   : > { %v9025_v5 = vpop.f32.mrf.mxu0 }
 0x46b   : > { %10812 = vst [vmem:[#allocation123_spill] sm:$0xff] %v9025_v5  ;;  %v2741_v27 = vmax.f32 %v9021_v41, %v9025_v5  ;;  %v9047_v5 = vpop.permute.xlu0 %2926 }
 0x46c   : > { %v9031_v18 = vpop.f32.mrf.mxu0 }
 0x46d   : > { %10813 = vst [vmem:[#allocation93_spill] sm:$0xff] %v9031_v18  ;;  %2742 = vmax.xlane.f32.xlu1 %v2741_v27  ;;  %v9051_v41 = vpop.permute.xlu1 %2958 }
 0x46e   : > { %v9033_v46 = vpop.f32.mrf.mxu0 }
 0x46f   : > { %10814 = vst [vmem:[#allocation94_spill] sm:$0xff] %v9033_v46  ;;  %v2744_v44 = vmax.f32 %v9031_v18, %v9033_v46 }
 0x470   : > { %v9039_v36 = vpop.f32.mrf.mxu0 }
 0x471   : > { %2745 = vmax.xlane.f32.xlu1 %v2744_v44  ;;  %v9059_v44 = vpop.permute.xlu0 %2956  ;;  %v9065_v38 = vpop.permute.xlu1 %2952 }
 0x472   : > { %v9043_v34 = vpop.f32.mrf.mxu0 }
 0x474   : > { %v9045_v16 = vpop.f32.mrf.mxu0 }
 0x475   : > { %10815 = vst [vmem:[#allocation122_spill] sm:$0xff] %v9045_v16  ;;  %v9075_v11 = vpop.permute.xlu0 %2924 }
 0x476   : > { %v9049_v27 = vpop.f32.mrf.mxu0 }
 0x477   : > { %10816 = vst [vmem:[#allocation96_spill] sm:$0xff] %v9049_v27  ;;  %v2750_v54 = vmax.f32 %v9045_v16, %v9049_v27 }
 0x478   : > { %v9055_v46 = vpop.f32.mrf.mxu0 }
 0x479   : > { %10817 = vst [vmem:[#allocation95_spill] sm:$0xff] %v9055_v46  ;;  %2751 = vmax.xlane.f32.xlu1 %v2750_v54  ;;  %v6445_v54 = vld [vmem:[%s7063_s28 + $0x18] sm:$0xff] }
 0x47a   : > { %v9057_v18 = vpop.f32.mrf.mxu0 }
 0x47b   : > { %10818 = vst [vmem:[#allocation125_spill] sm:$0xff] %v9057_v18  ;;  %v2753_v12 = vmax.f32 %v9055_v46, %v9057_v18  ;;  %v9079_v46 = vpop.permute.xlu1 %2918 }
 0x47c   : > { %v9063_v57 = vpop.f32.mrf.mxu0 }
 0x47d   : > { %10819 = vst [vmem:[#allocation97_spill] sm:$0xff] %v9063_v57  ;;  %2754 = vmax.xlane.f32.xlu1 %v2753_v12 }
 0x47e   : > { %v9067_v2 = vpop.f32.mrf.mxu0 }
 0x47f   : > { %10820 = vst [vmem:[#allocation98_spill] sm:$0xff] %v9067_v2  ;;  %v2756_v27 = vmax.f32 %v9063_v57, %v9067_v2  ;;  %2914 = vrot.lane.b32.xlu0 %v6445_v54, %s6774_s26  ;;  %v9089_v54 = vpop.permute.xlu0 %2954  ;;  %v9097_v37 = vpop.permute.xlu1 %2948 }
 0x480   : > { %v9073_v16 = vpop.f32.mrf.mxu0 }
 0x481   : > { %10821 = vst [vmem:[#allocation124_spill] sm:$0xff] %v9073_v16  ;;  %2757 = vmax.xlane.f32.xlu1 %v2756_v27 }
 0x482   : > { %v9077_v18 = vpop.f32.mrf.mxu0 }
 0x483   : > { %10822 = vst [vmem:[#allocation100_spill] sm:$0xff] %v9077_v18  ;;  %v2759_v12 = vmax.f32 %v9073_v16, %v9077_v18  ;;  %2944 = vrot.lane.b32.xlu0 %v6446_v49, %s6774_s26  ;;  %v9103_v18 = vpop.permute.xlu0 %2922  ;;  %v9105_v16 = vpop.permute.xlu1 %2916 }
 0x484   : > { %v9085_v2 = vpop.f32.mrf.mxu0  ;;  %10827 = vst [vmem:[#allocation111_spill] sm:$0xff] %v9105_v16 }
 0x485   : > { %10823 = vst [vmem:[#allocation99_spill] sm:$0xff] %v9085_v2  ;;  %2760 = vmax.xlane.f32.xlu1 %v2759_v12 }
 0x486   : > { %v9087_v57 = vpop.f32.mrf.mxu0 }
 0x487   : > { %10824 = vst [vmem:[#allocation112_spill] sm:$0xff] %v9087_v57  ;;  %v2762_v27 = vmax.f32 %v9085_v2, %v9087_v57  ;;  %2912 = vrot.lane.b32.xlu0 %v6447_v22, %s6774_s26  ;;  %v9107_v57 = vpop.permute.xlu0 %2920  ;;  %v9109_v2 = vpop.permute.xlu1 %2946 }
 0x488   : > { %v9095_v40 = vpop.f32.mrf.mxu0  ;;  %10828 = vst [vmem:[#allocation104_spill] sm:$0xff] %v9109_v2 }
 0x489   : > { %10825 = vst [vmem:[#allocation101_spill] sm:$0xff] %v9095_v40  ;;  %2763 = vmax.xlane.f32.xlu1 %v2762_v27 }
 0x48a   : > { %v9099_v49 = vpop.f32.mrf.mxu0 }
 0x48b   : > { %10826 = vst [vmem:[#allocation102_spill] sm:$0xff] %v9099_v49  ;;  %v2765_v12 = vmax.f32 %v9095_v40, %v9099_v49  ;;  %v9111_v22 = vpop.permute.xlu0 %2950  ;;  %v6448_v40 = vld [vmem:[%s7063_s28 + $0x1f8] sm:$0xff] }
 0x48c   : > { %v9119_v39 = vpop.f32.mrf.mxu0 }
 0x48d   : > { %2766 = vmax.xlane.f32.xlu1 %v2765_v12 }
 0x49a   : > { %v1791_v7 = vpop.xlane.xlu1 %1790 }
 0x49b   : > { %v1837_v27 = vsub.f32 %v8861_v45, %v1791_v7  ;;  %v1838_v21 = vsub.f32 %v8863_v60, %v1791_v7  ;;  %v6449_v45 = vld [vmem:[%s7063_s28 + $0x1e8] sm:$0xff]  ;;  %v2747_v60 = vmax.f32 %v9039_v36, %v9043_v34 }
 0x49d   : > { %v1869_v59 = vmul.f32 1.442695, %v1837_v27  ;;  %v1871_v56 = vmul.f32 1.442695, %v1838_v21  ;;  %v6451_v27 = vld [vmem:[%s7063_s28 + $0x1d8] sm:$0xff] }
 0x49e   : > { %v1794_v49 = vpop.xlane.xlu0 %1793  ;;  %3873 = vrot.lane.b32.xlu1 %v6448_v40, %s6775_s2 }
 0x49f   : > { %6104 = vpow2.f32 %v1869_v59  ;;  %v1839_v12 = vsub.f32 %v8867_v43, %v1794_v49  ;;  %v1840_v50 = vsub.f32 %v8869_v51, %v1794_v49 }
 0x4a0   : > { %6106 = vpow2.f32 %v1871_v56  ;;  %v9127_v56 = vpop.f32.mrf.mxu0 }
 0x4a1   : > { %v1873_v2 = vmul.f32 1.442695, %v1839_v12  ;;  %v1875_v16 = vmul.f32 1.442695, %v1840_v50  ;;  %v6450_v50 = vld [vmem:[%s7063_s28 + $0xe8] sm:$0xff] }
 0x4a2   : > { %3871 = vrot.lane.b32.xlu1 %v6449_v45, %s6775_s2  ;;  %v1797_v7 = vpop.xlane.xlu1 %1796 }
 0x4a3   : > { %6108 = vpow2.f32 %v1873_v2  ;;  %v1841_v21 = vsub.f32 %v8873_v25, %v1797_v7  ;;  %v1842_v40 = vsub.f32 %v8875_v31, %v1797_v7  ;;  %v3619_v31 = vmax.f32 %v9119_v39, %v9127_v56 }
 0x4a4   : > { %6110 = vpow2.f32 %v1875_v16 }
 0x4a5   : > { %v1877_v43 = vmul.f32 1.442695, %v1841_v21  ;;  %v1879_v51 = vmul.f32 1.442695, %v1842_v40 }
 0x4a6   : > { %v1800_v59 = vpop.xlane.xlu0 %1799  ;;  %2748 = vmax.xlane.f32.xlu0 %v2747_v60  ;;  %3839 = vrot.lane.b32.xlu1 %v6450_v50, %s6775_s2 }
 0x4a7   : > { %6112 = vpow2.f32 %v1877_v43  ;;  %v1843_v2 = vsub.f32 %v8879_v3, %v1800_v59  ;;  %v1844_v25 = vsub.f32 %v8881_v52, %v1800_v59 }
 0x4a8   : > { %6114 = vpow2.f32 %v1879_v51 }
 0x4a9   : > { %v1881_v16 = vmul.f32 1.442695, %v1843_v2  ;;  %v1883_v49 = vmul.f32 1.442695, %v1844_v25 }
 0x4aa   : > { %3620 = vmax.xlane.f32.xlu0 %v3619_v31  ;;  %3869 = vrot.lane.b32.xlu1 %v6451_v27, %s6775_s2  ;;  %v1803_v12 = vpop.xlane.xlu1 %1802 }
 0x4ab   : > { %6116 = vpow2.f32 %v1881_v16  ;;  %v1845_v45 = vsub.f32 %v8885_v15, %v1803_v12  ;;  %v1846_v7 = vsub.f32 %v8887_v20, %v1803_v12 }
 0x4ac   : > { %v6105_v21 = vpop.eup %6104  ;;  %6118 = vpow2.f32 %v1883_v49 }
 0x4ad   : > { %v6107_v3 = vpop.eup %6106  ;;  %v1885_v52 = vmul.f32 1.442695, %v1845_v45  ;;  %v1887_v40 = vmul.f32 1.442695, %v1846_v7 }
 0x4ae   : > { %2173 = vmatprep.mubr.f32.mxu1 %v6107_v3  ;;  %v1806_v60 = vpop.xlane.xlu0 %1805  ;;  %v9139_v43 = vadd.f32 %v6107_v3, %v6105_v21 }
 0x4af   : > { %6120 = vpow2.f32 %v1885_v52  ;;  %v1847_v51 = vsub.f32 %v8891_v13, %v1806_v60  ;;  %v1848_v59 = vsub.f32 %v8893_v42, %v1806_v60  ;;  %2174 = vmatmul.mubr.f32.vlgmr.msra.gmra.mxu1 %v6105_v21  ;;  %v6452_v21 = vld [vmem:[%s7063_s28 + $0xf8] sm:$0xff] }
 0x4b0   : > { %v6109_v50 = vpop.eup %6108  ;;  %6122 = vpow2.f32 %v1887_v40  ;;  %5534 = vmatpush3.msra.mxu1 %v8923_v10  ;;  %v6453_v40 = vld [vmem:[%s7063_s28 + $0xd8] sm:$0xff] }
 0x4b1   : > { %v6111_v15 = vpop.eup %6110  ;;  %v1889_v20 = vmul.f32 1.442695, %v1847_v51  ;;  %v1891_v2 = vmul.f32 1.442695, %v1848_v59  ;;  %5535 = vmatprep.subr.mxu1 %v8933_v24 }
 0x4b2   : > { %5536 = vmatpush3.msra.mxu1 %v8997_v35  ;;  %2178 = vmatprep.mubr.f32.mxu1 %v6111_v15  ;;  %v1809_v25 = vpop.xlane.xlu0 %1808  ;;  %v9146_v31 = vadd.f32 %v6111_v15, %v6109_v50 }
 0x4b3   : > { %6124 = vpow2.f32 %v1889_v20  ;;  %5537 = vmatprep.subr.mxu1 %v8945_v17  ;;  %v1849_v13 = vsub.f32 %v8897_v55, %v1809_v25  ;;  %v1850_v42 = vsub.f32 %v8899_v1, %v1809_v25  ;;  %2179 = vmatmul.mubr.f32.gmra.mxu1 %v6109_v50  ;;  %v6454_v50 = vld [vmem:[%s7063_s28 + $0x1c8] sm:$0xff] }
 0x4b4   : > { %v6113_v10 = vpop.eup %6112  ;;  %6126 = vpow2.f32 %v1891_v2  ;;  %5538 = vmatpush3.msra.mxu1 %v8955_v8  ;;  %v10830_v2 = vld [vmem:[#allocation104_spill] sm:$0xff] }
 0x4b5   : > { %v6115_v16 = vpop.eup %6114  ;;  %v1893_v24 = vmul.f32 1.442695, %v1849_v13  ;;  %v1895_v49 = vmul.f32 1.442695, %v1850_v42  ;;  %5539 = vmatprep.subr.mxu1 %v8967_v62  ;;  %v10832_v13 = vld [vmem:[#allocation75_spill] sm:$0xff] }
 0x4b6   : > { %5540 = vmatpush3.msra.mxu1 %v8977_v23  ;;  %2183 = vmatprep.mubr.f32.mxu1 %v6115_v16  ;;  %v1812_v35 = vpop.xlane.xlu1 %1811  ;;  %v9154_v27 = vadd.f32 %v6115_v16, %v6113_v10 }
 0x4b7   : > { %6128 = vpow2.f32 %v1893_v24  ;;  %5541 = vmatprep.subr.mxu1 %v8989_v58  ;;  %2184 = vmatmul.mubr.f32.gmra.mxu1 %v6113_v10  ;;  %v1851_v17 = vsub.f32 %v8903_v6, %v1812_v35  ;;  %v1852_v1 = vsub.f32 %v8905_v63, %v1812_v35 }
 0x4b8   : > { %v6117_v55 = vpop.eup %6116  ;;  %6130 = vpow2.f32 %v1895_v49  ;;  %5542 = vmatpush3.msra.mxu1 %v9009_v28 }
 0x4b9   : > { %v6119_v8 = vpop.eup %6118  ;;  %v1897_v62 = vmul.f32 1.442695, %v1851_v17  ;;  %v1899_v12 = vmul.f32 1.442695, %v1852_v1  ;;  %5543 = vmatprep.subr.mxu1 %v9023_v33 }
 0x4ba   : > { %5544 = vmatpush3.msra.mxu1 %v9001_v53  ;;  %2188 = vmatprep.mubr.f32.mxu1 %v6119_v8  ;;  %v1815_v23 = vpop.xlane.xlu0 %1814  ;;  %v9162_v45 = vadd.f32 %v6119_v8, %v6117_v55 }
 0x4bb   : > { %6132 = vpow2.f32 %v1897_v62  ;;  %5545 = vmatprep.subr.mxu1 %v9035_v0  ;;  %v1853_v58 = vsub.f32 %v8909_v29, %v1815_v23  ;;  %v1854_v63 = vsub.f32 %v8911_v32, %v1815_v23  ;;  %2189 = vmatmul.mubr.f32.gmra.mxu1 %v6117_v55  ;;  %v10833_v55 = vld [vmem:[#allocation77_spill] sm:$0xff]  ;;  %v10834_v62 = vld [vmem:[#allocation78_spill] sm:$0xff] }
 0x4bc   : > { %v6121_v28 = vpop.eup %6120  ;;  %6134 = vpow2.f32 %v1899_v12  ;;  %5546 = vmatpush3.msra.mxu1 %v9015_v61 }
 0x4bd   : > { %v6123_v6 = vpop.eup %6122  ;;  %v1901_v33 = vmul.f32 1.442695, %v1853_v58  ;;  %v1903_v53 = vmul.f32 1.442695, %v1854_v63  ;;  %5547 = vmatprep.subr.mxu1 %v9027_v4  ;;  %v6456_v58 = vld [vmem:[%s7063_s28 + $0x1b8] sm:$0xff] }
 0x4be   : > { %5548 = vmatpush3.msra.mxu1 %v9041_v47  ;;  %2193 = vmatprep.mubr.f32.mxu1 %v6123_v6  ;;  %v1818_v7 = vpop.xlane.xlu1 %1817  ;;  %v9170_v0 = vadd.f32 %v6123_v6, %v6121_v28 }
 0x4bf   : > { %6136 = vpow2.f32 %v1901_v33  ;;  %5549 = vmatprep.subr.mxu1 %v9051_v41  ;;  %2194 = vmatmul.mubr.f32.gmra.mxu1 %v6121_v28  ;;  %v1855_v32 = vsub.f32 %v8915_v30, %v1818_v7  ;;  %v1856_v29 = vsub.f32 %v8917_v9, %v1818_v7  ;;  %v10835_v7 = vld [vmem:[#allocation80_spill] sm:$0xff] }
 0x4c0   : > { %v6125_v61 = vpop.eup %6124  ;;  %6138 = vpow2.f32 %v1903_v53  ;;  %5550 = vmatpush3.msra.mxu1 %v9047_v5  ;;  %3841 = vrot.lane.b32.xlu0 %v6452_v21, %s6775_s2 }
 0x4c1   : > { %v6127_v4 = vpop.eup %6126  ;;  %v1905_v47 = vmul.f32 1.442695, %v1855_v32  ;;  %v1907_v3 = vmul.f32 1.442695, %v1856_v29  ;;  %5551 = vmatprep.subr.mxu1 %v9059_v44  ;;  %v9188_v44 = vpop.f32.mrf.mxu0  ;;  %v10836_v29 = vld [vmem:[#allocation79_spill] sm:$0xff] }
 0x4c2   : > { %5552 = vmatpush3.msra.mxu1 %v9075_v11  ;;  %2198 = vmatprep.mubr.f32.mxu1 %v6127_v4  ;;  %v1821_v41 = vpop.xlane.xlu1 %1820  ;;  %v9180_v30 = vadd.f32 %v6127_v4, %v6125_v61 }
 0x4c3   : > { %6140 = vpow2.f32 %v1905_v47  ;;  %5553 = vmatprep.subr.mxu1 %v9089_v54  ;;  %2199 = vmatmul.mubr.f32.gmra.mxu1 %v6125_v61  ;;  %v1857_v5 = vsub.f32 %v8921_v14, %v1821_v41  ;;  %v1858_v9 = vsub.f32 %v8925_v19, %v1821_v41 }
 0x4c4   : > { %v6129_v52 = vpop.eup %6128  ;;  %6142 = vpow2.f32 %v1907_v3  ;;  %5554 = vmatpush3.msra.mxu1 %v9103_v18  ;;  %3837 = vrot.lane.b32.xlu0 %v6453_v40, %s6775_s2  ;;  %v10839_v40 = vld [vmem:[#allocation82_spill] sm:$0xff] }
 0x4c5   : > { %v6131_v11 = vpop.eup %6130  ;;  %v1909_v60 = vmul.f32 1.442695, %v1857_v5  ;;  %v1911_v51 = vmul.f32 1.442695, %v1858_v9  ;;  %5555 = vmatprep.subr.mxu1 %v9065_v38  ;;  %v10838_v9 = vld [vmem:[#allocation81_spill] sm:$0xff] }
 0x4c6   : > { %5556 = vmatpush3.msra.mxu1 %v9107_v57  ;;  %2203 = vmatprep.mubr.f32.mxu1 %v6131_v11  ;;  %v1824_v14 = vpop.xlane.xlu1 %1823  ;;  %v9192_v19 = vadd.f32 %v6131_v11, %v6129_v52  ;;  %v9200_v57 = vpop.f32.mrf.mxu0 }
 0x4c7   : > { %6144 = vpow2.f32 %v1909_v60  ;;  %5557 = vmatprep.subr.mxu1 %v9111_v22  ;;  %2204 = vmatmul.mubr.f32.gmra.mxu1 %v6129_v52  ;;  %v1859_v18 = vsub.f32 %v8929_v26, %v1824_v14  ;;  %v1860_v54 = vsub.f32 %v8931_v48, %v1824_v14  ;;  %v10829_v22 = vld [vmem:[#allocation111_spill] sm:$0xff]  ;;  %v3622_v16 = vmax.f32 %v9188_v44, %v9200_v57 }
 0x4c8   : > { %v6133_v59 = vpop.eup %6132  ;;  %6146 = vpow2.f32 %v1911_v51  ;;  %5558 = vmatpush3.msra.mxu1 %v9079_v46  ;;  %3867 = vrot.lane.b32.xlu0 %v6454_v50, %s6775_s2  ;;  %v10831_v46 = vld [vmem:[#allocation76_spill] sm:$0xff]  ;;  %v10841_v50 = vld [vmem:[#allocation117_spill] sm:$0xff] }
 0x4c9   : > { %v6135_v38 = vpop.eup %6134  ;;  %v1913_v15 = vmul.f32 1.442695, %v1859_v18  ;;  %v1915_v20 = vmul.f32 1.442695, %v1860_v54  ;;  %5559 = vmatprep.subr.mxu1 %v9097_v37  ;;  %v6455_v37 = vld [vmem:[%s7063_s28 + $0xc8] sm:$0xff] }
 0x4ca   : > { %5560 = vmatpush3.msra.mxu1 %v10829_v22  ;;  %2208 = vmatprep.mubr.f32.mxu1 %v6135_v38  ;;  %v1827_v26 = vpop.xlane.xlu1 %1826  ;;  %v9204_v48 = vadd.f32 %v6135_v38, %v6133_v59 }
 0x4cb   : > { %6148 = vpow2.f32 %v1913_v15  ;;  %5561 = vmatprep.subr.mxu1 %v10830_v2  ;;  %2209 = vmatmul.mubr.f32.gmra.mxu1 %v6133_v59  ;;  %v1861_v25 = vsub.f32 %v10831_v46, %v1827_v26  ;;  %v1862_v42 = vsub.f32 %v10832_v13, %v1827_v26  ;;  %v10842_v15 = vld [vmem:[#allocation84_spill] sm:$0xff] }
 0x4cc   : > { %v6137_v10 = vpop.eup %6136  ;;  %6150 = vpow2.f32 %v1915_v20  ;;  %3835 = vrot.lane.b32.xlu0 %v6455_v37, %s6775_s2 }
 0x4cd   : > { %v6139_v24 = vpop.eup %6138  ;;  %v1917_v49 = vmul.f32 1.442695, %v1861_v25  ;;  %v1919_v35 = vmul.f32 1.442695, %v1862_v42  ;;  %v10844_v42 = vld [vmem:[#allocation83_spill] sm:$0xff] }
 0x4ce   : > { %2213 = vmatprep.mubr.f32.mxu1 %v6139_v24  ;;  %3623 = vmax.xlane.f32.xlu1 %v3622_v16  ;;  %v1830_v17 = vpop.xlane.xlu1 %1829  ;;  %v9213_v1 = vadd.f32 %v6139_v24, %v6137_v10  ;;  %v10845_v16 = vld [vmem:[#allocation119_spill] sm:$0xff]  ;;  %v6457_v24 = vld [vmem:[%s7063_s28 + $0xb8] sm:$0xff] }
 0x4cf   : > { %6152 = vpow2.f32 %v1917_v49  ;;  %2214 = vmatmul.mubr.f32.gmra.mxu1 %v6137_v10  ;;  %v1863_v8 = vsub.f32 %v10833_v55, %v1830_v17  ;;  %v1864_v12 = vsub.f32 %v10834_v62, %v1830_v17 }
 0x4d0   : > { %v6141_v23 = vpop.eup %6140  ;;  %6154 = vpow2.f32 %v1919_v35  ;;  %3865 = vrot.lane.b32.xlu0 %v6456_v58, %s6775_s2  ;;  %v10848_v58 = vld [vmem:[#allocation86_spill] sm:$0xff] }
 0x4d1   : > { %v6143_v63 = vpop.eup %6142  ;;  %v1921_v28 = vmul.f32 1.442695, %v1863_v8  ;;  %v1923_v6 = vmul.f32 1.442695, %v1864_v12  ;;  %v10847_v12 = vld [vmem:[#allocation85_spill] sm:$0xff] }
 0x4d2   : > { %2218 = vmatprep.mubr.f32.mxu1 %v6143_v63  ;;  %v1833_v33 = vpop.xlane.xlu0 %1832  ;;  %v9219_v53 = vadd.f32 %v6143_v63, %v6141_v23 }
 0x4d3   : > { %6156 = vpow2.f32 %v1921_v28  ;;  %v1865_v32 = vsub.f32 %v10835_v7, %v1833_v33  ;;  %v1866_v61 = vsub.f32 %v10836_v29, %v1833_v33  ;;  %2219 = vmatmul.mubr.f32.gmra.mxu1 %v6141_v23  ;;  %v6458_v28 = vld [vmem:[%s7063_s28 + $0xa8] sm:$0xff]  ;;  %v9243_v29 = vpop.f32.mrf.mxu0 }
 0x4d4   : > { %v6145_v21 = vpop.eup %6144  ;;  %6158 = vpow2.f32 %v1923_v6 }
 0x4d5   : > { %v6147_v4 = vpop.eup %6146  ;;  %v1925_v47 = vmul.f32 1.442695, %v1865_v32  ;;  %v1927_v3 = vmul.f32 1.442695, %v1866_v61 }
 0x4d6   : > { %2223 = vmatprep.mubr.f32.mxu1 %v6147_v4  ;;  %v1836_v41 = vpop.xlane.xlu1 %1835  ;;  %v9223_v5 = vadd.f32 %v6147_v4, %v6145_v21  ;;  %v10850_v4 = vld [vmem:[#allocation118_spill] sm:$0xff] }
 0x4d7   : > { %6160 = vpow2.f32 %v1925_v47  ;;  %2224 = vmatmul.mubr.f32.gmra.mxu1 %v6145_v21  ;;  %v1867_v52 = vsub.f32 %v10838_v9, %v1836_v41  ;;  %v1868_v11 = vsub.f32 %v10839_v40, %v1836_v41  ;;  %v6459_v9 = vld [vmem:[%s7063_s28 + $0x198] sm:$0xff] }
 0x4d8   : > { %10837 = vst [vmem:[#allocation103_spill] sm:$0xff] %v9223_v5  ;;  %v6149_v60 = vpop.eup %6148  ;;  %6162 = vpow2.f32 %v1927_v3  ;;  %v10851_v3 = vld [vmem:[#allocation88_spill] sm:$0xff] }
 0x4d9   : > { %v6151_v51 = vpop.eup %6150  ;;  %v1929_v14 = vmul.f32 1.442695, %v1867_v52  ;;  %v1931_v18 = vmul.f32 1.442695, %v1868_v11 }
 0x4da   : > { %2228 = vmatprep.mubr.f32.mxu1 %v6151_v51  ;;  %v2722_v54 = vpop.xlane.xlu1 %2721  ;;  %v9227_v59 = vadd.f32 %v6151_v51, %v6149_v60  ;;  %v9251_v51 = vpop.f32.mrf.mxu0 }
 0x4db   : > { %6164 = vpow2.f32 %v1929_v14  ;;  %2229 = vmatmul.mubr.f32.gmra.mxu1 %v6149_v60  ;;  %v2768_v38 = vsub.f32 %v10841_v50, %v2722_v54  ;;  %v2769_v20 = vsub.f32 %v10842_v15, %v2722_v54  ;;  %v10853_v54 = vld [vmem:[#allocation87_spill] sm:$0xff] }
 0x4dc   : > { %10840 = vst [vmem:[#allocation114_spill] sm:$0xff] %v9227_v59  ;;  %v6153_v22 = vpop.eup %6152  ;;  %6166 = vpow2.f32 %v1931_v18 }
 0x4dd   : > { %v6155_v26 = vpop.eup %6154  ;;  %v2800_v2 = vmul.f32 1.442695, %v2768_v38  ;;  %v2802_v46 = vmul.f32 1.442695, %v2769_v20  ;;  %v10854_v38 = vld [vmem:[#allocation121_spill] sm:$0xff] }
 0x4de   : > { %2233 = vmatprep.mubr.f32.mxu1 %v6155_v26  ;;  %v2725_v25 = vpop.xlane.xlu0 %2724  ;;  %v9231_v13 = vadd.f32 %v6155_v26, %v6153_v22  ;;  %v3625_v26 = vmax.f32 %v9243_v29, %v9251_v51 }
 0x4df   : > { %6168 = vpow2.f32 %v2800_v2  ;;  %v2770_v10 = vsub.f32 %v10844_v42, %v2725_v25  ;;  %v2771_v37 = vsub.f32 %v10845_v16, %v2725_v25  ;;  %2234 = vmatmul.mubr.f32.gmra.mxu1 %v6153_v22  ;;  %3833 = vrot.lane.b32.xlu1 %v6457_v24, %s6775_s2 }
 0x4e0   : > { %10843 = vst [vmem:[#allocation105_spill] sm:$0xff] %v9231_v13  ;;  %v6157_v49 = vpop.eup %6156  ;;  %6170 = vpow2.f32 %v2802_v46 }
 0x4e1   : > { %v6159_v35 = vpop.eup %6158  ;;  %v2804_v17 = vmul.f32 1.442695, %v2770_v10  ;;  %v2806_v55 = vmul.f32 1.442695, %v2771_v37  ;;  %v10855_v10 = vld [vmem:[#allocation89_spill] sm:$0xff]  ;;  %v10856_v37 = vld [vmem:[#allocation90_spill] sm:$0xff] }
 0x4e2   : > { %2238 = vmatprep.mubr.f32.mxu1 %v6159_v35  ;;  %v2728_v8 = vpop.xlane.xlu1 %2727  ;;  %v9237_v62 = vadd.f32 %v6159_v35, %v6157_v49 }
 0x4e3   : > { %6172 = vpow2.f32 %v2804_v17  ;;  %2239 = vmatmul.mubr.f32.gmra.mxu1 %v6157_v49  ;;  %v2772_v23 = vsub.f32 %v10847_v12, %v2728_v8  ;;  %v2773_v63 = vsub.f32 %v10848_v58, %v2728_v8  ;;  %3831 = vrot.lane.b32.xlu1 %v6458_v28, %s6775_s2 }
 0x4e4   : > { %10846 = vst [vmem:[#allocation106_spill] sm:$0xff] %v9237_v62  ;;  %v6161_v6 = vpop.eup %6160  ;;  %6174 = vpow2.f32 %v2806_v55 }
 0x4e5   : > { %v6163_v33 = vpop.eup %6162  ;;  %v2808_v7 = vmul.f32 1.442695, %v2772_v23  ;;  %v2810_v32 = vmul.f32 1.442695, %v2773_v63  ;;  %v10857_v23 = vld [vmem:[#allocation120_spill] sm:$0xff] }
 0x4e6   : > { %2243 = vmatprep.mubr.f32.mxu1 %v6163_v33  ;;  %v2731_v61 = vpop.xlane.xlu0 %2730  ;;  %v9245_v21 = vadd.f32 %v6163_v33, %v6161_v6  ;;  %v10858_v63 = vld [vmem:[#allocation92_spill] sm:$0xff] }
 0x4e7   : > { %6176 = vpow2.f32 %v2808_v7  ;;  %v2774_v47 = vsub.f32 %v10850_v4, %v2731_v61  ;;  %v2775_v41 = vsub.f32 %v10851_v3, %v2731_v61  ;;  %2244 = vmatmul.mubr.f32.gmra.mxu1 %v6161_v6  ;;  %3861 = vrot.lane.b32.xlu1 %v6459_v9, %s6775_s2  ;;  %v10859_v3 = vld [vmem:[#allocation91_spill] sm:$0xff] }
 0x4e8   : > { %10849 = vst [vmem:[#allocation113_spill] sm:$0xff] %v9245_v21  ;;  %v6165_v52 = vpop.eup %6164  ;;  %6178 = vpow2.f32 %v2810_v32  ;;  %v10860_v9 = vld [vmem:[#allocation123_spill] sm:$0xff] }
 0x4e9   : > { %v6167_v40 = vpop.eup %6166  ;;  %v2812_v11 = vmul.f32 1.442695, %v2774_v47  ;;  %v2814_v60 = vmul.f32 1.442695, %v2775_v41 }
 0x4ea   : > { %2248 = vmatprep.mubr.f32.mxu1 %v6167_v40  ;;  %v2734_v14 = vpop.xlane.xlu1 %2733  ;;  %v9253_v18 = vadd.f32 %v6167_v40, %v6165_v52 }
 0x4eb   : > { %6180 = vpow2.f32 %v2812_v11  ;;  %2249 = vmatmul.mubr.f32.gmra.mxu1 %v6165_v52  ;;  %v2776_v50 = vsub.f32 %v10853_v54, %v2734_v14  ;;  %v2777_v15 = vsub.f32 %v10854_v38, %v2734_v14 }
 0x4ec   : > { %10852 = vst [vmem:[#allocation108_spill] sm:$0xff] %v9253_v18  ;;  %v6169_v20 = vpop.eup %6168  ;;  %6182 = vpow2.f32 %v2814_v60 }
 0x4ed   : > { %v6171_v22 = vpop.eup %6170  ;;  %v2816_v2 = vmul.f32 1.442695, %v2776_v50  ;;  %v2818_v46 = vmul.f32 1.442695, %v2777_v15  ;;  %v10861_v15 = vld [vmem:[#allocation93_spill] sm:$0xff] }
 0x4ee   : > { %3072 = vmatprep.mubr.f32.mxu1 %v6171_v22  ;;  %v2737_v25 = vpop.xlane.xlu1 %2736  ;;  %v9259_v42 = vadd.f32 %v6171_v22, %v6169_v20 }
 0x4ef   : > { %6184 = vpow2.f32 %v2816_v2  ;;  %v2778_v16 = vsub.f32 %v10855_v10, %v2737_v25  ;;  %v2779_v24 = vsub.f32 %v10856_v37, %v2737_v25  ;;  %3626 = vmax.xlane.f32.xlu0 %v3625_v26  ;;  %v10862_v26 = vld [vmem:[#allocation94_spill] sm:$0xff] }
 0x4f0   : > { %v6173_v49 = vpop.eup %6172  ;;  %6186 = vpow2.f32 %v2818_v46 }
 0x4f1   : > { %v6175_v35 = vpop.eup %6174  ;;  %v2820_v17 = vmul.f32 1.442695, %v2778_v16  ;;  %v2822_v55 = vmul.f32 1.442695, %v2779_v24 }
 0x4f2   : > { %v2740_v8 = vpop.xlane.xlu0 %2739  ;;  %v9263_v12 = vadd.f32 %v6175_v35, %v6173_v49 }
 0x4f3   : > { %6188 = vpow2.f32 %v2820_v17  ;;  %v2780_v58 = vsub.f32 %v10857_v23, %v2740_v8  ;;  %v2781_v28 = vsub.f32 %v10858_v63, %v2740_v8  ;;  %v9282_v8 = vpop.f32.mrf.mxu0  ;;  %v10863_v63 = vld [vmem:[#allocation122_spill] sm:$0xff] }
 0x4f4   : > { %v6177_v6 = vpop.eup %6176  ;;  %6190 = vpow2.f32 %v2822_v55 }
 0x4f5   : > { %v6179_v33 = vpop.eup %6178  ;;  %v2824_v7 = vmul.f32 1.442695, %v2780_v58  ;;  %v2826_v32 = vmul.f32 1.442695, %v2781_v28 }
 0x4f6   : > { %v2915_v61 = vpop.permute.xlu0 %2914  ;;  %v2743_v4 = vpop.xlane.xlu1 %2742  ;;  %v9267_v47 = vadd.f32 %v6179_v33, %v6177_v6 }
 0x4f7   : > { %6192 = vpow2.f32 %v2824_v7  ;;  %v2782_v41 = vsub.f32 %v10859_v3, %v2743_v4  ;;  %v2783_v52 = vsub.f32 %v10860_v9, %v2743_v4  ;;  %5562 = vmatpush3.msra.mxu1 %v2915_v61  ;;  %v10864_v7 = vld [vmem:[#allocation96_spill] sm:$0xff] }
 0x4f8   : > { %v6181_v40 = vpop.eup %6180  ;;  %6194 = vpow2.f32 %v2826_v32  ;;  %v6460_v9 = vld [vmem:[%s7063_s28 + $0x1a8] sm:$0xff] }
 0x4f9   : > { %v6183_v11 = vpop.eup %6182  ;;  %v2828_v60 = vmul.f32 1.442695, %v2782_v41  ;;  %v2830_v14 = vmul.f32 1.442695, %v2783_v52 }
 0x4fa   : > { %v2945_v54 = vpop.permute.xlu0 %2944  ;;  %v2746_v50 = vpop.xlane.xlu1 %2745  ;;  %v9271_v38 = vadd.f32 %v6183_v11, %v6181_v40 }
 0x4fb   : > { %6196 = vpow2.f32 %v2828_v60  ;;  %v2784_v22 = vsub.f32 %v10861_v15, %v2746_v50  ;;  %v2785_v2 = vsub.f32 %v10862_v26, %v2746_v50  ;;  %5563 = vmatprep.subr.mxu1 %v2945_v54  ;;  %v10865_v60 = vld [vmem:[#allocation95_spill] sm:$0xff]  ;;  %v10866_v54 = vld [vmem:[#allocation125_spill] sm:$0xff] }
 0x4fc   : > { %v9275_v46 = vpop.eup %6184  ;;  %6198 = vpow2.f32 %v2830_v14 }
 0x4fd   : > { %v6187_v25 = vpop.eup %6186  ;;  %v2832_v10 = vmul.f32 1.442695, %v2784_v22  ;;  %v2834_v16 = vmul.f32 1.442695, %v2785_v2  ;;  %v6461_v2 = vld [vmem:[%s7063_s28 + $0x98] sm:$0xff] }
 0x4fe   : > { %v2913_v37 = vpop.permute.xlu0 %2912  ;;  %v9278_v24 = vadd.f32 %v6187_v25, %v9275_v46 }
 0x4ff   : > { %6200 = vpow2.f32 %v2832_v10  ;;  %5564 = vmatpush3.msra.mxu1 %v2913_v37  ;;  %v10867_v37 = vld [vmem:[#allocation97_spill] sm:$0xff] }
 0x500   : > { %v9280_v17 = vpop.eup %6188  ;;  %6202 = vpow2.f32 %v2834_v16  ;;  %3073 = vmatmul.mubr.f32.vlgmr.msra.gmra.mxu1 %v6169_v20  ;;  %v9293_v20 = vpop.f32.mrf.mxu0 }
 0x501   : > { %v6191_v55 = vpop.eup %6190  ;;  %3077 = vmatprep.mubr.f32.mxu1 %v6175_v35  ;;  %v3628_v22 = vmax.f32 %v9282_v8, %v9293_v20 }
 0x502   : > { %v2752_v23 = vpop.xlane.xlu1 %2751  ;;  %v9285_v58 = vadd.f32 %v6191_v55, %v9280_v17 }
 0x503   : > { %v2788_v28 = vsub.f32 %v10863_v63, %v2752_v23  ;;  %v2789_v32 = vsub.f32 %v10864_v7, %v2752_v23  ;;  %v10868_v63 = vld [vmem:[#allocation98_spill] sm:$0xff] }
 0x504   : > { %v9289_v61 = vpop.eup %6192  ;;  %3078 = vmatmul.mubr.f32.gmra.mxu1 %v6173_v49 }
 0x505   : > { %v6195_v4 = vpop.eup %6194  ;;  %v2840_v3 = vmul.f32 1.442695, %v2788_v28  ;;  %v2842_v41 = vmul.f32 1.442695, %v2789_v32  ;;  %3863 = vrot.lane.b32.xlu0 %v6460_v9, %s6775_s2  ;;  %3082 = vmatprep.mubr.f32.mxu1 %v6179_v33 }
 0x506   : > { %v2755_v35 = vpop.xlane.xlu1 %2754  ;;  %v9296_v52 = vadd.f32 %v6195_v4, %v9289_v61 }
 0x507   : > { %6204 = vpow2.f32 %v2840_v3  ;;  %v2790_v14 = vsub.f32 %v10865_v60, %v2755_v35  ;;  %v2791_v50 = vsub.f32 %v10866_v54, %v2755_v35  ;;  %v10869_v35 = vld [vmem:[#allocation124_spill] sm:$0xff] }
 0x508   : > { %v9300_v49 = vpop.eup %6196  ;;  %6206 = vpow2.f32 %v2842_v41  ;;  %3083 = vmatmul.mubr.f32.gmra.mxu1 %v6177_v6  ;;  %v6462_v41 = vld [vmem:[%s7063_s28 + $0x188] sm:$0xff] }
 0x509   : > { %v6199_v15 = vpop.eup %6198  ;;  %v2844_v33 = vmul.f32 1.442695, %v2790_v14  ;;  %v2846_v26 = vmul.f32 1.442695, %v2791_v50  ;;  %3829 = vrot.lane.b32.xlu0 %v6461_v2, %s6775_s2  ;;  %3087 = vmatprep.mubr.f32.mxu1 %v6183_v11  ;;  %v10870_v14 = vld [vmem:[#allocation100_spill] sm:$0xff] }
 0x50a   : > { %v2758_v10 = vpop.xlane.xlu1 %2757  ;;  %v9307_v16 = vadd.f32 %v6199_v15, %v9300_v49  ;;  %v10872_v2 = vld [vmem:[#allocation112_spill] sm:$0xff] }
 0x50b   : > { %6208 = vpow2.f32 %v2844_v33  ;;  %v2792_v23 = vsub.f32 %v10867_v37, %v2758_v10  ;;  %v2793_v6 = vsub.f32 %v10868_v63, %v2758_v10  ;;  %3629 = vmax.xlane.f32.xlu1 %v3628_v22  ;;  %v6463_v22 = vld [vmem:[%s7063_s28 + $0x88] sm:$0xff] }
 0x50c   : > { %v6201_v28 = vpop.eup %6200  ;;  %6210 = vpow2.f32 %v2846_v26  ;;  %3088 = vmatmul.mubr.f32.gmra.mxu1 %v6181_v40 }
 0x50d   : > { %v6203_v7 = vpop.eup %6202  ;;  %v2848_v32 = vmul.f32 1.442695, %v2792_v23  ;;  %v2850_v3 = vmul.f32 1.442695, %v2793_v6  ;;  %3859 = vrot.lane.b32.xlu0 %v6462_v41, %s6775_s2  ;;  %3092 = vmatprep.mubr.f32.mxu1 %v6187_v25  ;;  %v10871_v25 = vld [vmem:[#allocation99_spill] sm:$0xff]  ;;  %v6464_v6 = vld [vmem:[%s7063_s28 + $0x178] sm:$0xff] }
 0x50e   : > { %v2761_v11 = vpop.xlane.xlu1 %2760  ;;  %v9313_v9 = vadd.f32 %v6203_v7, %v6201_v28 }
 0x50f   : > { %6212 = vpow2.f32 %v2848_v32  ;;  %v2794_v60 = vsub.f32 %v10869_v35, %v2761_v11  ;;  %v2795_v54 = vsub.f32 %v10870_v14, %v2761_v11  ;;  %v10875_v11 = vld [vmem:[#allocation102_spill] sm:$0xff] }
 0x510   : > { %6214 = vpow2.f32 %v2850_v3  ;;  %3093 = vmatmul.mubr.f32.gmra.mxu1 %v9275_v46  ;;  %v10874_v3 = vld [vmem:[#allocation101_spill] sm:$0xff] }
 0x511   : > { %v2852_v40 = vmul.f32 1.442695, %v2794_v60  ;;  %v2854_v50 = vmul.f32 1.442695, %v2795_v54  ;;  %3827 = vrot.lane.b32.xlu0 %v6463_v22, %s6775_s2  ;;  %3097 = vmatprep.mubr.f32.mxu1 %v6191_v55  ;;  %v6465_v22 = vld [vmem:[%s7063_s28 + $0x78] sm:$0xff] }
 0x512   : > { %v2764_v33 = vpop.xlane.xlu1 %2763 }
 0x513   : > { %6216 = vpow2.f32 %v2852_v40  ;;  %v2796_v26 = vsub.f32 %v10871_v25, %v2764_v33  ;;  %v2797_v10 = vsub.f32 %v10872_v2, %v2764_v33  ;;  %v6466_v25 = vld [vmem:[%s7063_s28 + $0x168] sm:$0xff] }
 0x514   : > { %v9322_v37 = vpop.eup %6204  ;;  %6218 = vpow2.f32 %v2854_v50  ;;  %3098 = vmatmul.mubr.f32.gmra.mxu1 %v9280_v17 }
 0x515   : > { %v9325_v23 = vpop.eup %6206  ;;  %v2856_v46 = vmul.f32 1.442695, %v2796_v26  ;;  %v2858_v63 = vmul.f32 1.442695, %v2797_v10  ;;  %3857 = vrot.lane.b32.xlu0 %v6464_v6, %s6775_s2  ;;  %3102 = vmatprep.mubr.f32.mxu1 %v6195_v4 }
 0x516   : > { %v2767_v55 = vpop.xlane.xlu1 %2766  ;;  %v9331_v32 = vadd.f32 %v9325_v23, %v9322_v37 }
 0x517   : > { %6220 = vpow2.f32 %v2856_v46  ;;  %v2798_v41 = vsub.f32 %v10874_v3, %v2767_v55  ;;  %v2799_v35 = vsub.f32 %v10875_v11, %v2767_v55  ;;  %v6467_v46 = vld [vmem:[%s7063_s28 + $0x158] sm:$0xff] }
 0x518   : > { %10873 = vst [vmem:[#allocation107_spill] sm:$0xff] %v9331_v32  ;;  %v9335_v17 = vpop.eup %6208  ;;  %6222 = vpow2.f32 %v2858_v63  ;;  %3103 = vmatmul.mubr.f32.gmra.mxu1 %v9289_v61 }
 0x519   : > { %v9338_v60 = vpop.eup %6210  ;;  %v2860_v14 = vmul.f32 1.442695, %v2798_v41  ;;  %v2862_v4 = vmul.f32 1.442695, %v2799_v35  ;;  %3107 = vmatprep.mubr.f32.mxu1 %v6199_v15 }
 0x51a   : > { %v3874_v54 = vpop.permute.xlu1 %3873  ;;  %v9342_v40 = vadd.f32 %v9338_v60, %v9335_v17 }
 0x51b   : > { %6224 = vpow2.f32 %v2860_v14  ;;  %5677 = vmatprep.subr.mxu1 %v3874_v54 }
 0x51c   : > { %10876 = vst [vmem:[#allocation116_spill] sm:$0xff] %v9342_v40  ;;  %v9344_v50 = vpop.eup %6212  ;;  %6226 = vpow2.f32 %v2862_v4  ;;  %3825 = vrot.lane.b32.xlu1 %v6465_v22, %s6775_s2  ;;  %3108 = vmatmul.mubr.f32.gmra.mxu1 %v9300_v49 }
 0x51d   : > { %v6215_v61 = vpop.eup %6214  ;;  %3112 = vmatprep.mubr.f32.mxu1 %v6203_v7 }
 0x51e   : > { %v9350_v15 = vadd.f32 %v6215_v61, %v9344_v50  ;;  %v3872_v3 = vpop.permute.xlu1 %3871 }
 0x520   : > { %10877 = vst [vmem:[#allocation109_spill] sm:$0xff] %v9350_v15  ;;  %v9352_v33 = vpop.eup %6216  ;;  %3855 = vrot.lane.b32.xlu1 %v6466_v25, %s6775_s2  ;;  %3113 = vmatmul.mubr.f32.gmra.mxu1 %v6201_v28  ;;  %v9371_v28 = vpop.f32.mrf.mxu0 }
 0x521   : > { %v6219_v26 = vpop.eup %6218 }
 0x522   : > { %v9357_v2 = vadd.f32 %v6219_v26, %v9352_v33  ;;  %v9373_v41 = vpop.f32.mrf.mxu0  ;;  %v3840_v25 = vpop.permute.xlu1 %3839 }
 0x523   : > { %v3631_v4 = vmax.f32 %v9371_v28, %v9373_v41 }
 0x524   : > { %10878 = vst [vmem:[#allocation110_spill] sm:$0xff] %v9357_v2  ;;  %v9359_v10 = vpop.eup %6220  ;;  %3853 = vrot.lane.b32.xlu1 %v6467_v46, %s6775_s2 }
 0x525   : > { %v6223_v49 = vpop.eup %6222 }
 0x526   : > { %v9364_v7 = vadd.f32 %v6223_v49, %v9359_v10  ;;  %v3870_v15 = vpop.permute.xlu1 %3869 }
 0x528   : > { %10879 = vst [vmem:[#allocation115_spill] sm:$0xff] %v9364_v7  ;;  %v9366_v63 = vpop.eup %6224 }
 0x529   : > { %v6227_v6 = vpop.eup %6226 }
 0x52a   : > { %v9369_v55 = vadd.f32 %v6227_v6, %v9366_v63 }
 0x52c   : > { %10880 = vst [vmem:[#allocation127_spill] sm:$0xff] %v9369_v55 }
 0x52f   : > { %v2749_v11 = vpop.xlane.xlu0 %2748 }
 0x530   : > { %v2786_v35 = vsub.f32 %v9039_v36, %v2749_v11  ;;  %v2787_v14 = vsub.f32 %v9043_v34, %v2749_v11  ;;  %v9381_v36 = vpop.f32.mrf.mxu0 }
 0x532   : > { %v2836_v54 = vmul.f32 1.442695, %v2786_v35  ;;  %v2838_v22 = vmul.f32 1.442695, %v2787_v14  ;;  %v9383_v14 = vpop.f32.mrf.mxu0 }
 0x533   : > { %v9379_v46 = vpop.xlane.xlu0 %3620 }
 0x534   : > { %6228 = vpow2.f32 %v2836_v54  ;;  %3632 = vmax.xlane.f32.xlu0 %v3631_v4 }
 0x535   : > { %6230 = vpow2.f32 %v2838_v22  ;;  %v6469_v22 = vld [vmem:[%s7063_s28 + $0x58] sm:$0xff] }
 0x537   : > { %v3842_v62 = vpop.permute.xlu0 %3841 }
 0x538   : > { %5678 = vmatpush3.msra.mxu1 %v3842_v62  ;;  %v3634_v62 = vmax.f32 %v9381_v36, %v9383_v14 }
 0x539   : > { %5679 = vmatprep.subr.mxu1 %v3872_v3  ;;  %v6468_v3 = vld [vmem:[%s7063_s28 + $0x68] sm:$0xff] }
 0x53a   : > { %5680 = vmatpush3.msra.mxu1 %v3840_v25 }
 0x53b   : > { %v3838_v55 = vpop.permute.xlu0 %3837  ;;  %5681 = vmatprep.subr.mxu1 %v3870_v15  ;;  %v3668_v15 = vsub.f32 %v9127_v56, %v9379_v46  ;;  %v6470_v56 = vld [vmem:[%s7063_s28 + $0x148] sm:$0xff] }
 0x53c   : > { %5682 = vmatpush3.msra.mxu1 %v3838_v55 }
 0x53f   : > { %v3868_v34 = vpop.permute.xlu0 %3867 }
 0x540   : > { %5683 = vmatprep.subr.mxu1 %v3868_v34  ;;  %v6475_v34 = vld [vmem:[%s7063_s28 + $0x28] sm:$0xff] }
 0x541   : > { %v6229_v11 = vpop.eup %6228 }
 0x542   : > { %v6231_v35 = vpop.eup %6230 }
 0x543   : > { %3117 = vmatprep.mubr.f32.mxu1 %v6231_v35  ;;  %v3836_v4 = vpop.permute.xlu0 %3835  ;;  %v9385_v54 = vadd.f32 %v6231_v35, %v6229_v11  ;;  %v6476_v35 = vld [vmem:[%s7063_s28 + $0x118] sm:$0xff] }
 0x544   : > { %3118 = vmatmul.mubr.f32.gmra.mxu1 %v6229_v11 }
 0x545   : > { %10881 = vst [vmem:[#allocation126_spill] sm:$0xff] %v9385_v54  ;;  %3122 = vmatprep.mubr.f32.mxu1 %v9325_v23  ;;  %5684 = vmatpush3.msra.mxu1 %v3836_v4  ;;  %v3701_v23 = vmul.f32 1.442695, %v3668_v15  ;;  %v6478_v15 = vld [vmem:[%s7063_s28 + $0x8] sm:$0xff] }
 0x547   : > { %v3866_v55 = vpop.permute.xlu0 %3865  ;;  %6232 = vpow2.f32 %v3701_v23 }
 0x548   : > { %3123 = vmatmul.mubr.f32.gmra.mxu1 %v9322_v37  ;;  %3635 = vmax.xlane.f32.xlu1 %v3634_v62  ;;  %v9402_v37 = vpop.f32.mrf.mxu0  ;;  %v6477_v62 = vld [vmem:[%s7063_s28 + $0x18] sm:$0xff] }
 0x549   : > { %3127 = vmatprep.mubr.f32.mxu1 %v9338_v60  ;;  %5685 = vmatprep.subr.mxu1 %v3866_v55 }
 0x54a   : > { %3823 = vrot.lane.b32.xlu0 %v6468_v3, %s6775_s2  ;;  %v9407_v60 = vpop.f32.mrf.mxu0 }
 0x54c   : > { %3128 = vmatmul.mubr.f32.gmra.mxu1 %v9335_v17  ;;  %v6471_v17 = vld [vmem:[%s7063_s28 + $0x48] sm:$0xff] }
 0x54d   : > { %3132 = vmatprep.mubr.f32.mxu1 %v6215_v61 }
 0x54e   : > { %3821 = vrot.lane.b32.xlu0 %v6469_v22, %s6775_s2 }
 0x550   : > { %3133 = vmatmul.mubr.f32.gmra.mxu1 %v9344_v50  ;;  %v6472_v50 = vld [vmem:[%s7063_s28 + $0x38] sm:$0xff] }
 0x551   : > { %3137 = vmatprep.mubr.f32.mxu1 %v6219_v26  ;;  %v6473_v26 = vld [vmem:[%s7063_s28 + $0x138] sm:$0xff] }
 0x552   : > { %3851 = vrot.lane.b32.xlu0 %v6470_v56, %s6775_s2 }
 0x554   : > { %3138 = vmatmul.mubr.f32.gmra.mxu1 %v9352_v33  ;;  %v9416_v33 = vpop.f32.mrf.mxu0  ;;  %v9418_v25 = vpop.eup %6232 }
 0x555   : > { %3142 = vmatprep.mubr.f32.mxu1 %v6223_v49 }
 0x556   : > { %3819 = vrot.lane.b32.xlu0 %v6471_v17, %s6775_s2 }
 0x557   : > { %v9409_v61 = vpop.xlane.xlu1 %3623 }
 0x558   : > { %3143 = vmatmul.mubr.f32.gmra.mxu1 %v9359_v10  ;;  %v6474_v10 = vld [vmem:[%s7063_s28 + $0x128] sm:$0xff]  ;;  %v3669_v13 = vsub.f32 %v9188_v44, %v9409_v61 }
 0x559   : > { %3147 = vmatprep.mubr.f32.mxu1 %v6227_v6  ;;  %3817 = vrot.lane.b32.xlu1 %v6472_v50, %s6775_s2  ;;  %v9424_v6 = vpop.f32.mrf.mxu0  ;;  %v3637_v50 = vmax.f32 %v9402_v37, %v9407_v60 }
 0x55a   : > { %3849 = vrot.lane.b32.xlu0 %v6473_v26, %s6775_s2  ;;  %v3703_v54 = vmul.f32 1.442695, %v3669_v13 }
 0x55b   : > { %v3834_v49 = vpop.permute.xlu1 %3833  ;;  %v9428_v11 = vpop.f32.mrf.mxu0 }
 0x55c   : > { %3148 = vmatmul.mubr.f32.gmra.mxu1 %v9366_v63  ;;  %6234 = vpow2.f32 %v3703_v54 }
 0x55d   : > { %3971 = vmatprep.mubr.f32.mxu1 %v9418_v25  ;;  %3847 = vrot.lane.b32.xlu1 %v6474_v10, %s6775_s2  ;;  %v9432_v4 = vpop.f32.mrf.mxu0 }
 0x55e   : > { %5686 = vmatpush3.msra.mxu1 %v3834_v49 }
 0x55f   : > { %v9436_v63 = vpop.f32.mrf.mxu0  ;;  %v3832_v10 = vpop.permute.xlu1 %3831 }
 0x561   : > { %3815 = vrot.lane.b32.xlu1 %v6475_v34, %s6775_s2  ;;  %v9440_v55 = vpop.f32.mrf.mxu0 }
 0x563   : > { %v9446_v22 = vpop.f32.mrf.mxu0 }
 0x565   : > { %3845 = vrot.lane.b32.xlu1 %v6476_v35, %s6775_s2  ;;  %v9454_v26 = vpop.f32.mrf.mxu0 }
 0x569   : > { %3813 = vrot.lane.b32.xlu1 %v6477_v62, %s6775_s2  ;;  %v3640_v62 = vmax.f32 %v9416_v33, %v9424_v6 }
 0x56d   : > { %3811 = vrot.lane.b32.xlu1 %v6478_v15, %s6775_s2 }
 0x56f   : > { %v9442_v3 = vpop.f32.mrf.mxu1 }
 0x570   : > { %10882 = vst [vmem:[#allocation129_spill] sm:$0xff] %v9442_v3  ;;  %v3862_v3 = vpop.permute.xlu1 %3861 }
 0x571   : > { %v9444_v23 = vpop.f32.mrf.mxu1 }
 0x572   : > { %10883 = vst [vmem:[#allocation128_spill] sm:$0xff] %v9444_v23 }
 0x573   : > { %v9448_v56 = vpop.f32.mrf.mxu1 }
 0x574   : > { %10884 = vst [vmem:[#allocation131_spill] sm:$0xff] %v9448_v56  ;;  %v9466_v56 = vpop.f32.mrf.mxu0 }
 0x575   : > { %v9450_v17 = vpop.f32.mrf.mxu1  ;;  %10889 = vst [vmem:[#allocation134_spill] sm:$0xff] %v9466_v56 }
 0x576   : > { %10885 = vst [vmem:[#allocation130_spill] sm:$0xff] %v9450_v17  ;;  %v9472_v59 = vpop.f32.mrf.mxu0 }
 0x577   : > { %v9456_v49 = vpop.f32.mrf.mxu1  ;;  %10892 = vst [vmem:[#allocation139_spill] sm:$0xff] %v9472_v59 }
 0x578   : > { %10886 = vst [vmem:[#allocation133_spill] sm:$0xff] %v9456_v49  ;;  %v9458_v34 = vpop.xlane.xlu0 %3626 }
 0x579   : > { %v9460_v35 = vpop.f32.mrf.mxu1  ;;  %3638 = vmax.xlane.f32.xlu0 %v3637_v50 }
 0x57a   : > { %10887 = vst [vmem:[#allocation132_spill] sm:$0xff] %v9460_v35 }
 0x57b   : > { %v9464_v15 = vpop.f32.mrf.mxu1 }
 0x57c   : > { %10888 = vst [vmem:[#allocation135_spill] sm:$0xff] %v9464_v15  ;;  %v3864_v17 = vpop.permute.xlu0 %3863  ;;  %v9478_v15 = vpop.f32.mrf.mxu0 }
 0x57d   : > { %v9468_v23 = vpop.f32.mrf.mxu1  ;;  %3641 = vmax.xlane.f32.xlu0 %v3640_v62  ;;  %5687 = vmatprep.subr.mxu1 %v3864_v17 }
 0x57e   : > { %10890 = vst [vmem:[#allocation137_spill] sm:$0xff] %v9468_v23  ;;  %5688 = vmatpush3.msra.mxu1 %v3832_v10  ;;  %v9484_v10 = vpop.f32.mrf.mxu0 }
 0x57f   : > { %v9470_v49 = vpop.f32.mrf.mxu1  ;;  %5689 = vmatprep.subr.mxu1 %v3862_v3  ;;  %v3655_v44 = vmax.f32 %v9478_v15, %v9484_v10 }
 0x580   : > { %10891 = vst [vmem:[#allocation136_spill] sm:$0xff] %v9470_v49  ;;  %v3830_v50 = vpop.permute.xlu0 %3829 }
 0x581   : > { %v9474_v35 = vpop.f32.mrf.mxu1  ;;  %5690 = vmatpush3.msra.mxu1 %v3830_v50  ;;  %v9490_v50 = vpop.f32.mrf.mxu0 }
 0x582   : > { %10893 = vst [vmem:[#allocation138_spill] sm:$0xff] %v9474_v35 }
 0x583   : > { %v9476_v18 = vpop.f32.mrf.mxu1 }
 0x584   : > { %10894 = vst [vmem:[#allocation141_spill] sm:$0xff] %v9476_v18  ;;  %v3860_v32 = vpop.permute.xlu0 %3859 }
 0x585   : > { %v9480_v7 = vpop.f32.mrf.mxu1  ;;  %5691 = vmatprep.subr.mxu1 %v3860_v32  ;;  %v3643_v32 = vmax.f32 %v9428_v11, %v9432_v4 }
 0x586   : > { %10895 = vst [vmem:[#allocation140_spill] sm:$0xff] %v9480_v7 }
 0x587   : > { %v9482_v17 = vpop.f32.mrf.mxu1 }
 0x588   : > { %10896 = vst [vmem:[#allocation143_spill] sm:$0xff] %v9482_v17  ;;  %v3828_v62 = vpop.permute.xlu0 %3827  ;;  %v9496_v17 = vpop.f32.mrf.mxu0 }
 0x589   : > { %v9486_v3 = vpop.f32.mrf.mxu1  ;;  %5692 = vmatpush3.msra.mxu1 %v3828_v62  ;;  %v3649_v62 = vmax.f32 %v9446_v22, %v9454_v26 }
 0x58a   : > { %10897 = vst [vmem:[#allocation142_spill] sm:$0xff] %v9486_v3  ;;  %v6479_v3 = vld [vmem:[%s7063_s28 + $0x108] sm:$0xff]  ;;  %v9504_v2 = vpop.f32.mrf.mxu0  ;;  %s10141_s28 = scalar_lea.vmem [#allocation12], %s4942_s5  ;;  %s10991_s5 = sld [smem:[#allocation19_spill]] }
 0x58b   : > { %v9488_v23 = vpop.f32.mrf.mxu1  ;;  %s4786_s20 = sshll.u32 %s10141_s28, 4  ;;  %s10229_s20 = int_to_ptr.vmem [resolvable:$true] %s4786_s20 }
 0x58c   : > { %10898 = vst [vmem:[#allocation145_spill] sm:$0xff] %v9488_v23  ;;  %v3858_v35 = vpop.permute.xlu0 %3857  ;;  %s6630_s16 = scalar_lea.vmem %s10229_s20, 2048 }
 0x58d   : > { %v9492_v49 = vpop.f32.mrf.mxu1  ;;  %5693 = vmatprep.subr.mxu1 %v3858_v35  ;;  %p6631_p6 = scmp.ne.s32.totalorder %s10229_s20, %s6630_s16 }
 0x58e   : > { %10899 = vst [vmem:[#allocation144_spill] sm:$0xff] %v9492_v49 }
 0x58f   : > { %v5445_v7 = vpop.f32.mrf.mxu1  ;;  %p6632_p0 = pnand %p6631_p6, %p6974_p5 }
 0x591   : > { %v5446_v18 = vpop.f32.mrf.mxu1  ;;  %3644 = vmax.xlane.f32.xlu1 %v3643_v32  ;;  %p6633_p3 = pneg %p6632_p0 }
 0x592   : > { %v9498_v21 = vadd.f32 %v5446_v18, %v5445_v7  ;;  %v3652_v18 = vmax.f32 %v9466_v56, %v9472_v59  ;;  %v3670_v7 = vsub.f32 %v9200_v57, %v9409_v61  ;;  %v3658_v61 = vmax.f32 %v9490_v50, %v9496_v17 }
 0x593   : > { %v5448_v23 = vpop.f32.mrf.mxu1  ;;  %3843 = vrot.lane.b32.xlu0 %v6479_v3, %s6775_s2 }
 0x594   : > { %10900 = vst [vmem:[#allocation147_spill] sm:$0xff] %v9498_v21  ;;  %v3630_v35 = vpop.xlane.xlu1 %3629  ;;  %v9514_v21 = vpop.f32.mrf.mxu0 }
 0x595   : > { %v5449_v49 = vpop.f32.mrf.mxu1  ;;  %3650 = vmax.xlane.f32.xlu1 %v3649_v62  ;;  %v3674_v54 = vsub.f32 %v9293_v20, %v3630_v35 }
 0x596   : > { %v9508_v40 = vadd.f32 %v5449_v49, %v5448_v23  ;;  %v3705_v23 = vmul.f32 1.442695, %v3670_v7  ;;  %v3673_v7 = vsub.f32 %v9282_v8, %v3630_v35 }
 0x597   : > { %v5451_v32 = vpop.f32.mrf.mxu1 }
 0x598   : > { %10901 = vst [vmem:[#allocation146_spill] sm:$0xff] %v9508_v40  ;;  %v3826_v3 = vpop.permute.xlu1 %3825  ;;  %v9520_v40 = vpop.f32.mrf.mxu0  ;;  %6236 = vpow2.f32 %v3705_v23  ;;  %v3711_v23 = vmul.f32 1.442695, %v3673_v7  ;;  %v3671_v7 = vsub.f32 %v9243_v29, %v9458_v34 }
 0x599   : > { %v5452_v5 = vpop.f32.mrf.mxu1  ;;  %3653 = vmax.xlane.f32.xlu1 %v3652_v18  ;;  %5694 = vmatpush3.msra.mxu1 %v3826_v3 }
 0x59a   : > { %v9516_v62 = vadd.f32 %v5452_v5, %v5451_v32  ;;  %v9526_v13 = vpop.f32.mrf.mxu0  ;;  %6238 = vpow2.f32 %v3711_v23 }
 0x59b   : > { %v5454_v49 = vpop.f32.mrf.mxu1  ;;  %v3664_v3 = vmax.f32 %v9520_v40, %v9526_v13 }
 0x59c   : > { %10902 = vst [vmem:[#allocation149_spill] sm:$0xff] %v9516_v62  ;;  %v3856_v56 = vpop.permute.xlu1 %3855 }
 0x59d   : > { %v5455_v59 = vpop.f32.mrf.mxu1  ;;  %3656 = vmax.xlane.f32.xlu1 %v3655_v44  ;;  %5695 = vmatprep.subr.mxu1 %v3856_v56  ;;  %v3667_v56 = vsub.f32 %v9119_v39, %v9379_v46 }
 0x59e   : > { %v9522_v57 = vadd.f32 %v5455_v59, %v5454_v49 }
 0x59f   : > { %v5457_v5 = vpop.f32.mrf.mxu1  ;;  %v3699_v62 = vmul.f32 1.442695, %v3667_v56 }
 0x5a0   : > { %10903 = vst [vmem:[#allocation148_spill] sm:$0xff] %v9522_v57  ;;  %v3713_v57 = vmul.f32 1.442695, %v3674_v54 }
 0x5a1   : > { %v5458_v18 = vpop.f32.mrf.mxu1  ;;  %3659 = vmax.xlane.f32.xlu1 %v3658_v61 }
 0x5a2   : > { %v9529_v32 = vadd.f32 %v5458_v18, %v5457_v5  ;;  %v9541_v18 = vpop.eup %6234  ;;  %6240 = vpow2.f32 %v3713_v57  ;;  %v3672_v57 = vsub.f32 %v9251_v51, %v9458_v34 }
 0x5a3   : > { %v5460_v59 = vpop.f32.mrf.mxu1  ;;  %6242 = vpow2.f32 %v3699_v62  ;;  %v3707_v62 = vmul.f32 1.442695, %v3671_v7 }
 0x5a4   : > { %v3709_v54 = vmul.f32 1.442695, %v3672_v57 }
 0x5a5   : > { %v5461_v44 = vpop.f32.mrf.mxu1  ;;  %3665 = vmax.xlane.f32.xlu1 %v3664_v3  ;;  %v9543_v35 = vpop.eup %6236  ;;  %v3646_v3 = vmax.f32 %v9436_v63, %v9440_v55  ;;  %6244 = vpow2.f32 %v3707_v62 }
 0x5a6   : > { %v9536_v49 = vadd.f32 %v5461_v44, %v5460_v59  ;;  %6246 = vpow2.f32 %v3709_v54 }
 0x5a7   : > { %v5463_v61 = vpop.f32.mrf.mxu1  ;;  %v9559_v29 = vpop.eup %6238 }
 0x5a9   : > { %v5464_v8 = vpop.f32.mrf.mxu1  ;;  %2865 = vadd.xlane.f32.xlu1 %v9259_v42  ;;  %v3766_v42 = vadd.f32 %v9543_v35, %v9541_v18 }
 0x5aa   : > { %v9539_v5 = vadd.f32 %v5464_v8, %v5463_v61 }
 0x5ab   : > { %v5466_v20 = vpop.f32.mrf.mxu1 }
 0x5ad   : > { %v5467_v39 = vpop.f32.mrf.mxu1  ;;  %1937 = vadd.xlane.f32.xlu1 %v9146_v31  ;;  %v3661_v31 = vmax.f32 %v9504_v2, %v9514_v21 }
 0x5ae   : > { %v9546_v46 = vadd.f32 %v5467_v39, %v5466_v20 }
 0x5af   : > { %v9561_v59 = vpop.eup %6240 }
 0x5b0   : > { %v9563_v56 = vpop.eup %6242  ;;  %v3772_v51 = vadd.f32 %v9561_v59, %v9559_v29 }
 0x5b1   : > { %3767 = vadd.xlane.f32.xlu1 %v3766_v42  ;;  %v3763_v34 = vadd.f32 %v9563_v56, %v9418_v25 }
 0x5b2   : > { %3647 = vmax.xlane.f32.xlu0 %v3646_v3  ;;  %v9579_v25 = vpop.eup %6244 }
 0x5b5   : > { %2871 = vadd.xlane.f32.xlu1 %v9267_v47 }
 0x5b6   : > { %3662 = vmax.xlane.f32.xlu0 %v3661_v31 }
 0x5b9   : > { %1943 = vadd.xlane.f32.xlu1 %v9162_v45 }
 0x5ba   : > { %1934 = vadd.xlane.f32.xlu0 %v9139_v43  ;;  %v3854_v43 = vpop.permute.xlu1 %3853 }
 0x5bd   : > { %v3633_v47 = vpop.xlane.xlu0 %3632  ;;  %3773 = vadd.xlane.f32.xlu1 %v3772_v51 }
 0x5be   : > { %v3675_v44 = vsub.f32 %v9371_v28, %v3633_v47  ;;  %v3676_v23 = vsub.f32 %v9373_v41, %v3633_v47  ;;  %3764 = vadd.xlane.f32.xlu0 %v3763_v34  ;;  %v9581_v41 = vpop.eup %6246 }
 0x5bf   : > { %v3769_v3 = vadd.f32 %v9581_v41, %v9579_v25 }
 0x5c0   : > { %v3715_v61 = vmul.f32 1.442695, %v3675_v44  ;;  %v3717_v8 = vmul.f32 1.442695, %v3676_v23  ;;  %v9573_v20 = vpop.f32.mrf.mxu1 }
 0x5c1   : > { %v3824_v45 = vpop.permute.xlu0 %3823  ;;  %2877 = vadd.xlane.f32.xlu1 %v9278_v24 }
 0x5c2   : > { %2868 = vadd.xlane.f32.xlu0 %v9263_v12  ;;  %v9577_v39 = vpop.f32.mrf.mxu1  ;;  %5696 = vmatpush3.msra.mxu1 %v3824_v45  ;;  %6248 = vpow2.f32 %v3715_v61 }
 0x5c3   : > { %5697 = vmatprep.subr.mxu1 %v3854_v43  ;;  %6250 = vpow2.f32 %v3717_v8 }
 0x5c4   : > { %v5568_v28 = vpop.f32.mrf.mxu1 }
 0x5c5   : > { %v3822_v7 = vpop.permute.xlu0 %3821  ;;  %1949 = vadd.xlane.f32.xlu1 %v9180_v30 }
 0x5c6   : > { %1940 = vadd.xlane.f32.xlu0 %v9154_v27  ;;  %v5569_v24 = vpop.f32.mrf.mxu1  ;;  %5698 = vmatpush3.msra.mxu1 %v3822_v7 }
 0x5c7   : > { %v9585_v42 = vadd.f32 %v5569_v24, %v5568_v28 }
 0x5c8   : > { %v5571_v12 = vpop.f32.mrf.mxu1 }
 0x5c9   : > { %v3852_v57 = vpop.permute.xlu0 %3851 }
 0x5ca   : > { %3770 = vadd.xlane.f32.xlu0 %v3769_v3  ;;  %v5572_v62 = vpop.f32.mrf.mxu1  ;;  %5699 = vmatprep.subr.mxu1 %v3852_v57 }
 0x5cb   : > { %v9589_v31 = vadd.f32 %v5572_v62, %v5571_v12 }
 0x5cc   : > { %v5574_v54 = vpop.f32.mrf.mxu1 }
 0x5cd   : > { %v3820_v51 = vpop.permute.xlu0 %3819 }
 0x5ce   : > { %2874 = vadd.xlane.f32.xlu0 %v9271_v38  ;;  %v5575_v30 = vpop.f32.mrf.mxu1  ;;  %5700 = vmatpush3.msra.mxu1 %v3820_v51 }
 0x5cf   : > { %v9592_v27 = vadd.f32 %v5575_v30, %v5574_v54  ;;  %v9594_v34 = vpop.eup %6248 }
 0x5d0   : > { %v5577_v47 = vpop.f32.mrf.mxu1  ;;  %v9596_v44 = vpop.eup %6250 }
 0x5d1   : > { %v3850_v23 = vpop.permute.xlu0 %3849  ;;  %v3636_v61 = vpop.xlane.xlu1 %3635  ;;  %v3775_v12 = vadd.f32 %v9596_v44, %v9594_v34 }
 0x5d2   : > { %v3677_v8 = vsub.f32 %v9381_v36, %v3636_v61  ;;  %v3678_v45 = vsub.f32 %v9383_v14, %v3636_v61  ;;  %1946 = vadd.xlane.f32.xlu0 %v9170_v0  ;;  %v5578_v43 = vpop.f32.mrf.mxu1  ;;  %5701 = vmatprep.subr.mxu1 %v3850_v23 }
 0x5d3   : > { %v9601_v38 = vadd.f32 %v5578_v43, %v5577_v47 }
 0x5d4   : > { %v3719_v28 = vmul.f32 1.442695, %v3677_v8  ;;  %v3721_v7 = vmul.f32 1.442695, %v3678_v45  ;;  %v5580_v24 = vpop.f32.mrf.mxu1 }
 0x5d5   : > { %v3818_v3 = vpop.permute.xlu1 %3817 }
 0x5d6   : > { %6252 = vpow2.f32 %v3719_v28  ;;  %3776 = vadd.xlane.f32.xlu0 %v3775_v12  ;;  %v5581_v57 = vpop.f32.mrf.mxu1  ;;  %5702 = vmatpush3.msra.mxu1 %v3818_v3 }
 0x5d7   : > { %6254 = vpow2.f32 %v3721_v7  ;;  %v9605_v36 = vadd.f32 %v5581_v57, %v5580_v24 }
 0x5d8   : > { %v5583_v14 = vpop.f32.mrf.mxu1 }
 0x5d9   : > { %v3848_v0 = vpop.permute.xlu1 %3847 }
 0x5da   : > { %v5584_v62 = vpop.f32.mrf.mxu1  ;;  %2880 = vadd.xlane.f32.xlu0 %v9285_v58  ;;  %5703 = vmatprep.subr.mxu1 %v3848_v0 }
 0x5db   : > { %v9608_v54 = vadd.f32 %v5584_v62, %v5583_v14 }
 0x5dc   : > { %v5586_v51 = vpop.f32.mrf.mxu1 }
 0x5dd   : > { %v3816_v30 = vpop.permute.xlu1 %3815 }
 0x5de   : > { %1952 = vadd.xlane.f32.xlu0 %v9192_v19  ;;  %v5587_v47 = vpop.f32.mrf.mxu1  ;;  %5704 = vmatpush3.msra.mxu1 %v3816_v30 }
 0x5df   : > { %v9611_v23 = vadd.f32 %v5587_v47, %v5586_v51 }
 0x5e0   : > { %v5589_v61 = vpop.f32.mrf.mxu1 }
 0x5e1   : > { %v3846_v8 = vpop.permute.xlu1 %3845 }
 0x5e2   : > { %v5590_v45 = vpop.f32.mrf.mxu1  ;;  %5705 = vmatprep.subr.mxu1 %v3846_v8 }
 0x5e3   : > { %v9613_v43 = vpop.eup %6252  ;;  %v9615_v28 = vadd.f32 %v5590_v45, %v5589_v61 }
 0x5e4   : > { %v9617_v58 = vpop.eup %6254 }
 0x5e5   : > { %v3778_v7 = vadd.f32 %v9617_v58, %v9613_v43  ;;  %v3814_v24 = vpop.permute.xlu1 %3813 }
 0x5e6   : > { %5706 = vmatpush3.msra.mxu1 %v3814_v24 }
 0x5e7   : > { %3779 = vadd.xlane.f32.xlu1 %v3778_v7 }
 0x5e9   : > { %v3812_v45 = vpop.permute.xlu1 %3811 }
 0x5eb   : > { %2883 = vadd.xlane.f32.xlu1 %v9296_v52 }
 0x5ef   : > { %1955 = vadd.xlane.f32.xlu1 %v9204_v48 }
 0x602   : > { %v3639_v19 = vpop.xlane.xlu0 %3638 }
 0x603   : > { %v3679_v12 = vsub.f32 %v9402_v37, %v3639_v19  ;;  %v3680_v3 = vsub.f32 %v9407_v60, %v3639_v19 }
 0x604   : > { %v5592_v57 = vpop.f32.mrf.mxu1 }
 0x605   : > { %v3723_v14 = vmul.f32 1.442695, %v3679_v12  ;;  %v3725_v0 = vmul.f32 1.442695, %v3680_v3 }
 0x606   : > { %v5593_v62 = vpop.f32.mrf.mxu1  ;;  %v3642_v51 = vpop.xlane.xlu0 %3641 }
 0x607   : > { %6256 = vpow2.f32 %v3723_v14  ;;  %v9625_v30 = vadd.f32 %v5593_v62, %v5592_v57  ;;  %v3681_v47 = vsub.f32 %v9416_v33, %v3642_v51  ;;  %v3682_v61 = vsub.f32 %v9424_v6, %v3642_v51 }
 0x608   : > { %6258 = vpow2.f32 %v3725_v0  ;;  %v5595_v52 = vpop.f32.mrf.mxu1 }
 0x609   : > { %v3727_v48 = vmul.f32 1.442695, %v3681_v47  ;;  %v3729_v8 = vmul.f32 1.442695, %v3682_v61 }
 0x60a   : > { %v5596_v37 = vpop.f32.mrf.mxu1  ;;  %v3844_v7 = vpop.permute.xlu0 %3843 }
 0x60b   : > { %6260 = vpow2.f32 %v3727_v48  ;;  %v9629_v60 = vadd.f32 %v5596_v37, %v5595_v52  ;;  %5707 = vmatprep.subr.mxu1 %v3844_v7 }
 0x60c   : > { %6262 = vpow2.f32 %v3729_v8  ;;  %v5598_v24 = vpop.f32.mrf.mxu1  ;;  %5708 = vmatpush3.msra.mxu1 %v3812_v45 }
 0x60d   : > { %3972 = vmatmul.mubr.f32.vlgmr.msra.gmra.mxu1 %v9563_v56 }
 0x60e   : > { %v5599_v19 = vpop.f32.mrf.mxu1  ;;  %3976 = vmatprep.mubr.f32.mxu1 %v9543_v35 }
 0x60f   : > { %v9633_v33 = vadd.f32 %v5599_v19, %v5598_v24 }
 0x610   : > { %v5601_v6 = vpop.f32.mrf.mxu1 }
 0x611   : > { %3977 = vmatmul.mubr.f32.gmra.mxu1 %v9541_v18 }
 0x612   : > { %v5602_v12 = vpop.f32.mrf.mxu1  ;;  %3981 = vmatprep.mubr.f32.mxu1 %v9581_v41 }
 0x613   : > { %v9637_v3 = vadd.f32 %v5602_v12, %v5601_v6  ;;  %v10904_v6 = vld [vmem:[#allocation126_spill] sm:$0xff] }
 0x614   : > { %v6257_v57 = vpop.eup %6256  ;;  %v5604_v14 = vpop.f32.mrf.mxu1 }
 0x615   : > { %v6259_v0 = vpop.eup %6258  ;;  %3982 = vmatmul.mubr.f32.gmra.mxu1 %v9579_v25 }
 0x616   : > { %v5605_v62 = vpop.f32.mrf.mxu1  ;;  %3986 = vmatprep.mubr.f32.mxu1 %v9561_v59  ;;  %v3781_v56 = vadd.f32 %v6259_v0, %v6257_v57 }
 0x617   : > { %v9641_v35 = vadd.f32 %v5605_v62, %v5604_v14  ;;  %v10905_v14 = vld [vmem:[#allocation103_spill] sm:$0xff] }
 0x618   : > { %v6261_v51 = vpop.eup %6260  ;;  %3782 = vadd.xlane.f32.xlu0 %v3781_v56  ;;  %v5607_v47 = vpop.f32.mrf.mxu1 }
 0x619   : > { %v6263_v18 = vpop.eup %6262  ;;  %3987 = vmatmul.mubr.f32.gmra.mxu1 %v9559_v29 }
 0x61a   : > { %v5608_v41 = vpop.f32.mrf.mxu1  ;;  %3991 = vmatprep.mubr.f32.mxu1 %v9596_v44  ;;  %v3645_v61 = vpop.xlane.xlu1 %3644  ;;  %v3784_v52 = vadd.f32 %v6263_v18, %v6261_v51 }
 0x61b   : > { %v9645_v48 = vadd.f32 %v5608_v41, %v5607_v47  ;;  %v3683_v25 = vsub.f32 %v9428_v11, %v3645_v61  ;;  %v3684_v59 = vsub.f32 %v9432_v4, %v3645_v61  ;;  %v10906_v61 = vld [vmem:[#allocation139_spill] sm:$0xff] }
 0x61c   : > { %2886 = vadd.xlane.f32.xlu0 %v9307_v16  ;;  %3785 = vadd.xlane.f32.xlu1 %v3784_v52 }
 0x61d   : > { %v3731_v8 = vmul.f32 1.442695, %v3683_v25  ;;  %v3733_v45 = vmul.f32 1.442695, %v3684_v59  ;;  %3992 = vmatmul.mubr.f32.gmra.mxu1 %v9594_v34  ;;  %v10907_v59 = vld [vmem:[#allocation116_spill] sm:$0xff] }
 0x61e   : > { %3996 = vmatprep.mubr.f32.mxu1 %v9617_v58  ;;  %v3651_v29 = vpop.xlane.xlu1 %3650 }
 0x61f   : > { %6264 = vpow2.f32 %v3731_v8  ;;  %v3687_v11 = vsub.f32 %v9446_v22, %v3651_v29  ;;  %v3688_v16 = vsub.f32 %v9454_v26, %v3651_v29 }
 0x620   : > { %6266 = vpow2.f32 %v3733_v45  ;;  %1958 = vadd.xlane.f32.xlu0 %v9213_v1  ;;  %2889 = vadd.xlane.f32.xlu1 %v9313_v9  ;;  %v10908_v45 = vld [vmem:[#allocation134_spill] sm:$0xff] }
 0x621   : > { %3997 = vmatmul.mubr.f32.gmra.mxu1 %v9613_v43  ;;  %v3739_v34 = vmul.f32 1.442695, %v3687_v11  ;;  %v3741_v44 = vmul.f32 1.442695, %v3688_v16 }
 0x622   : > { %4001 = vmatprep.mubr.f32.mxu1 %v6259_v0  ;;  %v3654_v4 = vpop.xlane.xlu1 %3653 }
 0x623   : > { %6268 = vpow2.f32 %v3739_v34  ;;  %v3690_v52 = vsub.f32 %v10906_v61, %v3654_v4  ;;  %v3689_v29 = vsub.f32 %v10908_v45, %v3654_v4  ;;  %v10909_v34 = vld [vmem:[#allocation105_spill] sm:$0xff] }
 0x624   : > { %1961 = vadd.xlane.f32.xlu1 %v9219_v53  ;;  %6270 = vpow2.f32 %v3741_v44 }
 0x625   : > { %4002 = vmatmul.mubr.f32.gmra.mxu1 %v6257_v57  ;;  %v3745_v16 = vmul.f32 1.442695, %v3690_v52  ;;  %v3743_v44 = vmul.f32 1.442695, %v3689_v29 }
 0x626   : > { %4006 = vmatprep.mubr.f32.mxu1 %v6263_v18  ;;  %v3657_v58 = vpop.xlane.xlu1 %3656 }
 0x627   : > { %v3691_v22 = vsub.f32 %v9478_v15, %v3657_v58  ;;  %v3692_v43 = vsub.f32 %v9484_v10, %v3657_v58 }
 0x629   : > { %4007 = vmatmul.mubr.f32.gmra.mxu1 %v6261_v51  ;;  %v3747_v53 = vmul.f32 1.442695, %v3691_v22  ;;  %v3749_v24 = vmul.f32 1.442695, %v3692_v43 }
 0x62a   : > { %v3660_v1 = vpop.xlane.xlu1 %3659 }
 0x62b   : > { %6272 = vpow2.f32 %v3747_v53  ;;  %v3694_v58 = vsub.f32 %v9496_v17, %v3660_v1  ;;  %v3693_v4 = vsub.f32 %v9490_v50, %v3660_v1 }
 0x62c   : > { %v6265_v9 = vpop.eup %6264  ;;  %6274 = vpow2.f32 %v3749_v24 }
 0x62d   : > { %v6267_v37 = vpop.eup %6266  ;;  %v3753_v43 = vmul.f32 1.442695, %v3694_v58 }
 0x62e   : > { %4011 = vmatprep.mubr.f32.mxu1 %v6267_v37  ;;  %v9660_v26 = vpop.xlane.xlu1 %3665  ;;  %v3787_v7 = vadd.f32 %v6267_v37, %v6265_v9 }
 0x62f   : > { %4012 = vmatmul.mubr.f32.gmra.mxu1 %v6265_v9 }
 0x630   : > { %3788 = vadd.xlane.f32.xlu0 %v3787_v7  ;;  %v6269_v12 = vpop.eup %6268 }
 0x631   : > { %v6271_v15 = vpop.eup %6270 }
 0x632   : > { %v9662_v19 = vpop.xlane.xlu1 %2865  ;;  %v3793_v0 = vadd.f32 %v6271_v15, %v6269_v12 }
 0x634   : > { %2892 = vadd.xlane.f32.xlu0 %v10904_v6  ;;  %v10910_v6 = vld [vmem:[#allocation110_spill] sm:$0xff] }
 0x636   : > { %v9665_v57 = vpop.xlane.xlu1 %1937 }
 0x638   : > { %1964 = vadd.xlane.f32.xlu0 %v10905_v14  ;;  %v6273_v8 = vpop.eup %6272 }
 0x63a   : > { %v9668_v10 = vpop.xlane.xlu1 %3767 }
 0x63b   : > { %v3648_v62 = vpop.xlane.xlu0 %3647 }
 0x63c   : > { %v3685_v56 = vsub.f32 %v9436_v63, %v3648_v62  ;;  %v3686_v51 = vsub.f32 %v9440_v55, %v3648_v62  ;;  %3794 = vadd.xlane.f32.xlu0 %v3793_v0  ;;  %v6275_v63 = vpop.eup %6274  ;;  %v3751_v0 = vmul.f32 1.442695, %v3693_v4 }
 0x63d   : > { %v3799_v37 = vadd.f32 %v6275_v63, %v6273_v8 }
 0x63e   : > { %v3735_v47 = vmul.f32 1.442695, %v3685_v56  ;;  %v3737_v18 = vmul.f32 1.442695, %v3686_v51  ;;  %v9672_v41 = vpop.xlane.xlu1 %2871  ;;  %v3698_v51 = vsub.f32 %v9526_v13, %v9660_v26 }
 0x63f   : > { %v3663_v25 = vpop.xlane.xlu0 %3662 }
 0x640   : > { %6276 = vpow2.f32 %v3735_v47  ;;  %2898 = vadd.xlane.f32.xlu0 %v10907_v59  ;;  %v3696_v53 = vsub.f32 %v9514_v21, %v3663_v25  ;;  %v3695_v62 = vsub.f32 %v9504_v2, %v3663_v25  ;;  %v10911_v47 = vld [vmem:[#allocation113_spill] sm:$0xff]  ;;  %v3761_v61 = vmul.f32 1.442695, %v3698_v51  ;;  %v10912_v25 = vld [vmem:[#allocation115_spill] sm:$0xff] }
 0x641   : > { %6278 = vpow2.f32 %v3737_v18  ;;  %v3697_v18 = vsub.f32 %v9520_v40, %v9660_v26  ;;  %v10913_v59 = vld [vmem:[#allocation107_spill] sm:$0xff]  ;;  %v10914_v40 = vld [vmem:[#allocation108_spill] sm:$0xff]  ;;  %v10915_v26 = vld [vmem:[#allocation114_spill] sm:$0xff] }
 0x642   : > { %v9677_v11 = vpop.xlane.xlu1 %1943  ;;  %6280 = vpow2.f32 %v3745_v16  ;;  %v3757_v50 = vmul.f32 1.442695, %v3696_v53  ;;  %v3755_v2 = vmul.f32 1.442695, %v3695_v62 }
 0x643   : > { %v9679_v55 = vpop.xlane.xlu0 %1934  ;;  %6282 = vpow2.f32 %v3743_v44  ;;  %v3759_v45 = vmul.f32 1.442695, %v3697_v18 }
 0x644   : > { %1970 = vadd.xlane.f32.xlu0 %v10909_v34  ;;  %6284 = vpow2.f32 %v3753_v43  ;;  %v10917_v34 = vld [vmem:[#allocation140_spill] sm:$0xff]  ;;  %v10918_v43 = vld [vmem:[#allocation127_spill] sm:$0xff] }
 0x646   : > { %v9683_v9 = vpop.xlane.xlu1 %3773 }
 0x647   : > { %v9685_v22 = vpop.xlane.xlu0 %3764 }
 0x648   : > { %3800 = vadd.xlane.f32.xlu0 %v3799_v37 }
 0x64a   : > { %v9688_v7 = vpop.xlane.xlu1 %2877 }
 0x64b   : > { %v9691_v24 = vpop.xlane.xlu0 %2868 }
 0x64c   : > { %2904 = vadd.xlane.f32.xlu0 %v10910_v6 }
 0x64d   : > { %v6277_v17 = vpop.eup %6276 }
 0x64e   : > { %v6279_v14 = vpop.eup %6278  ;;  %v1950_v56 = vpop.xlane.xlu1 %1949 }
 0x64f   : > { %4016 = vmatprep.mubr.f32.mxu1 %v6279_v14  ;;  %6286 = vrcp.f32 %v1950_v56  ;;  %v9697_v1 = vpop.xlane.xlu0 %1940  ;;  %v3790_v21 = vadd.f32 %v6279_v14, %v6277_v17  ;;  %v6281_v13 = vpop.eup %6280  ;;  %v10919_v14 = vld [vmem:[#allocation38_spill] sm:$0xff] }
 0x650   : > { %4017 = vmatmul.mubr.f32.gmra.mxu1 %v6277_v17  ;;  %1976 = vadd.xlane.f32.xlu0 %v10911_v47  ;;  %6288 = vpow2.f32 %v3751_v0  ;;  %v6283_v29 = vpop.eup %6282  ;;  %v10920_v0 = vld [vmem:[#allocation109_spill] sm:$0xff] }
 0x651   : > { %3791 = vadd.xlane.f32.xlu1 %v3790_v21  ;;  %4021 = vmatprep.mubr.f32.mxu1 %v6271_v15  ;;  %6290 = vpow2.f32 %v3757_v50  ;;  %v6285_v16 = vpop.eup %6284  ;;  %v3796_v37 = vadd.f32 %v6283_v29, %v6281_v13  ;;  %v10922_v50 = vld [vmem:[#allocation106_spill] sm:$0xff] }
 0x652   : > { %6292 = vpow2.f32 %v3755_v2  ;;  %v10923_v2 = vld [vmem:[#allocation31_spill] sm:$0xff] }
 0x653   : > { %v9702_v52 = vpop.xlane.xlu0 %3770  ;;  %6294 = vpow2.f32 %v3761_v61  ;;  %v10924_v61 = vld [vmem:[#allocation37_spill] sm:$0xff] }
 0x654   : > { %4022 = vmatmul.mubr.f32.gmra.mxu1 %v6269_v12  ;;  %2907 = vadd.xlane.f32.xlu0 %v10912_v25  ;;  %6296 = vpow2.f32 %v3759_v45  ;;  %v10916_v12 = vld [vmem:[#allocation141_spill] sm:$0xff] }
 0x655   : > { %2895 = vadd.xlane.f32.xlu1 %v10913_v59  ;;  %4026 = vmatprep.mubr.f32.mxu1 %v6281_v13  ;;  %v5438_v44 = vadd.f32 %v10917_v34, %v10916_v12  ;;  %v10927_v34 = vld [vmem:[#allocation27_spill] sm:$0xff] }
 0x657   : > { %v9706_v15 = vpop.xlane.xlu0 %2874 }
 0x658   : > { %4027 = vmatmul.mubr.f32.gmra.mxu1 %v6283_v29  ;;  %1979 = vadd.xlane.f32.xlu0 %v10914_v40  ;;  %v10925_v29 = vld [vmem:[#allocation143_spill] sm:$0xff]  ;;  %v10926_v40 = vld [vmem:[#allocation142_spill] sm:$0xff] }
 0x659   : > { %1967 = vadd.xlane.f32.xlu1 %v10915_v26  ;;  %4031 = vmatprep.mubr.f32.mxu1 %v6275_v63  ;;  %v5441_v26 = vadd.f32 %v10926_v40, %v10925_v29  ;;  %v10935_v29 = vld [vmem:[#allocation33_spill] sm:$0xff]  ;;  %v4225_v40 = vld [vmem:[#allocation9 + $0xe0] sm:$0xff] }
 0x65b   : > { %v9712_v58 = vpop.xlane.xlu0 %1946 }
 0x65c   : > { %v6287_v4 = vpop.eup %6286  ;;  %4032 = vmatmul.mubr.f32.gmra.mxu1 %v6273_v8  ;;  %2910 = vadd.xlane.f32.xlu0 %v10918_v43  ;;  %v10921_v8 = vld [vmem:[#allocation29_spill] sm:$0xff] }
 0x65d   : > { %3797 = vadd.xlane.f32.xlu1 %v3796_v37  ;;  %4036 = vmatprep.mubr.f32.mxu1 %v6285_v16  ;;  %v9715_v53 = vmul.f32 %v6287_v4, %v5438_v44  ;;  %v6289_v6 = vpop.eup %6288  ;;  %v10928_v43 = vld [vmem:[#allocation129_spill] sm:$0xff] }
 0x65e   : > { %v6291_v63 = vpop.eup %6290  ;;  %v3802_v18 = vadd.f32 %v6289_v6, %v6285_v16 }
 0x65f   : > { %v9717_v17 = vpop.xlane.xlu0 %3776  ;;  %v6293_v62 = vpop.eup %6292 }
 0x660   : > { %1202 = vadd.xlane.f32.xlu0 %v10919_v14  ;;  %4037 = vmatmul.mubr.f32.gmra.mxu1 %v6289_v6  ;;  %v6295_v51 = vpop.eup %6294  ;;  %v3805_v13 = vadd.f32 %v6293_v62, %v6291_v63  ;;  %v10929_v6 = vld [vmem:[#allocation128_spill] sm:$0xff] }
 0x661   : > { %2901 = vadd.xlane.f32.xlu1 %v10920_v0  ;;  %4041 = vmatprep.mubr.f32.mxu1 %v6291_v63  ;;  %v6297_v21 = vpop.eup %6296  ;;  %v5423_v63 = vadd.f32 %v10929_v6, %v10928_v43  ;;  %v10930_v14 = vld [vmem:[#allocation28_spill] sm:$0xff]  ;;  %v10931_v0 = vld [vmem:[#allocation30_spill] sm:$0xff]  ;;  %v4217_v6 = vld [vmem:[#allocation9 + $0xa0] sm:$0xff] }
 0x662   : > { %v4218_v43 = vld [vmem:[#allocation9 + $0xa8] sm:$0xff] }
 0x663   : > { %v2881_v56 = vpop.xlane.xlu0 %2880 }
 0x664   : > { %6298 = vrcp.f32 %v2881_v56  ;;  %1208 = vadd.xlane.f32.xlu0 %v10921_v8  ;;  %4042 = vmatmul.mubr.f32.gmra.mxu1 %v6293_v62  ;;  %v10933_v8 = vld [vmem:[#allocation144_spill] sm:$0xff] }
 0x665   : > { %1973 = vadd.xlane.f32.xlu1 %v10922_v50  ;;  %4046 = vmatprep.mubr.f32.mxu1 %v6295_v51 }
 0x667   : > { %v1953_v47 = vpop.xlane.xlu0 %1952 }
 0x668   : > { %6300 = vrcp.f32 %v1953_v47  ;;  %1214 = vadd.xlane.f32.xlu0 %v10923_v2  ;;  %4047 = vmatmul.mubr.f32.gmra.mxu1 %v6297_v21 }
 0x669   : > { %3803 = vadd.xlane.f32.xlu1 %v3802_v18  ;;  %6302 = vrcp.f32 %v9679_v55  ;;  %v3808_v55 = vadd.f32 %v6297_v21, %v6295_v51  ;;  %v10932_v51 = vld [vmem:[#allocation145_spill] sm:$0xff]  ;;  %v10934_v21 = vld [vmem:[#allocation32_spill] sm:$0xff] }
 0x66a   : > { %v5444_v50 = vadd.f32 %v10933_v8, %v10932_v51  ;;  %v4212_v51 = vld [vmem:[#allocation9 + $0x78] sm:$0xff]  ;;  %v4211_v8 = vld [vmem:[#allocation9 + $0x70] sm:$0xff] }
 0x66d   : > { %1196 = vadd.xlane.f32.xlu1 %v10924_v61  ;;  %v5567_v61 = vadd.f32 %v9577_v39, %v9573_v20  ;;  %v4222_v20 = vld [vmem:[#allocation9 + $0xc8] sm:$0xff]  ;;  %v4221_v39 = vld [vmem:[#allocation9 + $0xc0] sm:$0xff] }
 0x670   : > { %v9726_v25 = vpop.xlane.xlu1 %3779 }
 0x671   : > { %v6299_v59 = vpop.eup %6298  ;;  %3806 = vadd.xlane.f32.xlu1 %v3805_v13 }
 0x672   : > { %v9729_v45 = vmul.f32 %v6299_v59, %v9605_v36  ;;  %v4228_v59 = vld [vmem:[#allocation9 + $0xf8] sm:$0xff] }
 0x673   : > { %4273 = vmatprep.subr.mxu0 %v4228_v59  ;;  %v10936_v59 = vld [vmem:[#allocation133_spill] sm:$0xff] }
 0x674   : > { %v2884_v16 = vpop.xlane.xlu1 %2883 }
 0x675   : > { %v6301_v12 = vpop.eup %6300  ;;  %6304 = vrcp.f32 %v2884_v16  ;;  %1199 = vadd.xlane.f32.xlu1 %v10927_v34  ;;  %v4223_v16 = vld [vmem:[#allocation9 + $0xd0] sm:$0xff]  ;;  %v4220_v34 = vld [vmem:[#allocation9 + $0xb8] sm:$0xff] }
 0x676   : > { %v9734_v44 = vmul.f32 %v6301_v12, %v5441_v26  ;;  %v6303_v4 = vpop.eup %6302  ;;  %v4224_v26 = vld [vmem:[#allocation9 + $0xd8] sm:$0xff] }
 0x677   : > { %v2270_v36 = vmul.f32 %v6303_v4, %v5423_v63  ;;  %v4215_v63 = vld [vmem:[#allocation9 + $0x90] sm:$0xff] }
 0x678   : > { %v1956_v37 = vpop.xlane.xlu1 %1955 }
 0x679   : > { %6306 = vrcp.f32 %v1956_v37  ;;  %3809 = vadd.xlane.f32.xlu1 %v3808_v55  ;;  %v4219_v55 = vld [vmem:[#allocation9 + $0xb0] sm:$0xff] }
 0x67a   : > { %6308 = vrcp.f32 %v9662_v19  ;;  %v4226_v19 = vld [vmem:[#allocation9 + $0xe8] sm:$0xff] }
 0x67b   : > { %6310 = vrcp.f32 %v9697_v1  ;;  %v4216_v1 = vld [vmem:[#allocation9 + $0x98] sm:$0xff] }
 0x67d   : > { %1205 = vadd.xlane.f32.xlu1 %v10930_v14 }
 0x67e   : > { %2302 = vrot.lane.b32.xlu0 %v2270_v36, %s6775_s2 }
 0x681   : > { %1211 = vadd.xlane.f32.xlu1 %v10931_v0  ;;  %v4214_v0 = vld [vmem:[#allocation9 + $0x88] sm:$0xff] }
 0x682   : > { %v6305_v62 = vpop.eup %6304 }
 0x683   : > { %v9742_v56 = vmul.f32 %v6305_v62, %v9608_v54  ;;  %v4227_v54 = vld [vmem:[#allocation9 + $0xf0] sm:$0xff]  ;;  %v4213_v62 = vld [vmem:[#allocation9 + $0x80] sm:$0xff] }
 0x684   : > { %4274 = vmatpush1.msra.mxu0 %v4227_v54  ;;  %v10937_v54 = vld [vmem:[#allocation132_spill] sm:$0xff] }
 0x685   : > { %1217 = vadd.xlane.f32.xlu1 %v10934_v21  ;;  %4275 = vmatprep.subr.mxu0 %v4226_v19  ;;  %v4210_v21 = vld [vmem:[#allocation9 + $0x68] sm:$0xff] }
 0x686   : > { %v6307_v47 = vpop.eup %6306  ;;  %4276 = vmatpush1.msra.mxu0 %v4225_v40  ;;  %v4206_v19 = vld [vmem:[#allocation9 + $0x48] sm:$0xff]  ;;  %v4205_v40 = vld [vmem:[#allocation9 + $0x40] sm:$0xff] }
 0x687   : > { %v9748_v18 = vmul.f32 %v6307_v47, %v5444_v50  ;;  %v6309_v2 = vpop.eup %6308  ;;  %4277 = vmatprep.subr.mxu0 %v4224_v26  ;;  %v4209_v47 = vld [vmem:[#allocation9 + $0x60] sm:$0xff] }
 0x688   : > { %v3169_v13 = vmul.f32 %v6309_v2, %v5567_v61  ;;  %4278 = vmatpush1.msra.mxu0 %v4223_v16  ;;  %v4208_v2 = vld [vmem:[#allocation9 + $0x58] sm:$0xff]  ;;  %v6311_v61 = vpop.eup %6310 }
 0x689   : > { %4279 = vmatprep.subr.mxu0 %v4222_v20  ;;  %v4204_v16 = vld [vmem:[#allocation9 + $0x38] sm:$0xff]  ;;  %v4203_v20 = vld [vmem:[#allocation9 + $0x30] sm:$0xff] }
 0x68a   : > { %4280 = vmatpush1.msra.mxu0 %v4221_v39 }
 0x68b   : > { %4281 = vmatprep.subr.mxu0 %v4220_v34  ;;  %v4202_v34 = vld [vmem:[#allocation9 + $0x28] sm:$0xff] }
 0x68c   : > { %4282 = vmatpush1.msra.mxu0 %v4219_v55  ;;  %v4201_v55 = vld [vmem:[#allocation9 + $0x20] sm:$0xff] }
 0x68d   : > { %4283 = vmatprep.subr.mxu0 %v4218_v43  ;;  %v4200_v43 = vld [vmem:[#allocation9 + $0x18] sm:$0xff] }
 0x68e   : > { %4284 = vmatpush1.msra.mxu0 %v4217_v6  ;;  %v4199_v6 = vld [vmem:[#allocation9 + $0x10] sm:$0xff] }
 0x68f   : > { %4285 = vmatprep.subr.mxu0 %v4216_v1 }
 0x690   : > { %4286 = vmatpush1.msra.mxu0 %v4215_v63  ;;  %v4198_v63 = vld [vmem:[#allocation9 + $0x8] sm:$0xff] }
 0x691   : > { %4287 = vmatprep.subr.mxu0 %v4214_v0  ;;  %v10938_v0 = vld [vmem:[#allocation147_spill] sm:$0xff] }
 0x692   : > { %4288 = vmatpush1.msra.mxu0 %v4213_v62 }
 0x693   : > { %4289 = vmatprep.subr.mxu0 %v4212_v51 }
 0x694   : > { %4290 = vmatpush1.msra.mxu0 %v4211_v8  ;;  %v4260_v8 = vld [vmem:[#allocation9 + $0x1f8] sm:$0xff] }
 0x695   : > { %4291 = vmatprep.subr.mxu0 %v4210_v21 }
 0x696   : > { %3201 = vrot.lane.b32.xlu1 %v3169_v13, %s6774_s26  ;;  %v4207_v13 = vld [vmem:[#allocation9 + $0x50] sm:$0xff]  ;;  %4292 = vmatpush1.msra.mxu0 %v4209_v47  ;;  %v4258_v47 = vld [vmem:[#allocation9 + $0x1e8] sm:$0xff] }
 0x697   : > { %4293 = vmatprep.subr.mxu0 %v4208_v2  ;;  %v4257_v2 = vld [vmem:[#allocation9 + $0x1e0] sm:$0xff] }
 0x698   : > { %4294 = vmatpush1.msra.mxu0 %v4207_v13 }
 0x699   : > { %4295 = vmatprep.subr.mxu0 %v4206_v19  ;;  %v4254_v19 = vld [vmem:[#allocation9 + $0x1c8] sm:$0xff] }
 0x69a   : > { %4296 = vmatpush1.msra.mxu0 %v4205_v40 }
 0x69b   : > { %4297 = vmatprep.subr.mxu0 %v4204_v16  ;;  %v4251_v16 = vld [vmem:[#allocation9 + $0x1b0] sm:$0xff] }
 0x69c   : > { %4298 = vmatpush1.msra.mxu0 %v4203_v20  ;;  %v4250_v20 = vld [vmem:[#allocation9 + $0x1a8] sm:$0xff] }
 0x69d   : > { %1220 = vadd.xlane.f32.xlu0 %v10935_v29  ;;  %v5429_v29 = vadd.f32 %v10937_v54, %v10936_v59  ;;  %4299 = vmatprep.subr.mxu0 %v4202_v34  ;;  %v4256_v54 = vld [vmem:[#allocation9 + $0x1d8] sm:$0xff] }
 0x69e   : > { %4300 = vmatpush1.msra.mxu0 %v4201_v55  ;;  %v4248_v55 = vld [vmem:[#allocation9 + $0x198] sm:$0xff] }
 0x69f   : > { %v2272_v26 = vmul.f32 %v6311_v61, %v5429_v29  ;;  %4301 = vmatprep.subr.mxu0 %v4200_v43  ;;  %v10939_v61 = vld [vmem:[#allocation146_spill] sm:$0xff]  ;;  %v4255_v29 = vld [vmem:[#allocation9 + $0x1d0] sm:$0xff]  ;;  %v9780_v43 = vpop.f32.mrf.mxu1 }
 0x6a0   : > { %4302 = vmatpush1.msra.mxu0 %v4199_v6  ;;  %v4247_v6 = vld [vmem:[#allocation9 + $0x190] sm:$0xff] }
 0x6a1   : > { %v9755_v12 = vpop.xlane.xlu0 %3782  ;;  %4303 = vmatprep.subr.mxu0 %v4198_v63  ;;  %v4245_v63 = vld [vmem:[#allocation9 + $0x180] sm:$0xff] }
 0x6a5   : > { %v2887_v37 = vpop.xlane.xlu0 %2886  ;;  %v9757_v4 = vpop.xlane.xlu1 %3785 }
 0x6a6   : > { %6312 = vrcp.f32 %v2887_v37 }
 0x6a9   : > { %v1959_v36 = vpop.xlane.xlu0 %1958  ;;  %v2890_v14 = vpop.xlane.xlu1 %2889 }
 0x6aa   : > { %6314 = vrcp.f32 %v1959_v36 }
 0x6ab   : > { %6316 = vrcp.f32 %v2890_v14  ;;  %v4197_v14 = vld [vmem:[#allocation9] sm:$0xff] }
 0x6ac   : > { %4304 = vmatpush1.msra.mxu0 %v4197_v14 }
 0x6ad   : > { %v1962_v50 = vpop.xlane.xlu1 %1961  ;;  %4305 = vmatprep.subr.mxu0 %v4260_v8  ;;  %v4242_v8 = vld [vmem:[#allocation9 + $0x168] sm:$0xff] }
 0x6ae   : > { %6318 = vrcp.f32 %v1962_v50  ;;  %v4259_v50 = vld [vmem:[#allocation9 + $0x1f0] sm:$0xff] }
 0x6af   : > { %4306 = vmatpush2.msra.mxu0 %v4259_v50  ;;  %v4241_v50 = vld [vmem:[#allocation9 + $0x160] sm:$0xff] }
 0x6b0   : > { %4307 = vmatprep.subr.mxu0 %v4258_v47 }
 0x6b1   : > { %4308 = vmatpush2.msra.mxu0 %v4257_v2  ;;  %v4240_v2 = vld [vmem:[#allocation9 + $0x158] sm:$0xff] }
 0x6b2   : > { %4309 = vmatprep.subr.mxu0 %v4256_v54  ;;  %v4239_v54 = vld [vmem:[#allocation9 + $0x150] sm:$0xff] }
 0x6b3   : > { %v6313_v39 = vpop.eup %6312  ;;  %2306 = vrot.lane.b32.xlu0 %v2272_v26, %s6775_s2  ;;  %4310 = vmatpush2.msra.mxu0 %v4255_v29  ;;  %v4252_v26 = vld [vmem:[#allocation9 + $0x1b8] sm:$0xff]  ;;  %v4238_v29 = vld [vmem:[#allocation9 + $0x148] sm:$0xff] }
 0x6b4   : > { %v9763_v37 = vmul.f32 %v6313_v39, %v9611_v23  ;;  %4311 = vmatprep.subr.mxu0 %v4254_v19  ;;  %v4249_v39 = vld [vmem:[#allocation9 + $0x1a0] sm:$0xff] }
 0x6b7   : > { %v6315_v1 = vpop.eup %6314 }
 0x6b8   : > { %v6317_v36 = vpop.eup %6316  ;;  %v9766_v62 = vmul.f32 %v6315_v1, %v10938_v0  ;;  %v4246_v1 = vld [vmem:[#allocation9 + $0x188] sm:$0xff]  ;;  %v9783_v0 = vpop.f32.mrf.mxu1 }
 0x6b9   : > { %v9768_v51 = vpop.xlane.xlu0 %3788  ;;  %v9771_v23 = vmul.f32 %v6317_v36, %v9615_v28  ;;  %v4253_v28 = vld [vmem:[#allocation9 + $0x1c0] sm:$0xff] }
 0x6ba   : > { %4312 = vmatpush2.msra.mxu0 %v4253_v28  ;;  %v10940_v28 = vld [vmem:[#allocation149_spill] sm:$0xff] }
 0x6bb   : > { %v6319_v21 = vpop.eup %6318  ;;  %4313 = vmatprep.subr.mxu0 %v4252_v26 }
 0x6bc   : > { %v9774_v13 = vmul.f32 %v6319_v21, %v10939_v61  ;;  %4314 = vmatpush2.msra.mxu0 %v4251_v16 }
 0x6bd   : > { %v2893_v59 = vpop.xlane.xlu0 %2892  ;;  %4315 = vmatprep.subr.mxu0 %v4250_v20  ;;  %v4236_v20 = vld [vmem:[#allocation9 + $0x138] sm:$0xff] }
 0x6be   : > { %6320 = vrcp.f32 %v2893_v59  ;;  %4316 = vmatpush2.msra.mxu0 %v4249_v39 }
 0x6bf   : > { %4317 = vmatprep.subr.mxu0 %v4248_v55 }
 0x6c0   : > { %4318 = vmatpush2.msra.mxu0 %v4247_v6 }
 0x6c1   : > { %v1965_v40 = vpop.xlane.xlu0 %1964  ;;  %4319 = vmatprep.subr.mxu0 %v4246_v1  ;;  %v4235_v1 = vld [vmem:[#allocation9 + $0x130] sm:$0xff] }
 0x6c2   : > { %6322 = vrcp.f32 %v1965_v40  ;;  %4320 = vmatpush2.msra.mxu0 %v4245_v63  ;;  %v4234_v63 = vld [vmem:[#allocation9 + $0x128] sm:$0xff] }
 0x6c3   : > { %6324 = vrcp.f32 %v9685_v22  ;;  %v4244_v22 = vld [vmem:[#allocation9 + $0x178] sm:$0xff] }
 0x6c4   : > { %6326 = vrcp.f32 %v9665_v57  ;;  %v4243_v57 = vld [vmem:[#allocation9 + $0x170] sm:$0xff]  ;;  %4321 = vmatprep.subr.mxu0 %v4244_v22 }
 0x6c5   : > { %v9777_v34 = vpop.xlane.xlu0 %3794  ;;  %6328 = vrcp.f32 %v9691_v24  ;;  %4322 = vmatpush2.msra.mxu0 %v4243_v57 }
 0x6c6   : > { %4323 = vmatprep.subr.mxu0 %v4242_v8 }
 0x6c7   : > { %4324 = vmatpush2.msra.mxu0 %v4241_v50  ;;  %v4232_v50 = vld [vmem:[#allocation9 + $0x118] sm:$0xff] }
 0x6c8   : > { %4325 = vmatprep.subr.mxu0 %v4240_v2  ;;  %v4231_v2 = vld [vmem:[#allocation9 + $0x110] sm:$0xff] }
 0x6c9   : > { %v2899_v36 = vpop.xlane.xlu0 %2898  ;;  %4326 = vmatpush2.msra.mxu0 %v4239_v54  ;;  %v4230_v54 = vld [vmem:[#allocation9 + $0x108] sm:$0xff] }
 0x6ca   : > { %6330 = vrcp.f32 %v2899_v36  ;;  %4327 = vmatprep.subr.mxu0 %v4238_v29  ;;  %v10942_v36 = vld [vmem:[#allocation130_spill] sm:$0xff] }
 0x6cb   : > { %v6321_v14 = vpop.eup %6320  ;;  %6332 = vrcp.f32 %v9702_v52  ;;  %v4237_v52 = vld [vmem:[#allocation9 + $0x140] sm:$0xff] }
 0x6cc   : > { %v9787_v21 = vmul.f32 %v6321_v14, %v9625_v30  ;;  %4328 = vmatpush2.msra.mxu0 %v4237_v52  ;;  %v4233_v14 = vld [vmem:[#allocation9 + $0x120] sm:$0xff] }
 0x6cd   : > { %v1971_v47 = vpop.xlane.xlu0 %1970  ;;  %v5709_v24 = vpop.f32.mrf.mxu1  ;;  %4329 = vmatprep.subr.mxu0 %v4236_v20 }
 0x6ce   : > { %6334 = vrcp.f32 %v1971_v47  ;;  %4330 = vmatpush2.msra.mxu0 %v4235_v1 }
 0x6cf   : > { %v6323_v61 = vpop.eup %6322  ;;  %v5710_v59 = vpop.f32.mrf.mxu1  ;;  %6336 = vrcp.f32 %v9668_v10  ;;  %v10941_v10 = vld [vmem:[#allocation131_spill] sm:$0xff]  ;;  %4331 = vmatprep.subr.mxu0 %v4234_v63 }
 0x6d0   : > { %v5711_v19 = vadd.f32 %v5710_v59, %v5709_v24  ;;  %v9791_v40 = vmul.f32 %v6323_v61, %v10940_v28  ;;  %v6325_v30 = vpop.eup %6324  ;;  %v5426_v22 = vadd.f32 %v10942_v36, %v10941_v10  ;;  %4332 = vmatpush2.msra.mxu0 %v4233_v14 }
 0x6d1   : > { %v9793_v26 = vpop.xlane.xlu0 %3800  ;;  %v5712_v16 = vpop.f32.mrf.mxu1  ;;  %4333 = vmatprep.subr.mxu0 %v4232_v50 }
 0x6d2   : > { %v4068_v39 = vmul.f32 %v6325_v30, %v5711_v19  ;;  %v6327_v55 = vpop.eup %6326  ;;  %v4229_v19 = vld [vmem:[#allocation9 + $0x100] sm:$0xff]  ;;  %4334 = vmatpush2.msra.mxu0 %v4231_v2 }
 0x6d3   : > { %v5713_v6 = vpop.f32.mrf.mxu1  ;;  %v6329_v47 = vpop.eup %6328  ;;  %v2271_v24 = vmul.f32 %v6327_v55, %v5426_v22  ;;  %4335 = vmatprep.subr.mxu0 %v4230_v54 }
 0x6d4   : > { %4100 = vrot.lane.b32.xlu1 %v4068_v39, %s6773_s24  ;;  %v5714_v20 = vadd.f32 %v5713_v6, %v5712_v16  ;;  %v3170_v1 = vmul.f32 %v6329_v47, %v9585_v42  ;;  %4336 = vmatpush2.msra.mxu0 %v4229_v19 }
 0x6d5   : > { %v2905_v57 = vpop.xlane.xlu0 %2904  ;;  %v5715_v8 = vpop.f32.mrf.mxu1 }
 0x6d6   : > { %6338 = vrcp.f32 %v2905_v57 }
 0x6d7   : > { %v6331_v61 = vpop.eup %6330  ;;  %v5716_v59 = vpop.f32.mrf.mxu1 }
 0x6d8   : > { %v5717_v29 = vadd.f32 %v5716_v59, %v5715_v8  ;;  %2304 = vrot.lane.b32.xlu1 %v2271_v24, %s6775_s2  ;;  %v9800_v52 = vmul.f32 %v6331_v61, %v9633_v33  ;;  %v6333_v28 = vpop.eup %6332 }
 0x6d9   : > { %v1977_v30 = vpop.xlane.xlu0 %1976 }
 0x6da   : > { %v4070_v39 = vmul.f32 %v6333_v28, %v5717_v29  ;;  %6340 = vrcp.f32 %v1977_v30  ;;  %v9802_v55 = vpop.xlane.xlu1 %3791 }
 0x6db   : > { %v6335_v63 = vpop.eup %6334 }
 0x6dc   : > { %4104 = vrot.lane.b32.xlu0 %v4070_v39, %s6773_s24  ;;  %3203 = vrot.lane.b32.xlu1 %v3170_v1, %s6774_s26  ;;  %v9808_v33 = vmul.f32 %v6335_v63, %v9529_v32  ;;  %v6337_v10 = vpop.eup %6336  ;;  %v10943_v39 = vld [vmem:[#allocation148_spill] sm:$0xff] }
 0x6dd   : > { %v2908_v36 = vpop.xlane.xlu0 %2907  ;;  %v4069_v22 = vmul.f32 %v6337_v10, %v5714_v20 }
 0x6de   : > { %6342 = vrcp.f32 %v2908_v36  ;;  %v2896_v16 = vpop.xlane.xlu1 %2895  ;;  %v10944_v36 = vld [vmem:[#allocation44_spill] sm:$0xff] }
 0x6df   : > { %6344 = vrcp.f32 %v2896_v16 }
 0x6e0   : > { %4102 = vrot.lane.b32.xlu1 %v4069_v22, %s6773_s24  ;;  %v10945_v22 = vld [vmem:[#allocation46_spill] sm:$0xff] }
 0x6e1   : > { %v1980_v6 = vpop.xlane.xlu0 %1979  ;;  %v5285_v16 = vadd.f32 %v10945_v22, %v10944_v36  ;;  %v10951_v36 = vld [vmem:[#allocation45_spill] sm:$0xff] }
 0x6e2   : > { %6346 = vrcp.f32 %v1980_v6  ;;  %v1968_v42 = vpop.xlane.xlu1 %1967 }
 0x6e3   : > { %v6339_v14 = vpop.eup %6338  ;;  %6348 = vrcp.f32 %v1968_v42 }
 0x6e4   : > { %v9812_v57 = vmul.f32 %v6339_v14, %v9641_v35 }
 0x6e5   : > { %v2911_v8 = vpop.xlane.xlu0 %2910 }
 0x6e6   : > { %6350 = vrcp.f32 %v2911_v8  ;;  %v9814_v32 = vpop.xlane.xlu1 %3797 }
 0x6e7   : > { %v6341_v50 = vpop.eup %6340 }
 0x6e8   : > { %v9817_v47 = vmul.f32 %v6341_v50, %v9539_v5  ;;  %v10946_v50 = vld [vmem:[#allocation55_spill] sm:$0xff] }
 0x6e9   : > { %v1203_v24 = vpop.xlane.xlu0 %1202 }
 0x6ea   : > { %6352 = vrcp.f32 %v1203_v24  ;;  %v2902_v2 = vpop.xlane.xlu1 %2901  ;;  %v10947_v24 = vld [vmem:[#allocation48_spill] sm:$0xff] }
 0x6eb   : > { %v6343_v61 = vpop.eup %6342  ;;  %6354 = vrcp.f32 %v2902_v2 }
 0x6ec   : > { %v6345_v59 = vpop.eup %6344  ;;  %v9820_v54 = vmul.f32 %v6343_v61, %v9645_v48  ;;  %v5612_v48 = vadd.f32 %v9783_v0, %v9780_v43  ;;  %v5291_v43 = vadd.f32 %v10947_v24, %v10946_v50  ;;  %v10948_v61 = vld [vmem:[#allocation36_spill] sm:$0xff]  ;;  %v10954_v24 = vld [vmem:[#allocation49_spill] sm:$0xff] }
 0x6ed   : > { %v1209_v29 = vpop.xlane.xlu0 %1208  ;;  %v9823_v35 = vmul.f32 %v6345_v59, %v9629_v60 }
 0x6ee   : > { %6356 = vrcp.f32 %v1209_v29  ;;  %v1974_v19 = vpop.xlane.xlu1 %1973 }
 0x6ef   : > { %v6347_v28 = vpop.eup %6346  ;;  %6358 = vrcp.f32 %v1974_v19 }
 0x6f0   : > { %v6349_v30 = vpop.eup %6348  ;;  %v9826_v5 = vmul.f32 %v6347_v28, %v9546_v46  ;;  %v10949_v28 = vld [vmem:[#allocation57_spill] sm:$0xff] }
 0x6f1   : > { %v1215_v20 = vpop.xlane.xlu0 %1214  ;;  %v9829_v1 = vmul.f32 %v6349_v30, %v10943_v39  ;;  %v10950_v30 = vld [vmem:[#allocation54_spill] sm:$0xff] }
 0x6f2   : > { %6360 = vrcp.f32 %v1215_v20  ;;  %v9833_v63 = vpop.xlane.xlu1 %3803  ;;  %v5297_v20 = vadd.f32 %v10950_v30, %v10949_v28 }
 0x6f3   : > { %v6351_v60 = vpop.eup %6350 }
 0x6f4   : > { %v9835_v10 = vmul.f32 %v6351_v60, %v5612_v48 }
 0x6f6   : > { %v1197_v6 = vpop.xlane.xlu1 %1196 }
 0x6f7   : > { %v6353_v42 = vpop.eup %6352  ;;  %6362 = vrcp.f32 %v1197_v6  ;;  %v5718_v6 = vpop.f32.mrf.mxu1 }
 0x6f8   : > { %v6355_v46 = vpop.eup %6354  ;;  %v1406_v14 = vmul.f32 %v6353_v42, %v5285_v16  ;;  %6364 = vrcp.f32 %v9712_v58  ;;  %v10953_v58 = vld [vmem:[#allocation34_spill] sm:$0xff] }
 0x6f9   : > { %v9840_v8 = vmul.f32 %v6355_v46, %v9637_v3 }
 0x6fa   : > { %v9844_v0 = vpop.xlane.xlu1 %3806  ;;  %1422 = vst.msk [vmem:[#allocation2 + $0x28] sm:$0xff] %vm745_vm0, %v1406_v14  ;;  %v2303_v14 = vpop.permute.xlu0 %2302 }
 0x6fb   : > { %v6357_v2 = vpop.eup %6356  ;;  %1226 = vadd.xlane.f32.xlu0 %v10948_v61 }
 0x6fc   : > { %v6359_v59 = vpop.eup %6358  ;;  %v1408_v29 = vmul.f32 %v6357_v2, %v5291_v43  ;;  %v10955_v43 = vld [vmem:[#allocation42_spill] sm:$0xff] }
 0x6fd   : > { %v9849_v19 = vmul.f32 %v6359_v59, %v9536_v49  ;;  %v10952_v49 = vld [vmem:[#allocation47_spill] sm:$0xff]  ;;  %v5282_v2 = vadd.f32 %v10955_v43, %v10954_v24  ;;  %v10956_v59 = vld [vmem:[#allocation136_spill] sm:$0xff] }
 0x6fe   : > { %v1200_v3 = vpop.xlane.xlu1 %1199  ;;  %1424 = vst.msk [vmem:[#allocation2 + $0x48] sm:$0xff] %vm745_vm0, %v1408_v29  ;;  %v5279_v22 = vadd.f32 %v10952_v49, %v10951_v36  ;;  %v10957_v29 = vld [vmem:[#allocation138_spill] sm:$0xff]  ;;  %v10958_v49 = vld [vmem:[#allocation51_spill] sm:$0xff] }
 0x6ff   : > { %v6361_v39 = vpop.eup %6360  ;;  %6366 = vrcp.f32 %v1200_v3  ;;  %v5435_v28 = vadd.f32 %v10957_v29, %v10956_v59 }
 0x700   : > { %v1410_v48 = vmul.f32 %v6361_v39, %v5297_v20  ;;  %6368 = vrcp.f32 %v9672_v41  ;;  %v5719_v41 = vpop.f32.mrf.mxu1 }
 0x701   : > { %6370 = vrcp.f32 %v9688_v7 }
 0x702   : > { %v9856_v60 = vpop.xlane.xlu1 %3809  ;;  %1426 = vst.msk [vmem:[#allocation2 + $0x68] sm:$0xff] %vm745_vm0, %v1410_v48  ;;  %6372 = vrcp.f32 %v9677_v11  ;;  %v5721_v11 = vpop.f32.mrf.mxu1 }
 0x704   : > { %v6363_v16 = vpop.eup %6362  ;;  %1223 = vadd.xlane.f32.xlu1 %v10953_v58 }
 0x705   : > { %v1404_v42 = vmul.f32 %v6363_v16, %v5279_v22  ;;  %v6365_v50 = vpop.eup %6364  ;;  %v10959_v22 = vld [vmem:[#allocation53_spill] sm:$0xff] }
 0x706   : > { %v1206_v46 = vpop.xlane.xlu1 %1205  ;;  %v2274_v39 = vmul.f32 %v6365_v50, %v5435_v28  ;;  %v5288_v16 = vadd.f32 %v10959_v22, %v10958_v49  ;;  %v10961_v50 = vld [vmem:[#allocation137_spill] sm:$0xff] }
 0x707   : > { %1420 = vst.msk [vmem:[#allocation2 + $0x8] sm:$0xff] %vm745_vm0, %v1404_v42  ;;  %6374 = vrcp.f32 %v1206_v46 }
 0x708   : > { %2351 = vst.msk [vmem:[#allocation2 + $0x8] sm:$0xff] %vm2350_vm1, %v2303_v14  ;;  %6376 = vrcp.f32 %v9717_v17 }
 0x709   : > { %6378 = vrcp.f32 %v9706_v15  ;;  %v5722_v15 = vpop.f32.mrf.mxu1 }
 0x70a   : > { %v1212_v7 = vpop.xlane.xlu1 %1211  ;;  %v5723_v58 = vadd.f32 %v5722_v15, %v5721_v11  ;;  %v10963_v11 = vld [vmem:[#allocation52_spill] sm:$0xff] }
 0x70b   : > { %6380 = vrcp.f32 %v1212_v7  ;;  %v10960_v7 = vld [vmem:[#allocation135_spill] sm:$0xff] }
 0x70c   : > { %v6367_v61 = vpop.eup %6366  ;;  %v5432_v24 = vadd.f32 %v10961_v50, %v10960_v7  ;;  %v10968_v7 = vld [vmem:[#allocation41_spill] sm:$0xff] }
 0x70d   : > { %v1405_v30 = vmul.f32 %v6367_v61, %v5282_v2  ;;  %v6369_v3 = vpop.eup %6368  ;;  %v10962_v61 = vld [vmem:[#allocation50_spill] sm:$0xff] }
 0x70e   : > { %v1218_v20 = vpop.xlane.xlu1 %1217  ;;  %v6371_v17 = vpop.eup %6370  ;;  %v3171_v42 = vmul.f32 %v6369_v3, %v9589_v31  ;;  %v5294_v59 = vadd.f32 %v10963_v11, %v10962_v61  ;;  %v10965_v3 = vld [vmem:[#allocation58_spill] sm:$0xff] }
 0x70f   : > { %6382 = vrcp.f32 %v1218_v20  ;;  %1421 = vst.msk [vmem:[#allocation2 + $0x18] sm:$0xff] %vm745_vm0, %v1405_v30  ;;  %v6373_v36 = vpop.eup %6372  ;;  %v3173_v46 = vmul.f32 %v6371_v17, %v9601_v38  ;;  %v10964_v20 = vld [vmem:[#allocation56_spill] sm:$0xff]  ;;  %v5720_v17 = vadd.f32 %v5719_v41, %v5718_v6 }
 0x710   : > { %6384 = vrcp.f32 %v9683_v9  ;;  %v5724_v9 = vpop.f32.mrf.mxu1  ;;  %v2273_v28 = vmul.f32 %v6373_v36, %v5432_v24  ;;  %v10966_v41 = vld [vmem:[#allocation60_spill] sm:$0xff]  ;;  %v10969_v24 = vld [vmem:[#allocation39_spill] sm:$0xff] }
 0x711   : > { %6386 = vrcp.f32 %v9726_v25  ;;  %2310 = vrot.lane.b32.xlu0 %v2274_v39, %s6775_s2  ;;  %v5300_v39 = vadd.f32 %v10965_v3, %v10964_v20 }
 0x712   : > { %v3202_v48 = vpop.permute.xlu1 %3201  ;;  %v5725_v38 = vpop.f32.mrf.mxu1 }
 0x713   : > { %3250 = vst.msk [vmem:[#allocation2 + $0x8] sm:$0xff] %vm3249_vm2, %v3202_v48  ;;  %v5726_v15 = vadd.f32 %v5725_v38, %v5724_v9 }
 0x714   : > { %v6375_v14 = vpop.eup %6374  ;;  %v5727_v50 = vpop.f32.mrf.mxu1 }
 0x715   : > { %3205 = vrot.lane.b32.xlu1 %v3171_v42, %s6774_s26  ;;  %3209 = vrot.lane.b32.xlu0 %v3173_v46, %s6774_s26  ;;  %v1407_v25 = vmul.f32 %v6375_v14, %v5288_v16  ;;  %v6377_v43 = vpop.eup %6376  ;;  %v10967_v46 = vld [vmem:[#allocation59_spill] sm:$0xff] }
 0x716   : > { %v6379_v2 = vpop.eup %6378  ;;  %v4072_v29 = vmul.f32 %v6377_v43, %v5723_v58  ;;  %v5303_v14 = vadd.f32 %v10967_v46, %v10966_v41  ;;  %v5728_v43 = vpop.f32.mrf.mxu1 }
 0x717   : > { %1423 = vst.msk [vmem:[#allocation2 + $0x38] sm:$0xff] %vm745_vm0, %v1407_v25  ;;  %v3172_v48 = vmul.f32 %v6379_v2, %v9592_v27  ;;  %v10970_v2 = vld [vmem:[#allocation35_spill] sm:$0xff] }
 0x718   : > { %v6381_v31 = vpop.eup %6380  ;;  %v5730_v11 = vpop.f32.mrf.mxu1 }
 0x719   : > { %2308 = vrot.lane.b32.xlu1 %v2273_v28, %s6775_s2  ;;  %4108 = vrot.lane.b32.xlu0 %v4072_v29, %s6773_s24  ;;  %v1409_v30 = vmul.f32 %v6381_v31, %v5294_v59  ;;  %v4165_v59 = vld [vmem:[#allocation2] sm:$0xff] }
 0x71a   : > { %v5731_v31 = vpop.f32.mrf.mxu1 }
 0x71b   : > { %1425 = vst.msk [vmem:[#allocation2 + $0x58] sm:$0xff] %vm745_vm0, %v1409_v30 }
 0x71c   : > { %v6383_v49 = vpop.eup %6382  ;;  %v5733_v30 = vpop.f32.mrf.mxu1 }
 0x71d   : > { %v6385_v36 = vpop.eup %6384  ;;  %3207 = vrot.lane.b32.xlu1 %v3172_v48, %s6774_s26  ;;  %2312 = vrot.lane.b32.xlu0 %v9715_v53, %s6775_s2  ;;  %v1411_v22 = vmul.f32 %v6383_v49, %v5300_v39  ;;  %v4167_v39 = vld [vmem:[#allocation2 + $0x10] sm:$0xff] }
 0x71e   : > { %v6387_v16 = vpop.eup %6386  ;;  %v4071_v58 = vmul.f32 %v6385_v36, %v5720_v17  ;;  %v5734_v20 = vpop.f32.mrf.mxu1 }
 0x71f   : > { %v4073_v42 = vmul.f32 %v6387_v16, %v5726_v15  ;;  %1427 = vst.msk [vmem:[#allocation2 + $0x78] sm:$0xff] %vm745_vm0, %v1411_v22 }
 0x720   : > { %v5736_v3 = vpop.f32.mrf.mxu1 }
 0x721   : > { %4106 = vrot.lane.b32.xlu1 %v4071_v58, %s6773_s24  ;;  %4110 = vrot.lane.b32.xlu0 %v4073_v42, %s6773_s24 }
 0x726   : > { %v1221_v27 = vpop.xlane.xlu0 %1220 }
 0x727   : > { %6388 = vrcp.f32 %v1221_v27 }
 0x728   : > { %6390 = vrcp.f32 %v9757_v4  ;;  %v5732_v4 = vadd.f32 %v5731_v31, %v5730_v11  ;;  %v10974_v11 = vld [vmem:[#allocation63_spill] sm:$0xff] }
 0x729   : > { %6392 = vrcp.f32 %v9755_v12  ;;  %v5737_v12 = vpop.f32.mrf.mxu1 }
 0x72a   : > { %v2307_v6 = vpop.permute.xlu0 %2306  ;;  %6394 = vrcp.f32 %v9768_v51  ;;  %v5735_v51 = vadd.f32 %v5734_v20, %v5733_v30 }
 0x72b   : > { %2353 = vst.msk [vmem:[#allocation2 + $0x28] sm:$0xff] %vm2350_vm1, %v2307_v6  ;;  %v9923_v49 = vpop.f32.mrf.mxu1  ;;  %6396 = vrcp.f32 %v9802_v55  ;;  %v5738_v55 = vadd.f32 %v5737_v12, %v5736_v3  ;;  %v4169_v3 = vld [vmem:[#allocation2 + $0x20] sm:$0xff] }
 0x72c   : > { %6398 = vrcp.f32 %v9814_v32 }
 0x72d   : > { %v9930_v16 = vpop.f32.mrf.mxu1  ;;  %6400 = vrcp.f32 %v9833_v63 }
 0x734   : > { %v6389_v9 = vpop.eup %6388 }
 0x735   : > { %v1412_v53 = vmul.f32 %v6389_v9, %v5303_v14  ;;  %v6391_v15 = vpop.eup %6390 }
 0x736   : > { %v4075_v48 = vmul.f32 %v6391_v15, %v5732_v4  ;;  %v6393_v36 = vpop.eup %6392 }
 0x737   : > { %1428 = vst.msk [vmem:[#allocation2 + $0x88] sm:$0xff] %vm745_vm0, %v1412_v53 }
 0x740   : > { %1235 = vadd.xlane.f32.xlu0 %v10968_v7 }
 0x745   : > { %1229 = vadd.xlane.f32.xlu1 %v10969_v24  ;;  %v10971_v24 = vld [vmem:[#allocation43_spill] sm:$0xff] }
 0x746   : > { %v4101_v25 = vpop.permute.xlu1 %4100 }
 0x747   : > { %4149 = vst.msk [vmem:[#allocation2 + $0x8] sm:$0xff] %vm4148_vm3, %v4101_v25 }
 0x749   : > { %1232 = vadd.xlane.f32.xlu1 %v10970_v2 }
 0x74a   : > { %v2305_v61 = vpop.permute.xlu1 %2304 }
 0x74b   : > { %2352 = vst.msk [vmem:[#allocation2 + $0x18] sm:$0xff] %vm2350_vm1, %v2305_v61  ;;  %v10973_v61 = vld [vmem:[#allocation64_spill] sm:$0xff] }
 0x74e   : > { %v3204_v29 = vpop.permute.xlu1 %3203  ;;  %v4166_v28 = vld [vmem:[#allocation2 + $0x8] sm:$0xff]  ;;  %v4105_v46 = vpop.permute.xlu0 %4104 }
 0x74f   : > { %3251 = vst.msk [vmem:[#allocation2 + $0x18] sm:$0xff] %vm3249_vm2, %v3204_v29  ;;  %4337 = vmatprep.mubr.f32.mxu0 %v4166_v28 }
 0x750   : > { %4338 = vmatmul.mubr.f32.vlgmr.msra.gmra.mxu0 %v4165_v59  ;;  %v5309_v59 = vadd.f32 %v10974_v11, %v10973_v61  ;;  %v4576_v11 = vld [vmem:[#allocation11 + $0xb0] sm:$0xff] }
 0x752   : > { %v4103_v38 = vpop.permute.xlu1 %4102 }
 0x753   : > { %4150 = vst.msk [vmem:[#allocation2 + $0x18] sm:$0xff] %vm4148_vm3, %v4103_v38 }
 0x756   : > { %2316 = vrot.lane.b32.xlu0 %v9748_v18, %s6775_s2  ;;  %v5729_v18 = vadd.f32 %v5728_v43, %v5727_v50 }
 0x75a   : > { %3211 = vrot.lane.b32.xlu1 %v9729_v45, %s6774_s26  ;;  %3215 = vrot.lane.b32.xlu0 %v9763_v37, %s6774_s26  ;;  %v4168_v17 = vld [vmem:[#allocation2 + $0x18] sm:$0xff]  ;;  %v6395_v45 = vpop.eup %6394  ;;  %v4074_v37 = vmul.f32 %v6393_v36, %v5729_v18  ;;  %v4171_v36 = vld [vmem:[#allocation2 + $0x30] sm:$0xff] }
 0x75b   : > { %4343 = vmatprep.mubr.f32.mxu0 %v4168_v17  ;;  %v4076_v22 = vmul.f32 %v6395_v45, %v5735_v51 }
 0x75c   : > { %4344 = vmatmul.mubr.f32.gmra.mxu0 %v4167_v39  ;;  %v10976_v39 = vld [vmem:[#allocation61_spill] sm:$0xff] }
 0x75e   : > { %2314 = vrot.lane.b32.xlu1 %v9734_v44, %s6775_s2  ;;  %4114 = vrot.lane.b32.xlu0 %v4075_v48, %s6773_s24  ;;  %v5742_v44 = vpop.f32.mrf.mxu1 }
 0x760   : > { %v5743_v58 = vpop.f32.mrf.mxu1 }
 0x761   : > { %v5744_v6 = vadd.f32 %v5743_v58, %v5742_v44  ;;  %v4173_v44 = vld [vmem:[#allocation2 + $0x40] sm:$0xff]  ;;  %v4569_v58 = vld [vmem:[#allocation11 + $0x78] sm:$0xff] }
 0x762   : > { %3213 = vrot.lane.b32.xlu1 %v9742_v56, %s6774_s26  ;;  %2318 = vrot.lane.b32.xlu0 %v9766_v62, %s6775_s2  ;;  %v6397_v56 = vpop.eup %6396  ;;  %v9939_v42 = vpop.f32.mrf.mxu1 }
 0x763   : > { %v4077_v62 = vmul.f32 %v6397_v56, %v5738_v55  ;;  %v6399_v32 = vpop.eup %6398  ;;  %v4585_v55 = vld [vmem:[#allocation11 + $0xf8] sm:$0xff]  ;;  %v4584_v56 = vld [vmem:[#allocation11 + $0xf0] sm:$0xff] }
 0x764   : > { %v9942_v27 = vpop.f32.mrf.mxu1  ;;  %5757 = vmatprep.subr.mxu1 %v4585_v55 }
 0x765   : > { %5758 = vmatpush3.msra.mxu1 %v4569_v58 }
 0x766   : > { %4112 = vrot.lane.b32.xlu1 %v4074_v37, %s6773_s24  ;;  %4116 = vrot.lane.b32.xlu0 %v4076_v22, %s6773_s24 }
 0x767   : > { %5759 = vmatprep.subr.mxu1 %v4584_v56 }
 0x76a   : > { %2320 = vrot.lane.b32.xlu0 %v9774_v13, %s6775_s2  ;;  %v5748_v13 = vpop.f32.mrf.mxu1 }
 0x76c   : > { %v5749_v41 = vpop.f32.mrf.mxu1 }
 0x76d   : > { %v5750_v9 = vadd.f32 %v5749_v41, %v5748_v13  ;;  %v4581_v13 = vld [vmem:[#allocation11 + $0xd8] sm:$0xff] }
 0x76e   : > { %3219 = vrot.lane.b32.xlu0 %v9787_v21, %s6774_s26  ;;  %v4079_v21 = vmul.f32 %v6399_v32, %v5744_v6  ;;  %v9950_v14 = vpop.f32.mrf.mxu1  ;;  %v4582_v6 = vld [vmem:[#allocation11 + $0xe0] sm:$0xff] }
 0x770   : > { %v9954_v53 = vpop.f32.mrf.mxu1 }
 0x772   : > { %4118 = vrot.lane.b32.xlu0 %v4077_v62, %s6773_s24  ;;  %v5754_v50 = vpop.f32.mrf.mxu1  ;;  %v4583_v62 = vld [vmem:[#allocation11 + $0xe8] sm:$0xff] }
 0x774   : > { %v5755_v25 = vpop.f32.mrf.mxu1 }
 0x776   : > { %3221 = vrot.lane.b32.xlu0 %v9823_v35, %s6774_s26 }
 0x77a   : > { %2324 = vrot.lane.b32.xlu0 %v9829_v1, %s6775_s2  ;;  %v6401_v1 = vpop.eup %6400 }
 0x77b   : > { %v4081_v63 = vmul.f32 %v6401_v1, %v5750_v9  ;;  %v4579_v9 = vld [vmem:[#allocation11 + $0xc8] sm:$0xff]  ;;  %v10977_v1 = vld [vmem:[#allocation69_spill] sm:$0xff] }
 0x77e   : > { %4122 = vrot.lane.b32.xlu0 %v4079_v21, %s6773_s24  ;;  %v4565_v21 = vld [vmem:[#allocation11 + $0x58] sm:$0xff] }
 0x782   : > { %3225 = vrot.lane.b32.xlu0 %v9840_v8, %s6774_s26 }
 0x784   : > { %v1227_v35 = vpop.xlane.xlu0 %1226 }
 0x785   : > { %6402 = vrcp.f32 %v1227_v35 }
 0x786   : > { %6404 = vrcp.f32 %v9856_v60  ;;  %2328 = vrot.lane.b32.xlu0 %v9849_v19, %s6775_s2  ;;  %v10972_v60 = vld [vmem:[#allocation40_spill] sm:$0xff]  ;;  %v5756_v19 = vadd.f32 %v5755_v25, %v5754_v50  ;;  %v4562_v25 = vld [vmem:[#allocation11 + $0x40] sm:$0xff] }
 0x788   : > { %v2311_v7 = vpop.permute.xlu0 %2310 }
 0x789   : > { %2355 = vst.msk [vmem:[#allocation2 + $0x48] sm:$0xff] %vm2350_vm1, %v2311_v7 }
 0x78a   : > { %1238 = vadd.xlane.f32.xlu1 %v10971_v24  ;;  %4126 = vrot.lane.b32.xlu0 %v4081_v63, %s6773_s24  ;;  %v10978_v63 = vld [vmem:[#allocation70_spill] sm:$0xff]  ;;  %v4578_v24 = vld [vmem:[#allocation11 + $0xc0] sm:$0xff] }
 0x78b   : > { %v5318_v7 = vadd.f32 %v10978_v63, %v10977_v1 }
 0x78c   : > { %v3210_v8 = vpop.permute.xlu0 %3209 }
 0x78d   : > { %3254 = vst.msk [vmem:[#allocation2 + $0x48] sm:$0xff] %vm3249_vm2, %v3210_v8  ;;  %v1224_v43 = vpop.xlane.xlu1 %1223 }
 0x78e   : > { %6406 = vrcp.f32 %v1224_v43  ;;  %1241 = vadd.xlane.f32.xlu1 %v10972_v60  ;;  %3229 = vrot.lane.b32.xlu0 %v9820_v54, %s6774_s26  ;;  %v4577_v60 = vld [vmem:[#allocation11 + $0xb8] sm:$0xff] }
 0x78f   : > { %6408 = vrcp.f32 %v9777_v34  ;;  %v5741_v34 = vadd.f32 %v9930_v16, %v9923_v49  ;;  %v5753_v49 = vadd.f32 %v9954_v53, %v9950_v14  ;;  %v4564_v14 = vld [vmem:[#allocation11 + $0x50] sm:$0xff]  ;;  %v4563_v53 = vld [vmem:[#allocation11 + $0x48] sm:$0xff] }
 0x790   : > { %v4109_v2 = vpop.permute.xlu0 %4108  ;;  %6410 = vrcp.f32 %v9793_v26 }
 0x791   : > { %4153 = vst.msk [vmem:[#allocation2 + $0x48] sm:$0xff] %vm4148_vm3, %v4109_v2  ;;  %v3206_v29 = vpop.permute.xlu1 %3205  ;;  %6412 = vrcp.f32 %v9844_v0  ;;  %v4561_v2 = vld [vmem:[#allocation11 + $0x38] sm:$0xff] }
 0x792   : > { %v6403_v28 = vpop.eup %6402  ;;  %3252 = vst.msk [vmem:[#allocation2 + $0x28] sm:$0xff] %vm3249_vm2, %v3206_v29  ;;  %2332 = vrot.lane.b32.xlu0 %v9826_v5, %s6775_s2  ;;  %v10975_v5 = vld [vmem:[#allocation62_spill] sm:$0xff]  ;;  %v10980_v29 = vld [vmem:[#allocation65_spill] sm:$0xff] }
 0x793   : > { %v6405_v31 = vpop.eup %6404  ;;  %4151 = vst.msk [vmem:[#allocation2 + $0x28] sm:$0xff] %vm4148_vm3, %v4105_v46  ;;  %v1414_v38 = vmul.f32 %v6403_v28, %v5309_v59  ;;  %v5306_v17 = vadd.f32 %v10976_v39, %v10975_v5  ;;  %v4580_v46 = vld [vmem:[#allocation11 + $0xd0] sm:$0xff]  ;;  %v10979_v59 = vld [vmem:[#allocation66_spill] sm:$0xff]  ;;  %v4574_v39 = vld [vmem:[#allocation11 + $0xa0] sm:$0xff] }
 0x794   : > { %v4083_v30 = vmul.f32 %v6405_v31, %v5756_v19  ;;  %v2313_v54 = vpop.permute.xlu0 %2312  ;;  %v5312_v28 = vadd.f32 %v10980_v29, %v10979_v59  ;;  %v4560_v31 = vld [vmem:[#allocation11 + $0x30] sm:$0xff] }
 0x795   : > { %2356 = vst.msk [vmem:[#allocation2 + $0x58] sm:$0xff] %vm2350_vm1, %v2313_v54  ;;  %v2309_v20 = vpop.permute.xlu1 %2308  ;;  %v4175_v5 = vld [vmem:[#allocation2 + $0x50] sm:$0xff] }
 0x796   : > { %1430 = vst.msk [vmem:[#allocation2 + $0xa8] sm:$0xff] %vm745_vm0, %v1414_v38  ;;  %4130 = vrot.lane.b32.xlu0 %v4083_v30, %s6773_s24  ;;  %v4575_v30 = vld [vmem:[#allocation11 + $0xa8] sm:$0xff] }
 0x797   : > { %2354 = vst.msk [vmem:[#allocation2 + $0x38] sm:$0xff] %vm2350_vm1, %v2309_v20 }
 0x798   : > { %v4174_v22 = vld [vmem:[#allocation2 + $0x48] sm:$0xff] }
 0x799   : > { %v3208_v4 = vpop.permute.xlu1 %3207 }
 0x79a   : > { %3253 = vst.msk [vmem:[#allocation2 + $0x38] sm:$0xff] %vm3249_vm2, %v3208_v4  ;;  %v4170_v15 = vld [vmem:[#allocation2 + $0x28] sm:$0xff] }
 0x79b   : > { %v6407_v48 = vpop.eup %6406  ;;  %4349 = vmatprep.mubr.f32.mxu0 %v4170_v15  ;;  %v4559_v4 = vld [vmem:[#allocation11 + $0x28] sm:$0xff]  ;;  %v10982_v15 = vld [vmem:[#allocation67_spill] sm:$0xff] }
 0x79c   : > { %4350 = vmatmul.mubr.f32.gmra.mxu0 %v4169_v3  ;;  %v1413_v12 = vmul.f32 %v6407_v48, %v5306_v17  ;;  %v6409_v51 = vpop.eup %6408  ;;  %v10981_v17 = vld [vmem:[#allocation68_spill] sm:$0xff] }
 0x79d   : > { %v4107_v18 = vpop.permute.xlu1 %4106  ;;  %v4078_v45 = vmul.f32 %v6409_v51, %v5741_v34  ;;  %v5315_v48 = vadd.f32 %v10982_v15, %v10981_v17  ;;  %v4573_v51 = vld [vmem:[#allocation11 + $0x98] sm:$0xff] }
 0x79e   : > { %4152 = vst.msk [vmem:[#allocation2 + $0x38] sm:$0xff] %vm4148_vm3, %v4107_v18  ;;  %v4558_v18 = vld [vmem:[#allocation11 + $0x20] sm:$0xff] }
 0x79f   : > { %1429 = vst.msk [vmem:[#allocation2 + $0x98] sm:$0xff] %vm745_vm0, %v1413_v12  ;;  %3217 = vrot.lane.b32.xlu1 %v9771_v23, %s6774_s26  ;;  %v5747_v23 = vadd.f32 %v9942_v27, %v9939_v42 }
 0x7a3   : > { %2322 = vrot.lane.b32.xlu1 %v9791_v40, %s6775_s2  ;;  %v6411_v40 = vpop.eup %6410 }
 0x7a4   : > { %v4080_v26 = vmul.f32 %v6411_v40, %v5747_v23  ;;  %v4556_v23 = vld [vmem:[#allocation11 + $0x10] sm:$0xff]  ;;  %v4571_v40 = vld [vmem:[#allocation11 + $0x88] sm:$0xff] }
 0x7a5   : > { %v4172_v37 = vld [vmem:[#allocation2 + $0x38] sm:$0xff] }
 0x7a6   : > { %4355 = vmatprep.mubr.f32.mxu0 %v4172_v37  ;;  %v4557_v37 = vld [vmem:[#allocation11 + $0x18] sm:$0xff] }
 0x7a7   : > { %4120 = vrot.lane.b32.xlu1 %v4078_v45, %s6773_s24  ;;  %4356 = vmatmul.mubr.f32.gmra.mxu0 %v4171_v36 }
 0x7a8   : > { %4361 = vmatprep.mubr.f32.mxu0 %v4174_v22 }
 0x7ab   : > { %3223 = vrot.lane.b32.xlu1 %v9800_v52, %s6774_s26  ;;  %4362 = vmatmul.mubr.f32.gmra.mxu0 %v4173_v44  ;;  %v6413_v52 = vpop.eup %6412  ;;  %v4572_v44 = vld [vmem:[#allocation11 + $0x90] sm:$0xff] }
 0x7ac   : > { %v4082_v16 = vmul.f32 %v6413_v52, %v5753_v49  ;;  %v4555_v49 = vld [vmem:[#allocation11 + $0x8] sm:$0xff]  ;;  %v4570_v52 = vld [vmem:[#allocation11 + $0x80] sm:$0xff] }
 0x7af   : > { %2326 = vrot.lane.b32.xlu1 %v9808_v33, %s6775_s2  ;;  %v4111_v33 = vpop.permute.xlu0 %4110 }
 0x7b3   : > { %4124 = vrot.lane.b32.xlu1 %v4080_v26, %s6773_s24 }
 0x7b7   : > { %3227 = vrot.lane.b32.xlu1 %v9812_v57, %s6774_s26  ;;  %v4568_v57 = vld [vmem:[#allocation11 + $0x70] sm:$0xff] }
 0x7b8   : > { %5760 = vmatpush3.msra.mxu1 %v4568_v57  ;;  %v4179_v57 = vld [vmem:[#allocation2 + $0x70] sm:$0xff] }
 0x7b9   : > { %5761 = vmatprep.subr.mxu1 %v4583_v62 }
 0x7bb   : > { %2330 = vrot.lane.b32.xlu1 %v9817_v47, %s6775_s2  ;;  %v4567_v47 = vld [vmem:[#allocation11 + $0x68] sm:$0xff] }
 0x7bc   : > { %5762 = vmatpush3.msra.mxu1 %v4567_v47 }
 0x7bd   : > { %5763 = vmatprep.subr.mxu1 %v4582_v6  ;;  %v4263_v6 = vlaneseq }
 0x7bf   : > { %4128 = vrot.lane.b32.xlu1 %v4082_v16, %s6773_s24  ;;  %v4554_v16 = vld [vmem:[#allocation11] sm:$0xff]  ;;  %s10992_s24 = sld [smem:[#allocation20_spill]] }
 0x7c3   : > { %3231 = vrot.lane.b32.xlu1 %v9835_v10, %s6774_s26  ;;  %v4566_v10 = vld [vmem:[#allocation11 + $0x60] sm:$0xff]  ;;  %s5143_s26 = sshll.u32 %s10991_s5, 4 }
 0x7c4   : > { %5764 = vmatpush3.msra.mxu1 %v4566_v10  ;;  %v4264_v10 = vshrl.u32 %v4263_v6, 7 }
 0x7c5   : > { %5765 = vmatprep.subr.mxu1 %v4581_v13  ;;  %s5144_s2 = sshll.u32 %s10992_s24, 5 }
 0x7c6   : > { %5766 = vmatpush3.msra.mxu1 %v4565_v21  ;;  %v4265_v13 = vsub.s32 0, %v4264_v10  ;;  %v4269_v21 = vsub.s32 1, %v4264_v10  ;;  %s4783_s6 = sadd.s32 %s5144_s2, %s5143_s26 }
 0x7c7   : > { %5767 = vmatprep.subr.mxu1 %v4580_v46  ;;  %s5145_s21 = sshll.u32 %s4783_s6, 7 }
 0x7c8   : > { %5768 = vmatpush3.msra.mxu1 %v4564_v14  ;;  %v4478_v14 = vld [vmem:[%s10985_s12] sm:$0x3]  ;;  %s10227_s3 = scalar_lea.hbm %s10994_s8, %s5145_s21  ;;  %s6634_s12 = sshll.u32 %s6776_s29, 4  ;;  %s6635_s12 = int_to_ptr.vmem [resolvable:$false] %s6634_s12 }
 0x7c9   : > { %v1236_v0 = vpop.xlane.xlu0 %1235  ;;  %5769 = vmatprep.subr.mxu1 %v4579_v9  ;;  %v10053_v63 = vrot.slane %v4478_v14, %v4265_v13  ;;  %s6636_s11 = scalar_lea.vmem %s6635_s12, 4096  ;;  %p6637_p13 = scmp.lt.s32.totalorder %s10229_s20, %s6635_s12 }
 0x7ca   : > { %6414 = vrcp.f32 %v1236_v0  ;;  %5770 = vmatpush3.msra.mxu1 %v4563_v53  ;;  %v4177_v0 = vld [vmem:[#allocation2 + $0x60] sm:$0xff]  ;;  %p6638_p12 = scmp.lt.s32.totalorder %s6636_s11, %s6630_s16 }
 0x7cb   : > { %5771 = vmatprep.subr.mxu1 %v4578_v24 }
 0x7cc   : > { %5772 = vmatpush3.msra.mxu1 %v4562_v25  ;;  %p6639_p7 = por %p6638_p12, %p6637_p13 }
 0x7cd   : > { %v2317_v42 = vpop.permute.xlu0 %2316  ;;  %5773 = vmatprep.subr.mxu1 %v4577_v60 }
 0x7ce   : > { %2358 = vst.msk [vmem:[#allocation2 + $0x78] sm:$0xff] %vm2350_vm1, %v2317_v42  ;;  %v1230_v27 = vpop.xlane.xlu1 %1229  ;;  %5774 = vmatpush3.msra.mxu1 %v4561_v2  ;;  %p6640_p9 = pnand %p6639_p7, %p6633_p3 }
 0x7cf   : > { %6416 = vrcp.f32 %v1230_v27  ;;  %5775 = vmatprep.subr.mxu1 %v4576_v11 }
 0x7d0   : > { %5776 = vmatpush3.msra.mxu1 %v4560_v31 }
 0x7d1   : > { %v3216_v32 = vpop.permute.xlu0 %3215  ;;  %5777 = vmatprep.subr.mxu1 %v4575_v30 }
 0x7d2   : > { %3257 = vst.msk [vmem:[#allocation2 + $0x78] sm:$0xff] %vm3249_vm2, %v3216_v32  ;;  %v1233_v41 = vpop.xlane.xlu1 %1232  ;;  %5778 = vmatpush3.msra.mxu1 %v4559_v4  ;;  %v4261_v32 = vld [vmem:[%s10983_s7] sm:$0x3] }
 0x7d3   : > { %6418 = vrcp.f32 %v1233_v41  ;;  %5779 = vmatprep.subr.mxu1 %v4574_v39  ;;  %v4434_v41 = vld [vmem:[%s10984_s27] sm:$0x3]  ;;  %v10043_v46 = vrot.slane %v4261_v32, %v4265_v13  ;;  %s4771_s27 = scalar_lea.sflag [#allocation5], %s7049_s4 }
 0x7d4   : > { %5780 = vmatpush3.msra.mxu1 %v4558_v18  ;;  %v10048_v9 = vrot.slane %v4434_v41, %v4265_v13  ;;  %v10987_v39 = vld [vmem:[#allocation71_spill] sm:$0xff] }
 0x7d5   : > { %v4115_v35 = vpop.permute.xlu0 %4114  ;;  %5781 = vmatprep.subr.mxu1 %v4573_v51  ;;  %v4181_v51 = vld [vmem:[#allocation2 + $0x80] sm:$0xff] }
 0x7d6   : > { %4156 = vst.msk [vmem:[#allocation2 + $0x78] sm:$0xff] %vm4148_vm3, %v4115_v35  ;;  %v3212_v50 = vpop.permute.xlu1 %3211  ;;  %5782 = vmatpush3.msra.mxu1 %v4557_v37  ;;  %v10050_v35 = vrot.slane %v4261_v32, %v4269_v21  ;;  %v10989_v37 = vld [vmem:[#allocation74_spill] sm:$0xff]  ;;  %v4191_v32 = vld [vmem:[#allocation2 + $0xd0] sm:$0xff] }
 0x7d7   : > { %v6415_v8 = vpop.eup %6414  ;;  %3255 = vst.msk [vmem:[#allocation2 + $0x58] sm:$0xff] %vm3249_vm2, %v3212_v50  ;;  %5783 = vmatprep.subr.mxu1 %v4572_v44 }
 0x7d8   : > { %4154 = vst.msk [vmem:[#allocation2 + $0x58] sm:$0xff] %vm4148_vm3, %v4111_v33  ;;  %v1417_v43 = vmul.f32 %v6415_v8, %v5318_v7  ;;  %5784 = vmatpush3.msra.mxu1 %v4556_v23  ;;  %v10055_v7 = vrot.slane %v4434_v41, %v4269_v21 }
 0x7d9   : > { %v2319_v19 = vpop.permute.xlu0 %2318  ;;  %5785 = vmatprep.subr.mxu1 %v4571_v40 }
 0x7da   : > { %2359 = vst.msk [vmem:[#allocation2 + $0x88] sm:$0xff] %vm2350_vm1, %v2319_v19  ;;  %v2315_v61 = vpop.permute.xlu1 %2314  ;;  %5786 = vmatpush3.msra.mxu1 %v4555_v49 }
 0x7db   : > { %1433 = vst.msk [vmem:[#allocation2 + $0xd8] sm:$0xff] %vm745_vm0, %v1417_v43  ;;  %5787 = vmatprep.subr.mxu1 %v4570_v52  ;;  %v10059_v43 = vrot.slane %v4478_v14, %v4269_v21 }
 0x7dc   : > { %2357 = vst.msk [vmem:[#allocation2 + $0x68] sm:$0xff] %vm2350_vm1, %v2315_v61  ;;  %v6417_v38 = vpop.eup %6416  ;;  %5788 = vmatpush3.msra.mxu1 %v4554_v16 }
 0x7dd   : > { %v10020_v54 = vpop.permute.xlu0 %4116  ;;  %v1415_v20 = vmul.f32 %v6417_v38, %v5312_v28  ;;  %v4180_v58 = vld [vmem:[#allocation2 + $0x78] sm:$0xff] }
 0x7de   : > { %v3214_v3 = vpop.permute.xlu1 %3213 }
 0x7df   : > { %3256 = vst.msk [vmem:[#allocation2 + $0x68] sm:$0xff] %vm3249_vm2, %v3214_v3  ;;  %v4176_v12 = vld [vmem:[#allocation2 + $0x58] sm:$0xff] }
 0x7e0   : > { %1431 = vst.msk [vmem:[#allocation2 + $0xb8] sm:$0xff] %vm745_vm0, %v1415_v20  ;;  %v6419_v34 = vpop.eup %6418  ;;  %4367 = vmatprep.mubr.f32.mxu0 %v4176_v12 }
 0x7e1   : > { %v2321_v36 = vpop.permute.xlu0 %2320  ;;  %4368 = vmatmul.mubr.f32.gmra.mxu0 %v4175_v5  ;;  %v1416_v45 = vmul.f32 %v6419_v34, %v5315_v48  ;;  %v10986_v5 = vld [vmem:[#allocation72_spill] sm:$0xff] }
 0x7e2   : > { %2360 = vst.msk [vmem:[#allocation2 + $0x98] sm:$0xff] %vm2350_vm1, %v2321_v36  ;;  %v4113_v22 = vpop.permute.xlu1 %4112  ;;  %v5321_v17 = vadd.f32 %v10987_v39, %v10986_v5 }
 0x7e3   : > { %4155 = vst.msk [vmem:[#allocation2 + $0x68] sm:$0xff] %vm4148_vm3, %v4113_v22 }
 0x7e4   : > { %1432 = vst.msk [vmem:[#allocation2 + $0xc8] sm:$0xff] %vm745_vm0, %v1416_v45  ;;  %v10988_v45 = vld [vmem:[#allocation73_spill] sm:$0xff] }
 0x7e5   : > { %v3220_v26 = vpop.permute.xlu0 %3219  ;;  %v5324_v22 = vadd.f32 %v10989_v37, %v10988_v45 }
 0x7e6   : > { %3259 = vst.msk [vmem:[#allocation2 + $0x98] sm:$0xff] %vm3249_vm2, %v3220_v26 }
 0x7e9   : > { %v4119_v33 = vpop.permute.xlu0 %4118 }
 0x7ea   : > { %4158 = vst.msk [vmem:[#allocation2 + $0x98] sm:$0xff] %vm4148_vm3, %v4119_v33  ;;  %v4178_v55 = vld [vmem:[#allocation2 + $0x68] sm:$0xff]  ;;  %v4183_v33 = vld [vmem:[#allocation2 + $0x90] sm:$0xff] }
 0x7eb   : > { %4373 = vmatprep.mubr.f32.mxu0 %v4178_v55 }
 0x7ec   : > { %4374 = vmatmul.mubr.f32.gmra.mxu0 %v4177_v0 }
 0x7ed   : > { %v3222_v56 = vpop.permute.xlu0 %3221  ;;  %4379 = vmatprep.mubr.f32.mxu0 %v4180_v58 }
 0x7f0   : > { %4380 = vmatmul.mubr.f32.gmra.mxu0 %v4179_v57 }
 0x7f1   : > { %v2325_v62 = vpop.permute.xlu0 %2324  ;;  %v4184_v52 = vld [vmem:[#allocation2 + $0x98] sm:$0xff] }
 0x7f2   : > { %2362 = vst.msk [vmem:[#allocation2 + $0xb8] sm:$0xff] %vm2350_vm1, %v2325_v62  ;;  %v4187_v62 = vld [vmem:[#allocation2 + $0xb0] sm:$0xff] }
 0x7f5   : > { %v10032_v42 = vpop.permute.xlu0 %4122 }
 0x7f9   : > { %v10034_v47 = vpop.permute.xlu0 %3225 }
 0x7fd   : > { %v2329_v27 = vpop.permute.xlu0 %2328 }
 0x7fe   : > { %2364 = vst.msk [vmem:[#allocation2 + $0xd8] sm:$0xff] %vm2350_vm1, %v2329_v27 }
 0x801   : > { %v4127_v28 = vpop.permute.xlu0 %4126 }
 0x805   : > { %v3230_v12 = vpop.permute.xlu0 %3229 }
 0x809   : > { %v2333_v0 = vpop.permute.xlu0 %2332 }
 0x80d   : > { %v4131_v14 = vpop.permute.xlu0 %4130 }
 0x810   : > { %v4339_v53 = vpop.f32.mrf.mxu0 }
 0x811   : > { %v4340_v1 = vadd.f32 %v4339_v53, %v10043_v46  ;;  %v4193_v53 = vld [vmem:[#allocation2 + $0xe0] sm:$0xff] }
 0x812   : > { %v4341_v50 = vpop.f32.mrf.mxu0 }
 0x813   : > { %v1239_v24 = vpop.xlane.xlu1 %1238  ;;  %v4446_v8 = vmul.f32 %v10048_v9, %v4340_v1  ;;  %v4342_v25 = vadd.f32 %v4341_v50, %v10050_v35  ;;  %v4195_v50 = vld [vmem:[#allocation2 + $0xf0] sm:$0xff] }
 0x814   : > { %6420 = vrcp.f32 %v1239_v24 }
 0x815   : > { %v4490_v60 = vadd.f32 %v10053_v63, %v4446_v8  ;;  %v4447_v19 = vmul.f32 %v10055_v7, %v4342_v25 }
 0x817   : > { %v1242_v2 = vpop.xlane.xlu1 %1241  ;;  %v4491_v61 = vadd.f32 %v10059_v43, %v4447_v19  ;;  %v4522_v11 = vmax.f32 %v4490_v60, 0.0 }
 0x818   : > { %6422 = vrcp.f32 %v1242_v2 }
 0x819   : > { %v4523_v59 = vmax.f32 %v4491_v61, 0.0 }
 0x81b   : > { %v3218_v29 = vpop.permute.xlu1 %3217  ;;  %4657 = vmatprep.mubr.f32.mxu1 %v4523_v59 }
 0x81c   : > { %3258 = vst.msk [vmem:[#allocation2 + $0x88] sm:$0xff] %vm3249_vm2, %v3218_v29  ;;  %v4345_v31 = vpop.f32.mrf.mxu0  ;;  %4658 = vmatmul.mubr.f32.vlgmr.msra.gmra.mxu1 %v4522_v11 }
 0x81d   : > { %4157 = vst.msk [vmem:[#allocation2 + $0x88] sm:$0xff] %vm4148_vm3, %v10020_v54  ;;  %v4346_v38 = vadd.f32 %v4345_v31, %v10043_v46 }
 0x81e   : > { %v4347_v30 = vpop.f32.mrf.mxu0 }
 0x81f   : > { %v2323_v20 = vpop.permute.xlu1 %2322  ;;  %v4448_v4 = vmul.f32 %v10048_v9, %v4346_v38  ;;  %v4348_v3 = vadd.f32 %v4347_v30, %v10050_v35 }
 0x820   : > { %2361 = vst.msk [vmem:[#allocation2 + $0xa8] sm:$0xff] %vm2350_vm1, %v2323_v20 }
 0x821   : > { %v6421_v15 = vpop.eup %6420  ;;  %3260 = vst.msk [vmem:[#allocation2 + $0xa8] sm:$0xff] %vm3249_vm2, %v3222_v56  ;;  %v4492_v48 = vadd.f32 %v10053_v63, %v4448_v4  ;;  %v4449_v54 = vmul.f32 %v10055_v7, %v4348_v3  ;;  %v4185_v56 = vld [vmem:[#allocation2 + $0xa0] sm:$0xff] }
 0x822   : > { %v1418_v18 = vmul.f32 %v6421_v15, %v5321_v17 }
 0x823   : > { %v4121_v34 = vpop.permute.xlu1 %4120  ;;  %v4493_v36 = vadd.f32 %v10059_v43, %v4449_v54  ;;  %v4524_v23 = vmax.f32 %v4492_v48, 0.0 }
 0x824   : > { %4159 = vst.msk [vmem:[#allocation2 + $0xa8] sm:$0xff] %vm4148_vm3, %v4121_v34  ;;  %v4182_v44 = vld [vmem:[#allocation2 + $0x88] sm:$0xff] }
 0x825   : > { %1434 = vst.msk [vmem:[#allocation2 + $0xe8] sm:$0xff] %vm745_vm0, %v1418_v18  ;;  %v6423_v40 = vpop.eup %6422  ;;  %4385 = vmatprep.mubr.f32.mxu0 %v4182_v44  ;;  %v4525_v26 = vmax.f32 %v4493_v36, 0.0 }
 0x826   : > { %v1419_v49 = vmul.f32 %v6423_v40, %v5324_v22  ;;  %4386 = vmatmul.mubr.f32.gmra.mxu0 %v4181_v51 }
 0x827   : > { %4391 = vmatprep.mubr.f32.mxu0 %v4184_v52  ;;  %v3224_v16 = vpop.permute.xlu1 %3223  ;;  %4662 = vmatprep.mubr.f32.mxu1 %v4525_v26 }
 0x828   : > { %1435 = vst.msk [vmem:[#allocation2 + $0xf8] sm:$0xff] %vm745_vm0, %v1419_v49  ;;  %4663 = vmatmul.mubr.f32.gmra.mxu1 %v4524_v23 }
 0x829   : > { %3261 = vst.msk [vmem:[#allocation2 + $0xb8] sm:$0xff] %vm3249_vm2, %v3224_v16 }
 0x82a   : > { %2366 = vst.msk [vmem:[#allocation2 + $0xf8] sm:$0xff] %vm2350_vm1, %v2333_v0  ;;  %4392 = vmatmul.mubr.f32.gmra.mxu0 %v4183_v33 }
 0x82b   : > { %4160 = vst.msk [vmem:[#allocation2 + $0xb8] sm:$0xff] %vm4148_vm3, %v10032_v42  ;;  %v2327_v55 = vpop.permute.xlu1 %2326  ;;  %v4186_v58 = vld [vmem:[#allocation2 + $0xa8] sm:$0xff]  ;;  %v4189_v42 = vld [vmem:[#allocation2 + $0xc0] sm:$0xff] }
 0x82c   : > { %2363 = vst.msk [vmem:[#allocation2 + $0xc8] sm:$0xff] %vm2350_vm1, %v2327_v55  ;;  %4397 = vmatprep.mubr.f32.mxu0 %v4186_v58 }
 0x82d   : > { %3262 = vst.msk [vmem:[#allocation2 + $0xc8] sm:$0xff] %vm3249_vm2, %v10034_v47 }
 0x82e   : > { %4398 = vmatmul.mubr.f32.gmra.mxu0 %v4185_v56 }
 0x82f   : > { %v4125_v57 = vpop.permute.xlu1 %4124 }
 0x830   : > { %4161 = vst.msk [vmem:[#allocation2 + $0xc8] sm:$0xff] %vm4148_vm3, %v4125_v57 }
 0x832   : > { %v4188_v27 = vld [vmem:[#allocation2 + $0xb8] sm:$0xff] }
 0x833   : > { %4403 = vmatprep.mubr.f32.mxu0 %v4188_v27  ;;  %v3228_v6 = vpop.permute.xlu1 %3227 }
 0x834   : > { %4404 = vmatmul.mubr.f32.gmra.mxu0 %v4187_v62  ;;  %3263 = vst.msk [vmem:[#allocation2 + $0xd8] sm:$0xff] %vm3249_vm2, %v3228_v6 }
 0x835   : > { %4162 = vst.msk [vmem:[#allocation2 + $0xd8] sm:$0xff] %vm4148_vm3, %v4127_v28 }
 0x837   : > { %v2331_v10 = vpop.permute.xlu1 %2330  ;;  %v4190_v13 = vld [vmem:[#allocation2 + $0xc8] sm:$0xff] }
 0x838   : > { %2365 = vst.msk [vmem:[#allocation2 + $0xe8] sm:$0xff] %vm2350_vm1, %v2331_v10  ;;  %4409 = vmatprep.mubr.f32.mxu0 %v4190_v13 }
 0x839   : > { %3264 = vst.msk [vmem:[#allocation2 + $0xe8] sm:$0xff] %vm3249_vm2, %v3230_v12  ;;  %4410 = vmatmul.mubr.f32.gmra.mxu0 %v4189_v42 }
 0x83b   : > { %v4129_v47 = vpop.permute.xlu1 %4128 }
 0x83c   : > { %4163 = vst.msk [vmem:[#allocation2 + $0xe8] sm:$0xff] %vm4148_vm3, %v4129_v47  ;;  %v4192_v21 = vld [vmem:[#allocation2 + $0xd8] sm:$0xff] }
 0x83d   : > { %4415 = vmatprep.mubr.f32.mxu0 %v4192_v21 }
 0x83e   : > { %4416 = vmatmul.mubr.f32.gmra.mxu0 %v4191_v32 }
 0x83f   : > { %v3232_v41 = vpop.permute.xlu1 %3231 }
 0x840   : > { %3265 = vst.msk [vmem:[#allocation2 + $0xf8] sm:$0xff] %vm3249_vm2, %v3232_v41 }
 0x841   : > { %4164 = vst.msk [vmem:[#allocation2 + $0xf8] sm:$0xff] %vm4148_vm3, %v4131_v14 }
 0x843   : > { %v4194_v1 = vld [vmem:[#allocation2 + $0xe8] sm:$0xff] }
 0x844   : > { %4421 = vmatprep.mubr.f32.mxu0 %v4194_v1 }
 0x845   : > { %4422 = vmatmul.mubr.f32.gmra.mxu0 %v4193_v53 }
 0x848   : > { %v4196_v24 = vld [vmem:[#allocation2 + $0xf8] sm:$0xff] }
 0x849   : > { %4427 = vmatprep.mubr.f32.mxu0 %v4196_v24 }
 0x84a   : > { %4428 = vmatmul.mubr.f32.gmra.mxu0 %v4195_v50 }
 0x85c   : > { %v4351_v8 = vpop.f32.mrf.mxu0 }
 0x85d   : > { %v4352_v25 = vadd.f32 %v4351_v8, %v10043_v46 }
 0x85e   : > { %v4353_v60 = vpop.f32.mrf.mxu0 }
 0x85f   : > { %v4450_v19 = vmul.f32 %v10048_v9, %v4352_v25  ;;  %v4354_v2 = vadd.f32 %v4353_v60, %v10050_v35 }
 0x861   : > { %v4494_v61 = vadd.f32 %v10053_v63, %v4450_v19  ;;  %v4451_v11 = vmul.f32 %v10055_v7, %v4354_v2  ;;  %v10136_v19 = vld [vmem:[%s10990_s10] ss:$0 sm:$0xff] }
 0x863   : > { %v4495_v59 = vadd.f32 %v10059_v43, %v4451_v11  ;;  %v4526_v29 = vmax.f32 %v4494_v61, 0.0 }
 0x865   : > { %v4527_v28 = vmax.f32 %v4495_v59, 0.0  ;;  %v6480_v59 = vld [vmem:[#allocation2] sm:$0xff] }
 0x867   : > { %v4357_v31 = vpop.f32.mrf.mxu0  ;;  %4667 = vmatprep.mubr.f32.mxu1 %v4527_v28 }
 0x868   : > { %v4358_v38 = vadd.f32 %v4357_v31, %v10043_v46  ;;  %4668 = vmatmul.mubr.f32.gmra.mxu1 %v4526_v29 }
 0x869   : > { %v4359_v30 = vpop.f32.mrf.mxu0 }
 0x86a   : > { %v4452_v20 = vmul.f32 %v10048_v9, %v4358_v38  ;;  %v4360_v4 = vadd.f32 %v4359_v30, %v10050_v35 }
 0x86b   : > { %v4363_v3 = vpop.f32.mrf.mxu0 }
 0x86c   : > { %v4496_v5 = vadd.f32 %v10053_v63, %v4452_v20  ;;  %v4453_v39 = vmul.f32 %v10055_v7, %v4360_v4  ;;  %v4364_v17 = vadd.f32 %v4363_v3, %v10043_v46 }
 0x86d   : > { %v4365_v15 = vpop.f32.mrf.mxu0 }
 0x86e   : > { %v4454_v48 = vmul.f32 %v10048_v9, %v4364_v17  ;;  %v4366_v54 = vadd.f32 %v4365_v15, %v10050_v35  ;;  %v4497_v12 = vadd.f32 %v10059_v43, %v4453_v39  ;;  %v4528_v18 = vmax.f32 %v4496_v5, 0.0 }
 0x870   : > { %v4498_v34 = vadd.f32 %v10053_v63, %v4454_v48  ;;  %v4455_v51 = vmul.f32 %v10055_v7, %v4366_v54  ;;  %v4529_v36 = vmax.f32 %v4497_v12, 0.0 }
 0x872   : > { %4672 = vmatprep.mubr.f32.mxu1 %v4529_v36  ;;  %v4499_v45 = vadd.f32 %v10059_v43, %v4455_v51  ;;  %v4530_v37 = vmax.f32 %v4498_v34, 0.0 }
 0x873   : > { %4673 = vmatmul.mubr.f32.gmra.mxu1 %v4528_v18 }
 0x874   : > { %v4531_v22 = vmax.f32 %v4499_v45, 0.0 }
 0x876   : > { %4677 = vmatprep.mubr.f32.mxu1 %v4531_v22 }
 0x877   : > { %4678 = vmatmul.mubr.f32.gmra.mxu1 %v4530_v37 }
 0x8a1   : > { %v4369_v44 = vpop.f32.mrf.mxu0 }
 0x8a2   : > { %v4370_v23 = vadd.f32 %v4369_v44, %v10043_v46 }
 0x8a3   : > { %v4371_v40 = vpop.f32.mrf.mxu0 }
 0x8a4   : > { %v4456_v26 = vmul.f32 %v10048_v9, %v4370_v23  ;;  %v4372_v49 = vadd.f32 %v4371_v40, %v10050_v35 }
 0x8a6   : > { %v4500_v52 = vadd.f32 %v10053_v63, %v4456_v26  ;;  %v4457_v16 = vmul.f32 %v10055_v7, %v4372_v49  ;;  %v6481_v26 = vld [vmem:[#allocation2 + $0x10] sm:$0xff] }
 0x8a8   : > { %v4501_v33 = vadd.f32 %v10059_v43, %v4457_v16  ;;  %v4532_v0 = vmax.f32 %v4500_v52, 0.0 }
 0x8aa   : > { %v4533_v55 = vmax.f32 %v4501_v33, 0.0 }
 0x8ac   : > { %v4375_v58 = vpop.f32.mrf.mxu0  ;;  %4682 = vmatprep.mubr.f32.mxu1 %v4533_v55 }
 0x8ad   : > { %v4376_v56 = vadd.f32 %v4375_v58, %v10043_v46  ;;  %4683 = vmatmul.mubr.f32.gmra.mxu1 %v4532_v0 }
 0x8ae   : > { %v4377_v57 = vpop.f32.mrf.mxu0 }
 0x8af   : > { %v4458_v62 = vmul.f32 %v10048_v9, %v4376_v56  ;;  %v4378_v27 = vadd.f32 %v4377_v57, %v10050_v35 }
 0x8b0   : > { %v4381_v6 = vpop.f32.mrf.mxu0 }
 0x8b1   : > { %v4502_v42 = vadd.f32 %v10053_v63, %v4458_v62  ;;  %v4459_v10 = vmul.f32 %v10055_v7, %v4378_v27  ;;  %v4382_v13 = vadd.f32 %v4381_v6, %v10043_v46 }
 0x8b2   : > { %v4383_v47 = vpop.f32.mrf.mxu0 }
 0x8b3   : > { %v4460_v32 = vmul.f32 %v10048_v9, %v4382_v13  ;;  %v4384_v21 = vadd.f32 %v4383_v47, %v10050_v35  ;;  %v4503_v41 = vadd.f32 %v10059_v43, %v4459_v10  ;;  %v4534_v14 = vmax.f32 %v4502_v42, 0.0 }
 0x8b5   : > { %v4504_v53 = vadd.f32 %v10053_v63, %v4460_v32  ;;  %v4461_v1 = vmul.f32 %v10055_v7, %v4384_v21  ;;  %v4535_v50 = vmax.f32 %v4503_v41, 0.0 }
 0x8b7   : > { %4687 = vmatprep.mubr.f32.mxu1 %v4535_v50  ;;  %v4505_v24 = vadd.f32 %v10059_v43, %v4461_v1  ;;  %v4536_v8 = vmax.f32 %v4504_v53, 0.0 }
 0x8b8   : > { %4688 = vmatmul.mubr.f32.gmra.mxu1 %v4534_v14 }
 0x8b9   : > { %v4537_v25 = vmax.f32 %v4505_v24, 0.0 }
 0x8bb   : > { %4692 = vmatprep.mubr.f32.mxu1 %v4537_v25 }
 0x8bc   : > { %4693 = vmatmul.mubr.f32.gmra.mxu1 %v4536_v8 }
 0x8dc   : > { %v5789_v60 = vpop.f32.mrf.mxu1 }
 0x8de   : > { %v5790_v2 = vpop.f32.mrf.mxu1 }
 0x8df   : > { %v5791_v61 = vadd.f32 %v5790_v2, %v5789_v60 }
 0x8e1   : > { %v4660_v11 = vadd.f32 %v5791_v61, %v10136_v19 }
 0x8e3   : > { %v4738_v29 = vadd.f32 %v6480_v59, %v4660_v11 }
 0x8e5   : > { %4754 = vst [vmem:[%s10141_s28] sm:$0xff] %v4738_v29 }
 0x8e6   : > { %v4387_v28 = vpop.f32.mrf.mxu0 }
 0x8e7   : > { %v4388_v31 = vadd.f32 %v4387_v28, %v10043_v46 }
 0x8e8   : > { %v4389_v38 = vpop.f32.mrf.mxu0  ;;  %v5792_v30 = vpop.f32.mrf.mxu1 }
 0x8e9   : > { %v4462_v20 = vmul.f32 %v10048_v9, %v4388_v31  ;;  %v4390_v4 = vadd.f32 %v4389_v38, %v10050_v35 }
 0x8ea   : > { %v4393_v3 = vpop.f32.mrf.mxu0  ;;  %v5793_v5 = vpop.f32.mrf.mxu1 }
 0x8eb   : > { %v4506_v39 = vadd.f32 %v10053_v63, %v4462_v20  ;;  %v4463_v17 = vmul.f32 %v10055_v7, %v4390_v4  ;;  %v4394_v15 = vadd.f32 %v4393_v3, %v10043_v46  ;;  %v5794_v48 = vadd.f32 %v5793_v5, %v5792_v30 }
 0x8ec   : > { %v4395_v54 = vpop.f32.mrf.mxu0 }
 0x8ed   : > { %v4464_v12 = vmul.f32 %v10048_v9, %v4394_v15  ;;  %v4396_v18 = vadd.f32 %v4395_v54, %v10050_v35  ;;  %v4507_v34 = vadd.f32 %v10059_v43, %v4463_v17  ;;  %v4538_v51 = vmax.f32 %v4506_v39, 0.0 }
 0x8ee   : > { %v4399_v36 = vpop.f32.mrf.mxu0  ;;  %v4665_v45 = vadd.f32 %v5794_v48, %v10136_v19 }
 0x8ef   : > { %v4508_v37 = vadd.f32 %v10053_v63, %v4464_v12  ;;  %v4465_v22 = vmul.f32 %v10055_v7, %v4396_v18  ;;  %v4400_v44 = vadd.f32 %v4399_v36, %v10043_v46  ;;  %v4539_v23 = vmax.f32 %v4507_v34, 0.0 }
 0x8f0   : > { %v4401_v40 = vpop.f32.mrf.mxu0  ;;  %v4739_v49 = vadd.f32 %v6481_v26, %v4665_v45 }
 0x8f1   : > { %v4466_v52 = vmul.f32 %v10048_v9, %v4400_v44  ;;  %v4402_v16 = vadd.f32 %v4401_v40, %v10050_v35  ;;  %4697 = vmatprep.mubr.f32.mxu1 %v4539_v23  ;;  %v4509_v33 = vadd.f32 %v10059_v43, %v4465_v22  ;;  %v4540_v0 = vmax.f32 %v4508_v37, 0.0 }
 0x8f2   : > { %4698 = vmatmul.mubr.f32.gmra.mxu1 %v4538_v51  ;;  %4755 = vst [vmem:[%s10141_s28 + $0x8] sm:$0xff] %v4739_v49 }
 0x8f3   : > { %v4510_v58 = vadd.f32 %v10053_v63, %v4466_v52  ;;  %v4467_v56 = vmul.f32 %v10055_v7, %v4402_v16  ;;  %v4541_v62 = vmax.f32 %v4509_v33, 0.0 }
 0x8f4   : > { %v4405_v55 = vpop.f32.mrf.mxu0 }
 0x8f5   : > { %v4406_v57 = vadd.f32 %v4405_v55, %v10043_v46  ;;  %4702 = vmatprep.mubr.f32.mxu1 %v4541_v62  ;;  %v4511_v10 = vadd.f32 %v10059_v43, %v4467_v56  ;;  %v4542_v13 = vmax.f32 %v4510_v58, 0.0  ;;  %v6482_v55 = vld [vmem:[#allocation2 + $0x20] sm:$0xff] }
 0x8f6   : > { %v4407_v27 = vpop.f32.mrf.mxu0  ;;  %4703 = vmatmul.mubr.f32.gmra.mxu1 %v4540_v0 }
 0x8f7   : > { %v4468_v6 = vmul.f32 %v10048_v9, %v4406_v57  ;;  %v4408_v42 = vadd.f32 %v4407_v27, %v10050_v35  ;;  %v4543_v21 = vmax.f32 %v4511_v10, 0.0  ;;  %v6483_v27 = vld [vmem:[#allocation2 + $0x30] sm:$0xff] }
 0x8f9   : > { %v4512_v47 = vadd.f32 %v10053_v63, %v4468_v6  ;;  %v4469_v32 = vmul.f32 %v10055_v7, %v4408_v42  ;;  %v4411_v41 = vpop.f32.mrf.mxu0  ;;  %4707 = vmatprep.mubr.f32.mxu1 %v4543_v21 }
 0x8fa   : > { %v4412_v1 = vadd.f32 %v4411_v41, %v10043_v46  ;;  %4708 = vmatmul.mubr.f32.gmra.mxu1 %v4542_v13  ;;  %v6484_v13 = vld [vmem:[#allocation2 + $0x40] sm:$0xff] }
 0x8fb   : > { %v4513_v14 = vadd.f32 %v10059_v43, %v4469_v32  ;;  %v4544_v53 = vmax.f32 %v4512_v47, 0.0  ;;  %v4413_v50 = vpop.f32.mrf.mxu0 }
 0x8fc   : > { %v4470_v8 = vmul.f32 %v10048_v9, %v4412_v1  ;;  %v4414_v25 = vadd.f32 %v4413_v50, %v10050_v35 }
 0x8fd   : > { %v4545_v24 = vmax.f32 %v4513_v14, 0.0 }
 0x8fe   : > { %v4514_v60 = vadd.f32 %v10053_v63, %v4470_v8  ;;  %v4471_v2 = vmul.f32 %v10055_v7, %v4414_v25  ;;  %v4417_v61 = vpop.f32.mrf.mxu0 }
 0x8ff   : > { %4712 = vmatprep.mubr.f32.mxu1 %v4545_v24  ;;  %v4418_v11 = vadd.f32 %v4417_v61, %v10043_v46  ;;  %v6486_v61 = vld [vmem:[#allocation2 + $0x60] sm:$0xff] }
 0x900   : > { %4713 = vmatmul.mubr.f32.gmra.mxu1 %v4544_v53  ;;  %v4419_v59 = vpop.f32.mrf.mxu0  ;;  %v4515_v29 = vadd.f32 %v10059_v43, %v4471_v2  ;;  %v4546_v28 = vmax.f32 %v4514_v60, 0.0  ;;  %v6485_v53 = vld [vmem:[#allocation2 + $0x50] sm:$0xff] }
 0x901   : > { %v4472_v31 = vmul.f32 %v10048_v9, %v4418_v11  ;;  %v4420_v38 = vadd.f32 %v4419_v59, %v10050_v35 }
 0x902   : > { %v4547_v30 = vmax.f32 %v4515_v29, 0.0 }
 0x903   : > { %v4516_v20 = vadd.f32 %v10053_v63, %v4472_v31  ;;  %v4473_v4 = vmul.f32 %v10055_v7, %v4420_v38 }
 0x904   : > { %4717 = vmatprep.mubr.f32.mxu1 %v4547_v30 }
 0x905   : > { %v4423_v3 = vpop.f32.mrf.mxu0  ;;  %4718 = vmatmul.mubr.f32.gmra.mxu1 %v4546_v28  ;;  %v4517_v5 = vadd.f32 %v10059_v43, %v4473_v4  ;;  %v4548_v39 = vmax.f32 %v4516_v20, 0.0  ;;  %v6487_v28 = vld [vmem:[#allocation2 + $0x70] sm:$0xff] }
 0x906   : > { %v4424_v17 = vadd.f32 %v4423_v3, %v10043_v46 }
 0x907   : > { %v4425_v15 = vpop.f32.mrf.mxu0  ;;  %v4549_v48 = vmax.f32 %v4517_v5, 0.0 }
 0x908   : > { %v4474_v54 = vmul.f32 %v10048_v9, %v4424_v17  ;;  %v4426_v12 = vadd.f32 %v4425_v15, %v10050_v35 }
 0x909   : > { %4722 = vmatprep.mubr.f32.mxu1 %v4549_v48 }
 0x90a   : > { %v4475_v18 = vmul.f32 %v10055_v7, %v4426_v12  ;;  %v4429_v34 = vpop.f32.mrf.mxu0  ;;  %4723 = vmatmul.mubr.f32.gmra.mxu1 %v4548_v39  ;;  %v4518_v51 = vadd.f32 %v10053_v63, %v4474_v54  ;;  %v6488_v39 = vld [vmem:[#allocation2 + $0x80] sm:$0xff] }
 0x90b   : > { %v4430_v36 = vadd.f32 %v4429_v34, %v10043_v46 }
 0x90c   : > { %v4431_v45 = vpop.f32.mrf.mxu0  ;;  %v4519_v37 = vadd.f32 %v10059_v43, %v4475_v18  ;;  %v4550_v40 = vmax.f32 %v4518_v51, 0.0  ;;  %v6489_v18 = vld [vmem:[#allocation2 + $0x90] sm:$0xff] }
 0x90d   : > { %v4476_v22 = vmul.f32 %v10048_v9, %v4430_v36  ;;  %v4432_v44 = vadd.f32 %v4431_v45, %v10050_v35 }
 0x90e   : > { %v4551_v23 = vmax.f32 %v4519_v37, 0.0 }
 0x90f   : > { %v4477_v26 = vmul.f32 %v10055_v7, %v4432_v44  ;;  %v4520_v49 = vadd.f32 %v10053_v63, %v4476_v22  ;;  %v6490_v22 = vld [vmem:[#allocation2 + $0xa0] sm:$0xff] }
 0x910   : > { %4727 = vmatprep.mubr.f32.mxu1 %v4551_v23 }
 0x911   : > { %4728 = vmatmul.mubr.f32.gmra.mxu1 %v4550_v40  ;;  %v4521_v52 = vadd.f32 %v10059_v43, %v4477_v26  ;;  %v4552_v46 = vmax.f32 %v4520_v49, 0.0  ;;  %v6491_v26 = vld [vmem:[#allocation2 + $0xb0] sm:$0xff] }
 0x913   : > { %v4553_v16 = vmax.f32 %v4521_v52, 0.0 }
 0x915   : > { %4732 = vmatprep.mubr.f32.mxu1 %v4553_v16 }
 0x916   : > { %4733 = vmatmul.mubr.f32.gmra.mxu1 %v4552_v46 }
 0x928   : > { %v5795_v33 = vpop.f32.mrf.mxu1 }
 0x92a   : > { %v5796_v9 = vpop.f32.mrf.mxu1 }
 0x92b   : > { %v5797_v0 = vadd.f32 %v5796_v9, %v5795_v33 }
 0x92d   : > { %v4670_v35 = vadd.f32 %v5797_v0, %v10136_v19  ;;  %v6492_v0 = vld [vmem:[#allocation2 + $0xc0] sm:$0xff] }
 0x92f   : > { %v4740_v58 = vadd.f32 %v6482_v55, %v4670_v35 }
 0x931   : > { %4756 = vst [vmem:[%s10141_s28 + $0x10] sm:$0xff] %v4740_v58 }
 0x933   : > { %v5798_v7 = vpop.f32.mrf.mxu1 }
 0x935   : > { %v5799_v63 = vpop.f32.mrf.mxu1 }
 0x936   : > { %v5800_v56 = vadd.f32 %v5799_v63, %v5798_v7  ;;  %v6493_v63 = vld [vmem:[#allocation2 + $0xd0] sm:$0xff] }
 0x937   : > { %v5801_v57 = vpop.f32.mrf.mxu1 }
 0x938   : > { %v4675_v43 = vadd.f32 %v5800_v56, %v10136_v19 }
 0x939   : > { %v5802_v62 = vpop.f32.mrf.mxu1 }
 0x93a   : > { %v4741_v6 = vadd.f32 %v6483_v27, %v4675_v43  ;;  %v5803_v42 = vadd.f32 %v5802_v62, %v5801_v57 }
 0x93c   : > { %4757 = vst [vmem:[%s10141_s28 + $0x18] sm:$0xff] %v4741_v6  ;;  %v4680_v10 = vadd.f32 %v5803_v42, %v10136_v19  ;;  %v6494_v42 = vld [vmem:[#allocation2 + $0xe0] sm:$0xff] }
 0x93e   : > { %v4742_v47 = vadd.f32 %v6484_v13, %v4680_v10 }
 0x940   : > { %4758 = vst [vmem:[%s10141_s28 + $0x20] sm:$0xff] %v4742_v47 }
 0x96d   : > { %v5804_v32 = vpop.f32.mrf.mxu1 }
 0x96f   : > { %v5805_v21 = vpop.f32.mrf.mxu1 }
 0x970   : > { %v5806_v41 = vadd.f32 %v5805_v21, %v5804_v32  ;;  %v6495_v21 = vld [vmem:[#allocation2 + $0xf0] sm:$0xff] }
 0x972   : > { %v4685_v14 = vadd.f32 %v5806_v41, %v10136_v19 }
 0x974   : > { %v4743_v1 = vadd.f32 %v6485_v53, %v4685_v14 }
 0x976   : > { %4759 = vst [vmem:[%s10141_s28 + $0x28] sm:$0xff] %v4743_v1 }
 0x978   : > { %v5807_v50 = vpop.f32.mrf.mxu1 }
 0x97a   : > { %v5808_v24 = vpop.f32.mrf.mxu1 }
 0x97b   : > { %v5809_v8 = vadd.f32 %v5808_v24, %v5807_v50 }
 0x97c   : > { %v5810_v25 = vpop.f32.mrf.mxu1 }
 0x97d   : > { %v4690_v60 = vadd.f32 %v5809_v8, %v10136_v19 }
 0x97e   : > { %v5811_v2 = vpop.f32.mrf.mxu1 }
 0x97f   : > { %v4744_v11 = vadd.f32 %v6486_v61, %v4690_v60  ;;  %v5812_v59 = vadd.f32 %v5811_v2, %v5810_v25 }
 0x981   : > { %4760 = vst [vmem:[%s10141_s28 + $0x30] sm:$0xff] %v4744_v11  ;;  %v4695_v29 = vadd.f32 %v5812_v59, %v10136_v19 }
 0x983   : > { %v4745_v31 = vadd.f32 %v6487_v28, %v4695_v29 }
 0x985   : > { %4761 = vst [vmem:[%s10141_s28 + $0x38] sm:$0xff] %v4745_v31 }
 0x9b2   : > { %v5813_v38 = vpop.f32.mrf.mxu1 }
 0x9b4   : > { %v5814_v30 = vpop.f32.mrf.mxu1 }
 0x9b5   : > { %v5815_v20 = vadd.f32 %v5814_v30, %v5813_v38 }
 0x9b6   : > { %v5816_v4 = vpop.f32.mrf.mxu1 }
 0x9b7   : > { %v4700_v3 = vadd.f32 %v5815_v20, %v10136_v19 }
 0x9b8   : > { %v5817_v5 = vpop.f32.mrf.mxu1 }
 0x9b9   : > { %v4746_v17 = vadd.f32 %v6488_v39, %v4700_v3  ;;  %v5818_v15 = vadd.f32 %v5817_v5, %v5816_v4 }
 0x9ba   : > { %v5819_v48 = vpop.f32.mrf.mxu1 }
 0x9bb   : > { %4762 = vst [vmem:[%s10141_s28 + $0x40] sm:$0xff] %v4746_v17  ;;  %v4705_v54 = vadd.f32 %v5818_v15, %v10136_v19 }
 0x9bc   : > { %v5820_v12 = vpop.f32.mrf.mxu1 }
 0x9bd   : > { %v4747_v34 = vadd.f32 %v6489_v18, %v4705_v54  ;;  %v5821_v51 = vadd.f32 %v5820_v12, %v5819_v48 }
 0x9bf   : > { %4763 = vst [vmem:[%s10141_s28 + $0x48] sm:$0xff] %v4747_v34  ;;  %v4710_v45 = vadd.f32 %v5821_v51, %v10136_v19 }
 0x9c0   : > { %v5822_v36 = vpop.f32.mrf.mxu1 }
 0x9c1   : > { %v4748_v44 = vadd.f32 %v6490_v22, %v4710_v45 }
 0x9c2   : > { %v5823_v37 = vpop.f32.mrf.mxu1 }
 0x9c3   : > { %v5824_v23 = vadd.f32 %v5823_v37, %v5822_v36  ;;  %4764 = vst [vmem:[%s10141_s28 + $0x50] sm:$0xff] %v4748_v44 }
 0x9c5   : > { %v4715_v40 = vadd.f32 %v5824_v23, %v10136_v19  ;;  %v5825_v52 = vpop.f32.mrf.mxu1 }
 0x9c7   : > { %v4749_v49 = vadd.f32 %v6491_v26, %v4715_v40  ;;  %v5826_v16 = vpop.f32.mrf.mxu1 }
 0x9c8   : > { %v5827_v46 = vadd.f32 %v5826_v16, %v5825_v52 }
 0x9c9   : > { %4765 = vst [vmem:[%s10141_s28 + $0x58] sm:$0xff] %v4749_v49 }
 0x9ca   : > { %v4720_v33 = vadd.f32 %v5827_v46, %v10136_v19  ;;  %v5828_v9 = vpop.f32.mrf.mxu1 }
 0x9cc   : > { %v4750_v35 = vadd.f32 %v6492_v0, %v4720_v33  ;;  %v5829_v55 = vpop.f32.mrf.mxu1 }
 0x9cd   : > { %v5830_v58 = vadd.f32 %v5829_v55, %v5828_v9 }
 0x9ce   : > { %4766 = vst [vmem:[%s10141_s28 + $0x60] sm:$0xff] %v4750_v35 }
 0x9cf   : > { %v4725_v7 = vadd.f32 %v5830_v58, %v10136_v19 }
 0x9d1   : > { %v4751_v56 = vadd.f32 %v6493_v63, %v4725_v7  ;;  %v5831_v57 = vpop.f32.mrf.mxu1 }
 0x9d3   : > { %4767 = vst [vmem:[%s10141_s28 + $0x68] sm:$0xff] %v4751_v56  ;;  %v5832_v43 = vpop.f32.mrf.mxu1 }
 0x9d4   : > { %v5833_v62 = vadd.f32 %v5832_v43, %v5831_v57 }
 0x9d6   : > { %v4730_v27 = vadd.f32 %v5833_v62, %v10136_v19  ;;  %v5834_v6 = vpop.f32.mrf.mxu1 }
 0x9d8   : > { %v4752_v10 = vadd.f32 %v6494_v42, %v4730_v27  ;;  %v5835_v13 = vpop.f32.mrf.mxu1 }
 0x9d9   : > { %v5836_v47 = vadd.f32 %v5835_v13, %v5834_v6 }
 0x9da   : > { %4768 = vst [vmem:[%s10141_s28 + $0x70] sm:$0xff] %v4752_v10 }
 0x9db   : > { %v4735_v32 = vadd.f32 %v5836_v47, %v10136_v19 }
 0x9dd   : > { %v4753_v41 = vadd.f32 %v6495_v21, %v4735_v32 }
 0x9df   : > { %4769 = vst [vmem:[%s10141_s28 + $0x78] sm:$0xff] %v4753_v41 }
 0x9e0   : > { %6643 = shalt.err (!%p6640_p9)
}
 0x9e1   : > { %s6644_s30 = scalar_lea.hbm %s10227_s3, 2048  ;;  %s6648_s5 = scalar_lea.hbm %s10994_s8, 8192 }
 0x9e2   : > { %p6645_p2 = scmp.ne.s32.totalorder %s10227_s3, %s6644_s30  ;;  %p6649_p8 = scmp.lt.s32.totalorder %s10227_s3, %s10994_s8 }
 0x9e3   : > { %p6650_p4 = scmp.lt.s32.totalorder %s6648_s5, %s6644_s30 }
 0x9e4   : > { %p6646_p1 = pnand %p6645_p2, %p6974_p5 }
 0x9e5   : > { %p6651_p11 = por %p6650_p4, %p6649_p8 }
 0x9e6   : > { %p6647_p10 = pneg %p6646_p1 }
 0x9e8   : > { %p6652_p6 = pnand %p6651_p11, %p6647_p10 }
 0x9ea   : > { %6655 = shalt.err (!%p6652_p6)
}
 0x9eb   : > { %s6777_s2 = smov 128   ;;  %s6778_s6 = smov 8  }
 0x9ec   : > { %5909 = dma.vmem_to_hbm [thread:$0]  (%p6974_p5), %s10229_s20, 2048, %s10227_s3, %s4771_s27, %s6777_s2, %s6777_s2, %s6778_s6  }
 0x9ed PF: > { %s10995_s21 = sld [smem:[#allocation18_spill]]  ;;  %p5939_p0 = scmp.ge.s32.totalorder %s6762_s23, 2 }
 0x9ee   : > { %s10996_s13 = sld [smem:[#allocation23_spill]] }
 0x9f3   : > { %s4801_s7 = sand.u32 1, %s10995_s21  }
 0x9f4   : > { %p10997_p3 = scmp.ne.s32.totalorder %s10996_s13, 0  ;;  %s4802_s16 = scalar_lea.sflag [#allocation5], %s4801_s7 }
 0x9f6   : > { %p5929_p13 = pnand %p5939_p0, %p10997_p3 }
 0x9f8   : > { %p5930_p12 = pneg %p5929_p13 }
 0x9fa   : > { %6717 = dma.done.wait (%p5930_p12), %s4802_s16, 2048  }
 0x9fb   : > { %6719 = vsyncadd (%p5930_p12), %s4802_s16, 4294965248  ;;  %s30_s23 = sadd.s32 1, %s6762_s23   ;;  %s10998_s19 = sld [smem:[#allocation21_spill]] }
 0x9fc   : > { %p27_p7 = scmp.ge.s32.totalorder %s30_s23, 6   ;;  %s10999_s21 = sld [smem:[#allocation24_spill]] }
 0x9fd   : > { %s11000_s4 = sld [smem:[#allocation26_spill]]  ;;  %s11001_s13 = smov %s6726_s14 }
 0x9fe   : > { %s11002_s14 = smov %s6730_s15  ;;  %s11003_s15 = smov %s7024_s9 }
 0x9ff   : > { %s11004_s16 = smov %s6738_s17  ;;  %s11005_s17 = smov %s6742_s18 }
 0xa00   : > { %s11006_s18 = smov %s6997_s25  ;;  %s11007_s20 = smov %s6758_s22 }
 0xa01   :  { %29 = sbr.rel (!%p27_p7) target bundleno = 22 (0x16), region = 130 }
 0xa03   : > { %s11008_s22 = smov %s11000_s4 }
 0xa06   :  { %4807 = vsyncpa [#allocation4], 1 }
 0xa07   :  { %4809 = vsyncpa [#allocation4 + $0x1], 1 }
 0xa08   :  { %4810 = vsyncpa [#allocation7], 1 }
 0xa09   :  { %4812 = vsyncpa [#allocation7 + $0x1], 1 }
 0xa0a   :  { %4813 = vsyncpa [#allocation10], 1 }
 0xa0b   :  { %4814 = vsyncpa [#allocation5], 1 }
 0xa0c   :  { %4816 = vsyncpa [#allocation5 + $0x1], 1 }

</bundles_post_ra>
